<compile_context>
chip_gen: v7x
topology: tpu7x:2x2x1
jax: 0.10.0
libtpu: 0.0.40
codegen_flags: <defaults>
</compile_context>

<pallas_src>
import functools

import jax
import jax.numpy as jnp
from jax.experimental import pallas as pl
from jax.experimental.pallas import tpu as pltpu

FILTER = 256
NUM_X_FREQ = 6
NUM_D_FREQ = 3
XLEN = 3 * NUM_X_FREQ * 2 + 3   # 39
DLEN = 3 * NUM_D_FREQ * 2 + 3   # 21
TILE_N = 512                    # rows per grid step; fits comfortably in scoped VMEM
                                # on v5e (16 MiB default) / v6e / v7x (64 MiB physical)


def nerf_kernel(
    x_ref, d_ref,
    w1, b1, wsq, bsq, w6a, w6b, b6,
    w10_9, b10_9, w11a, w11b, b11, w12, b12,
    out_ref,
):
    xb = x_ref[...].astype(jnp.bfloat16)
    db = d_ref[...].astype(jnp.bfloat16)

    def mm(h, w):
        # bf16 x bf16 on the MXU with f32 accumulation.
        return jnp.dot(h.astype(jnp.bfloat16), w,
                       preferred_element_type=jnp.float32)

    relu = lambda v: jnp.maximum(v, 0.0)

    h1 = relu(mm(xb, w1[...]) + b1[...])
    h2 = relu(mm(h1, wsq[0]) + bsq[0])
    h3 = relu(mm(h2, wsq[1]) + bsq[1])
    h4 = relu(mm(h3, wsq[2]) + bsq[2])
    h5 = relu(mm(h4, wsq[3]) + bsq[3])
    # l6(cat(h5, x)) == h5 @ W6[:256] + x @ W6[256:] + b6
    h6 = relu(mm(h5, w6a[...]) + mm(xb, w6b[...]) + b6[...])
    h7 = relu(mm(h6, wsq[4]) + bsq[4])
    h8 = relu(mm(h7, wsq[5]) + bsq[5])
    # l10 and the 1-wide l9 (sigma) fused into a single [256,384] matmul.
    t = mm(h8, w10_9[...]) + b10_9[...]
    h10 = t[:, :FILTER]
    sigma = t[:, FILTER:FILTER + 1]
    # l11(cat(h10, d)) == h10 @ W11[:256] + d @ W11[256:] + b11
    h11 = relu(mm(h10, w11a[...]) + mm(db, w11b[...]) + b11[...])
    rgb = jax.nn.sigmoid(mm(h11, w12[...]) + b12[...])

    # Single packed output block per tile: cols 0..2 = rgb, col 3 = sigma.
    out_ref[...] = jnp.concatenate([rgb, sigma], axis=1).astype(out_ref.dtype)


def init_params(key):
    """Deterministic synthetic weights. Stored as [in, out]; biases as [1, out]."""
    shapes = {
        "l1": (XLEN, FILTER),
        "l2": (FILTER, FILTER),
        "l3": (FILTER, FILTER),
        "l4": (FILTER, FILTER),
        "l5": (FILTER, FILTER),
        "l6": (FILTER + XLEN, FILTER),
        "l7": (FILTER, FILTER),
        "l8": (FILTER, FILTER),
        "l9": (FILTER, 1),
        "l10": (FILTER, FILTER),
        "l11": (FILTER + DLEN, 128),
        "l12": (128, 3),
    }
    params = {}
    for name, (fan_in, fan_out) in shapes.items():
        key, kw, kb = jax.random.split(key, 3)
        bound = 1.0 / jnp.sqrt(fan_in)
        params[name] = {
            "w": jax.random.uniform(kw, (fan_in, fan_out), jnp.float32, -bound, bound),
            "b": jax.random.uniform(kb, (1, fan_out), jnp.float32, -bound, bound),
        }
    return params


def _pack_weights(params):
    """Repack parameters into the operand layout the kernel expects.

    Weights -> bf16 (MXU inputs), biases stay f32 (added to f32 accumulators).
    """
    p = params
    bf = lambda a: a.astype(jnp.bfloat16)
    wsq = bf(jnp.stack([p["l2"]["w"], p["l3"]["w"], p["l4"]["w"],
                        p["l5"]["w"], p["l7"]["w"], p["l8"]["w"]]))      # [6,256,256]
    bsq = jnp.stack([p["l2"]["b"], p["l3"]["b"], p["l4"]["b"],
                     p["l5"]["b"], p["l7"]["b"], p["l8"]["b"]])          # [6,1,256]
    w6a = bf(p["l6"]["w"][:FILTER])                                      # [256,256]
    w6b = bf(p["l6"]["w"][FILTER:])                                      # [39,256]
    # Fuse l10 (256 cols) + l9 (1 col) + zero pad to a lane-aligned 384 cols.
    w10_9 = bf(jnp.concatenate(
        [p["l10"]["w"], p["l9"]["w"], jnp.zeros((FILTER, 127), jnp.float32)], axis=1))
    b10_9 = jnp.concatenate(
        [p["l10"]["b"], p["l9"]["b"], jnp.zeros((1, 127), jnp.float32)], axis=1)
    w11a = bf(p["l11"]["w"][:FILTER])                                    # [256,128]
    w11b = bf(p["l11"]["w"][FILTER:])                                    # [21,128]
    return (
        bf(p["l1"]["w"]), p["l1"]["b"],
        wsq, bsq,
        w6a, w6b, p["l6"]["b"],
        w10_9, b10_9,
        w11a, w11b, p["l11"]["b"],
        bf(p["l12"]["w"]), p["l12"]["b"],
    )


def nerf_forward(params, x, d, *, tile_n=TILE_N):
    n = x.shape[0]
    n_blocks = pl.cdiv(n, tile_n)
    n_pad = n_blocks * tile_n
    if n_pad != n:
        x = jnp.pad(x, ((0, n_pad - n), (0, 0)))
        d = jnp.pad(d, ((0, n_pad - n), (0, 0)))

    weight_args = _pack_weights(params)

    def full_spec(arr):
        # whole (small) parameter resident in VMEM for every grid step
        nd = arr.ndim
        return pl.BlockSpec(arr.shape, lambda i, nd=nd: (0,) * nd)

    in_specs = [
        pl.BlockSpec((tile_n, XLEN), lambda i: (i, 0)),
        pl.BlockSpec((tile_n, DLEN), lambda i: (i, 0)),
    ] + [full_spec(a) for a in weight_args]

    out_spec = pl.BlockSpec((tile_n, 4), lambda i: (i, 0))

    out = pl.pallas_call(
        nerf_kernel,
        out_shape=jax.ShapeDtypeStruct((n_pad, 4), jnp.float32),
        grid_spec=pltpu.PrefetchScalarGridSpec(
            num_scalar_prefetch=0,
            grid=(n_blocks,),
            in_specs=in_specs,
            out_specs=out_spec,
        ),
        compiler_params=pltpu.CompilerParams(
            dimension_semantics=("parallel",),
            vmem_limit_bytes=48 * 1024 * 1024,
        ),
    )(x, d, *weight_args)

    rgb = out[:n, 0:3]
    sigma = out[:n, 3:4]
    return rgb, sigma


def nerf_reference(params, x, d, *, quantize):
    """Pure-JAX reference. quantize=True mimics the kernel's bf16-in / f32-acc."""
    p = params
    cast = (lambda a: a.astype(jnp.bfloat16)) if quantize else (lambda a: a)

    def lin(h, name):
        return jnp.dot(cast(h), cast(p[name]["w"]),
                       preferred_element_type=jnp.float32) + p[name]["b"]

    relu = jax.nn.relu
    h1 = relu(lin(x, "l1"))
    h2 = relu(lin(h1, "l2"))
    h3 = relu(lin(h2, "l3"))
    h4 = relu(lin(h3, "l4"))
    h5 = relu(lin(h4, "l5"))
    h6 = relu(lin(jnp.concatenate([h5, x], axis=1), "l6"))
    h7 = relu(lin(h6, "l7"))
    h8 = relu(lin(h7, "l8"))
    sigma = lin(h8, "l9")
    h10 = lin(h8, "l10")
    h11 = relu(lin(jnp.concatenate([h10, d], axis=1), "l11"))
    rgb = jax.nn.sigmoid(lin(h11, "l12"))
    return rgb, sigma


if __name__ == "__main__":
    key = jax.random.PRNGKey(0)
    kp, kx, kd = jax.random.split(key, 3)

    params = init_params(kp)

    N = 1000  # deliberately not a multiple of TILE_N to exercise the padding path
    x = jax.random.normal(kx, (N, XLEN), jnp.float32)
    d = jax.random.normal(kd, (N, DLEN), jnp.float32)

    rgb, sigma = jax.jit(functools.partial(nerf_forward, params))(x, d)
    jax.block_until_ready((rgb, sigma))
    assert rgb.shape == (N, 3) and sigma.shape == (N, 1)

    # Tight check vs a reference that applies the same bf16-input / f32-accumulate
    # quantization as the kernel.
    rgb_q, sigma_q = nerf_reference(params, x, d, quantize=True)
    assert jnp.allclose(rgb, rgb_q, atol=1e-3, rtol=1e-3), "rgb mismatch vs bf16 reference"
    assert jnp.allclose(sigma, sigma_q, atol=1e-3, rtol=1e-3), "sigma mismatch vs bf16 reference"

    # Loose check vs the full-f32 reference (bf16 weight quantization noise only).
    rgb_f, sigma_f = nerf_reference(params, x, d, quantize=False)
    assert jnp.allclose(rgb, rgb_f, atol=2e-2), "rgb drifted too far from f32 reference"
    assert jnp.allclose(sigma, sigma_f, atol=2e-2), "sigma drifted too far from f32 reference"

    print("KERNEL_OK")
</pallas_src>

<mosaic_0001>
module attributes {stable_mosaic.version = 11 : i64} {
  func.func @nerf_kernel(%arg0: i32, %arg1: memref<512x39xf32, #tpu.memory_space<vmem>>, %arg2: memref<512x21xf32, #tpu.memory_space<vmem>>, %arg3: memref<39x256xbf16, #tpu.memory_space<vmem>>, %arg4: memref<1x256xf32, #tpu.memory_space<vmem>>, %arg5: memref<6x256x256xbf16, #tpu.memory_space<vmem>>, %arg6: memref<6x1x256xf32, #tpu.memory_space<vmem>>, %arg7: memref<256x256xbf16, #tpu.memory_space<vmem>>, %arg8: memref<39x256xbf16, #tpu.memory_space<vmem>>, %arg9: memref<1x256xf32, #tpu.memory_space<vmem>>, %arg10: memref<256x384xbf16, #tpu.memory_space<vmem>>, %arg11: memref<1x384xf32, #tpu.memory_space<vmem>>, %arg12: memref<256x128xbf16, #tpu.memory_space<vmem>>, %arg13: memref<21x128xbf16, #tpu.memory_space<vmem>>, %arg14: memref<1x128xf32, #tpu.memory_space<vmem>>, %arg15: memref<128x3xbf16, #tpu.memory_space<vmem>>, %arg16: memref<1x3xf32, #tpu.memory_space<vmem>>, %arg17: memref<512x4xf32, #tpu.memory_space<vmem>>) attributes {dimension_semantics = [#tpu.dimension_semantics<parallel>], iteration_bounds = array<i64: 2>, scalar_prefetch = 0 : i64, scratch_operands = 0 : i64, tpu.core_type = #tpu.core_type<tc>, window_params = [{transform_indices = @transform_0, window_bounds = array<i64: 512, 39>}, {transform_indices = @transform_1, window_bounds = array<i64: 512, 21>}, {pipeline_mode = #tpu.pipeline_mode<synchronous>, transform_indices = @transform_2, window_bounds = array<i64: 39, 256>}, {pipeline_mode = #tpu.pipeline_mode<synchronous>, transform_indices = @transform_3, window_bounds = array<i64: 1, 256>}, {pipeline_mode = #tpu.pipeline_mode<synchronous>, transform_indices = @transform_4, window_bounds = array<i64: 6, 256, 256>}, {pipeline_mode = #tpu.pipeline_mode<synchronous>, transform_indices = @transform_5, window_bounds = array<i64: 6, 1, 256>}, {pipeline_mode = #tpu.pipeline_mode<synchronous>, transform_indices = @transform_6, window_bounds = array<i64: 256, 256>}, {pipeline_mode = #tpu.pipeline_mode<synchronous>, transform_indices = @transform_7, window_bounds = array<i64: 39, 256>}, {pipeline_mode = #tpu.pipeline_mode<synchronous>, transform_indices = @transform_8, window_bounds = array<i64: 1, 256>}, {pipeline_mode = #tpu.pipeline_mode<synchronous>, transform_indices = @transform_9, window_bounds = array<i64: 256, 384>}, {pipeline_mode = #tpu.pipeline_mode<synchronous>, transform_indices = @transform_10, window_bounds = array<i64: 1, 384>}, {pipeline_mode = #tpu.pipeline_mode<synchronous>, transform_indices = @transform_11, window_bounds = array<i64: 256, 128>}, {pipeline_mode = #tpu.pipeline_mode<synchronous>, transform_indices = @transform_12, window_bounds = array<i64: 21, 128>}, {pipeline_mode = #tpu.pipeline_mode<synchronous>, transform_indices = @transform_13, window_bounds = array<i64: 1, 128>}, {pipeline_mode = #tpu.pipeline_mode<synchronous>, transform_indices = @transform_14, window_bounds = array<i64: 128, 3>}, {pipeline_mode = #tpu.pipeline_mode<synchronous>, transform_indices = @transform_15, window_bounds = array<i64: 1, 3>}, {transform_indices = @transform_16, window_bounds = array<i64: 512, 4>}]} {
    %c0 = arith.constant 0 : index
    %c0_0 = arith.constant 0 : index
    %0 = vector.load %arg1[%c0, %c0_0] : memref<512x39xf32, #tpu.memory_space<vmem>>, vector<512x39xf32>
    %1 = arith.truncf %0 : vector<512x39xf32> to vector<512x39xbf16>
    %c0_1 = arith.constant 0 : index
    %c0_2 = arith.constant 0 : index
    %2 = vector.load %arg2[%c0_1, %c0_2] : memref<512x21xf32, #tpu.memory_space<vmem>>, vector<512x21xf32>
    %3 = arith.truncf %2 : vector<512x21xf32> to vector<512x21xbf16>
    %c0_3 = arith.constant 0 : index
    %c0_4 = arith.constant 0 : index
    %4 = vector.load %arg3[%c0_3, %c0_4] : memref<39x256xbf16, #tpu.memory_space<vmem>>, vector<39x256xbf16>
    %cst = arith.constant dense<0.000000e+00> : vector<512x256xf32>
    %5 = tpu.matmul %1, %4, %cst {dimension_numbers = #tpu.dot_dimension_numbers<[1], [0], [0], [1], [0, 0, 1, 1], [], []>} : vector<512x39xbf16>, vector<39x256xbf16>, vector<512x256xf32> -> vector<512x256xf32>
    %c0_5 = arith.constant 0 : index
    %c0_6 = arith.constant 0 : index
    %6 = vector.load %arg4[%c0_5, %c0_6] : memref<1x256xf32, #tpu.memory_space<vmem>>, vector<1x256xf32>
    %7 = vector.broadcast %6 : vector<1x256xf32> to vector<512x256xf32>
    %8 = arith.addf %5, %7 : vector<512x256xf32>
    %cst_7 = arith.constant 0.000000e+00 : f32
    %9 = vector.broadcast %cst_7 : f32 to vector<512x256xf32>
    %10 = arith.maximumf %8, %9 : vector<512x256xf32>
    %c0_8 = arith.constant 0 : index
    %c0_9 = arith.constant 0 : index
    %c0_10 = arith.constant 0 : index
    %11 = vector.load %arg5[%c0_8, %c0_9, %c0_10] : memref<6x256x256xbf16, #tpu.memory_space<vmem>>, vector<1x256x256xbf16>
    %12 = vector.shape_cast %11 : vector<1x256x256xbf16> to vector<256x256xbf16>
    %13 = arith.truncf %10 : vector<512x256xf32> to vector<512x256xbf16>
    %cst_11 = arith.constant dense<0.000000e+00> : vector<512x256xf32>
    %14 = tpu.matmul %13, %12, %cst_11 {dimension_numbers = #tpu.dot_dimension_numbers<[1], [0], [0], [1], [0, 0, 1, 1], [], []>} : vector<512x256xbf16>, vector<256x256xbf16>, vector<512x256xf32> -> vector<512x256xf32>
    %c0_12 = arith.constant 0 : index
    %c0_13 = arith.constant 0 : index
    %c0_14 = arith.constant 0 : index
    %15 = vector.load %arg6[%c0_12, %c0_13, %c0_14] : memref<6x1x256xf32, #tpu.memory_space<vmem>>, vector<1x1x256xf32>
    %16 = vector.shape_cast %15 : vector<1x1x256xf32> to vector<1x256xf32>
    %17 = vector.broadcast %16 : vector<1x256xf32> to vector<512x256xf32>
    %18 = arith.addf %14, %17 : vector<512x256xf32>
    %cst_15 = arith.constant 0.000000e+00 : f32
    %19 = vector.broadcast %cst_15 : f32 to vector<512x256xf32>
    %20 = arith.maximumf %18, %19 : vector<512x256xf32>
    %c1 = arith.constant 1 : index
    %c0_16 = arith.constant 0 : index
    %c0_17 = arith.constant 0 : index
    %21 = vector.load %arg5[%c1, %c0_16, %c0_17] : memref<6x256x256xbf16, #tpu.memory_space<vmem>>, vector<1x256x256xbf16>
    %22 = vector.shape_cast %21 : vector<1x256x256xbf16> to vector<256x256xbf16>
    %23 = arith.truncf %20 : vector<512x256xf32> to vector<512x256xbf16>
    %cst_18 = arith.constant dense<0.000000e+00> : vector<512x256xf32>
    %24 = tpu.matmul %23, %22, %cst_18 {dimension_numbers = #tpu.dot_dimension_numbers<[1], [0], [0], [1], [0, 0, 1, 1], [], []>} : vector<512x256xbf16>, vector<256x256xbf16>, vector<512x256xf32> -> vector<512x256xf32>
    %c1_19 = arith.constant 1 : index
    %c0_20 = arith.constant 0 : index
    %c0_21 = arith.constant 0 : index
    %25 = vector.load %arg6[%c1_19, %c0_20, %c0_21] : memref<6x1x256xf32, #tpu.memory_space<vmem>>, vector<1x1x256xf32>
    %26 = vector.shape_cast %25 : vector<1x1x256xf32> to vector<1x256xf32>
    %27 = vector.broadcast %26 : vector<1x256xf32> to vector<512x256xf32>
    %28 = arith.addf %24, %27 : vector<512x256xf32>
    %cst_22 = arith.constant 0.000000e+00 : f32
    %29 = vector.broadcast %cst_22 : f32 to vector<512x256xf32>
    %30 = arith.maximumf %28, %29 : vector<512x256xf32>
    %c2 = arith.constant 2 : index
    %c0_23 = arith.constant 0 : index
    %c0_24 = arith.constant 0 : index
    %31 = vector.load %arg5[%c2, %c0_23, %c0_24] : memref<6x256x256xbf16, #tpu.memory_space<vmem>>, vector<1x256x256xbf16>
    %32 = vector.shape_cast %31 : vector<1x256x256xbf16> to vector<256x256xbf16>
    %33 = arith.truncf %30 : vector<512x256xf32> to vector<512x256xbf16>
    %cst_25 = arith.constant dense<0.000000e+00> : vector<512x256xf32>
    %34 = tpu.matmul %33, %32, %cst_25 {dimension_numbers = #tpu.dot_dimension_numbers<[1], [0], [0], [1], [0, 0, 1, 1], [], []>} : vector<512x256xbf16>, vector<256x256xbf16>, vector<512x256xf32> -> vector<512x256xf32>
    %c2_26 = arith.constant 2 : index
    %c0_27 = arith.constant 0 : index
    %c0_28 = arith.constant 0 : index
    %35 = vector.load %arg6[%c2_26, %c0_27, %c0_28] : memref<6x1x256xf32, #tpu.memory_space<vmem>>, vector<1x1x256xf32>
    %36 = vector.shape_cast %35 : vector<1x1x256xf32> to vector<1x256xf32>
    %37 = vector.broadcast %36 : vector<1x256xf32> to vector<512x256xf32>
    %38 = arith.addf %34, %37 : vector<512x256xf32>
    %cst_29 = arith.constant 0.000000e+00 : f32
    %39 = vector.broadcast %cst_29 : f32 to vector<512x256xf32>
    %40 = arith.maximumf %38, %39 : vector<512x256xf32>
    %c3 = arith.constant 3 : index
    %c0_30 = arith.constant 0 : index
    %c0_31 = arith.constant 0 : index
    %41 = vector.load %arg5[%c3, %c0_30, %c0_31] : memref<6x256x256xbf16, #tpu.memory_space<vmem>>, vector<1x256x256xbf16>
    %42 = vector.shape_cast %41 : vector<1x256x256xbf16> to vector<256x256xbf16>
    %43 = arith.truncf %40 : vector<512x256xf32> to vector<512x256xbf16>
    %cst_32 = arith.constant dense<0.000000e+00> : vector<512x256xf32>
    %44 = tpu.matmul %43, %42, %cst_32 {dimension_numbers = #tpu.dot_dimension_numbers<[1], [0], [0], [1], [0, 0, 1, 1], [], []>} : vector<512x256xbf16>, vector<256x256xbf16>, vector<512x256xf32> -> vector<512x256xf32>
    %c3_33 = arith.constant 3 : index
    %c0_34 = arith.constant 0 : index
    %c0_35 = arith.constant 0 : index
    %45 = vector.load %arg6[%c3_33, %c0_34, %c0_35] : memref<6x1x256xf32, #tpu.memory_space<vmem>>, vector<1x1x256xf32>
    %46 = vector.shape_cast %45 : vector<1x1x256xf32> to vector<1x256xf32>
    %47 = vector.broadcast %46 : vector<1x256xf32> to vector<512x256xf32>
    %48 = arith.addf %44, %47 : vector<512x256xf32>
    %cst_36 = arith.constant 0.000000e+00 : f32
    %49 = vector.broadcast %cst_36 : f32 to vector<512x256xf32>
    %50 = arith.maximumf %48, %49 : vector<512x256xf32>
    %c0_37 = arith.constant 0 : index
    %c0_38 = arith.constant 0 : index
    %51 = vector.load %arg7[%c0_37, %c0_38] : memref<256x256xbf16, #tpu.memory_space<vmem>>, vector<256x256xbf16>
    %52 = arith.truncf %50 : vector<512x256xf32> to vector<512x256xbf16>
    %cst_39 = arith.constant dense<0.000000e+00> : vector<512x256xf32>
    %53 = tpu.matmul %52, %51, %cst_39 {dimension_numbers = #tpu.dot_dimension_numbers<[1], [0], [0], [1], [0, 0, 1, 1], [], []>} : vector<512x256xbf16>, vector<256x256xbf16>, vector<512x256xf32> -> vector<512x256xf32>
    %c0_40 = arith.constant 0 : index
    %c0_41 = arith.constant 0 : index
    %54 = vector.load %arg8[%c0_40, %c0_41] : memref<39x256xbf16, #tpu.memory_space<vmem>>, vector<39x256xbf16>
    %cst_42 = arith.constant dense<0.000000e+00> : vector<512x256xf32>
    %55 = tpu.matmul %1, %54, %cst_42 {dimension_numbers = #tpu.dot_dimension_numbers<[1], [0], [0], [1], [0, 0, 1, 1], [], []>} : vector<512x39xbf16>, vector<39x256xbf16>, vector<512x256xf32> -> vector<512x256xf32>
    %56 = arith.addf %53, %55 : vector<512x256xf32>
    %c0_43 = arith.constant 0 : index
    %c0_44 = arith.constant 0 : index
    %57 = vector.load %arg9[%c0_43, %c0_44] : memref<1x256xf32, #tpu.memory_space<vmem>>, vector<1x256xf32>
    %58 = vector.broadcast %57 : vector<1x256xf32> to vector<512x256xf32>
    %59 = arith.addf %56, %58 : vector<512x256xf32>
    %cst_45 = arith.constant 0.000000e+00 : f32
    %60 = vector.broadcast %cst_45 : f32 to vector<512x256xf32>
    %61 = arith.maximumf %59, %60 : vector<512x256xf32>
    %c4 = arith.constant 4 : index
    %c0_46 = arith.constant 0 : index
    %c0_47 = arith.constant 0 : index
    %62 = vector.load %arg5[%c4, %c0_46, %c0_47] : memref<6x256x256xbf16, #tpu.memory_space<vmem>>, vector<1x256x256xbf16>
    %63 = vector.shape_cast %62 : vector<1x256x256xbf16> to vector<256x256xbf16>
    %64 = arith.truncf %61 : vector<512x256xf32> to vector<512x256xbf16>
    %cst_48 = arith.constant dense<0.000000e+00> : vector<512x256xf32>
    %65 = tpu.matmul %64, %63, %cst_48 {dimension_numbers = #tpu.dot_dimension_numbers<[1], [0], [0], [1], [0, 0, 1, 1], [], []>} : vector<512x256xbf16>, vector<256x256xbf16>, vector<512x256xf32> -> vector<512x256xf32>
    %c4_49 = arith.constant 4 : index
    %c0_50 = arith.constant 0 : index
    %c0_51 = arith.constant 0 : index
    %66 = vector.load %arg6[%c4_49, %c0_50, %c0_51] : memref<6x1x256xf32, #tpu.memory_space<vmem>>, vector<1x1x256xf32>
    %67 = vector.shape_cast %66 : vector<1x1x256xf32> to vector<1x256xf32>
    %68 = vector.broadcast %67 : vector<1x256xf32> to vector<512x256xf32>
    %69 = arith.addf %65, %68 : vector<512x256xf32>
    %cst_52 = arith.constant 0.000000e+00 : f32
    %70 = vector.broadcast %cst_52 : f32 to vector<512x256xf32>
    %71 = arith.maximumf %69, %70 : vector<512x256xf32>
    %c5 = arith.constant 5 : index
    %c0_53 = arith.constant 0 : index
    %c0_54 = arith.constant 0 : index
    %72 = vector.load %arg5[%c5, %c0_53, %c0_54] : memref<6x256x256xbf16, #tpu.memory_space<vmem>>, vector<1x256x256xbf16>
    %73 = vector.shape_cast %72 : vector<1x256x256xbf16> to vector<256x256xbf16>
    %74 = arith.truncf %71 : vector<512x256xf32> to vector<512x256xbf16>
    %cst_55 = arith.constant dense<0.000000e+00> : vector<512x256xf32>
    %75 = tpu.matmul %74, %73, %cst_55 {dimension_numbers = #tpu.dot_dimension_numbers<[1], [0], [0], [1], [0, 0, 1, 1], [], []>} : vector<512x256xbf16>, vector<256x256xbf16>, vector<512x256xf32> -> vector<512x256xf32>
    %c5_56 = arith.constant 5 : index
    %c0_57 = arith.constant 0 : index
    %c0_58 = arith.constant 0 : index
    %76 = vector.load %arg6[%c5_56, %c0_57, %c0_58] : memref<6x1x256xf32, #tpu.memory_space<vmem>>, vector<1x1x256xf32>
    %77 = vector.shape_cast %76 : vector<1x1x256xf32> to vector<1x256xf32>
    %78 = vector.broadcast %77 : vector<1x256xf32> to vector<512x256xf32>
    %79 = arith.addf %75, %78 : vector<512x256xf32>
    %cst_59 = arith.constant 0.000000e+00 : f32
    %80 = vector.broadcast %cst_59 : f32 to vector<512x256xf32>
    %81 = arith.maximumf %79, %80 : vector<512x256xf32>
    %c0_60 = arith.constant 0 : index
    %c0_61 = arith.constant 0 : index
    %82 = vector.load %arg10[%c0_60, %c0_61] : memref<256x384xbf16, #tpu.memory_space<vmem>>, vector<256x384xbf16>
    %83 = arith.truncf %81 : vector<512x256xf32> to vector<512x256xbf16>
    %cst_62 = arith.constant dense<0.000000e+00> : vector<512x384xf32>
    %84 = tpu.matmul %83, %82, %cst_62 {dimension_numbers = #tpu.dot_dimension_numbers<[1], [0], [0], [1], [0, 0, 1, 1], [], []>} : vector<512x256xbf16>, vector<256x384xbf16>, vector<512x384xf32> -> vector<512x384xf32>
    %c0_63 = arith.constant 0 : index
    %c0_64 = arith.constant 0 : index
    %85 = vector.load %arg11[%c0_63, %c0_64] : memref<1x384xf32, #tpu.memory_space<vmem>>, vector<1x384xf32>
    %86 = vector.broadcast %85 : vector<1x384xf32> to vector<512x384xf32>
    %87 = arith.addf %84, %86 : vector<512x384xf32>
    %88 = vector.extract_strided_slice %87 {offsets = [0, 0], sizes = [512, 256], strides = [1, 1]} : vector<512x384xf32> to vector<512x256xf32>
    %89 = vector.extract_strided_slice %87 {offsets = [0, 256], sizes = [512, 1], strides = [1, 1]} : vector<512x384xf32> to vector<512x1xf32>
    %c0_65 = arith.constant 0 : index
    %c0_66 = arith.constant 0 : index
    %90 = vector.load %arg12[%c0_65, %c0_66] : memref<256x128xbf16, #tpu.memory_space<vmem>>, vector<256x128xbf16>
    %91 = arith.truncf %88 : vector<512x256xf32> to vector<512x256xbf16>
    %cst_67 = arith.constant dense<0.000000e+00> : vector<512x128xf32>
    %92 = tpu.matmul %91, %90, %cst_67 {dimension_numbers = #tpu.dot_dimension_numbers<[1], [0], [0], [1], [0, 0, 1, 1], [], []>} : vector<512x256xbf16>, vector<256x128xbf16>, vector<512x128xf32> -> vector<512x128xf32>
    %c0_68 = arith.constant 0 : index
    %c0_69 = arith.constant 0 : index
    %93 = vector.load %arg13[%c0_68, %c0_69] : memref<21x128xbf16, #tpu.memory_space<vmem>>, vector<21x128xbf16>
    %cst_70 = arith.constant dense<0.000000e+00> : vector<512x128xf32>
    %94 = tpu.matmul %3, %93, %cst_70 {dimension_numbers = #tpu.dot_dimension_numbers<[1], [0], [0], [1], [0, 0, 1, 1], [], []>} : vector<512x21xbf16>, vector<21x128xbf16>, vector<512x128xf32> -> vector<512x128xf32>
    %95 = arith.addf %92, %94 : vector<512x128xf32>
    %c0_71 = arith.constant 0 : index
    %c0_72 = arith.constant 0 : index
    %96 = vector.load %arg14[%c0_71, %c0_72] : memref<1x128xf32, #tpu.memory_space<vmem>>, vector<1x128xf32>
    %97 = vector.broadcast %96 : vector<1x128xf32> to vector<512x128xf32>
    %98 = arith.addf %95, %97 : vector<512x128xf32>
    %cst_73 = arith.constant 0.000000e+00 : f32
    %99 = vector.broadcast %cst_73 : f32 to vector<512x128xf32>
    %100 = arith.maximumf %98, %99 : vector<512x128xf32>
    %c0_74 = arith.constant 0 : index
    %c0_75 = arith.constant 0 : index
    %101 = vector.load %arg15[%c0_74, %c0_75] : memref<128x3xbf16, #tpu.memory_space<vmem>>, vector<128x3xbf16>
    %102 = arith.truncf %100 : vector<512x128xf32> to vector<512x128xbf16>
    %cst_76 = arith.constant dense<0.000000e+00> : vector<512x3xf32>
    %103 = tpu.matmul %102, %101, %cst_76 {dimension_numbers = #tpu.dot_dimension_numbers<[1], [0], [0], [1], [0, 0, 1, 1], [], []>} : vector<512x128xbf16>, vector<128x3xbf16>, vector<512x3xf32> -> vector<512x3xf32>
    %c0_77 = arith.constant 0 : index
    %c0_78 = arith.constant 0 : index
    %104 = vector.load %arg16[%c0_77, %c0_78] : memref<1x3xf32, #tpu.memory_space<vmem>>, vector<1x3xf32>
    %105 = vector.broadcast %104 : vector<1x3xf32> to vector<512x3xf32>
    %106 = arith.addf %103, %105 : vector<512x3xf32>
    %107 = arith.negf %106 : vector<512x3xf32>
    %108 = math.exp %107 : vector<512x3xf32>
    %cst_79 = arith.constant 1.000000e+00 : f32
    %109 = vector.broadcast %cst_79 : f32 to vector<512x3xf32>
    %110 = arith.addf %109, %108 : vector<512x3xf32>
    %111 = arith.divf %109, %110 : vector<512x3xf32>
    %112 = tpu.concatenate %111, %89 in 1 : vector<512x3xf32>, vector<512x1xf32> -> vector<512x4xf32>
    %c0_80 = arith.constant 0 : index
    %c0_81 = arith.constant 0 : index
    %113 = vector.load %arg17[%c0_80, %c0_81] : memref<512x4xf32, #tpu.memory_space<vmem>>, vector<512x4xf32>
    tpu.vector_store %arg17[%c0_80, %c0_81], %112 {strides = array<i32>} : memref<512x4xf32, #tpu.memory_space<vmem>>, vector<512x4xf32>,
    return
  }
  func.func @transform_0(%arg0: i32) -> (i32, i32) {
    %c0_i32 = arith.constant 0 : i32
    %c0_i32_0 = arith.constant 0 : i32
    return %arg0, %c0_i32 : i32, i32
  }
  func.func @transform_1(%arg0: i32) -> (i32, i32) {
    %c0_i32 = arith.constant 0 : i32
    %c0_i32_0 = arith.constant 0 : i32
    return %arg0, %c0_i32 : i32, i32
  }
  func.func @transform_2(%arg0: i32) -> (i32, i32) {
    %c0_i32 = arith.constant 0 : i32
    %c0_i32_0 = arith.constant 0 : i32
    %c0_i32_1 = arith.constant 0 : i32
    return %c0_i32, %c0_i32_0 : i32, i32
  }
  func.func @transform_3(%arg0: i32) -> (i32, i32) {
    %c0_i32 = arith.constant 0 : i32
    %c0_i32_0 = arith.constant 0 : i32
    %c0_i32_1 = arith.constant 0 : i32
    return %c0_i32, %c0_i32_0 : i32, i32
  }
  func.func @transform_4(%arg0: i32) -> (i32, i32, i32) {
    %c0_i32 = arith.constant 0 : i32
    %c0_i32_0 = arith.constant 0 : i32
    %c0_i32_1 = arith.constant 0 : i32
    %c0_i32_2 = arith.constant 0 : i32
    return %c0_i32, %c0_i32_0, %c0_i32_1 : i32, i32, i32
  }
  func.func @transform_5(%arg0: i32) -> (i32, i32, i32) {
    %c0_i32 = arith.constant 0 : i32
    %c0_i32_0 = arith.constant 0 : i32
    %c0_i32_1 = arith.constant 0 : i32
    %c0_i32_2 = arith.constant 0 : i32
    return %c0_i32, %c0_i32_0, %c0_i32_1 : i32, i32, i32
  }
  func.func @transform_6(%arg0: i32) -> (i32, i32) {
    %c0_i32 = arith.constant 0 : i32
    %c0_i32_0 = arith.constant 0 : i32
    %c0_i32_1 = arith.constant 0 : i32
    return %c0_i32, %c0_i32_0 : i32, i32
  }
  func.func @transform_7(%arg0: i32) -> (i32, i32) {
    %c0_i32 = arith.constant 0 : i32
    %c0_i32_0 = arith.constant 0 : i32
    %c0_i32_1 = arith.constant 0 : i32
    return %c0_i32, %c0_i32_0 : i32, i32
  }
  func.func @transform_8(%arg0: i32) -> (i32, i32) {
    %c0_i32 = arith.constant 0 : i32
    %c0_i32_0 = arith.constant 0 : i32
    %c0_i32_1 = arith.constant 0 : i32
    return %c0_i32, %c0_i32_0 : i32, i32
  }
  func.func @transform_9(%arg0: i32) -> (i32, i32) {
    %c0_i32 = arith.constant 0 : i32
    %c0_i32_0 = arith.constant 0 : i32
    %c0_i32_1 = arith.constant 0 : i32
    return %c0_i32, %c0_i32_0 : i32, i32
  }
  func.func @transform_10(%arg0: i32) -> (i32, i32) {
    %c0_i32 = arith.constant 0 : i32
    %c0_i32_0 = arith.constant 0 : i32
    %c0_i32_1 = arith.constant 0 : i32
    return %c0_i32, %c0_i32_0 : i32, i32
  }
  func.func @transform_11(%arg0: i32) -> (i32, i32) {
    %c0_i32 = arith.constant 0 : i32
    %c0_i32_0 = arith.constant 0 : i32
    %c0_i32_1 = arith.constant 0 : i32
    return %c0_i32, %c0_i32_0 : i32, i32
  }
  func.func @transform_12(%arg0: i32) -> (i32, i32) {
    %c0_i32 = arith.constant 0 : i32
    %c0_i32_0 = arith.constant 0 : i32
    %c0_i32_1 = arith.constant 0 : i32
    return %c0_i32, %c0_i32_0 : i32, i32
  }
  func.func @transform_13(%arg0: i32) -> (i32, i32) {
    %c0_i32 = arith.constant 0 : i32
    %c0_i32_0 = arith.constant 0 : i32
    %c0_i32_1 = arith.constant 0 : i32
    return %c0_i32, %c0_i32_0 : i32, i32
  }
  func.func @transform_14(%arg0: i32) -> (i32, i32) {
    %c0_i32 = arith.constant 0 : i32
    %c0_i32_0 = arith.constant 0 : i32
    %c0_i32_1 = arith.constant 0 : i32
    return %c0_i32, %c0_i32_0 : i32, i32
  }
  func.func @transform_15(%arg0: i32) -> (i32, i32) {
    %c0_i32 = arith.constant 0 : i32
    %c0_i32_0 = arith.constant 0 : i32
    %c0_i32_1 = arith.constant 0 : i32
    return %c0_i32, %c0_i32_0 : i32, i32
  }
  func.func @transform_16(%arg0: i32) -> (i32, i32) {
    %c0_i32 = arith.constant 0 : i32
    %c0_i32_0 = arith.constant 0 : i32
    return %arg0, %c0_i32 : i32, i32
  }
}

</mosaic_0001>

<bundles_post_ra>
// kernel: nerf_forward.1
= control target key start
LH: loop header
LB: loop body
LE: loop exit
PB: predicated region body
PF: predicated region fallthrough
CT: control target
= control target key end

     0   :  { %s12239_s21 = smov 0   ;;  %s16752_s0 = inlined_call_operand.vmem [shape: f32[1024,39], index: 0, kind: input, shape index: {}]   ;;  %s16753_s1 = inlined_call_operand.vmem [shape: f32[1024,21], index: 1, kind: input, shape index: {}]   ;;  %s16754_s2 = inlined_call_operand.vmem [shape: bf16[39,256], index: 2, kind: input, shape index: {}]   ;;  %s16755_s3 = inlined_call_operand.vmem [shape: f32[1,256], index: 3, kind: input, shape index: {}]   ;;  %s16756_s4 = inlined_call_operand.vmem [shape: bf16[6,256,256], index: 4, kind: input, shape index: {}]   ;;  %s16757_s5 = inlined_call_operand.vmem [shape: f32[6,1,256], index: 5, kind: input, shape index: {}]   ;;  %s16758_s6 = inlined_call_operand.vmem [shape: bf16[256,256], index: 6, kind: input, shape index: {}]   ;;  %s16759_s7 = inlined_call_operand.vmem [shape: bf16[39,256], index: 7, kind: input, shape index: {}]   ;;  %s16760_s8 = inlined_call_operand.vmem [shape: f32[1,256], index: 8, kind: input, shape index: {}]   ;;  %s16761_s9 = inlined_call_operand.vmem [shape: bf16[256,384], index: 9, kind: input, shape index: {}]   ;;  %s16762_s10 = inlined_call_operand.vmem [shape: f32[1,384], index: 10, kind: input, shape index: {}]   ;;  %s16763_s11 = inlined_call_operand.vmem [shape: bf16[256,128], index: 11, kind: input, shape index: {}]   ;;  %s16764_s12 = inlined_call_operand.vmem [shape: bf16[21,128], index: 12, kind: input, shape index: {}]   ;;  %s16765_s13 = inlined_call_operand.vmem [shape: f32[1,128], index: 13, kind: input, shape index: {}]   ;;  %s16766_s14 = inlined_call_operand.vmem [shape: bf16[128,3], index: 14, kind: input, shape index: {}]   ;;  %s16767_s15 = inlined_call_operand.vmem [shape: f32[1,3], index: 15, kind: input, shape index: {}]   ;;  %s16768_s16 = inlined_call_operand.vmem [shape: f32[1024,4], index: 16, kind: output, shape index: {}]  }
   0x1   :  { %16815 = sst [smem:[#allocation44_spill]] %s16752_s0 }
   0x2 LB: > { %s10433_s22 = sadd.s32 4294967295, %s12149_s21   ;;  %p10437_p0 = scmp.ge.s32.totalorder %s12149_s21, 1  ;;  %s12149_s21 = sphi %s12239_s21, %s26_s21  }
   0x3   : > { %p474_p1 = scmp.lt.s32.totalorder %s12149_s21, 3 }
   0x5   : > { %p475_p2 = pnand %p10437_p0, %p474_p1 }
   0x7   : > { %478 = sbr.rel (%p475_p2) target bundleno = 3007 (0xbbf), region = 84 }
   0xe   : > { %v11444_v0 = vld [vmem:[%s16754_s2 + $0x4] ss:$8 sps:$4 sm:$0xff]   ;;  %vm879_vm0 = vcmask 1042432   ;;  %vm880_vm1 = vcmask 1043456   ;;  %v11446_v1 = vld [vmem:[%s16754_s2] ss:$8 sps:$4 sm:$0xff]  }
   0xf   : > { %889 = vmatprep.subr.bf16.mxu0 %v11444_v0  ;;  %v11447_v2 = vld [vmem:[%s16754_s2 + $0x14] ss:$8 sps:$4 sm:$0xff]   ;;  %v11449_v3 = vld [vmem:[%s16754_s2 + $0x10] ss:$8 sps:$4 sm:$0xff]   ;;  %v744_v4 = vld [vmem:[%s16754_s2 + $0x20] sm:$0xff]  ;;  %v16769_v5 = vmov 65535  }
  0x10   : > { %v881_v6 = vsel %vm879_vm0, 4294967295, %v16769_v5  ;;  %v16770_v7 = vmov 0   ;;  %890 = vmatpush1.bf16.msra.mxu0 %v11446_v1  ;;  %v10449_v8 = vcombine.high %v744_v4, %v744_v4  ;;  %v10448_v10 = vcombine.low %v744_v4, %v744_v4  ;;  %s10438_s18 = sshll.u32 %s10433_s22, 6  ;;  %s16816_s24 = sld [smem:[#allocation44_spill]]  ;;  %v11452_v25 = vld [vmem:[%s16756_s4 + $0x4] ss:$8 sps:$4 sm:$0xff]  }
  0x11   : > { %921 = vmatprep.mubr.bf16.mxu0 %v16770_v7  ;;  %v12265_v9 = vsel %vm880_vm1, %v881_v6, 0  ;;  %891 = vmatprep.subr.bf16.mxu0 %v11447_v2  ;;  %p530_p3 = scmp.lt.s32.totalorder %s10438_s18, 127  ;;  %vm782_vm2 = vcmask 318464   ;;  %v11454_v28 = vld [vmem:[%s16756_s4] ss:$8 sps:$4 sm:$0xff]   ;;  %vm8388_vm3 = vcmask 1041408  }
  0x12   : > { %v887_v11 = vand.u32 %v10449_v8, %v12265_v9  ;;  %v884_v12 = vand.u32 %v10448_v10, %v12265_v9  ;;  %1638 = vmatprep.subr.bf16.mxu1 %v11452_v25  ;;  %v11455_v30 = vld [vmem:[%s16756_s4 + $0x14] ss:$8 sps:$4 sm:$0xff]   ;;  %v11457_v31 = vld [vmem:[%s16756_s4 + $0x10] ss:$8 sps:$4 sm:$0xff]   ;;  %v11458_v32 = vld [vmem:[%s16756_s4 + $0x24] ss:$8 sps:$4 sm:$0xff]  }
  0x13   : > { %s17022_s18 = smov (!%p530_p3, %s10438_s18), 127  ;;  %1639 = vmatpush1.bf16.msra.mxu1 %v11454_v28  ;;  %v11460_v35 = vld [vmem:[%s16756_s4 + $0x20] ss:$8 sps:$4 sm:$0xff]   ;;  %v11461_v37 = vld [vmem:[%s16756_s4 + $0x34] ss:$8 sps:$4 sm:$0xff]   ;;  %vm8291_vm4 = vcmask 171008  }
  0x14   : > { %892 = vmatpush1.bf16.msra.mxu0 %v11449_v3  ;;  %s12269_s19 = sshll.u32 %s17022_s18, 3  ;;  %1640 = vmatprep.subr.bf16.mxu1 %v11455_v30  ;;  %v11463_v38 = vld [vmem:[%s16756_s4 + $0x30] ss:$8 sps:$4 sm:$0xff]   ;;  %v11464_v39 = vld [vmem:[%s16756_s4 + $0x44] ss:$8 sps:$4 sm:$0xff]   ;;  %s12153_s28 = smov 3  }
  0x15   : > { %893 = vmatprep.subr.bf16.mxu0 %v887_v11  ;;  %v11466_v42 = vld [vmem:[%s16756_s4 + $0x40] ss:$8 sps:$4 sm:$0xff]   ;;  %v11467_v44 = vld [vmem:[%s16756_s4 + $0x54] ss:$8 sps:$4 sm:$0xff]   ;;  %v11469_v45 = vld [vmem:[%s16756_s4 + $0x50] ss:$8 sps:$4 sm:$0xff]   ;;  %s15236_s27 = scalar_lea.vmem %s16753_s1, %s12269_s19  ;;  %s16494_s23 = scalar_lea.vmem %s16768_s16, %s12269_s19 }
  0x16   : > { %s12275_s25 = scalar_lea.vmem %s16816_s24, %s12269_s19  ;;  %v11470_v46 = vld [vmem:[%s16756_s4 + $0x64] ss:$8 sps:$4 sm:$0xff]   ;;  %v11472_v49 = vld [vmem:[%s16756_s4 + $0x60] ss:$8 sps:$4 sm:$0xff]   ;;  %v11473_v52 = vld [vmem:[%s16756_s4 + $0x74] ss:$8 sps:$4 sm:$0xff]  }
  0x17   : > { %v548_v13 = vld [vmem:[%s12275_s25] sm:$0xff]  ;;  %v549_v14 = vld [vmem:[%s12275_s25 + $0x8] sm:$0xff]  ;;  %v550_v16 = vld [vmem:[%s12275_s25 + $0x10] sm:$0xff]  ;;  %1641 = vmatpush1.bf16.msra.mxu1 %v11457_v31  ;;  %vm10235_vm5 = vcmask 23552   ;;  %vm10300_vm6 = vcmask 31744  }
  0x18   : > { %894 = vmatpush1.bf16.msra.mxu0 %v884_v12  ;;  %v12279_v15 = vpack.c.bf16 %v549_v14, %v548_v13  ;;  %v551_v17 = vld [vmem:[%s12275_s25 + $0x18] sm:$0xff]  ;;  %v552_v19 = vld [vmem:[%s12275_s25 + $0x20] sm:$0xff]  ;;  %v553_v20 = vld [vmem:[%s12275_s25 + $0x28] sm:$0xff]  ;;  %1642 = vmatprep.subr.bf16.mxu1 %v11458_v32 }
  0x19   : > { %v12286_v18 = vpack.c.bf16 %v551_v17, %v550_v16  ;;  %v12293_v21 = vpack.c.bf16 %v553_v20, %v552_v19  ;;  %v554_v22 = vld [vmem:[%s12275_s25 + $0x30] sm:$0xff]  ;;  %v555_v23 = vld [vmem:[%s12275_s25 + $0x38] sm:$0xff]  ;;  %v556_v26 = vld [vmem:[%s12275_s25 + $0x40] sm:$0xff] }
  0x1a   : > { %v12300_v24 = vpack.c.bf16 %v555_v23, %v554_v22  ;;  %v557_v27 = vld [vmem:[%s12275_s25 + $0x48] sm:$0xff]  ;;  %v558_v33 = vld [vmem:[%s12275_s25 + $0x50] sm:$0xff]  ;;  %v559_v34 = vld [vmem:[%s12275_s25 + $0x58] sm:$0xff] }
  0x1b   : > { %10450 = vmatmul.mubr.msk.bf16.vlgmr.msra.gmra.mrb[0].mxu0 %vm782_vm2, %v12279_v15  ;;  %v12313_v29 = vpack.c.bf16 %v557_v27, %v556_v26  ;;  %v12332_v36 = vpack.c.bf16 %v559_v34, %v558_v33  ;;  %1643 = vmatpush1.bf16.msra.mxu1 %v11460_v35  ;;  %v560_v40 = vld [vmem:[%s12275_s25 + $0x60] sm:$0xff]  ;;  %v561_v41 = vld [vmem:[%s12275_s25 + $0x68] sm:$0xff]  ;;  %v562_v47 = vld [vmem:[%s12275_s25 + $0x70] sm:$0xff] }
  0x1c   : > { %931 = vmatprep.mubr.bf16.mxu0 %v16770_v7  ;;  %1644 = vmatprep.subr.bf16.mxu1 %v11461_v37  ;;  %v12351_v43 = vpack.c.bf16 %v561_v41, %v560_v40  ;;  %v563_v48 = vld [vmem:[%s12275_s25 + $0x78] sm:$0xff]  ;;  %v564_v51 = vld [vmem:[%s12275_s25 + $0x80] sm:$0xff]  ;;  %v565_v55 = vld [vmem:[%s12275_s25 + $0x88] sm:$0xff] }
  0x1d   : > { %v12370_v50 = vpack.c.bf16 %v563_v48, %v562_v47  ;;  %v11475_v53 = vld [vmem:[%s16756_s4 + $0x70] ss:$8 sps:$4 sm:$0xff]   ;;  %v11476_v54 = vld [vmem:[%s16756_s4 + $0x100] ss:$8 sps:$4 sm:$0xff]   ;;  %v11478_v56 = vld [vmem:[%s16756_s4 + $0x104] ss:$8 sps:$4 sm:$0xff]   ;;  %v12395_v59 = vpack.c.bf16 %v565_v55, %v564_v51 }
  0x1e   : > { %v11479_v57 = vld [vmem:[%s16756_s4 + $0x84] ss:$8 sps:$4 sm:$0xff]   ;;  %v11481_v58 = vld [vmem:[%s16756_s4 + $0x80] ss:$8 sps:$4 sm:$0xff]   ;;  %2389 = vmatprep.subr.bf16.mxu0 %v11478_v56  ;;  %v11482_v60 = vld [vmem:[%s16756_s4 + $0x94] ss:$8 sps:$4 sm:$0xff]  }
  0x1f   : > { %1645 = vmatpush1.bf16.msra.mxu1 %v11463_v38  ;;  %2390 = vmatpush1.bf16.msra.mxu0 %v11476_v54  ;;  %v11484_v61 = vld [vmem:[%s16756_s4 + $0x90] ss:$8 sps:$4 sm:$0xff]   ;;  %v11485_v62 = vld [vmem:[%s16756_s4 + $0xa4] ss:$8 sps:$4 sm:$0xff]   ;;  %v11487_v1 = vld [vmem:[%s16756_s4 + $0xa0] ss:$8 sps:$4 sm:$0xff]  }
  0x20   : > { %1646 = vmatprep.subr.bf16.mxu1 %v11464_v39  ;;  %v566_v63 = vld [vmem:[%s12275_s25 + $0x90] sm:$0xff]  ;;  %v567_v0 = vld [vmem:[%s12275_s25 + $0x98] sm:$0xff]  ;;  %v568_v3 = vld [vmem:[%s12275_s25 + $0xa0] sm:$0xff] }
  0x21   : > { %v12414_v2 = vpack.c.bf16 %v567_v0, %v566_v63  ;;  %v11488_v4 = vld [vmem:[%s16756_s4 + $0xb4] ss:$8 sps:$4 sm:$0xff]   ;;  %v11490_v6 = vld [vmem:[%s16756_s4 + $0xb0] ss:$8 sps:$4 sm:$0xff]   ;;  %v569_v10 = vld [vmem:[%s12275_s25 + $0xa8] sm:$0xff] }
  0x22   : > { %v11491_v8 = vld [vmem:[%s16756_s4 + $0x110] ss:$8 sps:$4 sm:$0xff]   ;;  %v11493_v11 = vld [vmem:[%s16756_s4 + $0x114] ss:$8 sps:$4 sm:$0xff]   ;;  %v11494_v12 = vld [vmem:[%s16756_s4 + $0xc4] ss:$8 sps:$4 sm:$0xff]   ;;  %v12439_v14 = vpack.c.bf16 %v569_v10, %v568_v3 }
  0x23   : > { %10451 = vmatmul.mubr.msk.bf16.gmra.mrb[4].mxu0 %vm782_vm2, %v12286_v18  ;;  %1647 = vmatpush1.bf16.msra.mxu1 %v11466_v42  ;;  %v11496_v13 = vld [vmem:[%s16756_s4 + $0xc0] ss:$8 sps:$4 sm:$0xff]   ;;  %v570_v16 = vld [vmem:[%s12275_s25 + $0xb0] sm:$0xff]  ;;  %v571_v17 = vld [vmem:[%s12275_s25 + $0xb8] sm:$0xff] }
  0x24   : > { %941 = vmatprep.mubr.bf16.mxu0 %v16770_v7  ;;  %1648 = vmatprep.subr.bf16.mxu1 %v11467_v44  ;;  %v11497_v19 = vld [vmem:[%s16756_s4 + $0xd4] ss:$8 sps:$4 sm:$0xff]   ;;  %v11499_v20 = vld [vmem:[%s16756_s4 + $0xd0] ss:$8 sps:$4 sm:$0xff]   ;;  %v12452_v22 = vpack.c.bf16 %v571_v17, %v570_v16  ;;  %v11500_v23 = vld [vmem:[%s16756_s4 + $0xe4] ss:$8 sps:$4 sm:$0xff]  }
  0x25   : > { %2391 = vmatprep.subr.bf16.mxu0 %v11493_v11  ;;  %v11502_v25 = vld [vmem:[%s16756_s4 + $0xe0] ss:$8 sps:$4 sm:$0xff]   ;;  %v11503_v28 = vld [vmem:[%s16756_s4 + $0xf4] ss:$8 sps:$4 sm:$0xff]   ;;  %v11505_v30 = vld [vmem:[%s16756_s4 + $0xf0] ss:$8 sps:$4 sm:$0xff]  }
  0x26   : > { %2392 = vmatpush1.bf16.msra.mxu0 %v11491_v8  ;;  %v572_v26 = vld [vmem:[%s12275_s25 + $0xc0] sm:$0xff]  ;;  %v573_v27 = vld [vmem:[%s12275_s25 + $0xc8] sm:$0xff]  ;;  %v574_v34 = vld [vmem:[%s12275_s25 + $0xd0] sm:$0xff] }
  0x27   : > { %1649 = vmatpush1.bf16.msra.mxu1 %v11469_v45  ;;  %v12471_v31 = vpack.c.bf16 %v573_v27, %v572_v26  ;;  %v11506_v32 = vld [vmem:[%s16756_s4 + $0x120] ss:$8 sps:$4 sm:$0xff]   ;;  %v11508_v33 = vld [vmem:[%s16756_s4 + $0x124] ss:$8 sps:$4 sm:$0xff]   ;;  %v575_v35 = vld [vmem:[%s12275_s25 + $0xd8] sm:$0xff] }
  0x28   : > { %1650 = vmatprep.subr.bf16.mxu1 %v11470_v46  ;;  %2393 = vmatprep.subr.bf16.mxu0 %v11508_v33  ;;  %v12484_v37 = vpack.c.bf16 %v575_v35, %v574_v34  ;;  %v576_v38 = vld [vmem:[%s12275_s25 + $0xe0] sm:$0xff]  ;;  %v577_v39 = vld [vmem:[%s12275_s25 + $0xe8] sm:$0xff]  ;;  %v11509_v41 = vld [vmem:[%s16756_s4 + $0x130] ss:$8 sps:$4 sm:$0xff]  }
  0x29   : > { %v12491_v40 = vpack.c.bf16 %v577_v39, %v576_v38  ;;  %v11511_v42 = vld [vmem:[%s16756_s4 + $0x134] ss:$8 sps:$4 sm:$0xff]   ;;  %v580_v47 = vld [vmem:[%s12275_s25 + $0x100] sm:$0xff]  ;;  %v581_v48 = vld [vmem:[%s12275_s25 + $0x108] sm:$0xff]  ;;  %v747_v39 = vlaneseq }
  0x2a   : > { %2394 = vmatpush1.bf16.msra.mxu0 %v11506_v32  ;;  %v578_v44 = vld [vmem:[%s12275_s25 + $0xf0] sm:$0xff]  ;;  %v579_v45 = vld [vmem:[%s12275_s25 + $0xf8] sm:$0xff]  ;;  %v11512_v51 = vld [vmem:[%s16756_s4 + $0x140] ss:$8 sps:$4 sm:$0xff]  }
  0x2b   : > { %10452 = vmatmul.mubr.msk.bf16.gmra.mrb[8].mxu0 %vm782_vm2, %v12293_v21  ;;  %1651 = vmatpush1.bf16.msra.mxu1 %v11472_v49  ;;  %v12504_v46 = vpack.c.bf16 %v579_v45, %v578_v44  ;;  %v12511_v49 = vpack.c.bf16 %v581_v48, %v580_v47  ;;  %v583_v54 = vld [vmem:[%s12275_s25 + $0x118] sm:$0xff]  ;;  %v584_v56 = vld [vmem:[%s12275_s25 + $0x120] sm:$0xff]  ;;  %v589_v3 = vld [vmem:[%s12275_s25 + $0x148] sm:$0xff] }
  0x2c   : > { %951 = vmatprep.mubr.bf16.mxu0 %v16770_v7  ;;  %1652 = vmatprep.subr.bf16.mxu1 %v11473_v52  ;;  %v11514_v52 = vld [vmem:[%s16756_s4 + $0x144] ss:$8 sps:$4 sm:$0xff]   ;;  %v587_v63 = vld [vmem:[%s12275_s25 + $0x138] sm:$0xff]  ;;  %v590_v10 = vld [vmem:[%s12275_s25 + $0x150] sm:$0xff] }
  0x2d   : > { %2395 = vmatprep.subr.bf16.mxu0 %v11511_v42  ;;  %v11520_v8 = vld [vmem:[%s16756_s4 + $0x164] ss:$8 sps:$4 sm:$0xff]   ;;  %v591_v11 = vld [vmem:[%s12275_s25 + $0x158] sm:$0xff]  ;;  %v11524_v32 = vld [vmem:[%s16756_s4 + $0x180] ss:$8 sps:$4 sm:$0xff]  }
  0x2e   : > { %2396 = vmatpush1.bf16.msra.mxu0 %v11509_v41  ;;  %v593_v16 = vld [vmem:[%s12275_s25 + $0x168] sm:$0xff]  ;;  %v596_v27 = vld [vmem:[%s12275_s25 + $0x180] sm:$0xff]  ;;  %v598_v34 = vld [vmem:[%s12275_s25 + $0x190] sm:$0xff]  ;;  %v12608_v41 = vshrl.u32 %v747_v39, 7 }
  0x2f   : > { %1653 = vmatpush1.bf16.msra.mxu1 %v11475_v53  ;;  %v582_v53 = vld [vmem:[%s12275_s25 + $0x110] sm:$0xff]  ;;  %2397 = vmatprep.subr.bf16.mxu0 %v11514_v52  ;;  %v11526_v33 = vld [vmem:[%s16756_s4 + $0x184] ss:$8 sps:$4 sm:$0xff]   ;;  %v599_v35 = vld [vmem:[%s12275_s25 + $0x198] sm:$0xff] }
  0x30   : > { %1654 = vmatprep.subr.bf16.mxu1 %v11479_v57  ;;  %v12524_v55 = vpack.c.bf16 %v583_v54, %v582_v53  ;;  %v585_v57 = vld [vmem:[%s12275_s25 + $0x128] sm:$0xff]  ;;  %v12604_v38 = vpack.c.bf16 %v599_v35, %v598_v34  ;;  %16817 = vst [vmem:[#allocation2_spill] sm:$0xff] %v12608_v41  ;;  %v600_v42 = vld [vmem:[%s12275_s25 + $0x1a0] sm:$0xff]  ;;  %v12616_v47 = vsub.s32 0, %v12608_v41  ;;  %v11527_v52 = vld [vmem:[%s16756_s4 + $0x190] ss:$8 sps:$4 sm:$0xff]  }
  0x31   : > { %v601_v44 = vld [vmem:[%s12275_s25 + $0x1a8] sm:$0xff]  ;;  %v745_v48 = vld [vmem:[%s16755_s3] sm:$0x3]  ;;  %v11529_v53 = vld [vmem:[%s16756_s4 + $0x194] ss:$8 sps:$4 sm:$0xff]  }
  0x32   : > { %2398 = vmatpush1.bf16.msra.mxu0 %v11512_v51  ;;  %v12613_v45 = vpack.c.bf16 %v601_v44, %v600_v42  ;;  %v12622_v51 = vsub.s32 1, %v12608_v41  ;;  %v12633_v54 = vrot.slane %v745_v48, %v12616_v47 }
  0x33   : > { %10453 = vmatmul.mubr.msk.bf16.gmra.mrb[12].mxu0 %vm782_vm2, %v12300_v24  ;;  %1655 = vmatpush1.bf16.msra.mxu1 %v11481_v58  ;;  %v12531_v58 = vpack.c.bf16 %v585_v57, %v584_v56  ;;  %v602_v56 = vld [vmem:[%s12275_s25 + $0x1b0] sm:$0xff]  ;;  %v603_v57 = vld [vmem:[%s12275_s25 + $0x1b8] sm:$0xff] }
  0x34   : > { %961 = vmatprep.mubr.bf16.mxu0 %v16770_v7  ;;  %1656 = vmatprep.subr.bf16.mxu1 %v11482_v60  ;;  %v11515_v60 = vld [vmem:[%s16756_s4 + $0x150] ss:$8 sps:$4 sm:$0xff]  }
  0x37   : > { %1657 = vmatpush1.bf16.msra.mxu1 %v11484_v61  ;;  %v11517_v61 = vld [vmem:[%s16756_s4 + $0x154] ss:$8 sps:$4 sm:$0xff]  }
  0x38   : > { %1658 = vmatprep.subr.bf16.mxu1 %v11485_v62  ;;  %2399 = vmatprep.subr.bf16.mxu0 %v11517_v61  ;;  %v586_v62 = vld [vmem:[%s12275_s25 + $0x130] sm:$0xff] }
  0x39   : > { %2400 = vmatpush1.bf16.msra.mxu0 %v11515_v60  ;;  %v12544_v0 = vpack.c.bf16 %v587_v63, %v586_v62  ;;  %v12639_v60 = vrot.slane %v745_v48, %v12622_v51 }
  0x3a   : > { %2401 = vmatprep.subr.bf16.mxu0 %v11520_v8 }
  0x3b   : > { %10454 = vmatmul.mubr.msk.bf16.gmra.mrb[16].mxu0 %vm782_vm2, %v12313_v29  ;;  %1659 = vmatpush1.bf16.msra.mxu1 %v11487_v1  ;;  %v588_v1 = vld [vmem:[%s12275_s25 + $0x140] sm:$0xff] }
  0x3c   : > { %971 = vmatprep.mubr.bf16.mxu0 %v16770_v7  ;;  %1660 = vmatprep.subr.bf16.mxu1 %v11488_v4  ;;  %v12551_v4 = vpack.c.bf16 %v589_v3, %v588_v1  ;;  %v12642_v1 = vpack.c.bf16 %v603_v57, %v602_v56 }
  0x3f   : > { %1661 = vmatpush1.bf16.msra.mxu1 %v11490_v6  ;;  %v11518_v6 = vld [vmem:[%s16756_s4 + $0x160] ss:$8 sps:$4 sm:$0xff]  }
  0x40   : > { %1662 = vmatprep.subr.bf16.mxu1 %v11494_v12  ;;  %2402 = vmatpush1.bf16.msra.mxu0 %v11518_v6  ;;  %v12564_v12 = vpack.c.bf16 %v591_v11, %v590_v10 }
  0x43   : > { %10455 = vmatmul.mubr.msk.bf16.gmra.mrb[20].mxu0 %vm782_vm2, %v12332_v36  ;;  %1663 = vmatpush1.bf16.msra.mxu1 %v11496_v13  ;;  %v592_v13 = vld [vmem:[%s12275_s25 + $0x160] sm:$0xff] }
  0x44   : > { %981 = vmatprep.mubr.bf16.mxu0 %v16770_v7  ;;  %1664 = vmatprep.subr.bf16.mxu1 %v11497_v19  ;;  %v12571_v17 = vpack.c.bf16 %v593_v16, %v592_v13  ;;  %v11521_v19 = vld [vmem:[%s16756_s4 + $0x170] ss:$8 sps:$4 sm:$0xff]  }
  0x47   : > { %1665 = vmatpush1.bf16.msra.mxu1 %v11499_v20  ;;  %v11523_v20 = vld [vmem:[%s16756_s4 + $0x174] ss:$8 sps:$4 sm:$0xff]  }
  0x48   : > { %1666 = vmatprep.subr.bf16.mxu1 %v11500_v23  ;;  %2403 = vmatprep.subr.bf16.mxu0 %v11523_v20  ;;  %v594_v23 = vld [vmem:[%s12275_s25 + $0x170] sm:$0xff] }
  0x49   : > { %2404 = vmatpush1.bf16.msra.mxu0 %v11521_v19 }
  0x4a   : > { %2405 = vmatprep.subr.bf16.mxu0 %v11526_v33 }
  0x4b   : > { %10456 = vmatmul.mubr.msk.bf16.gmra.mrb[24].mxu0 %vm782_vm2, %v12351_v43  ;;  %1667 = vmatpush1.bf16.msra.mxu1 %v11502_v25  ;;  %v595_v25 = vld [vmem:[%s12275_s25 + $0x178] sm:$0xff] }
  0x4c   : > { %991 = vmatprep.mubr.bf16.mxu0 %v16770_v7  ;;  %1668 = vmatprep.subr.bf16.mxu1 %v11503_v28  ;;  %v12584_v26 = vpack.c.bf16 %v595_v25, %v594_v23  ;;  %v597_v28 = vld [vmem:[%s12275_s25 + $0x188] sm:$0xff]  ;;  %v604_v23 = vld [vmem:[%s12275_s25 + $0x1c0] sm:$0xff] }
  0x4d   : > { %2406 = vmatpush1.bf16.msra.mxu0 %v11524_v32  ;;  %v605_v25 = vld [vmem:[%s12275_s25 + $0x1c8] sm:$0xff] }
  0x4e   : > { %2407 = vmatprep.subr.bf16.mxu0 %v11529_v53  ;;  %v12653_v35 = vpack.c.bf16 %v605_v25, %v604_v23  ;;  %v11532_v53 = vld [vmem:[%s16756_s4 + $0x1a4] ss:$8 sps:$4 sm:$0xff]  }
  0x4f   : > { %1669 = vmatpush1.bf16.msra.mxu1 %v11505_v30  ;;  %v12591_v30 = vpack.c.bf16 %v597_v28, %v596_v27 }
  0x51   : > { %2408 = vmatpush1.bf16.msra.mxu0 %v11527_v52  ;;  %v11530_v52 = vld [vmem:[%s16756_s4 + $0x1a0] ss:$8 sps:$4 sm:$0xff]  }
  0x52   : > { %2409 = vmatprep.subr.bf16.mxu0 %v11532_v53 }
  0x53   : > { %10457 = vmatmul.mubr.msk.bf16.gmra.mrb[28].mxu0 %vm782_vm2, %v12370_v50 }
  0x54   : > { %1001 = vmatprep.mubr.bf16.mxu0 %v16770_v7 }
  0x55   : > { %2410 = vmatpush1.bf16.msra.mxu0 %v11530_v52 }
  0x5b   : > { %10458 = vmatmul.mubr.msk.bf16.gmra.mrb[32].mxu0 %vm782_vm2, %v12395_v59 }
  0x5c   : > { %1011 = vmatprep.mubr.bf16.mxu0 %v16770_v7 }
  0x63   : > { %10459 = vmatmul.mubr.msk.bf16.gmra.mrb[36].mxu0 %vm782_vm2, %v12414_v2 }
  0x64   : > { %1021 = vmatprep.mubr.bf16.mxu0 %v16770_v7 }
  0x6b   : > { %10460 = vmatmul.mubr.msk.bf16.gmra.mrb[40].mxu0 %vm782_vm2, %v12439_v14 }
  0x6c   : > { %1031 = vmatprep.mubr.bf16.mxu0 %v16770_v7 }
  0x73   : > { %10461 = vmatmul.mubr.msk.bf16.gmra.mrb[44].mxu0 %vm782_vm2, %v12452_v22 }
  0x74   : > { %1041 = vmatprep.mubr.bf16.mxu0 %v16770_v7 }
  0x7b   : > { %10462 = vmatmul.mubr.msk.bf16.gmra.mrb[48].mxu0 %vm782_vm2, %v12471_v31 }
  0x7c   : > { %1051 = vmatprep.mubr.bf16.mxu0 %v16770_v7 }
  0x83   : > { %10463 = vmatmul.mubr.msk.bf16.gmra.mrb[52].mxu0 %vm782_vm2, %v12484_v37 }
  0x84   : > { %1061 = vmatprep.mubr.bf16.mxu0 %v16770_v7 }
  0x8b   : > { %10464 = vmatmul.mubr.msk.bf16.gmra.mrb[56].mxu0 %vm782_vm2, %v12491_v40 }
  0x8c   : > { %1071 = vmatprep.mubr.bf16.mxu0 %v16770_v7 }
  0x93   : > { %10465 = vmatmul.mubr.msk.bf16.gmra.mrb[60].mxu0 %vm782_vm2, %v12504_v46 }
  0x94   : > { %1081 = vmatprep.mubr.bf16.mxu0 %v16770_v7 }
  0x9b   : > { %10466 = vmatmul.mubr.msk.bf16.gmra.mrb[64].mxu0 %vm782_vm2, %v12511_v49 }
  0x9c   : > { %1091 = vmatprep.mubr.bf16.mxu0 %v16770_v7 }
  0xa3   : > { %10467 = vmatmul.mubr.msk.bf16.gmra.mrb[68].mxu0 %vm782_vm2, %v12524_v55 }
  0xa4   : > { %1101 = vmatprep.mubr.bf16.mxu0 %v16770_v7 }
  0xab   : > { %10468 = vmatmul.mubr.msk.bf16.gmra.mrb[72].mxu0 %vm782_vm2, %v12531_v58 }
  0xac   : > { %1111 = vmatprep.mubr.bf16.mxu0 %v16770_v7 }
  0xb3   : > { %10469 = vmatmul.mubr.msk.bf16.gmra.mrb[76].mxu0 %vm782_vm2, %v12544_v0 }
  0xb4   : > { %1121 = vmatprep.mubr.bf16.mxu0 %v16770_v7 }
  0xbb   : > { %10470 = vmatmul.mubr.msk.bf16.gmra.mrb[80].mxu0 %vm782_vm2, %v12551_v4 }
  0xbc   : > { %1131 = vmatprep.mubr.bf16.mxu0 %v16770_v7 }
  0xc3   : > { %10471 = vmatmul.mubr.msk.bf16.gmra.mrb[84].mxu0 %vm782_vm2, %v12564_v12 }
  0xc4   : > { %1141 = vmatprep.mubr.bf16.mxu0 %v16770_v7 }
  0xcb   : > { %10472 = vmatmul.mubr.msk.bf16.gmra.mrb[88].mxu0 %vm782_vm2, %v12571_v17 }
  0xcc   : > { %1151 = vmatprep.mubr.bf16.mxu0 %v16770_v7 }
  0xd3   : > { %10473 = vmatmul.mubr.msk.bf16.gmra.mrb[92].mxu0 %vm782_vm2, %v12584_v26 }
  0xd4   : > { %1161 = vmatprep.mubr.bf16.mxu0 %v16770_v7 }
  0xdb   : > { %10474 = vmatmul.mubr.msk.bf16.gmra.mrb[96].mxu0 %vm782_vm2, %v12591_v30 }
  0xdc   : > { %1171 = vmatprep.mubr.bf16.mxu0 %v16770_v7 }
  0xe3   : > { %10475 = vmatmul.mubr.msk.bf16.gmra.mrb[100].mxu0 %vm782_vm2, %v12604_v38 }
  0xe4   : > { %1181 = vmatprep.mubr.bf16.mxu0 %v16770_v7 }
  0xeb   : > { %10476 = vmatmul.mubr.msk.bf16.gmra.mrb[104].mxu0 %vm782_vm2, %v12613_v45 }
  0xec   : > { %1191 = vmatprep.mubr.bf16.mxu0 %v16770_v7 }
  0xee   : > { %v923_v61 = vpop.f32.mrb[0].mxu0 }
  0xef   : > { %v924_v62 = vadd.f32 %v923_v61, %v12633_v54  ;;  %v925_v63 = vpop.f32.mrb[1].mxu0 }
  0xf0   : > { %v927_v3 = vpop.f32.mrb[2].mxu0  ;;  %v926_v6 = vadd.f32 %v925_v63, %v12639_v60 }
  0xf1   : > { %v928_v8 = vadd.f32 %v927_v3, %v12633_v54  ;;  %v929_v10 = vpop.f32.mrb[3].mxu0  ;;  %v1242_v13 = vmax.f32 %v924_v62, 0.0  ;;  %v606_v3 = vld [vmem:[%s12275_s25 + $0x1d0] sm:$0xff] }
  0xf2   : > { %v930_v11 = vadd.f32 %v929_v10, %v12639_v60  ;;  %v1243_v19 = vmax.f32 %v926_v6, 0.0  ;;  %v607_v6 = vld [vmem:[%s12275_s25 + $0x1d8] sm:$0xff] }
  0xf3   : > { %v1244_v16 = vmax.f32 %v928_v8, 0.0  ;;  %10477 = vmatmul.mubr.msk.bf16.gmra.mrb[108].mxu0 %vm782_vm2, %v12642_v1 }
  0xf4   : > { %v1245_v20 = vmax.f32 %v930_v11, 0.0  ;;  %1201 = vmatprep.mubr.bf16.mxu0 %v16770_v7 }
  0xf5   : > { %v1402_v27 = vpack.c.bf16 %v1244_v16, %v1242_v13 }
  0xf6   : > { %v933_v28 = vpop.f32.mrb[4].mxu0  ;;  %v1403_v32 = vpack.c.bf16 %v1245_v20, %v1243_v19  ;;  %v12670_v19 = vpack.c.bf16 %v607_v6, %v606_v3 }
  0xf7   : > { %v934_v33 = vadd.f32 %v933_v28, %v12633_v54  ;;  %v935_v34 = vpop.f32.mrb[5].mxu0 }
  0xf8   : > { %v936_v39 = vadd.f32 %v935_v34, %v12639_v60  ;;  %v937_v42 = vpop.f32.mrb[6].mxu0  ;;  %1670 = vmatprep.mubr.bf16.mxu1 %v1403_v32 }
  0xf9   : > { %v938_v44 = vadd.f32 %v937_v42, %v12633_v54  ;;  %v939_v48 = vpop.f32.mrb[7].mxu0  ;;  %1671 = vmatmul.mubr.bf16.vlgmr.msra.gmra.mrb[0].mxu1 %v1402_v27  ;;  %v1246_v57 = vmax.f32 %v934_v33, 0.0  ;;  %v608_v42 = vld [vmem:[%s12275_s25 + $0x1e0] sm:$0xff] }
  0xfa   : > { %v940_v56 = vadd.f32 %v939_v48, %v12639_v60  ;;  %v1247_v62 = vmax.f32 %v936_v39, 0.0 }
  0xfb   : > { %v1248_v61 = vmax.f32 %v938_v44, 0.0  ;;  %10478 = vmatmul.mubr.msk.bf16.gmra.mrb[112].mxu0 %vm782_vm2, %v12653_v35  ;;  %v609_v44 = vld [vmem:[%s12275_s25 + $0x1e8] sm:$0xff] }
  0xfc   : > { %v1249_v63 = vmax.f32 %v940_v56, 0.0  ;;  %1211 = vmatprep.mubr.bf16.mxu0 %v16770_v7 }
  0xfd   : > { %v1404_v8 = vpack.c.bf16 %v1248_v61, %v1246_v57  ;;  %v12681_v61 = vpack.c.bf16 %v609_v44, %v608_v42 }
  0xfe   : > { %v943_v10 = vpop.f32.mrb[8].mxu0  ;;  %v1405_v11 = vpack.c.bf16 %v1249_v63, %v1247_v62 }
  0xff   : > { %v944_v13 = vadd.f32 %v943_v10, %v12633_v54  ;;  %v945_v16 = vpop.f32.mrb[9].mxu0  ;;  %v11535_v10 = vld [vmem:[%s16756_s4 + $0x1b4] ss:$8 sps:$4 sm:$0xff]  }
 0x100   : > { %v946_v20 = vadd.f32 %v945_v16, %v12639_v60  ;;  %v947_v23 = vpop.f32.mrb[10].mxu0  ;;  %1680 = vmatprep.mubr.bf16.mxu1 %v1405_v11  ;;  %2411 = vmatprep.subr.bf16.mxu0 %v11535_v10 }
 0x101   : > { %v948_v25 = vadd.f32 %v947_v23, %v12633_v54  ;;  %v949_v27 = vpop.f32.mrb[11].mxu0  ;;  %1681 = vmatmul.mubr.bf16.gmra.mrb[4].mxu1 %v1404_v8  ;;  %v1250_v32 = vmax.f32 %v944_v13, 0.0  ;;  %v11533_v8 = vld [vmem:[%s16756_s4 + $0x1b0] ss:$8 sps:$4 sm:$0xff]  }
 0x102   : > { %v950_v28 = vadd.f32 %v949_v27, %v12639_v60  ;;  %v1251_v34 = vmax.f32 %v946_v20, 0.0  ;;  %v611_v27 = vld [vmem:[%s12275_s25 + $0x1f8] sm:$0xff]  ;;  %2412 = vmatpush1.bf16.msra.mxu0 %v11533_v8 }
 0x103   : > { %v1252_v33 = vmax.f32 %v948_v25, 0.0  ;;  %10479 = vmatmul.mubr.msk.bf16.gmra.mrb[116].mxu0 %vm782_vm2, %v12670_v19  ;;  %v610_v25 = vld [vmem:[%s12275_s25 + $0x1f0] sm:$0xff] }
 0x104   : > { %v1253_v39 = vmax.f32 %v950_v28, 0.0  ;;  %1221 = vmatprep.mubr.bf16.mxu0 %v16770_v7  ;;  %v12698_v42 = vpack.c.bf16 %v611_v27, %v610_v25  ;;  %v11536_v27 = vld [vmem:[%s16756_s4 + $0x1c0] ss:$8 sps:$4 sm:$0xff]  }
 0x105   : > { %v1406_v48 = vpack.c.bf16 %v1252_v33, %v1250_v32 }
 0x106   : > { %v953_v52 = vpop.f32.mrb[12].mxu0  ;;  %v1407_v53 = vpack.c.bf16 %v1253_v39, %v1251_v34 }
 0x107   : > { %v954_v56 = vadd.f32 %v953_v52, %v12633_v54  ;;  %v955_v57 = vpop.f32.mrb[13].mxu0 }
 0x108   : > { %v956_v62 = vadd.f32 %v955_v57, %v12639_v60  ;;  %v957_v63 = vpop.f32.mrb[14].mxu0  ;;  %1690 = vmatprep.mubr.bf16.mxu1 %v1407_v53 }
 0x109   : > { %v958_v3 = vadd.f32 %v957_v63, %v12633_v54  ;;  %v959_v6 = vpop.f32.mrb[15].mxu0  ;;  %1691 = vmatmul.mubr.bf16.gmra.mrb[8].mxu1 %v1406_v48  ;;  %v1254_v13 = vmax.f32 %v954_v56, 0.0 }
 0x10a   : > { %v960_v11 = vadd.f32 %v959_v6, %v12639_v60  ;;  %v1255_v20 = vmax.f32 %v956_v62, 0.0 }
 0x10b   : > { %v1256_v16 = vmax.f32 %v958_v3, 0.0  ;;  %10480 = vmatmul.mubr.msk.bf16.gmra.mrb[120].mxu0 %vm782_vm2, %v12681_v61 }
 0x10c   : > { %v1257_v23 = vmax.f32 %v960_v11, 0.0  ;;  %1231 = vmatprep.mubr.bf16.mxu0 %v16770_v7 }
 0x10d   : > { %v1408_v28 = vpack.c.bf16 %v1256_v16, %v1254_v13 }
 0x10e   : > { %v963_v32 = vpop.f32.mrb[16].mxu0  ;;  %v1409_v33 = vpack.c.bf16 %v1257_v23, %v1255_v20 }
 0x10f   : > { %v964_v34 = vadd.f32 %v963_v32, %v12633_v54  ;;  %v965_v39 = vpop.f32.mrb[17].mxu0 }
 0x110   : > { %v966_v44 = vadd.f32 %v965_v39, %v12639_v60  ;;  %v967_v48 = vpop.f32.mrb[18].mxu0  ;;  %1700 = vmatprep.mubr.bf16.mxu1 %v1409_v33 }
 0x111   : > { %v968_v52 = vadd.f32 %v967_v48, %v12633_v54  ;;  %v969_v53 = vpop.f32.mrb[19].mxu0  ;;  %1701 = vmatmul.mubr.bf16.gmra.mrb[12].mxu1 %v1408_v28  ;;  %v1258_v57 = vmax.f32 %v964_v34, 0.0  ;;  %v11538_v28 = vld [vmem:[%s16756_s4 + $0x1c4] ss:$8 sps:$4 sm:$0xff]  }
 0x112   : > { %v970_v56 = vadd.f32 %v969_v53, %v12639_v60  ;;  %v1259_v63 = vmax.f32 %v966_v44, 0.0  ;;  %2413 = vmatprep.subr.bf16.mxu0 %v11538_v28 }
 0x113   : > { %v1260_v62 = vmax.f32 %v968_v52, 0.0  ;;  %10481 = vmatmul.mubr.msk.bf16.gmra.mrb[124].mxu0 %vm782_vm2, %v12698_v42 }
 0x114   : > { %v1261_v3 = vmax.f32 %v970_v56, 0.0  ;;  %2414 = vmatpush1.bf16.msra.mxu0 %v11536_v27 }
 0x115   : > { %v1410_v6 = vpack.c.bf16 %v1260_v62, %v1258_v57 }
 0x116   : > { %v973_v8 = vpop.f32.mrb[20].mxu0  ;;  %v1411_v10 = vpack.c.bf16 %v1261_v3, %v1259_v63 }
 0x117   : > { %v974_v11 = vadd.f32 %v973_v8, %v12633_v54  ;;  %v975_v13 = vpop.f32.mrb[21].mxu0 }
 0x118   : > { %v976_v16 = vadd.f32 %v975_v13, %v12639_v60  ;;  %v977_v20 = vpop.f32.mrb[22].mxu0  ;;  %1710 = vmatprep.mubr.bf16.mxu1 %v1411_v10 }
 0x119   : > { %v978_v23 = vadd.f32 %v977_v20, %v12633_v54  ;;  %v979_v25 = vpop.f32.mrb[23].mxu0  ;;  %1711 = vmatmul.mubr.bf16.gmra.mrb[16].mxu1 %v1410_v6  ;;  %v1262_v33 = vmax.f32 %v974_v11, 0.0 }
 0x11a   : > { %v980_v32 = vadd.f32 %v979_v25, %v12639_v60  ;;  %v1263_v39 = vmax.f32 %v976_v16, 0.0 }
 0x11b   : > { %v1264_v34 = vmax.f32 %v978_v23, 0.0 }
 0x11c   : > { %v1265_v44 = vmax.f32 %v980_v32, 0.0 }
 0x11d   : > { %v1412_v48 = vpack.c.bf16 %v1264_v34, %v1262_v33 }
 0x11e   : > { %v983_v52 = vpop.f32.mrb[24].mxu0  ;;  %v1413_v53 = vpack.c.bf16 %v1265_v44, %v1263_v39  ;;  %v11539_v44 = vld [vmem:[%s16756_s4 + $0x1d0] ss:$8 sps:$4 sm:$0xff]  }
 0x11f   : > { %v984_v56 = vadd.f32 %v983_v52, %v12633_v54  ;;  %v985_v57 = vpop.f32.mrb[25].mxu0 }
 0x120   : > { %v986_v62 = vadd.f32 %v985_v57, %v12639_v60  ;;  %v987_v63 = vpop.f32.mrb[26].mxu0  ;;  %1720 = vmatprep.mubr.bf16.mxu1 %v1413_v53 }
 0x121   : > { %v988_v3 = vadd.f32 %v987_v63, %v12633_v54  ;;  %v989_v6 = vpop.f32.mrb[27].mxu0  ;;  %1721 = vmatmul.mubr.bf16.gmra.mrb[20].mxu1 %v1412_v48  ;;  %v1266_v10 = vmax.f32 %v984_v56, 0.0  ;;  %v11541_v48 = vld [vmem:[%s16756_s4 + $0x1d4] ss:$8 sps:$4 sm:$0xff]  }
 0x122   : > { %v990_v8 = vadd.f32 %v989_v6, %v12639_v60  ;;  %v1267_v13 = vmax.f32 %v986_v62, 0.0  ;;  %2415 = vmatprep.subr.bf16.mxu0 %v11541_v48 }
 0x123   : > { %v1268_v11 = vmax.f32 %v988_v3, 0.0  ;;  %2416 = vmatpush1.bf16.msra.mxu0 %v11539_v44 }
 0x124   : > { %v1269_v16 = vmax.f32 %v990_v8, 0.0 }
 0x125   : > { %v1414_v20 = vpack.c.bf16 %v1268_v11, %v1266_v10 }
 0x126   : > { %v993_v23 = vpop.f32.mrb[28].mxu0  ;;  %v1415_v25 = vpack.c.bf16 %v1269_v16, %v1267_v13 }
 0x127   : > { %v994_v27 = vadd.f32 %v993_v23, %v12633_v54  ;;  %v995_v28 = vpop.f32.mrb[29].mxu0 }
 0x128   : > { %v996_v32 = vadd.f32 %v995_v28, %v12639_v60  ;;  %v997_v33 = vpop.f32.mrb[30].mxu0  ;;  %1730 = vmatprep.mubr.bf16.mxu1 %v1415_v25 }
 0x129   : > { %v998_v34 = vadd.f32 %v997_v33, %v12633_v54  ;;  %v999_v39 = vpop.f32.mrb[31].mxu0  ;;  %1731 = vmatmul.mubr.bf16.gmra.mrb[24].mxu1 %v1414_v20  ;;  %v1270_v53 = vmax.f32 %v994_v27, 0.0  ;;  %v11542_v33 = vld [vmem:[%s16756_s4 + $0x200] ss:$8 sps:$4 sm:$0xff]  }
 0x12a   : > { %v1000_v52 = vadd.f32 %v999_v39, %v12639_v60  ;;  %v1271_v57 = vmax.f32 %v996_v32, 0.0 }
 0x12b   : > { %v1272_v56 = vmax.f32 %v998_v34, 0.0  ;;  %v11544_v34 = vld [vmem:[%s16756_s4 + $0x204] ss:$8 sps:$4 sm:$0xff]  }
 0x12c   : > { %v1273_v62 = vmax.f32 %v1000_v52, 0.0  ;;  %3140 = vmatprep.subr.bf16.mxu1 %v11544_v34 }
 0x12d   : > { %v1416_v63 = vpack.c.bf16 %v1272_v56, %v1270_v53  ;;  %3141 = vmatpush1.bf16.msra.mxu1 %v11542_v33 }
 0x12e   : > { %v1003_v3 = vpop.f32.mrb[32].mxu0  ;;  %v1417_v6 = vpack.c.bf16 %v1273_v62, %v1271_v57 }
 0x12f   : > { %v1004_v8 = vadd.f32 %v1003_v3, %v12633_v54  ;;  %v1005_v10 = vpop.f32.mrb[33].mxu0  ;;  %v11545_v3 = vld [vmem:[%s16756_s4 + $0x1e0] ss:$8 sps:$4 sm:$0xff]  }
 0x130   : > { %v1006_v11 = vadd.f32 %v1005_v10, %v12639_v60  ;;  %v1007_v13 = vpop.f32.mrb[34].mxu0  ;;  %1740 = vmatprep.mubr.bf16.mxu1 %v1417_v6  ;;  %v11547_v6 = vld [vmem:[%s16756_s4 + $0x1e4] ss:$8 sps:$4 sm:$0xff]  }
 0x131   : > { %v1008_v16 = vadd.f32 %v1007_v13, %v12633_v54  ;;  %v1009_v20 = vpop.f32.mrb[35].mxu0  ;;  %1741 = vmatmul.mubr.bf16.gmra.mrb[28].mxu1 %v1416_v63  ;;  %v1274_v25 = vmax.f32 %v1004_v8, 0.0  ;;  %2417 = vmatprep.subr.bf16.mxu0 %v11547_v6 }
 0x132   : > { %v1010_v23 = vadd.f32 %v1009_v20, %v12639_v60  ;;  %v1275_v28 = vmax.f32 %v1006_v11, 0.0  ;;  %2418 = vmatpush1.bf16.msra.mxu0 %v11545_v3 }
 0x133   : > { %v1276_v27 = vmax.f32 %v1008_v16, 0.0 }
 0x134   : > { %v1277_v32 = vmax.f32 %v1010_v23, 0.0 }
 0x135   : > { %v1418_v39 = vpack.c.bf16 %v1276_v27, %v1274_v25 }
 0x136   : > { %v1013_v44 = vpop.f32.mrb[36].mxu0  ;;  %v1419_v48 = vpack.c.bf16 %v1277_v32, %v1275_v28 }
 0x137   : > { %v1014_v52 = vadd.f32 %v1013_v44, %v12633_v54  ;;  %v1015_v53 = vpop.f32.mrb[37].mxu0 }
 0x138   : > { %v1016_v56 = vadd.f32 %v1015_v53, %v12639_v60  ;;  %v1017_v57 = vpop.f32.mrb[38].mxu0  ;;  %1750 = vmatprep.mubr.bf16.mxu1 %v1419_v48 }
 0x139   : > { %v1018_v62 = vadd.f32 %v1017_v57, %v12633_v54  ;;  %v1019_v63 = vpop.f32.mrb[39].mxu0  ;;  %1751 = vmatmul.mubr.bf16.gmra.mrb[32].mxu1 %v1418_v39  ;;  %v1278_v10 = vmax.f32 %v1014_v52, 0.0  ;;  %v11548_v57 = vld [vmem:[%s16756_s4 + $0x210] ss:$8 sps:$4 sm:$0xff]  }
 0x13a   : > { %v1020_v8 = vadd.f32 %v1019_v63, %v12639_v60  ;;  %v1279_v13 = vmax.f32 %v1016_v56, 0.0 }
 0x13b   : > { %v1280_v11 = vmax.f32 %v1018_v62, 0.0  ;;  %v11550_v62 = vld [vmem:[%s16756_s4 + $0x214] ss:$8 sps:$4 sm:$0xff]  }
 0x13c   : > { %v1281_v16 = vmax.f32 %v1020_v8, 0.0  ;;  %3142 = vmatprep.subr.bf16.mxu1 %v11550_v62 }
 0x13d   : > { %v1420_v20 = vpack.c.bf16 %v1280_v11, %v1278_v10  ;;  %3143 = vmatpush1.bf16.msra.mxu1 %v11548_v57 }
 0x13e   : > { %v1023_v23 = vpop.f32.mrb[40].mxu0  ;;  %v1421_v25 = vpack.c.bf16 %v1281_v16, %v1279_v13 }
 0x13f   : > { %v1024_v27 = vadd.f32 %v1023_v23, %v12633_v54  ;;  %v1025_v28 = vpop.f32.mrb[41].mxu0  ;;  %v11551_v23 = vld [vmem:[%s16756_s4 + $0x1f0] ss:$8 sps:$4 sm:$0xff]  }
 0x140   : > { %v1026_v32 = vadd.f32 %v1025_v28, %v12639_v60  ;;  %v1027_v33 = vpop.f32.mrb[42].mxu0  ;;  %1760 = vmatprep.mubr.bf16.mxu1 %v1421_v25  ;;  %v11553_v25 = vld [vmem:[%s16756_s4 + $0x1f4] ss:$8 sps:$4 sm:$0xff]  }
 0x141   : > { %v1028_v34 = vadd.f32 %v1027_v33, %v12633_v54  ;;  %v1029_v39 = vpop.f32.mrb[43].mxu0  ;;  %1761 = vmatmul.mubr.bf16.gmra.mrb[36].mxu1 %v1420_v20  ;;  %v1282_v48 = vmax.f32 %v1024_v27, 0.0  ;;  %2419 = vmatprep.subr.bf16.mxu0 %v11553_v25 }
 0x142   : > { %v1030_v44 = vadd.f32 %v1029_v39, %v12639_v60  ;;  %v1283_v53 = vmax.f32 %v1026_v32, 0.0  ;;  %2420 = vmatpush1.bf16.msra.mxu0 %v11551_v23 }
 0x143   : > { %v1284_v52 = vmax.f32 %v1028_v34, 0.0 }
 0x144   : > { %v1285_v56 = vmax.f32 %v1030_v44, 0.0 }
 0x145   : > { %v1422_v63 = vpack.c.bf16 %v1284_v52, %v1282_v48 }
 0x146   : > { %v1033_v3 = vpop.f32.mrb[44].mxu0  ;;  %v1423_v6 = vpack.c.bf16 %v1285_v56, %v1283_v53 }
 0x147   : > { %v1034_v8 = vadd.f32 %v1033_v3, %v12633_v54  ;;  %v1035_v10 = vpop.f32.mrb[45].mxu0 }
 0x148   : > { %v1036_v11 = vadd.f32 %v1035_v10, %v12639_v60  ;;  %v1037_v13 = vpop.f32.mrb[46].mxu0  ;;  %1770 = vmatprep.mubr.bf16.mxu1 %v1423_v6 }
 0x149   : > { %v1038_v16 = vadd.f32 %v1037_v13, %v12633_v54  ;;  %v1039_v20 = vpop.f32.mrb[47].mxu0  ;;  %1771 = vmatmul.mubr.bf16.gmra.mrb[40].mxu1 %v1422_v63  ;;  %v1286_v28 = vmax.f32 %v1034_v8, 0.0 }
 0x14a   : > { %v1040_v27 = vadd.f32 %v1039_v20, %v12639_v60  ;;  %v1287_v33 = vmax.f32 %v1036_v11, 0.0  ;;  %v11556_v20 = vld [vmem:[%s16756_s4 + $0x224] ss:$8 sps:$4 sm:$0xff]  }
 0x14b   : > { %v1288_v32 = vmax.f32 %v1038_v16, 0.0  ;;  %v11554_v16 = vld [vmem:[%s16756_s4 + $0x220] ss:$8 sps:$4 sm:$0xff]   ;;  %3144 = vmatprep.subr.bf16.mxu1 %v11556_v20 }
 0x14c   : > { %v1289_v34 = vmax.f32 %v1040_v27, 0.0  ;;  %3145 = vmatpush1.bf16.msra.mxu1 %v11554_v16 }
 0x14d   : > { %v1424_v39 = vpack.c.bf16 %v1288_v32, %v1286_v28 }
 0x14e   : > { %v1043_v44 = vpop.f32.mrb[48].mxu0  ;;  %v1425_v48 = vpack.c.bf16 %v1289_v34, %v1287_v33 }
 0x14f   : > { %v1044_v52 = vadd.f32 %v1043_v44, %v12633_v54  ;;  %v1045_v53 = vpop.f32.mrb[49].mxu0 }
 0x150   : > { %v1046_v56 = vadd.f32 %v1045_v53, %v12639_v60  ;;  %v1047_v57 = vpop.f32.mrb[50].mxu0  ;;  %1780 = vmatprep.mubr.bf16.mxu1 %v1425_v48 }
 0x151   : > { %v1048_v62 = vadd.f32 %v1047_v57, %v12633_v54  ;;  %v1049_v63 = vpop.f32.mrb[51].mxu0  ;;  %1781 = vmatmul.mubr.bf16.gmra.mrb[44].mxu1 %v1424_v39  ;;  %v1290_v6 = vmax.f32 %v1044_v52, 0.0 }
 0x152   : > { %v1050_v3 = vadd.f32 %v1049_v63, %v12639_v60  ;;  %v1291_v10 = vmax.f32 %v1046_v56, 0.0 }
 0x153   : > { %v1292_v8 = vmax.f32 %v1048_v62, 0.0 }
 0x154   : > { %v1293_v11 = vmax.f32 %v1050_v3, 0.0 }
 0x155   : > { %v1426_v13 = vpack.c.bf16 %v1292_v8, %v1290_v6 }
 0x156   : > { %v1053_v23 = vpop.f32.mrb[52].mxu0  ;;  %v1427_v25 = vpack.c.bf16 %v1293_v11, %v1291_v10 }
 0x157   : > { %v1054_v27 = vadd.f32 %v1053_v23, %v12633_v54  ;;  %v1055_v28 = vpop.f32.mrb[53].mxu0 }
 0x158   : > { %v1056_v32 = vadd.f32 %v1055_v28, %v12639_v60  ;;  %v1057_v33 = vpop.f32.mrb[54].mxu0  ;;  %1790 = vmatprep.mubr.bf16.mxu1 %v1427_v25 }
 0x159   : > { %v1058_v34 = vadd.f32 %v1057_v33, %v12633_v54  ;;  %v1059_v39 = vpop.f32.mrb[55].mxu0  ;;  %1791 = vmatmul.mubr.bf16.gmra.mrb[48].mxu1 %v1426_v13  ;;  %v1294_v48 = vmax.f32 %v1054_v27, 0.0  ;;  %v11559_v33 = vld [vmem:[%s16756_s4 + $0x234] ss:$8 sps:$4 sm:$0xff]  }
 0x15a   : > { %v1060_v44 = vadd.f32 %v1059_v39, %v12639_v60  ;;  %v1295_v53 = vmax.f32 %v1056_v32, 0.0  ;;  %v11557_v32 = vld [vmem:[%s16756_s4 + $0x230] ss:$8 sps:$4 sm:$0xff]   ;;  %3146 = vmatprep.subr.bf16.mxu1 %v11559_v33 }
 0x15b   : > { %v1296_v52 = vmax.f32 %v1058_v34, 0.0  ;;  %3147 = vmatpush1.bf16.msra.mxu1 %v11557_v32 }
 0x15c   : > { %v1297_v56 = vmax.f32 %v1060_v44, 0.0 }
 0x15d   : > { %v1428_v57 = vpack.c.bf16 %v1296_v52, %v1294_v48 }
 0x15e   : > { %v1063_v62 = vpop.f32.mrb[56].mxu0  ;;  %v1429_v63 = vpack.c.bf16 %v1297_v56, %v1295_v53 }
 0x15f   : > { %v1064_v3 = vadd.f32 %v1063_v62, %v12633_v54  ;;  %v1065_v6 = vpop.f32.mrb[57].mxu0 }
 0x160   : > { %v1066_v8 = vadd.f32 %v1065_v6, %v12639_v60  ;;  %v1067_v10 = vpop.f32.mrb[58].mxu0  ;;  %1800 = vmatprep.mubr.bf16.mxu1 %v1429_v63 }
 0x161   : > { %v1068_v11 = vadd.f32 %v1067_v10, %v12633_v54  ;;  %v1069_v16 = vpop.f32.mrb[59].mxu0  ;;  %1801 = vmatmul.mubr.bf16.gmra.mrb[52].mxu1 %v1428_v57  ;;  %v1298_v20 = vmax.f32 %v1064_v3, 0.0 }
 0x162   : > { %v1070_v13 = vadd.f32 %v1069_v16, %v12639_v60  ;;  %v1299_v25 = vmax.f32 %v1066_v8, 0.0 }
 0x163   : > { %v1300_v23 = vmax.f32 %v1068_v11, 0.0 }
 0x164   : > { %v1301_v27 = vmax.f32 %v1070_v13, 0.0 }
 0x165   : > { %v1430_v28 = vpack.c.bf16 %v1300_v23, %v1298_v20 }
 0x166   : > { %v1073_v34 = vpop.f32.mrb[60].mxu0  ;;  %v1431_v39 = vpack.c.bf16 %v1301_v27, %v1299_v25 }
 0x167   : > { %v1074_v44 = vadd.f32 %v1073_v34, %v12633_v54  ;;  %v1075_v48 = vpop.f32.mrb[61].mxu0 }
 0x168   : > { %v1076_v52 = vadd.f32 %v1075_v48, %v12639_v60  ;;  %v1077_v53 = vpop.f32.mrb[62].mxu0  ;;  %1810 = vmatprep.mubr.bf16.mxu1 %v1431_v39 }
 0x169   : > { %v1078_v56 = vadd.f32 %v1077_v53, %v12633_v54  ;;  %v1079_v57 = vpop.f32.mrb[63].mxu0  ;;  %1811 = vmatmul.mubr.bf16.gmra.mrb[56].mxu1 %v1430_v28  ;;  %v1302_v63 = vmax.f32 %v1074_v44, 0.0  ;;  %v11562_v53 = vld [vmem:[%s16756_s4 + $0x244] ss:$8 sps:$4 sm:$0xff]  }
 0x16a   : > { %v1080_v62 = vadd.f32 %v1079_v57, %v12639_v60  ;;  %v1303_v6 = vmax.f32 %v1076_v52, 0.0  ;;  %v11560_v52 = vld [vmem:[%s16756_s4 + $0x240] ss:$8 sps:$4 sm:$0xff]   ;;  %3148 = vmatprep.subr.bf16.mxu1 %v11562_v53 }
 0x16b   : > { %v1304_v3 = vmax.f32 %v1078_v56, 0.0  ;;  %3149 = vmatpush1.bf16.msra.mxu1 %v11560_v52 }
 0x16c   : > { %v1305_v8 = vmax.f32 %v1080_v62, 0.0 }
 0x16d   : > { %v1432_v10 = vpack.c.bf16 %v1304_v3, %v1302_v63 }
 0x16e   : > { %v1083_v11 = vpop.f32.mrb[64].mxu0  ;;  %v1433_v16 = vpack.c.bf16 %v1305_v8, %v1303_v6 }
 0x16f   : > { %v1084_v13 = vadd.f32 %v1083_v11, %v12633_v54  ;;  %v1085_v20 = vpop.f32.mrb[65].mxu0 }
 0x170   : > { %v1086_v23 = vadd.f32 %v1085_v20, %v12639_v60  ;;  %v1087_v25 = vpop.f32.mrb[66].mxu0  ;;  %1820 = vmatprep.mubr.bf16.mxu1 %v1433_v16 }
 0x171   : > { %v1088_v27 = vadd.f32 %v1087_v25, %v12633_v54  ;;  %v1089_v32 = vpop.f32.mrb[67].mxu0  ;;  %1821 = vmatmul.mubr.bf16.gmra.mrb[60].mxu1 %v1432_v10  ;;  %v1306_v33 = vmax.f32 %v1084_v13, 0.0 }
 0x172   : > { %v1090_v28 = vadd.f32 %v1089_v32, %v12639_v60  ;;  %v1307_v39 = vmax.f32 %v1086_v23, 0.0 }
 0x173   : > { %v1308_v34 = vmax.f32 %v1088_v27, 0.0 }
 0x174   : > { %v1309_v44 = vmax.f32 %v1090_v28, 0.0 }
 0x175   : > { %v1434_v48 = vpack.c.bf16 %v1308_v34, %v1306_v33 }
 0x176   : > { %v1093_v56 = vpop.f32.mrb[68].mxu0  ;;  %v1435_v57 = vpack.c.bf16 %v1309_v44, %v1307_v39 }
 0x177   : > { %v1094_v62 = vadd.f32 %v1093_v56, %v12633_v54  ;;  %v1095_v63 = vpop.f32.mrb[69].mxu0 }
 0x178   : > { %v1096_v3 = vadd.f32 %v1095_v63, %v12639_v60  ;;  %v1097_v6 = vpop.f32.mrb[70].mxu0  ;;  %1830 = vmatprep.mubr.bf16.mxu1 %v1435_v57 }
 0x179   : > { %v1098_v8 = vadd.f32 %v1097_v6, %v12633_v54  ;;  %v1099_v10 = vpop.f32.mrb[71].mxu0  ;;  %1831 = vmatmul.mubr.bf16.gmra.mrb[64].mxu1 %v1434_v48  ;;  %v1310_v16 = vmax.f32 %v1094_v62, 0.0  ;;  %v11565_v6 = vld [vmem:[%s16756_s4 + $0x254] ss:$8 sps:$4 sm:$0xff]  }
 0x17a   : > { %v1100_v11 = vadd.f32 %v1099_v10, %v12639_v60  ;;  %v1311_v20 = vmax.f32 %v1096_v3, 0.0  ;;  %v11563_v3 = vld [vmem:[%s16756_s4 + $0x250] ss:$8 sps:$4 sm:$0xff]   ;;  %3150 = vmatprep.subr.bf16.mxu1 %v11565_v6 }
 0x17b   : > { %v1312_v13 = vmax.f32 %v1098_v8, 0.0  ;;  %3151 = vmatpush1.bf16.msra.mxu1 %v11563_v3 }
 0x17c   : > { %v1313_v23 = vmax.f32 %v1100_v11, 0.0 }
 0x17d   : > { %v1436_v25 = vpack.c.bf16 %v1312_v13, %v1310_v16 }
 0x17e   : > { %v1103_v27 = vpop.f32.mrb[72].mxu0  ;;  %v1437_v32 = vpack.c.bf16 %v1313_v23, %v1311_v20 }
 0x17f   : > { %v1104_v28 = vadd.f32 %v1103_v27, %v12633_v54  ;;  %v1105_v33 = vpop.f32.mrb[73].mxu0 }
 0x180   : > { %v1106_v34 = vadd.f32 %v1105_v33, %v12639_v60  ;;  %v1107_v39 = vpop.f32.mrb[74].mxu0  ;;  %1840 = vmatprep.mubr.bf16.mxu1 %v1437_v32 }
 0x181   : > { %v1108_v44 = vadd.f32 %v1107_v39, %v12633_v54  ;;  %v1109_v52 = vpop.f32.mrb[75].mxu0  ;;  %1841 = vmatmul.mubr.bf16.gmra.mrb[68].mxu1 %v1436_v25  ;;  %v1314_v53 = vmax.f32 %v1104_v28, 0.0 }
 0x182   : > { %v1110_v48 = vadd.f32 %v1109_v52, %v12639_v60  ;;  %v1315_v57 = vmax.f32 %v1106_v34, 0.0 }
 0x183   : > { %v1316_v56 = vmax.f32 %v1108_v44, 0.0 }
 0x184   : > { %v1317_v62 = vmax.f32 %v1110_v48, 0.0 }
 0x185   : > { %v1438_v63 = vpack.c.bf16 %v1316_v56, %v1314_v53 }
 0x186   : > { %v1113_v8 = vpop.f32.mrb[76].mxu0  ;;  %v1439_v10 = vpack.c.bf16 %v1317_v62, %v1315_v57 }
 0x187   : > { %v1114_v11 = vadd.f32 %v1113_v8, %v12633_v54  ;;  %v1115_v16 = vpop.f32.mrb[77].mxu0 }
 0x188   : > { %v1116_v13 = vadd.f32 %v1115_v16, %v12639_v60  ;;  %v1117_v20 = vpop.f32.mrb[78].mxu0  ;;  %1850 = vmatprep.mubr.bf16.mxu1 %v1439_v10 }
 0x189   : > { %v1118_v23 = vadd.f32 %v1117_v20, %v12633_v54  ;;  %v1119_v25 = vpop.f32.mrb[79].mxu0  ;;  %1851 = vmatmul.mubr.bf16.gmra.mrb[72].mxu1 %v1438_v63  ;;  %v1318_v32 = vmax.f32 %v1114_v11, 0.0  ;;  %v11568_v20 = vld [vmem:[%s16756_s4 + $0x264] ss:$8 sps:$4 sm:$0xff]  }
 0x18a   : > { %v1120_v27 = vadd.f32 %v1119_v25, %v12639_v60  ;;  %v1319_v33 = vmax.f32 %v1116_v13, 0.0  ;;  %v11566_v13 = vld [vmem:[%s16756_s4 + $0x260] ss:$8 sps:$4 sm:$0xff]   ;;  %3152 = vmatprep.subr.bf16.mxu1 %v11568_v20 }
 0x18b   : > { %v1320_v28 = vmax.f32 %v1118_v23, 0.0  ;;  %3153 = vmatpush1.bf16.msra.mxu1 %v11566_v13 }
 0x18c   : > { %v1321_v34 = vmax.f32 %v1120_v27, 0.0 }
 0x18d   : > { %v1440_v39 = vpack.c.bf16 %v1320_v28, %v1318_v32 }
 0x18e   : > { %v1123_v44 = vpop.f32.mrb[80].mxu0  ;;  %v1441_v52 = vpack.c.bf16 %v1321_v34, %v1319_v33 }
 0x18f   : > { %v1124_v48 = vadd.f32 %v1123_v44, %v12633_v54  ;;  %v1125_v53 = vpop.f32.mrb[81].mxu0 }
 0x190   : > { %v1126_v56 = vadd.f32 %v1125_v53, %v12639_v60  ;;  %v1127_v57 = vpop.f32.mrb[82].mxu0  ;;  %1860 = vmatprep.mubr.bf16.mxu1 %v1441_v52 }
 0x191   : > { %v1128_v62 = vadd.f32 %v1127_v57, %v12633_v54  ;;  %v1129_v3 = vpop.f32.mrb[83].mxu0  ;;  %1861 = vmatmul.mubr.bf16.gmra.mrb[76].mxu1 %v1440_v39  ;;  %v1322_v6 = vmax.f32 %v1124_v48, 0.0 }
 0x192   : > { %v1130_v63 = vadd.f32 %v1129_v3, %v12639_v60  ;;  %v1323_v10 = vmax.f32 %v1126_v56, 0.0 }
 0x193   : > { %v1324_v8 = vmax.f32 %v1128_v62, 0.0 }
 0x194   : > { %v1325_v11 = vmax.f32 %v1130_v63, 0.0 }
 0x195   : > { %v1442_v16 = vpack.c.bf16 %v1324_v8, %v1322_v6 }
 0x196   : > { %v1133_v23 = vpop.f32.mrb[84].mxu0  ;;  %v1443_v25 = vpack.c.bf16 %v1325_v11, %v1323_v10 }
 0x197   : > { %v1134_v27 = vadd.f32 %v1133_v23, %v12633_v54  ;;  %v1135_v32 = vpop.f32.mrb[85].mxu0 }
 0x198   : > { %v1136_v28 = vadd.f32 %v1135_v32, %v12639_v60  ;;  %v1137_v33 = vpop.f32.mrb[86].mxu0  ;;  %1870 = vmatprep.mubr.bf16.mxu1 %v1443_v25 }
 0x199   : > { %v1138_v34 = vadd.f32 %v1137_v33, %v12633_v54  ;;  %v1139_v39 = vpop.f32.mrb[87].mxu0  ;;  %1871 = vmatmul.mubr.bf16.gmra.mrb[80].mxu1 %v1442_v16  ;;  %v1326_v52 = vmax.f32 %v1134_v27, 0.0  ;;  %v11571_v33 = vld [vmem:[%s16756_s4 + $0x274] ss:$8 sps:$4 sm:$0xff]  }
 0x19a   : > { %v1140_v44 = vadd.f32 %v1139_v39, %v12639_v60  ;;  %v1327_v53 = vmax.f32 %v1136_v28, 0.0  ;;  %v11569_v28 = vld [vmem:[%s16756_s4 + $0x270] ss:$8 sps:$4 sm:$0xff]   ;;  %3154 = vmatprep.subr.bf16.mxu1 %v11571_v33 }
 0x19b   : > { %v1328_v48 = vmax.f32 %v1138_v34, 0.0  ;;  %3155 = vmatpush1.bf16.msra.mxu1 %v11569_v28 }
 0x19c   : > { %v1329_v56 = vmax.f32 %v1140_v44, 0.0 }
 0x19d   : > { %v1444_v57 = vpack.c.bf16 %v1328_v48, %v1326_v52 }
 0x19e   : > { %v1143_v62 = vpop.f32.mrb[88].mxu0  ;;  %v1445_v3 = vpack.c.bf16 %v1329_v56, %v1327_v53 }
 0x19f   : > { %v1144_v63 = vadd.f32 %v1143_v62, %v12633_v54  ;;  %v1145_v6 = vpop.f32.mrb[89].mxu0 }
 0x1a0   : > { %v1146_v8 = vadd.f32 %v1145_v6, %v12639_v60  ;;  %v1147_v10 = vpop.f32.mrb[90].mxu0  ;;  %1880 = vmatprep.mubr.bf16.mxu1 %v1445_v3 }
 0x1a1   : > { %v1148_v11 = vadd.f32 %v1147_v10, %v12633_v54  ;;  %v1149_v13 = vpop.f32.mrb[91].mxu0  ;;  %1881 = vmatmul.mubr.bf16.gmra.mrb[84].mxu1 %v1444_v57  ;;  %v1330_v20 = vmax.f32 %v1144_v63, 0.0 }
 0x1a2   : > { %v1150_v16 = vadd.f32 %v1149_v13, %v12639_v60  ;;  %v1331_v25 = vmax.f32 %v1146_v8, 0.0 }
 0x1a3   : > { %v1332_v23 = vmax.f32 %v1148_v11, 0.0 }
 0x1a4   : > { %v1333_v27 = vmax.f32 %v1150_v16, 0.0 }
 0x1a5   : > { %v1446_v32 = vpack.c.bf16 %v1332_v23, %v1330_v20 }
 0x1a6   : > { %v1153_v34 = vpop.f32.mrb[92].mxu0  ;;  %v1447_v39 = vpack.c.bf16 %v1333_v27, %v1331_v25 }
 0x1a7   : > { %v1154_v44 = vadd.f32 %v1153_v34, %v12633_v54  ;;  %v1155_v52 = vpop.f32.mrb[93].mxu0 }
 0x1a8   : > { %v1156_v48 = vadd.f32 %v1155_v52, %v12639_v60  ;;  %v1157_v53 = vpop.f32.mrb[94].mxu0  ;;  %1890 = vmatprep.mubr.bf16.mxu1 %v1447_v39 }
 0x1a9   : > { %v1158_v56 = vadd.f32 %v1157_v53, %v12633_v54  ;;  %v1159_v57 = vpop.f32.mrb[95].mxu0  ;;  %1891 = vmatmul.mubr.bf16.gmra.mrb[88].mxu1 %v1446_v32  ;;  %v1334_v3 = vmax.f32 %v1154_v44, 0.0  ;;  %v11574_v53 = vld [vmem:[%s16756_s4 + $0x284] ss:$8 sps:$4 sm:$0xff]  }
 0x1aa   : > { %v1160_v62 = vadd.f32 %v1159_v57, %v12639_v60  ;;  %v1335_v6 = vmax.f32 %v1156_v48, 0.0  ;;  %v11572_v48 = vld [vmem:[%s16756_s4 + $0x280] ss:$8 sps:$4 sm:$0xff]   ;;  %3156 = vmatprep.subr.bf16.mxu1 %v11574_v53 }
 0x1ab   : > { %v1336_v63 = vmax.f32 %v1158_v56, 0.0  ;;  %3157 = vmatpush1.bf16.msra.mxu1 %v11572_v48 }
 0x1ac   : > { %v1337_v8 = vmax.f32 %v1160_v62, 0.0 }
 0x1ad   : > { %v1448_v10 = vpack.c.bf16 %v1336_v63, %v1334_v3 }
 0x1ae   : > { %v1163_v11 = vpop.f32.mrb[96].mxu0  ;;  %v1449_v13 = vpack.c.bf16 %v1337_v8, %v1335_v6 }
 0x1af   : > { %v1164_v16 = vadd.f32 %v1163_v11, %v12633_v54  ;;  %v1165_v20 = vpop.f32.mrb[97].mxu0 }
 0x1b0   : > { %v1166_v23 = vadd.f32 %v1165_v20, %v12639_v60  ;;  %v1167_v25 = vpop.f32.mrb[98].mxu0  ;;  %1900 = vmatprep.mubr.bf16.mxu1 %v1449_v13 }
 0x1b1   : > { %v1168_v27 = vadd.f32 %v1167_v25, %v12633_v54  ;;  %v1169_v28 = vpop.f32.mrb[99].mxu0  ;;  %1901 = vmatmul.mubr.bf16.gmra.mrb[92].mxu1 %v1448_v10  ;;  %v1338_v33 = vmax.f32 %v1164_v16, 0.0 }
 0x1b2   : > { %v1170_v32 = vadd.f32 %v1169_v28, %v12639_v60  ;;  %v1339_v39 = vmax.f32 %v1166_v23, 0.0 }
 0x1b3   : > { %v1340_v34 = vmax.f32 %v1168_v27, 0.0 }
 0x1b4   : > { %v1341_v44 = vmax.f32 %v1170_v32, 0.0 }
 0x1b5   : > { %v1450_v52 = vpack.c.bf16 %v1340_v34, %v1338_v33 }
 0x1b6   : > { %v1173_v56 = vpop.f32.mrb[100].mxu0  ;;  %v1451_v57 = vpack.c.bf16 %v1341_v44, %v1339_v39 }
 0x1b7   : > { %v1174_v62 = vadd.f32 %v1173_v56, %v12633_v54  ;;  %v1175_v3 = vpop.f32.mrb[101].mxu0 }
 0x1b8   : > { %v1176_v63 = vadd.f32 %v1175_v3, %v12639_v60  ;;  %v1177_v6 = vpop.f32.mrb[102].mxu0  ;;  %1910 = vmatprep.mubr.bf16.mxu1 %v1451_v57 }
 0x1b9   : > { %v1178_v8 = vadd.f32 %v1177_v6, %v12633_v54  ;;  %v1179_v10 = vpop.f32.mrb[103].mxu0  ;;  %1911 = vmatmul.mubr.bf16.gmra.mrb[96].mxu1 %v1450_v52  ;;  %v1342_v13 = vmax.f32 %v1174_v62, 0.0  ;;  %v11577_v6 = vld [vmem:[%s16756_s4 + $0x294] ss:$8 sps:$4 sm:$0xff]  }
 0x1ba   : > { %v1180_v11 = vadd.f32 %v1179_v10, %v12639_v60  ;;  %v1343_v20 = vmax.f32 %v1176_v63, 0.0  ;;  %v11575_v63 = vld [vmem:[%s16756_s4 + $0x290] ss:$8 sps:$4 sm:$0xff]   ;;  %3158 = vmatprep.subr.bf16.mxu1 %v11577_v6 }
 0x1bb   : > { %v1344_v16 = vmax.f32 %v1178_v8, 0.0  ;;  %3159 = vmatpush1.bf16.msra.mxu1 %v11575_v63 }
 0x1bc   : > { %v1345_v23 = vmax.f32 %v1180_v11, 0.0  ;;  %v1466_v11 = vld [vmem:[%s16757_s5] sm:$0x3] }
 0x1bd   : > { %v1452_v25 = vpack.c.bf16 %v1344_v16, %v1342_v13 }
 0x1be   : > { %v1183_v27 = vpop.f32.mrb[104].mxu0  ;;  %v1453_v28 = vpack.c.bf16 %v1345_v23, %v1343_v20 }
 0x1bf   : > { %v1184_v32 = vadd.f32 %v1183_v27, %v12633_v54  ;;  %v1185_v33 = vpop.f32.mrb[105].mxu0 }
 0x1c0   : > { %v1186_v34 = vadd.f32 %v1185_v33, %v12639_v60  ;;  %v1187_v39 = vpop.f32.mrb[106].mxu0  ;;  %1920 = vmatprep.mubr.bf16.mxu1 %v1453_v28  ;;  %v12884_v28 = vrot.slane %v1466_v11, %v12616_v47  ;;  %v12888_v33 = vrot.slane %v1466_v11, %v12622_v51 }
 0x1c1   : > { %v1188_v44 = vadd.f32 %v1187_v39, %v12633_v54  ;;  %v1189_v48 = vpop.f32.mrb[107].mxu0  ;;  %1921 = vmatmul.mubr.bf16.gmra.mrb[100].mxu1 %v1452_v25  ;;  %v1346_v53 = vmax.f32 %v1184_v32, 0.0 }
 0x1c2   : > { %v1190_v52 = vadd.f32 %v1189_v48, %v12639_v60  ;;  %v1347_v57 = vmax.f32 %v1186_v34, 0.0 }
 0x1c3   : > { %v1348_v56 = vmax.f32 %v1188_v44, 0.0 }
 0x1c4   : > { %v1349_v62 = vmax.f32 %v1190_v52, 0.0 }
 0x1c5   : > { %v1454_v3 = vpack.c.bf16 %v1348_v56, %v1346_v53 }
 0x1c6   : > { %v1193_v8 = vpop.f32.mrb[108].mxu0  ;;  %v1455_v10 = vpack.c.bf16 %v1349_v62, %v1347_v57 }
 0x1c7   : > { %v1194_v13 = vadd.f32 %v1193_v8, %v12633_v54  ;;  %v1195_v16 = vpop.f32.mrb[109].mxu0 }
 0x1c8   : > { %v1196_v20 = vadd.f32 %v1195_v16, %v12639_v60  ;;  %v1197_v23 = vpop.f32.mrb[110].mxu0  ;;  %1930 = vmatprep.mubr.bf16.mxu1 %v1455_v10 }
 0x1c9   : > { %v1198_v25 = vadd.f32 %v1197_v23, %v12633_v54  ;;  %v1199_v27 = vpop.f32.mrb[111].mxu0  ;;  %1931 = vmatmul.mubr.bf16.gmra.mrb[104].mxu1 %v1454_v3  ;;  %v1350_v34 = vmax.f32 %v1194_v13, 0.0 }
 0x1ca   : > { %v1200_v32 = vadd.f32 %v1199_v27, %v12639_v60  ;;  %v1351_v44 = vmax.f32 %v1196_v20, 0.0 }
 0x1cb   : > { %v1352_v39 = vmax.f32 %v1198_v25, 0.0 }
 0x1cc   : > { %v1353_v48 = vmax.f32 %v1200_v32, 0.0  ;;  %v1672_v52 = vpop.f32.mrb[0].mxu1 }
 0x1cd   : > { %v1673_v53 = vadd.f32 %v1672_v52, %v12884_v28  ;;  %v1674_v56 = vpop.f32.mrb[1].mxu1  ;;  %v1456_v57 = vpack.c.bf16 %v1352_v39, %v1350_v34 }
 0x1ce   : > { %v1675_v62 = vadd.f32 %v1674_v56, %v12888_v33  ;;  %v1203_v3 = vpop.f32.mrb[112].mxu0  ;;  %v1676_v63 = vpop.f32.mrb[2].mxu1  ;;  %v1457_v6 = vpack.c.bf16 %v1353_v48, %v1351_v44 }
 0x1cf   : > { %v1204_v8 = vadd.f32 %v1203_v3, %v12633_v54  ;;  %v1677_v10 = vadd.f32 %v1676_v63, %v12884_v28  ;;  %v1205_v11 = vpop.f32.mrb[113].mxu0  ;;  %v1678_v16 = vpop.f32.mrb[3].mxu1  ;;  %v1991_v25 = vmax.f32 %v1673_v53, 0.0 }
 0x1d0   : > { %v1206_v13 = vadd.f32 %v1205_v11, %v12639_v60  ;;  %v1679_v20 = vadd.f32 %v1678_v16, %v12888_v33  ;;  %v1207_v23 = vpop.f32.mrb[114].mxu0  ;;  %1940 = vmatprep.mubr.bf16.mxu1 %v1457_v6  ;;  %v1992_v44 = vmax.f32 %v1675_v62, 0.0 }
 0x1d1   : > { %v1993_v27 = vmax.f32 %v1677_v10, 0.0  ;;  %v1208_v32 = vadd.f32 %v1207_v23, %v12633_v54  ;;  %v1209_v34 = vpop.f32.mrb[115].mxu0  ;;  %1941 = vmatmul.mubr.bf16.gmra.mrb[108].mxu1 %v1456_v57  ;;  %v1354_v52 = vmax.f32 %v1204_v8, 0.0  ;;  %v11578_v10 = vld [vmem:[%s16756_s4 + $0x2a0] ss:$8 sps:$4 sm:$0xff]  }
 0x1d2   : > { %v1210_v39 = vadd.f32 %v1209_v34, %v12639_v60  ;;  %v1994_v48 = vmax.f32 %v1679_v20, 0.0  ;;  %v1355_v63 = vmax.f32 %v1206_v13, 0.0  ;;  %v11580_v57 = vld [vmem:[%s16756_s4 + $0x2a4] ss:$8 sps:$4 sm:$0xff]  }
 0x1d3   : > { %v2152_v56 = vpack.c.bf16 %v1993_v27, %v1991_v25  ;;  %v1356_v3 = vmax.f32 %v1208_v32, 0.0  ;;  %3160 = vmatprep.subr.bf16.mxu1 %v11580_v57 }
 0x1d4   : > { %v1357_v5 = vmax.f32 %v1210_v39, 0.0  ;;  %v1682_v11 = vpop.f32.mrb[4].mxu1  ;;  %v2153_v7 = vpack.c.bf16 %v1994_v48, %v1992_v44  ;;  %3161 = vmatpush1.bf16.msra.mxu1 %v11578_v10 }
 0x1d5   : > { %v1683_v16 = vadd.f32 %v1682_v11, %v12884_v28  ;;  %v1684_v6 = vpop.f32.mrb[5].mxu1  ;;  %v1458_v53 = vpack.c.bf16 %v1356_v3, %v1354_v52 }
 0x1d6   : > { %v1685_v62 = vadd.f32 %v1684_v6, %v12888_v33  ;;  %v1213_v8 = vpop.f32.mrb[116].mxu0  ;;  %v1686_v20 = vpop.f32.mrb[6].mxu1  ;;  %2421 = vmatprep.mubr.bf16.mxu0 %v2153_v7  ;;  %v1459_v13 = vpack.c.bf16 %v1357_v5, %v1355_v63 }
 0x1d7   : > { %v1214_v23 = vadd.f32 %v1213_v8, %v12633_v54  ;;  %v1687_v25 = vadd.f32 %v1686_v20, %v12884_v28  ;;  %v1215_v27 = vpop.f32.mrb[117].mxu0  ;;  %v1688_v32 = vpop.f32.mrb[7].mxu1  ;;  %2422 = vmatmul.mubr.bf16.vlgmr.msra.gmra.mrb[128].mxu0 %v2152_v56  ;;  %v1995_v5 = vmax.f32 %v1683_v16, 0.0 }
 0x1d8   : > { %v1216_v34 = vadd.f32 %v1215_v27, %v12639_v60  ;;  %v1689_v39 = vadd.f32 %v1688_v32, %v12888_v33  ;;  %v1217_v44 = vpop.f32.mrb[118].mxu0  ;;  %1950 = vmatprep.mubr.bf16.mxu1 %v1459_v13  ;;  %v1996_v63 = vmax.f32 %v1685_v62, 0.0 }
 0x1d9   : > { %v1218_v48 = vadd.f32 %v1217_v44, %v12633_v54  ;;  %v1219_v52 = vpop.f32.mrb[119].mxu0  ;;  %1951 = vmatmul.mubr.bf16.gmra.mrb[112].mxu1 %v1458_v53  ;;  %v1997_v7 = vmax.f32 %v1687_v25, 0.0  ;;  %v1358_v6 = vmax.f32 %v1214_v23, 0.0 }
 0x1da   : > { %v1220_v3 = vadd.f32 %v1219_v52, %v12639_v60  ;;  %v1998_v11 = vmax.f32 %v1689_v39, 0.0  ;;  %v1359_v8 = vmax.f32 %v1216_v34, 0.0 }
 0x1db   : > { %v1360_v56 = vmax.f32 %v1218_v48, 0.0  ;;  %v2154_v57 = vpack.c.bf16 %v1997_v7, %v1995_v5 }
 0x1dc   : > { %v1361_v20 = vmax.f32 %v1220_v3, 0.0  ;;  %v1692_v27 = vpop.f32.mrb[8].mxu1  ;;  %v2155_v32 = vpack.c.bf16 %v1998_v11, %v1996_v63 }
 0x1dd   : > { %v1693_v13 = vadd.f32 %v1692_v27, %v12884_v28  ;;  %v1694_v10 = vpop.f32.mrb[9].mxu1  ;;  %v1460_v41 = vpack.c.bf16 %v1360_v56, %v1358_v6 }
 0x1de   : > { %v1695_v44 = vadd.f32 %v1694_v10, %v12888_v33  ;;  %v1223_v53 = vpop.f32.mrb[120].mxu0  ;;  %v1696_v16 = vpop.f32.mrb[10].mxu1  ;;  %2431 = vmatprep.mubr.bf16.mxu0 %v2155_v32  ;;  %v1461_v25 = vpack.c.bf16 %v1361_v20, %v1359_v8 }
 0x1df   : > { %v1224_v62 = vadd.f32 %v1223_v53, %v12633_v54  ;;  %v1697_v23 = vadd.f32 %v1696_v16, %v12884_v28  ;;  %v1225_v39 = vpop.f32.mrb[121].mxu0  ;;  %v1698_v48 = vpop.f32.mrb[11].mxu1  ;;  %2432 = vmatmul.mubr.bf16.gmra.mrb[132].mxu0 %v2154_v57  ;;  %v1999_v63 = vmax.f32 %v1693_v13, 0.0  ;;  %v11583_v13 = vld [vmem:[%s16756_s4 + $0x2b4] ss:$8 sps:$4 sm:$0xff]  }
 0x1e0   : > { %v1226_v34 = vadd.f32 %v1225_v39, %v12639_v60  ;;  %v1699_v52 = vadd.f32 %v1698_v48, %v12888_v33  ;;  %v1227_v5 = vpop.f32.mrb[122].mxu0  ;;  %1960 = vmatprep.mubr.bf16.mxu1 %v1461_v25  ;;  %v2000_v56 = vmax.f32 %v1695_v44, 0.0  ;;  %3162 = vmatprep.subr.bf16.mxu1 %v11583_v13 }
 0x1e1   : > { %v1228_v7 = vadd.f32 %v1227_v5, %v12633_v54  ;;  %v1229_v3 = vpop.f32.mrb[123].mxu0  ;;  %1961 = vmatmul.mubr.bf16.gmra.mrb[116].mxu1 %v1460_v41  ;;  %v2001_v11 = vmax.f32 %v1697_v23, 0.0  ;;  %v1362_v20 = vmax.f32 %v1224_v62, 0.0  ;;  %v11581_v41 = vld [vmem:[%s16756_s4 + $0x2b0] ss:$8 sps:$4 sm:$0xff]  }
 0x1e2   : > { %v1230_v6 = vadd.f32 %v1229_v3, %v12639_v60  ;;  %v2002_v8 = vmax.f32 %v1699_v52, 0.0  ;;  %v1363_v57 = vmax.f32 %v1226_v34, 0.0  ;;  %3163 = vmatpush1.bf16.msra.mxu1 %v11581_v41 }
 0x1e3   : > { %v1364_v27 = vmax.f32 %v1228_v7, 0.0  ;;  %v2156_v32 = vpack.c.bf16 %v2001_v11, %v1999_v63 }
 0x1e4   : > { %v1365_v10 = vmax.f32 %v1230_v6, 0.0  ;;  %v1702_v53 = vpop.f32.mrb[12].mxu1  ;;  %v2157_v16 = vpack.c.bf16 %v2002_v8, %v2000_v56 }
 0x1e5   : > { %v1703_v39 = vadd.f32 %v1702_v53, %v12884_v28  ;;  %v1704_v25 = vpop.f32.mrb[13].mxu1  ;;  %v1462_v48 = vpack.c.bf16 %v1364_v27, %v1362_v20 }
 0x1e6   : > { %v1705_v44 = vadd.f32 %v1704_v25, %v12888_v33  ;;  %v1233_v62 = vpop.f32.mrb[124].mxu0  ;;  %v1706_v23 = vpop.f32.mrb[14].mxu1  ;;  %2441 = vmatprep.mubr.bf16.mxu0 %v2157_v16  ;;  %v1463_v34 = vpack.c.bf16 %v1365_v10, %v1363_v57 }
 0x1e7   : > { %v1234_v52 = vadd.f32 %v1233_v62, %v12633_v54  ;;  %v1707_v5 = vadd.f32 %v1706_v23, %v12884_v28  ;;  %v1235_v7 = vpop.f32.mrb[125].mxu0  ;;  %v1708_v3 = vpop.f32.mrb[15].mxu1  ;;  %2442 = vmatmul.mubr.bf16.gmra.mrb[136].mxu0 %v2156_v32  ;;  %v2003_v20 = vmax.f32 %v1703_v39, 0.0 }
 0x1e8   : > { %v1236_v63 = vadd.f32 %v1235_v7, %v12639_v60  ;;  %v1709_v11 = vadd.f32 %v1708_v3, %v12888_v33  ;;  %v1237_v6 = vpop.f32.mrb[126].mxu0  ;;  %1970 = vmatprep.mubr.bf16.mxu1 %v1463_v34  ;;  %v2004_v10 = vmax.f32 %v1705_v44, 0.0 }
 0x1e9   : > { %v1238_v56 = vadd.f32 %v1237_v6, %v12633_v54  ;;  %v1239_v8 = vpop.f32.mrb[127].mxu0  ;;  %1971 = vmatmul.mubr.bf16.gmra.mrb[120].mxu1 %v1462_v48  ;;  %v2005_v27 = vmax.f32 %v1707_v5, 0.0  ;;  %v1366_v16 = vmax.f32 %v1234_v52, 0.0 }
 0x1ea   : > { %v1240_v57 = vadd.f32 %v1239_v8, %v12639_v60  ;;  %v2006_v53 = vmax.f32 %v1709_v11, 0.0  ;;  %v1367_v13 = vmax.f32 %v1236_v63, 0.0 }
 0x1eb   : > { %v1368_v32 = vmax.f32 %v1238_v56, 0.0  ;;  %v2158_v25 = vpack.c.bf16 %v2005_v27, %v2003_v20 }
 0x1ec   : > { %v1369_v62 = vmax.f32 %v1240_v57, 0.0  ;;  %v1712_v23 = vpop.f32.mrb[16].mxu1  ;;  %v2159_v7 = vpack.c.bf16 %v2006_v53, %v2004_v10  ;;  %v11584_v10 = vld [vmem:[%s16756_s4 + $0x2c0] ss:$8 sps:$4 sm:$0xff]   ;;  %v11586_v53 = vld [vmem:[%s16756_s4 + $0x2c4] ss:$8 sps:$4 sm:$0xff]  }
 0x1ed   : > { %v1713_v34 = vadd.f32 %v1712_v23, %v12884_v28  ;;  %v1714_v41 = vpop.f32.mrb[17].mxu1  ;;  %v1464_v3 = vpack.c.bf16 %v1368_v32, %v1366_v16  ;;  %3164 = vmatprep.subr.bf16.mxu1 %v11586_v53 }
 0x1ee   : > { %v1715_v54 = vadd.f32 %v1714_v41, %v12888_v33  ;;  %v1716_v48 = vpop.f32.mrb[18].mxu1  ;;  %2451 = vmatprep.mubr.bf16.mxu0 %v2159_v7  ;;  %v1465_v39 = vpack.c.bf16 %v1369_v62, %v1367_v13  ;;  %3165 = vmatpush1.bf16.msra.mxu1 %v11584_v10 }
 0x1ef   : > { %v1717_v60 = vadd.f32 %v1716_v48, %v12884_v28  ;;  %v1718_v44 = vpop.f32.mrb[19].mxu1  ;;  %2452 = vmatmul.mubr.bf16.gmra.mrb[140].mxu0 %v2158_v25  ;;  %v2007_v5 = vmax.f32 %v1713_v34, 0.0 }
 0x1f0   : > { %v1719_v52 = vadd.f32 %v1718_v44, %v12888_v33  ;;  %1980 = vmatprep.mubr.bf16.mxu1 %v1465_v39  ;;  %v2008_v11 = vmax.f32 %v1715_v54, 0.0 }
 0x1f1   : > { %1981 = vmatmul.mubr.bf16.gmra.mrb[124].mxu1 %v1464_v3  ;;  %v2009_v63 = vmax.f32 %v1717_v60, 0.0 }
 0x1f2   : > { %v2010_v6 = vmax.f32 %v1719_v52, 0.0 }
 0x1f3   : > { %v2160_v56 = vpack.c.bf16 %v2009_v63, %v2007_v5 }
 0x1f4   : > { %v1722_v8 = vpop.f32.mrb[20].mxu1  ;;  %v2161_v20 = vpack.c.bf16 %v2010_v6, %v2008_v11 }
 0x1f5   : > { %v1723_v27 = vadd.f32 %v1722_v8, %v12884_v28  ;;  %v1724_v57 = vpop.f32.mrb[21].mxu1 }
 0x1f6   : > { %v1725_v16 = vadd.f32 %v1724_v57, %v12888_v33  ;;  %v1726_v32 = vpop.f32.mrb[22].mxu1  ;;  %2461 = vmatprep.mubr.bf16.mxu0 %v2161_v20 }
 0x1f7   : > { %v1727_v25 = vadd.f32 %v1726_v32, %v12884_v28  ;;  %v1728_v13 = vpop.f32.mrb[23].mxu1  ;;  %2462 = vmatmul.mubr.bf16.gmra.mrb[144].mxu0 %v2160_v56  ;;  %v2011_v23 = vmax.f32 %v1723_v27, 0.0  ;;  %v11587_v32 = vld [vmem:[%s16756_s4 + $0x2d0] ss:$8 sps:$4 sm:$0xff]  }
 0x1f8   : > { %v1729_v62 = vadd.f32 %v1728_v13, %v12888_v33  ;;  %v2012_v34 = vmax.f32 %v1725_v16, 0.0 }
 0x1f9   : > { %v2013_v7 = vmax.f32 %v1727_v25, 0.0  ;;  %v11589_v25 = vld [vmem:[%s16756_s4 + $0x2d4] ss:$8 sps:$4 sm:$0xff]  }
 0x1fa   : > { %v2014_v41 = vmax.f32 %v1729_v62, 0.0  ;;  %3166 = vmatprep.subr.bf16.mxu1 %v11589_v25 }
 0x1fb   : > { %v2162_v3 = vpack.c.bf16 %v2013_v7, %v2011_v23  ;;  %3167 = vmatpush1.bf16.msra.mxu1 %v11587_v32 }
 0x1fc   : > { %v1732_v54 = vpop.f32.mrb[24].mxu1  ;;  %v2163_v48 = vpack.c.bf16 %v2014_v41, %v2012_v34 }
 0x1fd   : > { %v1733_v39 = vadd.f32 %v1732_v54, %v12884_v28  ;;  %v1734_v60 = vpop.f32.mrb[25].mxu1 }
 0x1fe   : > { %v1735_v44 = vadd.f32 %v1734_v60, %v12888_v33  ;;  %v1736_v52 = vpop.f32.mrb[26].mxu1  ;;  %2471 = vmatprep.mubr.bf16.mxu0 %v2163_v48 }
 0x1ff   : > { %v1737_v5 = vadd.f32 %v1736_v52, %v12884_v28  ;;  %v1738_v63 = vpop.f32.mrb[27].mxu1  ;;  %2472 = vmatmul.mubr.bf16.gmra.mrb[148].mxu0 %v2162_v3  ;;  %v2015_v6 = vmax.f32 %v1733_v39, 0.0 }
 0x200   : > { %v1739_v11 = vadd.f32 %v1738_v63, %v12888_v33  ;;  %v2016_v8 = vmax.f32 %v1735_v44, 0.0 }
 0x201   : > { %v2017_v56 = vmax.f32 %v1737_v5, 0.0 }
 0x202   : > { %v2018_v20 = vmax.f32 %v1739_v11, 0.0 }
 0x203   : > { %v2164_v27 = vpack.c.bf16 %v2017_v56, %v2015_v6 }
 0x204   : > { %v1742_v57 = vpop.f32.mrb[28].mxu1  ;;  %v2165_v10 = vpack.c.bf16 %v2018_v20, %v2016_v8 }
 0x205   : > { %v1743_v53 = vadd.f32 %v1742_v57, %v12884_v28  ;;  %v1744_v16 = vpop.f32.mrb[29].mxu1 }
 0x206   : > { %v1745_v13 = vadd.f32 %v1744_v16, %v12888_v33  ;;  %v1746_v62 = vpop.f32.mrb[30].mxu1  ;;  %2481 = vmatprep.mubr.bf16.mxu0 %v2165_v10 }
 0x207   : > { %v1747_v23 = vadd.f32 %v1746_v62, %v12884_v28  ;;  %v1748_v7 = vpop.f32.mrb[31].mxu1  ;;  %2482 = vmatmul.mubr.bf16.gmra.mrb[152].mxu0 %v2164_v27  ;;  %v2019_v41 = vmax.f32 %v1743_v53, 0.0  ;;  %v11590_v62 = vld [vmem:[%s16756_s4 + $0x2e0] ss:$8 sps:$4 sm:$0xff]  }
 0x208   : > { %v1749_v34 = vadd.f32 %v1748_v7, %v12888_v33  ;;  %v2020_v54 = vmax.f32 %v1745_v13, 0.0 }
 0x209   : > { %v2021_v3 = vmax.f32 %v1747_v23, 0.0  ;;  %v11592_v23 = vld [vmem:[%s16756_s4 + $0x2e4] ss:$8 sps:$4 sm:$0xff]  }
 0x20a   : > { %v2022_v48 = vmax.f32 %v1749_v34, 0.0  ;;  %3168 = vmatprep.subr.bf16.mxu1 %v11592_v23 }
 0x20b   : > { %v2166_v39 = vpack.c.bf16 %v2021_v3, %v2019_v41  ;;  %3169 = vmatpush1.bf16.msra.mxu1 %v11590_v62 }
 0x20c   : > { %v1752_v60 = vpop.f32.mrb[32].mxu1  ;;  %v2167_v44 = vpack.c.bf16 %v2022_v48, %v2020_v54 }
 0x20d   : > { %v1753_v52 = vadd.f32 %v1752_v60, %v12884_v28  ;;  %v1754_v5 = vpop.f32.mrb[33].mxu1 }
 0x20e   : > { %v1755_v63 = vadd.f32 %v1754_v5, %v12888_v33  ;;  %v1756_v11 = vpop.f32.mrb[34].mxu1  ;;  %2491 = vmatprep.mubr.bf16.mxu0 %v2167_v44 }
 0x20f   : > { %v1757_v6 = vadd.f32 %v1756_v11, %v12884_v28  ;;  %v1758_v56 = vpop.f32.mrb[35].mxu1  ;;  %2492 = vmatmul.mubr.bf16.gmra.mrb[156].mxu0 %v2166_v39  ;;  %v2023_v20 = vmax.f32 %v1753_v52, 0.0 }
 0x210   : > { %v1759_v8 = vadd.f32 %v1758_v56, %v12888_v33  ;;  %v2024_v57 = vmax.f32 %v1755_v63, 0.0 }
 0x211   : > { %v2025_v27 = vmax.f32 %v1757_v6, 0.0 }
 0x212   : > { %v2026_v10 = vmax.f32 %v1759_v8, 0.0 }
 0x213   : > { %v2168_v53 = vpack.c.bf16 %v2025_v27, %v2023_v20 }
 0x214   : > { %v1762_v16 = vpop.f32.mrb[36].mxu1  ;;  %v2169_v32 = vpack.c.bf16 %v2026_v10, %v2024_v57 }
 0x215   : > { %v1763_v25 = vadd.f32 %v1762_v16, %v12884_v28  ;;  %v1764_v13 = vpop.f32.mrb[37].mxu1 }
 0x216   : > { %v1765_v7 = vadd.f32 %v1764_v13, %v12888_v33  ;;  %v1766_v34 = vpop.f32.mrb[38].mxu1  ;;  %2501 = vmatprep.mubr.bf16.mxu0 %v2169_v32 }
 0x217   : > { %v1767_v41 = vadd.f32 %v1766_v34, %v12884_v28  ;;  %v1768_v3 = vpop.f32.mrb[39].mxu1  ;;  %2502 = vmatmul.mubr.bf16.gmra.mrb[160].mxu0 %v2168_v53  ;;  %v2027_v48 = vmax.f32 %v1763_v25, 0.0  ;;  %v11593_v34 = vld [vmem:[%s16756_s4 + $0x2f0] ss:$8 sps:$4 sm:$0xff]  }
 0x218   : > { %v1769_v54 = vadd.f32 %v1768_v3, %v12888_v33  ;;  %v2028_v60 = vmax.f32 %v1765_v7, 0.0 }
 0x219   : > { %v2029_v39 = vmax.f32 %v1767_v41, 0.0  ;;  %v11595_v41 = vld [vmem:[%s16756_s4 + $0x2f4] ss:$8 sps:$4 sm:$0xff]  }
 0x21a   : > { %v2030_v44 = vmax.f32 %v1769_v54, 0.0  ;;  %3170 = vmatprep.subr.bf16.mxu1 %v11595_v41 }
 0x21b   : > { %v2170_v52 = vpack.c.bf16 %v2029_v39, %v2027_v48  ;;  %3171 = vmatpush1.bf16.msra.mxu1 %v11593_v34 }
 0x21c   : > { %v1772_v5 = vpop.f32.mrb[40].mxu1  ;;  %v2171_v63 = vpack.c.bf16 %v2030_v44, %v2028_v60 }
 0x21d   : > { %v1773_v11 = vadd.f32 %v1772_v5, %v12884_v28  ;;  %v1774_v6 = vpop.f32.mrb[41].mxu1 }
 0x21e   : > { %v1775_v56 = vadd.f32 %v1774_v6, %v12888_v33  ;;  %v1776_v8 = vpop.f32.mrb[42].mxu1  ;;  %2511 = vmatprep.mubr.bf16.mxu0 %v2171_v63 }
 0x21f   : > { %v1777_v20 = vadd.f32 %v1776_v8, %v12884_v28  ;;  %v1778_v27 = vpop.f32.mrb[43].mxu1  ;;  %2512 = vmatmul.mubr.bf16.gmra.mrb[164].mxu0 %v2170_v52  ;;  %v2031_v10 = vmax.f32 %v1773_v11, 0.0 }
 0x220   : > { %v1779_v57 = vadd.f32 %v1778_v27, %v12888_v33  ;;  %v2032_v16 = vmax.f32 %v1775_v56, 0.0 }
 0x221   : > { %v2033_v53 = vmax.f32 %v1777_v20, 0.0 }
 0x222   : > { %v2034_v32 = vmax.f32 %v1779_v57, 0.0 }
 0x223   : > { %v2172_v25 = vpack.c.bf16 %v2033_v53, %v2031_v10 }
 0x224   : > { %v1782_v13 = vpop.f32.mrb[44].mxu1  ;;  %v2173_v62 = vpack.c.bf16 %v2034_v32, %v2032_v16 }
 0x225   : > { %v1783_v23 = vadd.f32 %v1782_v13, %v12884_v28  ;;  %v1784_v7 = vpop.f32.mrb[45].mxu1 }
 0x226   : > { %v1785_v3 = vadd.f32 %v1784_v7, %v12888_v33  ;;  %v1786_v54 = vpop.f32.mrb[46].mxu1  ;;  %2521 = vmatprep.mubr.bf16.mxu0 %v2173_v62 }
 0x227   : > { %v1787_v48 = vadd.f32 %v1786_v54, %v12884_v28  ;;  %v1788_v39 = vpop.f32.mrb[47].mxu1  ;;  %2522 = vmatmul.mubr.bf16.gmra.mrb[168].mxu0 %v2172_v25  ;;  %v2035_v44 = vmax.f32 %v1783_v23, 0.0 }
 0x228   : > { %v1789_v60 = vadd.f32 %v1788_v39, %v12888_v33  ;;  %v2036_v5 = vmax.f32 %v1785_v3, 0.0 }
 0x229   : > { %v2037_v52 = vmax.f32 %v1787_v48, 0.0 }
 0x22a   : > { %v2038_v63 = vmax.f32 %v1789_v60, 0.0 }
 0x22b   : > { %v2174_v11 = vpack.c.bf16 %v2037_v52, %v2035_v44  ;;  %v11598_v44 = vld [vmem:[%s16759_s7 + $0x4] ss:$8 sps:$4 sm:$0xff]  }
 0x22c   : > { %v1792_v6 = vpop.f32.mrb[48].mxu1  ;;  %v2175_v56 = vpack.c.bf16 %v2038_v63, %v2036_v5  ;;  %4504 = vmatprep.subr.bf16.mxu1 %v11598_v44 }
 0x22d   : > { %v1793_v8 = vadd.f32 %v1792_v6, %v12884_v28  ;;  %v1794_v20 = vpop.f32.mrb[49].mxu1 }
 0x22e   : > { %v1795_v27 = vadd.f32 %v1794_v20, %v12888_v33  ;;  %v1796_v57 = vpop.f32.mrb[50].mxu1  ;;  %2531 = vmatprep.mubr.bf16.mxu0 %v2175_v56 }
 0x22f   : > { %v1797_v10 = vadd.f32 %v1796_v57, %v12884_v28  ;;  %v1798_v53 = vpop.f32.mrb[51].mxu1  ;;  %2532 = vmatmul.mubr.bf16.gmra.mrb[172].mxu0 %v2174_v11  ;;  %v2039_v32 = vmax.f32 %v1793_v8, 0.0 }
 0x230   : > { %v1799_v16 = vadd.f32 %v1798_v53, %v12888_v33  ;;  %v2040_v13 = vmax.f32 %v1795_v27, 0.0 }
 0x231   : > { %v2041_v25 = vmax.f32 %v1797_v10, 0.0 }
 0x232   : > { %v2042_v62 = vmax.f32 %v1799_v16, 0.0 }
 0x233   : > { %v2176_v23 = vpack.c.bf16 %v2041_v25, %v2039_v32 }
 0x234   : > { %v1802_v7 = vpop.f32.mrb[52].mxu1  ;;  %v2177_v34 = vpack.c.bf16 %v2042_v62, %v2040_v13 }
 0x235   : > { %v1803_v41 = vadd.f32 %v1802_v7, %v12884_v28  ;;  %v1804_v3 = vpop.f32.mrb[53].mxu1 }
 0x236   : > { %v1805_v54 = vadd.f32 %v1804_v3, %v12888_v33  ;;  %v1806_v48 = vpop.f32.mrb[54].mxu1  ;;  %2541 = vmatprep.mubr.bf16.mxu0 %v2177_v34 }
 0x237   : > { %v1807_v39 = vadd.f32 %v1806_v48, %v12884_v28  ;;  %v1808_v60 = vpop.f32.mrb[55].mxu1  ;;  %2542 = vmatmul.mubr.bf16.gmra.mrb[176].mxu0 %v2176_v23  ;;  %v2043_v5 = vmax.f32 %v1803_v41, 0.0 }
 0x238   : > { %v1809_v52 = vadd.f32 %v1808_v60, %v12888_v33  ;;  %v2044_v11 = vmax.f32 %v1805_v54, 0.0 }
 0x239   : > { %v2045_v63 = vmax.f32 %v1807_v39, 0.0 }
 0x23a   : > { %v2046_v6 = vmax.f32 %v1809_v52, 0.0 }
 0x23b   : > { %v2178_v56 = vpack.c.bf16 %v2045_v63, %v2043_v5 }
 0x23c   : > { %v1812_v8 = vpop.f32.mrb[56].mxu1  ;;  %v2179_v20 = vpack.c.bf16 %v2046_v6, %v2044_v11 }
 0x23d   : > { %v1813_v27 = vadd.f32 %v1812_v8, %v12884_v28  ;;  %v1814_v57 = vpop.f32.mrb[57].mxu1 }
 0x23e   : > { %v1815_v10 = vadd.f32 %v1814_v57, %v12888_v33  ;;  %v1816_v53 = vpop.f32.mrb[58].mxu1  ;;  %2551 = vmatprep.mubr.bf16.mxu0 %v2179_v20 }
 0x23f   : > { %v1817_v16 = vadd.f32 %v1816_v53, %v12884_v28  ;;  %v1818_v32 = vpop.f32.mrb[59].mxu1  ;;  %2552 = vmatmul.mubr.bf16.gmra.mrb[180].mxu0 %v2178_v56  ;;  %v2047_v13 = vmax.f32 %v1813_v27, 0.0 }
 0x240   : > { %v1819_v25 = vadd.f32 %v1818_v32, %v12888_v33  ;;  %v2048_v23 = vmax.f32 %v1815_v10, 0.0 }
 0x241   : > { %v2049_v62 = vmax.f32 %v1817_v16, 0.0 }
 0x242   : > { %v2050_v7 = vmax.f32 %v1819_v25, 0.0 }
 0x243   : > { %v2180_v34 = vpack.c.bf16 %v2049_v62, %v2047_v13 }
 0x244   : > { %v1822_v41 = vpop.f32.mrb[60].mxu1  ;;  %v2181_v3 = vpack.c.bf16 %v2050_v7, %v2048_v23 }
 0x245   : > { %v1823_v54 = vadd.f32 %v1822_v41, %v12884_v28  ;;  %v1824_v48 = vpop.f32.mrb[61].mxu1 }
 0x246   : > { %v1825_v39 = vadd.f32 %v1824_v48, %v12888_v33  ;;  %v1826_v60 = vpop.f32.mrb[62].mxu1  ;;  %2561 = vmatprep.mubr.bf16.mxu0 %v2181_v3 }
 0x247   : > { %v1827_v44 = vadd.f32 %v1826_v60, %v12884_v28  ;;  %v1828_v52 = vpop.f32.mrb[63].mxu1  ;;  %2562 = vmatmul.mubr.bf16.gmra.mrb[184].mxu0 %v2180_v34  ;;  %v2051_v63 = vmax.f32 %v1823_v54, 0.0 }
 0x248   : > { %v1829_v5 = vadd.f32 %v1828_v52, %v12888_v33  ;;  %v2052_v6 = vmax.f32 %v1825_v39, 0.0 }
 0x249   : > { %v2053_v11 = vmax.f32 %v1827_v44, 0.0 }
 0x24a   : > { %v2054_v56 = vmax.f32 %v1829_v5, 0.0 }
 0x24b   : > { %v2182_v8 = vpack.c.bf16 %v2053_v11, %v2051_v63  ;;  %v11599_v11 = vld [vmem:[%s16756_s4 + $0x300] ss:$8 sps:$4 sm:$0xff]  }
 0x24c   : > { %v1832_v20 = vpop.f32.mrb[64].mxu1  ;;  %v2183_v27 = vpack.c.bf16 %v2054_v56, %v2052_v6  ;;  %v11601_v6 = vld [vmem:[%s16756_s4 + $0x304] ss:$8 sps:$4 sm:$0xff]  }
 0x24d   : > { %v1833_v57 = vadd.f32 %v1832_v20, %v12884_v28  ;;  %v1834_v10 = vpop.f32.mrb[65].mxu1  ;;  %3891 = vmatprep.subr.bf16.mxu0 %v11601_v6 }
 0x24e   : > { %v1835_v53 = vadd.f32 %v1834_v10, %v12888_v33  ;;  %v1836_v16 = vpop.f32.mrb[66].mxu1  ;;  %2571 = vmatprep.mubr.bf16.mxu0 %v2183_v27  ;;  %3892 = vmatpush1.bf16.msra.mxu0 %v11599_v11 }
 0x24f   : > { %v1837_v32 = vadd.f32 %v1836_v16, %v12884_v28  ;;  %v1838_v25 = vpop.f32.mrb[67].mxu1  ;;  %2572 = vmatmul.mubr.bf16.gmra.mrb[188].mxu0 %v2182_v8  ;;  %v2055_v62 = vmax.f32 %v1833_v57, 0.0 }
 0x250   : > { %v1839_v13 = vadd.f32 %v1838_v25, %v12888_v33  ;;  %v2056_v7 = vmax.f32 %v1835_v53, 0.0 }
 0x251   : > { %v2057_v23 = vmax.f32 %v1837_v32, 0.0 }
 0x252   : > { %v2058_v34 = vmax.f32 %v1839_v13, 0.0 }
 0x253   : > { %v2184_v41 = vpack.c.bf16 %v2057_v23, %v2055_v62 }
 0x254   : > { %v1842_v3 = vpop.f32.mrb[68].mxu1  ;;  %v2185_v54 = vpack.c.bf16 %v2058_v34, %v2056_v7 }
 0x255   : > { %v1843_v48 = vadd.f32 %v1842_v3, %v12884_v28  ;;  %v1844_v39 = vpop.f32.mrb[69].mxu1 }
 0x256   : > { %v1845_v60 = vadd.f32 %v1844_v39, %v12888_v33  ;;  %v1846_v44 = vpop.f32.mrb[70].mxu1  ;;  %2581 = vmatprep.mubr.bf16.mxu0 %v2185_v54 }
 0x257   : > { %v1847_v52 = vadd.f32 %v1846_v44, %v12884_v28  ;;  %v1848_v5 = vpop.f32.mrb[71].mxu1  ;;  %2582 = vmatmul.mubr.bf16.gmra.mrb[192].mxu0 %v2184_v41  ;;  %v2059_v56 = vmax.f32 %v1843_v48, 0.0 }
 0x258   : > { %v1849_v63 = vadd.f32 %v1848_v5, %v12888_v33  ;;  %v2060_v20 = vmax.f32 %v1845_v60, 0.0 }
 0x259   : > { %v2061_v8 = vmax.f32 %v1847_v52, 0.0 }
 0x25a   : > { %v2062_v27 = vmax.f32 %v1849_v63, 0.0 }
 0x25b   : > { %v2186_v57 = vpack.c.bf16 %v2061_v8, %v2059_v56  ;;  %v11602_v8 = vld [vmem:[%s16756_s4 + $0x310] ss:$8 sps:$4 sm:$0xff]  }
 0x25c   : > { %v1852_v10 = vpop.f32.mrb[72].mxu1  ;;  %v2187_v53 = vpack.c.bf16 %v2062_v27, %v2060_v20  ;;  %v11604_v20 = vld [vmem:[%s16756_s4 + $0x314] ss:$8 sps:$4 sm:$0xff]  }
 0x25d   : > { %v1853_v16 = vadd.f32 %v1852_v10, %v12884_v28  ;;  %v1854_v32 = vpop.f32.mrb[73].mxu1  ;;  %3893 = vmatprep.subr.bf16.mxu0 %v11604_v20 }
 0x25e   : > { %v1855_v25 = vadd.f32 %v1854_v32, %v12888_v33  ;;  %v1856_v13 = vpop.f32.mrb[74].mxu1  ;;  %2591 = vmatprep.mubr.bf16.mxu0 %v2187_v53  ;;  %3894 = vmatpush1.bf16.msra.mxu0 %v11602_v8 }
 0x25f   : > { %v1857_v62 = vadd.f32 %v1856_v13, %v12884_v28  ;;  %v1858_v23 = vpop.f32.mrb[75].mxu1  ;;  %2592 = vmatmul.mubr.bf16.gmra.mrb[196].mxu0 %v2186_v57  ;;  %v2063_v34 = vmax.f32 %v1853_v16, 0.0 }
 0x260   : > { %v1859_v7 = vadd.f32 %v1858_v23, %v12888_v33  ;;  %v2064_v3 = vmax.f32 %v1855_v25, 0.0 }
 0x261   : > { %v2065_v41 = vmax.f32 %v1857_v62, 0.0 }
 0x262   : > { %v2066_v54 = vmax.f32 %v1859_v7, 0.0 }
 0x263   : > { %v2188_v48 = vpack.c.bf16 %v2065_v41, %v2063_v34 }
 0x264   : > { %v1862_v39 = vpop.f32.mrb[76].mxu1  ;;  %v2189_v60 = vpack.c.bf16 %v2066_v54, %v2064_v3 }
 0x265   : > { %v1863_v44 = vadd.f32 %v1862_v39, %v12884_v28  ;;  %v1864_v52 = vpop.f32.mrb[77].mxu1 }
 0x266   : > { %v1865_v5 = vadd.f32 %v1864_v52, %v12888_v33  ;;  %v1866_v63 = vpop.f32.mrb[78].mxu1  ;;  %2601 = vmatprep.mubr.bf16.mxu0 %v2189_v60 }
 0x267   : > { %v1867_v11 = vadd.f32 %v1866_v63, %v12884_v28  ;;  %v1868_v6 = vpop.f32.mrb[79].mxu1  ;;  %2602 = vmatmul.mubr.bf16.gmra.mrb[200].mxu0 %v2188_v48  ;;  %v2067_v27 = vmax.f32 %v1863_v44, 0.0 }
 0x268   : > { %v1869_v56 = vadd.f32 %v1868_v6, %v12888_v33  ;;  %v2068_v10 = vmax.f32 %v1865_v5, 0.0 }
 0x269   : > { %v2069_v57 = vmax.f32 %v1867_v11, 0.0 }
 0x26a   : > { %v2070_v53 = vmax.f32 %v1869_v56, 0.0 }
 0x26b   : > { %v2190_v16 = vpack.c.bf16 %v2069_v57, %v2067_v27  ;;  %v11605_v57 = vld [vmem:[%s16756_s4 + $0x320] ss:$8 sps:$4 sm:$0xff]  }
 0x26c   : > { %v1872_v32 = vpop.f32.mrb[80].mxu1  ;;  %v2191_v25 = vpack.c.bf16 %v2070_v53, %v2068_v10  ;;  %v11607_v10 = vld [vmem:[%s16756_s4 + $0x324] ss:$8 sps:$4 sm:$0xff]  }
 0x26d   : > { %v1873_v13 = vadd.f32 %v1872_v32, %v12884_v28  ;;  %v1874_v62 = vpop.f32.mrb[81].mxu1  ;;  %3895 = vmatprep.subr.bf16.mxu0 %v11607_v10 }
 0x26e   : > { %v1875_v23 = vadd.f32 %v1874_v62, %v12888_v33  ;;  %v1876_v7 = vpop.f32.mrb[82].mxu1  ;;  %2611 = vmatprep.mubr.bf16.mxu0 %v2191_v25  ;;  %3896 = vmatpush1.bf16.msra.mxu0 %v11605_v57 }
 0x26f   : > { %v1877_v34 = vadd.f32 %v1876_v7, %v12884_v28  ;;  %v1878_v41 = vpop.f32.mrb[83].mxu1  ;;  %2612 = vmatmul.mubr.bf16.gmra.mrb[204].mxu0 %v2190_v16  ;;  %v2071_v54 = vmax.f32 %v1873_v13, 0.0 }
 0x270   : > { %v1879_v3 = vadd.f32 %v1878_v41, %v12888_v33  ;;  %v2072_v39 = vmax.f32 %v1875_v23, 0.0 }
 0x271   : > { %v2073_v48 = vmax.f32 %v1877_v34, 0.0 }
 0x272   : > { %v2074_v60 = vmax.f32 %v1879_v3, 0.0 }
 0x273   : > { %v2192_v44 = vpack.c.bf16 %v2073_v48, %v2071_v54 }
 0x274   : > { %v1882_v52 = vpop.f32.mrb[84].mxu1  ;;  %v2193_v5 = vpack.c.bf16 %v2074_v60, %v2072_v39 }
 0x275   : > { %v1883_v63 = vadd.f32 %v1882_v52, %v12884_v28  ;;  %v1884_v11 = vpop.f32.mrb[85].mxu1 }
 0x276   : > { %v1885_v6 = vadd.f32 %v1884_v11, %v12888_v33  ;;  %v1886_v56 = vpop.f32.mrb[86].mxu1  ;;  %2621 = vmatprep.mubr.bf16.mxu0 %v2193_v5 }
 0x277   : > { %v1887_v8 = vadd.f32 %v1886_v56, %v12884_v28  ;;  %v1888_v20 = vpop.f32.mrb[87].mxu1  ;;  %2622 = vmatmul.mubr.bf16.gmra.mrb[208].mxu0 %v2192_v44  ;;  %v2075_v53 = vmax.f32 %v1883_v63, 0.0 }
 0x278   : > { %v1889_v27 = vadd.f32 %v1888_v20, %v12888_v33  ;;  %v2076_v32 = vmax.f32 %v1885_v6, 0.0 }
 0x279   : > { %v2077_v16 = vmax.f32 %v1887_v8, 0.0 }
 0x27a   : > { %v2078_v25 = vmax.f32 %v1889_v27, 0.0 }
 0x27b   : > { %v2194_v13 = vpack.c.bf16 %v2077_v16, %v2075_v53  ;;  %v11608_v16 = vld [vmem:[%s16756_s4 + $0x330] ss:$8 sps:$4 sm:$0xff]  }
 0x27c   : > { %v1892_v62 = vpop.f32.mrb[88].mxu1  ;;  %v2195_v23 = vpack.c.bf16 %v2078_v25, %v2076_v32  ;;  %v11610_v32 = vld [vmem:[%s16756_s4 + $0x334] ss:$8 sps:$4 sm:$0xff]  }
 0x27d   : > { %v1893_v7 = vadd.f32 %v1892_v62, %v12884_v28  ;;  %v1894_v34 = vpop.f32.mrb[89].mxu1  ;;  %3897 = vmatprep.subr.bf16.mxu0 %v11610_v32 }
 0x27e   : > { %v1895_v41 = vadd.f32 %v1894_v34, %v12888_v33  ;;  %v1896_v3 = vpop.f32.mrb[90].mxu1  ;;  %2631 = vmatprep.mubr.bf16.mxu0 %v2195_v23  ;;  %3898 = vmatpush1.bf16.msra.mxu0 %v11608_v16 }
 0x27f   : > { %v1897_v54 = vadd.f32 %v1896_v3, %v12884_v28  ;;  %v1898_v48 = vpop.f32.mrb[91].mxu1  ;;  %2632 = vmatmul.mubr.bf16.gmra.mrb[212].mxu0 %v2194_v13  ;;  %v2079_v60 = vmax.f32 %v1893_v7, 0.0 }
 0x280   : > { %v1899_v39 = vadd.f32 %v1898_v48, %v12888_v33  ;;  %v2080_v52 = vmax.f32 %v1895_v41, 0.0 }
 0x281   : > { %v2081_v44 = vmax.f32 %v1897_v54, 0.0 }
 0x282   : > { %v2082_v5 = vmax.f32 %v1899_v39, 0.0 }
 0x283   : > { %v2196_v63 = vpack.c.bf16 %v2081_v44, %v2079_v60 }
 0x284   : > { %v1902_v11 = vpop.f32.mrb[92].mxu1  ;;  %v2197_v6 = vpack.c.bf16 %v2082_v5, %v2080_v52 }
 0x285   : > { %v1903_v56 = vadd.f32 %v1902_v11, %v12884_v28  ;;  %v1904_v8 = vpop.f32.mrb[93].mxu1 }
 0x286   : > { %v1905_v20 = vadd.f32 %v1904_v8, %v12888_v33  ;;  %v1906_v27 = vpop.f32.mrb[94].mxu1  ;;  %2641 = vmatprep.mubr.bf16.mxu0 %v2197_v6 }
 0x287   : > { %v1907_v57 = vadd.f32 %v1906_v27, %v12884_v28  ;;  %v1908_v10 = vpop.f32.mrb[95].mxu1  ;;  %2642 = vmatmul.mubr.bf16.gmra.mrb[216].mxu0 %v2196_v63  ;;  %v2083_v25 = vmax.f32 %v1903_v56, 0.0 }
 0x288   : > { %v1909_v53 = vadd.f32 %v1908_v10, %v12888_v33  ;;  %v2084_v62 = vmax.f32 %v1905_v20, 0.0 }
 0x289   : > { %v2085_v13 = vmax.f32 %v1907_v57, 0.0 }
 0x28a   : > { %v2086_v23 = vmax.f32 %v1909_v53, 0.0 }
 0x28b   : > { %v2198_v7 = vpack.c.bf16 %v2085_v13, %v2083_v25  ;;  %v11614_v13 = vld [vmem:[%s16756_s4 + $0x340] ss:$8 sps:$4 sm:$0xff]  }
 0x28c   : > { %v1912_v34 = vpop.f32.mrb[96].mxu1  ;;  %v2199_v41 = vpack.c.bf16 %v2086_v23, %v2084_v62  ;;  %v11616_v62 = vld [vmem:[%s16756_s4 + $0x344] ss:$8 sps:$4 sm:$0xff]  }
 0x28d   : > { %v1913_v3 = vadd.f32 %v1912_v34, %v12884_v28  ;;  %v1914_v54 = vpop.f32.mrb[97].mxu1  ;;  %3899 = vmatprep.subr.bf16.mxu0 %v11616_v62 }
 0x28e   : > { %v1915_v48 = vadd.f32 %v1914_v54, %v12888_v33  ;;  %v1916_v39 = vpop.f32.mrb[98].mxu1  ;;  %2651 = vmatprep.mubr.bf16.mxu0 %v2199_v41  ;;  %3900 = vmatpush1.bf16.msra.mxu0 %v11614_v13 }
 0x28f   : > { %v1917_v60 = vadd.f32 %v1916_v39, %v12884_v28  ;;  %v1918_v44 = vpop.f32.mrb[99].mxu1  ;;  %2652 = vmatmul.mubr.bf16.gmra.mrb[220].mxu0 %v2198_v7  ;;  %v2087_v5 = vmax.f32 %v1913_v3, 0.0 }
 0x290   : > { %v1919_v52 = vadd.f32 %v1918_v44, %v12888_v33  ;;  %v2088_v11 = vmax.f32 %v1915_v48, 0.0 }
 0x291   : > { %v2089_v63 = vmax.f32 %v1917_v60, 0.0 }
 0x292   : > { %v2090_v6 = vmax.f32 %v1919_v52, 0.0 }
 0x293   : > { %v2200_v56 = vpack.c.bf16 %v2089_v63, %v2087_v5 }
 0x294   : > { %v1922_v8 = vpop.f32.mrb[100].mxu1  ;;  %v2201_v20 = vpack.c.bf16 %v2090_v6, %v2088_v11 }
 0x295   : > { %v1923_v27 = vadd.f32 %v1922_v8, %v12884_v28  ;;  %v1924_v57 = vpop.f32.mrb[101].mxu1 }
 0x296   : > { %v1925_v10 = vadd.f32 %v1924_v57, %v12888_v33  ;;  %v1926_v53 = vpop.f32.mrb[102].mxu1  ;;  %2661 = vmatprep.mubr.bf16.mxu0 %v2201_v20 }
 0x297   : > { %v1927_v16 = vadd.f32 %v1926_v53, %v12884_v28  ;;  %v1928_v32 = vpop.f32.mrb[103].mxu1  ;;  %2662 = vmatmul.mubr.bf16.gmra.mrb[224].mxu0 %v2200_v56  ;;  %v2091_v23 = vmax.f32 %v1923_v27, 0.0  ;;  %v10546_v53 = vld [vmem:[%s16757_s5 + $0x2] sm:$0x3] }
 0x298   : > { %v1929_v25 = vadd.f32 %v1928_v32, %v12888_v33  ;;  %v2092_v34 = vmax.f32 %v1925_v10, 0.0 }
 0x299   : > { %v2093_v7 = vmax.f32 %v1927_v16, 0.0 }
 0x29a   : > { %v2094_v41 = vmax.f32 %v1929_v25, 0.0 }
 0x29b   : > { %v2202_v3 = vpack.c.bf16 %v2093_v7, %v2091_v23  ;;  %v13090_v7 = vrot.slane %v10546_v53, %v12616_v47 }
 0x29c   : > { %v1932_v54 = vpop.f32.mrb[104].mxu1  ;;  %v2203_v48 = vpack.c.bf16 %v2094_v41, %v2092_v34  ;;  %v13094_v41 = vrot.slane %v10546_v53, %v12622_v51 }
 0x29d   : > { %v1933_v39 = vadd.f32 %v1932_v54, %v12884_v28  ;;  %v1934_v60 = vpop.f32.mrb[105].mxu1  ;;  %v11619_v54 = vld [vmem:[%s16756_s4 + $0x354] ss:$8 sps:$4 sm:$0xff]  }
 0x29e   : > { %v1935_v44 = vadd.f32 %v1934_v60, %v12888_v33  ;;  %v1936_v52 = vpop.f32.mrb[106].mxu1  ;;  %2671 = vmatprep.mubr.bf16.mxu0 %v2203_v48  ;;  %3901 = vmatprep.subr.bf16.mxu0 %v11619_v54 }
 0x29f   : > { %v1937_v5 = vadd.f32 %v1936_v52, %v12884_v28  ;;  %v1938_v63 = vpop.f32.mrb[107].mxu1  ;;  %2672 = vmatmul.mubr.bf16.gmra.mrb[228].mxu0 %v2202_v3  ;;  %v2095_v6 = vmax.f32 %v1933_v39, 0.0  ;;  %v11617_v3 = vld [vmem:[%s16756_s4 + $0x350] ss:$8 sps:$4 sm:$0xff]  }
 0x2a0   : > { %v1939_v11 = vadd.f32 %v1938_v63, %v12888_v33  ;;  %v2096_v8 = vmax.f32 %v1935_v44, 0.0  ;;  %3902 = vmatpush1.bf16.msra.mxu0 %v11617_v3 }
 0x2a1   : > { %v2097_v56 = vmax.f32 %v1937_v5, 0.0 }
 0x2a2   : > { %v2098_v20 = vmax.f32 %v1939_v11, 0.0 }
 0x2a3   : > { %v2204_v27 = vpack.c.bf16 %v2097_v56, %v2095_v6 }
 0x2a4   : > { %v1942_v57 = vpop.f32.mrb[108].mxu1  ;;  %v2205_v10 = vpack.c.bf16 %v2098_v20, %v2096_v8 }
 0x2a5   : > { %v1943_v16 = vadd.f32 %v1942_v57, %v12884_v28  ;;  %v1944_v32 = vpop.f32.mrb[109].mxu1 }
 0x2a6   : > { %v1945_v25 = vadd.f32 %v1944_v32, %v12888_v33  ;;  %v1946_v13 = vpop.f32.mrb[110].mxu1  ;;  %2681 = vmatprep.mubr.bf16.mxu0 %v2205_v10 }
 0x2a7   : > { %v1947_v62 = vadd.f32 %v1946_v13, %v12884_v28  ;;  %v1948_v23 = vpop.f32.mrb[111].mxu1  ;;  %2682 = vmatmul.mubr.bf16.gmra.mrb[232].mxu0 %v2204_v27  ;;  %v2099_v48 = vmax.f32 %v1943_v16, 0.0 }
 0x2a8   : > { %v1949_v34 = vadd.f32 %v1948_v23, %v12888_v33  ;;  %v2100_v44 = vmax.f32 %v1945_v25, 0.0 }
 0x2a9   : > { %v2101_v39 = vmax.f32 %v1947_v62, 0.0 }
 0x2aa   : > { %v2423_v60 = vpop.f32.mrb[128].mxu0  ;;  %v2102_v52 = vmax.f32 %v1949_v34, 0.0 }
 0x2ab   : > { %v2424_v5 = vadd.f32 %v2423_v60, %v13090_v7  ;;  %v2425_v63 = vpop.f32.mrb[129].mxu0  ;;  %v2206_v11 = vpack.c.bf16 %v2101_v39, %v2099_v48 }
 0x2ac   : > { %v2426_v6 = vadd.f32 %v2425_v63, %v13094_v41  ;;  %v1952_v56 = vpop.f32.mrb[112].mxu1  ;;  %v2427_v8 = vpop.f32.mrb[130].mxu0  ;;  %v2207_v20 = vpack.c.bf16 %v2102_v52, %v2100_v44 }
 0x2ad   : > { %v1953_v27 = vadd.f32 %v1952_v56, %v12884_v28  ;;  %v2428_v57 = vadd.f32 %v2427_v8, %v13090_v7  ;;  %v1954_v10 = vpop.f32.mrb[113].mxu1  ;;  %v2429_v53 = vpop.f32.mrb[131].mxu0  ;;  %v2742_v13 = vmax.f32 %v2424_v5, 0.0  ;;  %v11596_v56 = vld [vmem:[%s16759_s7] ss:$8 sps:$4 sm:$0xff]  }
 0x2ae   : > { %v1955_v16 = vadd.f32 %v1954_v10, %v12888_v33  ;;  %v2430_v32 = vadd.f32 %v2429_v53, %v13094_v41  ;;  %v1956_v25 = vpop.f32.mrb[114].mxu1  ;;  %2691 = vmatprep.mubr.bf16.mxu0 %v2207_v20  ;;  %v2743_v3 = vmax.f32 %v2426_v6, 0.0 }
 0x2af   : > { %v2744_v62 = vmax.f32 %v2428_v57, 0.0  ;;  %v1957_v23 = vadd.f32 %v1956_v25, %v12884_v28  ;;  %v1958_v34 = vpop.f32.mrb[115].mxu1  ;;  %2692 = vmatmul.mubr.bf16.gmra.mrb[236].mxu0 %v2206_v11  ;;  %v2103_v60 = vmax.f32 %v1953_v27, 0.0  ;;  %v11613_v11 = vld [vmem:[%s16759_s7 + $0x14] ss:$8 sps:$4 sm:$0xff]  }
 0x2b0   : > { %v2745_v54 = vmax.f32 %v2430_v32, 0.0  ;;  %v1959_v48 = vadd.f32 %v1958_v34, %v12888_v33  ;;  %v2104_v8 = vmax.f32 %v1955_v16, 0.0 }
 0x2b1   : > { %v2903_v39 = vpack.c.bf16 %v2744_v62, %v2742_v13  ;;  %v2105_v44 = vmax.f32 %v1957_v23, 0.0 }
 0x2b2   : > { %v2433_v52 = vpop.f32.mrb[132].mxu0  ;;  %v2904_v63 = vpack.c.bf16 %v2745_v54, %v2743_v3  ;;  %v2106_v5 = vmax.f32 %v1959_v48, 0.0  ;;  %v11611_v54 = vld [vmem:[%s16759_s7 + $0x10] ss:$8 sps:$4 sm:$0xff]  }
 0x2b3   : > { %v2434_v20 = vadd.f32 %v2433_v52, %v13090_v7  ;;  %v2435_v57 = vpop.f32.mrb[133].mxu0  ;;  %v2208_v10 = vpack.c.bf16 %v2105_v44, %v2103_v60 }
 0x2b4   : > { %v2436_v6 = vadd.f32 %v2435_v57, %v13094_v41  ;;  %v1962_v27 = vpop.f32.mrb[116].mxu1  ;;  %v2437_v53 = vpop.f32.mrb[134].mxu0  ;;  %3172 = vmatprep.mubr.bf16.mxu1 %v2904_v63  ;;  %v2209_v32 = vpack.c.bf16 %v2106_v5, %v2104_v8  ;;  %v11622_v5 = vld [vmem:[%s16756_s4 + $0x364] ss:$8 sps:$4 sm:$0xff]  }
 0x2b5   : > { %v1963_v25 = vadd.f32 %v1962_v27, %v12884_v28  ;;  %v2438_v13 = vadd.f32 %v2437_v53, %v13090_v7  ;;  %v1964_v16 = vpop.f32.mrb[117].mxu1  ;;  %v2439_v62 = vpop.f32.mrb[135].mxu0  ;;  %3173 = vmatmul.mubr.bf16.vlgmr.msra.gmra.mrb[128].mxu1 %v2903_v39  ;;  %v2746_v48 = vmax.f32 %v2434_v20, 0.0  ;;  %3903 = vmatprep.subr.bf16.mxu0 %v11622_v5 }
 0x2b6   : > { %v1965_v23 = vadd.f32 %v1964_v16, %v12888_v33  ;;  %v2440_v34 = vadd.f32 %v2439_v62, %v13094_v41  ;;  %4505 = vmatpush1.bf16.msra.mxu1 %v11596_v56  ;;  %v1966_v3 = vpop.f32.mrb[118].mxu1  ;;  %2701 = vmatprep.mubr.bf16.mxu0 %v2209_v32  ;;  %v2747_v63 = vmax.f32 %v2436_v6, 0.0  ;;  %v11620_v56 = vld [vmem:[%s16756_s4 + $0x360] ss:$8 sps:$4 sm:$0xff]  }
 0x2b7   : > { %v2748_v60 = vmax.f32 %v2438_v13, 0.0  ;;  %v1967_v44 = vadd.f32 %v1966_v3, %v12884_v28  ;;  %v1968_v52 = vpop.f32.mrb[119].mxu1  ;;  %2702 = vmatmul.mubr.bf16.gmra.mrb[240].mxu0 %v2208_v10  ;;  %4506 = vmatprep.subr.bf16.mxu1 %v11613_v11  ;;  %v2107_v20 = vmax.f32 %v1963_v25, 0.0 }
 0x2b8   : > { %v2749_v39 = vmax.f32 %v2440_v34, 0.0  ;;  %v1969_v8 = vadd.f32 %v1968_v52, %v12888_v33  ;;  %v2108_v13 = vmax.f32 %v1965_v23, 0.0  ;;  %3904 = vmatpush1.bf16.msra.mxu0 %v11620_v56 }
 0x2b9   : > { %v2905_v57 = vpack.c.bf16 %v2748_v60, %v2746_v48  ;;  %v2109_v27 = vmax.f32 %v1967_v44, 0.0 }
 0x2ba   : > { %v2443_v53 = vpop.f32.mrb[136].mxu0  ;;  %v2906_v32 = vpack.c.bf16 %v2749_v39, %v2747_v63  ;;  %v2110_v10 = vmax.f32 %v1969_v8, 0.0  ;;  %4507 = vmatpush1.bf16.msra.mxu1 %v11611_v54 }
 0x2bb   : > { %v2444_v11 = vadd.f32 %v2443_v53, %v13090_v7  ;;  %v2445_v6 = vpop.f32.mrb[137].mxu0  ;;  %v2210_v16 = vpack.c.bf16 %v2109_v27, %v2107_v20 }
 0x2bc   : > { %v2446_v62 = vadd.f32 %v2445_v6, %v13094_v41  ;;  %v1972_v34 = vpop.f32.mrb[120].mxu1  ;;  %v2447_v3 = vpop.f32.mrb[138].mxu0  ;;  %3182 = vmatprep.mubr.bf16.mxu1 %v2906_v32  ;;  %v2211_v52 = vpack.c.bf16 %v2110_v10, %v2108_v13 }
 0x2bd   : > { %v1973_v25 = vadd.f32 %v1972_v34, %v12884_v28  ;;  %v2448_v48 = vadd.f32 %v2447_v3, %v13090_v7  ;;  %v1974_v60 = vpop.f32.mrb[121].mxu1  ;;  %v2449_v23 = vpop.f32.mrb[139].mxu0  ;;  %3183 = vmatmul.mubr.bf16.gmra.mrb[132].mxu1 %v2905_v57  ;;  %v2750_v39 = vmax.f32 %v2444_v11, 0.0 }
 0x2be   : > { %v1975_v54 = vadd.f32 %v1974_v60, %v12888_v33  ;;  %v2450_v44 = vadd.f32 %v2449_v23, %v13094_v41  ;;  %v1976_v63 = vpop.f32.mrb[122].mxu1  ;;  %2711 = vmatprep.mubr.bf16.mxu0 %v2211_v52  ;;  %v2751_v20 = vmax.f32 %v2446_v62, 0.0 }
 0x2bf   : > { %v2752_v8 = vmax.f32 %v2448_v48, 0.0  ;;  %v1977_v56 = vadd.f32 %v1976_v63, %v12884_v28  ;;  %v1978_v5 = vpop.f32.mrb[123].mxu1  ;;  %2712 = vmatmul.mubr.bf16.gmra.mrb[244].mxu0 %v2210_v16  ;;  %v2111_v13 = vmax.f32 %v1973_v25, 0.0 }
 0x2c0   : > { %v2753_v27 = vmax.f32 %v2450_v44, 0.0  ;;  %v1979_v53 = vadd.f32 %v1978_v5, %v12888_v33  ;;  %v2112_v34 = vmax.f32 %v1975_v54, 0.0 }
 0x2c1   : > { %v2907_v32 = vpack.c.bf16 %v2752_v8, %v2750_v39  ;;  %v2113_v10 = vmax.f32 %v1977_v56, 0.0 }
 0x2c2   : > { %v2453_v57 = vpop.f32.mrb[140].mxu0  ;;  %v2908_v6 = vpack.c.bf16 %v2753_v27, %v2751_v20  ;;  %v2114_v3 = vmax.f32 %v1979_v53, 0.0 }
 0x2c3   : > { %v2454_v60 = vadd.f32 %v2453_v57, %v13090_v7  ;;  %v2455_v52 = vpop.f32.mrb[141].mxu0  ;;  %v2212_v11 = vpack.c.bf16 %v2113_v10, %v2111_v13 }
 0x2c4   : > { %v2456_v48 = vadd.f32 %v2455_v52, %v13094_v41  ;;  %v1982_v23 = vpop.f32.mrb[124].mxu1  ;;  %v2457_v63 = vpop.f32.mrb[142].mxu0  ;;  %3192 = vmatprep.mubr.bf16.mxu1 %v2908_v6  ;;  %v2213_v16 = vpack.c.bf16 %v2114_v3, %v2112_v34  ;;  %v11625_v6 = vld [vmem:[%s16756_s4 + $0x374] ss:$8 sps:$4 sm:$0xff]  }
 0x2c5   : > { %v1983_v62 = vadd.f32 %v1982_v23, %v12884_v28  ;;  %v2458_v44 = vadd.f32 %v2457_v63, %v13090_v7  ;;  %v1984_v25 = vpop.f32.mrb[125].mxu1  ;;  %v2459_v39 = vpop.f32.mrb[143].mxu0  ;;  %3193 = vmatmul.mubr.bf16.gmra.mrb[136].mxu1 %v2907_v32  ;;  %v2754_v5 = vmax.f32 %v2454_v60, 0.0  ;;  %v11623_v32 = vld [vmem:[%s16756_s4 + $0x370] ss:$8 sps:$4 sm:$0xff]   ;;  %3905 = vmatprep.subr.bf16.mxu0 %v11625_v6 }
 0x2c6   : > { %v1985_v54 = vadd.f32 %v1984_v25, %v12888_v33  ;;  %v2460_v8 = vadd.f32 %v2459_v39, %v13094_v41  ;;  %v1986_v56 = vpop.f32.mrb[126].mxu1  ;;  %2721 = vmatprep.mubr.bf16.mxu0 %v2213_v16  ;;  %v2755_v13 = vmax.f32 %v2456_v48, 0.0  ;;  %3906 = vmatpush1.bf16.msra.mxu0 %v11623_v32 }
 0x2c7   : > { %v2756_v20 = vmax.f32 %v2458_v44, 0.0  ;;  %v1987_v27 = vadd.f32 %v1986_v56, %v12884_v28  ;;  %v1988_v53 = vpop.f32.mrb[127].mxu1  ;;  %2722 = vmatmul.mubr.bf16.gmra.mrb[248].mxu0 %v2212_v11  ;;  %v2115_v3 = vmax.f32 %v1983_v62, 0.0 }
 0x2c8   : > { %v2757_v10 = vmax.f32 %v2460_v8, 0.0  ;;  %v1989_v57 = vadd.f32 %v1988_v53, %v12888_v33  ;;  %v2116_v28 = vmax.f32 %v1985_v54, 0.0 }
 0x2c9   : > { %v2909_v34 = vpack.c.bf16 %v2756_v20, %v2754_v5  ;;  %v2117_v60 = vmax.f32 %v1987_v27, 0.0 }
 0x2ca   : > { %v2463_v52 = vpop.f32.mrb[144].mxu0  ;;  %v2910_v23 = vpack.c.bf16 %v2757_v10, %v2755_v13  ;;  %v2118_v63 = vmax.f32 %v1989_v57, 0.0 }
 0x2cb   : > { %v2464_v11 = vadd.f32 %v2463_v52, %v13090_v7  ;;  %v2465_v48 = vpop.f32.mrb[145].mxu0  ;;  %v2214_v33 = vpack.c.bf16 %v2117_v60, %v2115_v3 }
 0x2cc   : > { %v2466_v16 = vadd.f32 %v2465_v48, %v13094_v41  ;;  %v2467_v44 = vpop.f32.mrb[146].mxu0  ;;  %3202 = vmatprep.mubr.bf16.mxu1 %v2910_v23  ;;  %v2215_v25 = vpack.c.bf16 %v2118_v63, %v2116_v28  ;;  %v11628_v48 = vld [vmem:[%s16756_s4 + $0x384] ss:$8 sps:$4 sm:$0xff]  }
 0x2cd   : > { %v2468_v39 = vadd.f32 %v2467_v44, %v13090_v7  ;;  %v2469_v8 = vpop.f32.mrb[147].mxu0  ;;  %3203 = vmatmul.mubr.bf16.gmra.mrb[140].mxu1 %v2909_v34  ;;  %v2758_v54 = vmax.f32 %v2464_v11, 0.0  ;;  %v11626_v11 = vld [vmem:[%s16756_s4 + $0x380] ss:$8 sps:$4 sm:$0xff]   ;;  %3907 = vmatprep.subr.bf16.mxu0 %v11628_v48 }
 0x2ce   : > { %v2470_v62 = vadd.f32 %v2469_v8, %v13094_v41  ;;  %2731 = vmatprep.mubr.bf16.mxu0 %v2215_v25  ;;  %v2759_v5 = vmax.f32 %v2466_v16, 0.0  ;;  %3908 = vmatpush1.bf16.msra.mxu0 %v11626_v11 }
 0x2cf   : > { %v2760_v56 = vmax.f32 %v2468_v39, 0.0  ;;  %2732 = vmatmul.mubr.bf16.gmra.mrb[252].mxu0 %v2214_v33 }
 0x2d0   : > { %v2761_v20 = vmax.f32 %v2470_v62, 0.0 }
 0x2d1   : > { %v2911_v27 = vpack.c.bf16 %v2760_v56, %v2758_v54 }
 0x2d2   : > { %v2473_v53 = vpop.f32.mrb[148].mxu0  ;;  %v2912_v13 = vpack.c.bf16 %v2761_v20, %v2759_v5 }
 0x2d3   : > { %v2474_v10 = vadd.f32 %v2473_v53, %v13090_v7  ;;  %v2475_v57 = vpop.f32.mrb[149].mxu0 }
 0x2d4   : > { %v2476_v32 = vadd.f32 %v2475_v57, %v13094_v41  ;;  %v2477_v6 = vpop.f32.mrb[150].mxu0  ;;  %3212 = vmatprep.mubr.bf16.mxu1 %v2912_v13 }
 0x2d5   : > { %v2478_v34 = vadd.f32 %v2477_v6, %v13090_v7  ;;  %v2479_v3 = vpop.f32.mrb[151].mxu0  ;;  %3213 = vmatmul.mubr.bf16.gmra.mrb[144].mxu1 %v2911_v27  ;;  %v2762_v52 = vmax.f32 %v2474_v10, 0.0  ;;  %v4472_v10 = vld [vmem:[%s16759_s7 + $0x20] sm:$0xff] }
 0x2d6   : > { %v2480_v60 = vadd.f32 %v2479_v3, %v13094_v41  ;;  %v2763_v28 = vmax.f32 %v2476_v32, 0.0  ;;  %v10713_v32 = vcombine.low %v4472_v10, %v4472_v10  ;;  %v10714_v6 = vcombine.high %v4472_v10, %v4472_v10 }
 0x2d7   : > { %v2764_v23 = vmax.f32 %v2478_v34, 0.0 }
 0x2d8   : > { %v2765_v63 = vmax.f32 %v2480_v60, 0.0 }
 0x2d9   : > { %v2913_v33 = vpack.c.bf16 %v2764_v23, %v2762_v52  ;;  %v4502_v23 = vand.u32 %v10714_v6, %v12265_v9 }
 0x2da   : > { %v2483_v16 = vpop.f32.mrb[152].mxu0  ;;  %v2914_v44 = vpack.c.bf16 %v2765_v63, %v2763_v28  ;;  %v4499_v28 = vand.u32 %v10713_v32, %v12265_v9  ;;  %v11631_v9 = vld [vmem:[%s16756_s4 + $0x390] ss:$8 sps:$4 sm:$0xff]  }
 0x2db   : > { %v2484_v25 = vadd.f32 %v2483_v16, %v13090_v7  ;;  %v2485_v39 = vpop.f32.mrb[153].mxu0  ;;  %4508 = vmatprep.subr.bf16.mxu1 %v4502_v23 }
 0x2dc   : > { %v2486_v8 = vadd.f32 %v2485_v39, %v13094_v41  ;;  %v2487_v62 = vpop.f32.mrb[154].mxu0  ;;  %3222 = vmatprep.mubr.bf16.mxu1 %v2914_v44  ;;  %4509 = vmatpush1.bf16.msra.mxu1 %v4499_v28 }
 0x2dd   : > { %v2488_v54 = vadd.f32 %v2487_v62, %v13090_v7  ;;  %v2489_v56 = vpop.f32.mrb[155].mxu0  ;;  %3223 = vmatmul.mubr.bf16.gmra.mrb[148].mxu1 %v2913_v33  ;;  %v2766_v20 = vmax.f32 %v2484_v25, 0.0  ;;  %v11633_v62 = vld [vmem:[%s16756_s4 + $0x394] ss:$8 sps:$4 sm:$0xff]  }
 0x2de   : > { %v2490_v5 = vadd.f32 %v2489_v56, %v13094_v41  ;;  %v2767_v53 = vmax.f32 %v2486_v8, 0.0  ;;  %3909 = vmatprep.subr.bf16.mxu0 %v11633_v62 }
 0x2df   : > { %v2768_v27 = vmax.f32 %v2488_v54, 0.0  ;;  %3910 = vmatpush1.bf16.msra.mxu0 %v11631_v9 }
 0x2e0   : > { %v2769_v13 = vmax.f32 %v2490_v5, 0.0 }
 0x2e1   : > { %v2915_v57 = vpack.c.bf16 %v2768_v27, %v2766_v20 }
 0x2e2   : > { %v2493_v34 = vpop.f32.mrb[156].mxu0  ;;  %v2916_v3 = vpack.c.bf16 %v2769_v13, %v2767_v53 }
 0x2e3   : > { %v2494_v60 = vadd.f32 %v2493_v34, %v13090_v7  ;;  %v2495_v52 = vpop.f32.mrb[157].mxu0 }
 0x2e4   : > { %v2496_v63 = vadd.f32 %v2495_v52, %v13094_v41  ;;  %v2497_v11 = vpop.f32.mrb[158].mxu0  ;;  %3232 = vmatprep.mubr.bf16.mxu1 %v2916_v3 }
 0x2e5   : > { %v2498_v48 = vadd.f32 %v2497_v11, %v13090_v7  ;;  %v2499_v33 = vpop.f32.mrb[159].mxu0  ;;  %3233 = vmatmul.mubr.bf16.gmra.mrb[152].mxu1 %v2915_v57  ;;  %v2770_v44 = vmax.f32 %v2494_v60, 0.0 }
 0x2e6   : > { %v2500_v16 = vadd.f32 %v2499_v33, %v13094_v41  ;;  %v2771_v39 = vmax.f32 %v2496_v63, 0.0 }
 0x2e7   : > { %v2772_v25 = vmax.f32 %v2498_v48, 0.0 }
 0x2e8   : > { %v2773_v8 = vmax.f32 %v2500_v16, 0.0 }
 0x2e9   : > { %v2917_v54 = vpack.c.bf16 %v2772_v25, %v2770_v44 }
 0x2ea   : > { %v2503_v56 = vpop.f32.mrb[160].mxu0  ;;  %v2918_v5 = vpack.c.bf16 %v2773_v8, %v2771_v39 }
 0x2eb   : > { %v2504_v20 = vadd.f32 %v2503_v56, %v13090_v7  ;;  %v2505_v27 = vpop.f32.mrb[161].mxu0  ;;  %v11636_v56 = vld [vmem:[%s16756_s4 + $0x3a4] ss:$8 sps:$4 sm:$0xff]  }
 0x2ec   : > { %v2506_v53 = vadd.f32 %v2505_v27, %v13094_v41  ;;  %v2507_v13 = vpop.f32.mrb[162].mxu0  ;;  %3242 = vmatprep.mubr.bf16.mxu1 %v2918_v5  ;;  %3911 = vmatprep.subr.bf16.mxu0 %v11636_v56  ;;  %v11645_v56 = vld [vmem:[%s16756_s4 + $0x3d4] ss:$8 sps:$4 sm:$0xff]  }
 0x2ed   : > { %v2508_v10 = vadd.f32 %v2507_v13, %v13090_v7  ;;  %v2509_v57 = vpop.f32.mrb[163].mxu0  ;;  %3243 = vmatmul.mubr.bf16.gmra.mrb[156].mxu1 %v2917_v54  ;;  %v2774_v6 = vmax.f32 %v2504_v20, 0.0  ;;  %v11634_v54 = vld [vmem:[%s16756_s4 + $0x3a0] ss:$8 sps:$4 sm:$0xff]  }
 0x2ee   : > { %v2510_v32 = vadd.f32 %v2509_v57, %v13094_v41  ;;  %v2775_v3 = vmax.f32 %v2506_v53, 0.0  ;;  %3912 = vmatpush1.bf16.msra.mxu0 %v11634_v54 }
 0x2ef   : > { %v2776_v34 = vmax.f32 %v2508_v10, 0.0 }
 0x2f0   : > { %v2777_v60 = vmax.f32 %v2510_v32, 0.0 }
 0x2f1   : > { %v2919_v52 = vpack.c.bf16 %v2776_v34, %v2774_v6  ;;  %v11639_v34 = vld [vmem:[%s16756_s4 + $0x3b4] ss:$8 sps:$4 sm:$0xff]  }
 0x2f2   : > { %v2513_v23 = vpop.f32.mrb[164].mxu0  ;;  %v2920_v28 = vpack.c.bf16 %v2777_v60, %v2775_v3  ;;  %v11637_v60 = vld [vmem:[%s16756_s4 + $0x3b0] ss:$8 sps:$4 sm:$0xff]   ;;  %3913 = vmatprep.subr.bf16.mxu0 %v11639_v34 }
 0x2f3   : > { %v2514_v63 = vadd.f32 %v2513_v23, %v13090_v7  ;;  %v2515_v11 = vpop.f32.mrb[165].mxu0  ;;  %3914 = vmatpush1.bf16.msra.mxu0 %v11637_v60 }
 0x2f4   : > { %v2516_v48 = vadd.f32 %v2515_v11, %v13094_v41  ;;  %v2517_v33 = vpop.f32.mrb[166].mxu0  ;;  %3252 = vmatprep.mubr.bf16.mxu1 %v2920_v28 }
 0x2f5   : > { %v2518_v16 = vadd.f32 %v2517_v33, %v13090_v7  ;;  %v2519_v44 = vpop.f32.mrb[167].mxu0  ;;  %3253 = vmatmul.mubr.bf16.gmra.mrb[160].mxu1 %v2919_v52  ;;  %v2778_v39 = vmax.f32 %v2514_v63, 0.0 }
 0x2f6   : > { %v2520_v25 = vadd.f32 %v2519_v44, %v13094_v41  ;;  %v2779_v9 = vmax.f32 %v2516_v48, 0.0  ;;  %v11642_v48 = vld [vmem:[%s16756_s4 + $0x3c4] ss:$8 sps:$4 sm:$0xff]   ;;  %v11640_v44 = vld [vmem:[%s16756_s4 + $0x3c0] ss:$8 sps:$4 sm:$0xff]  }
 0x2f7   : > { %v2780_v8 = vmax.f32 %v2518_v16, 0.0  ;;  %3915 = vmatprep.subr.bf16.mxu0 %v11642_v48  ;;  %v11651_v48 = vld [vmem:[%s16756_s4 + $0x3f4] ss:$8 sps:$4 sm:$0xff]  }
 0x2f8   : > { %v2781_v62 = vmax.f32 %v2520_v25, 0.0  ;;  %3916 = vmatpush1.bf16.msra.mxu0 %v11640_v44 }
 0x2f9   : > { %v2921_v5 = vpack.c.bf16 %v2780_v8, %v2778_v39  ;;  %3917 = vmatprep.subr.bf16.mxu0 %v11645_v56 }
 0x2fa   : > { %v2523_v20 = vpop.f32.mrb[168].mxu0  ;;  %v2922_v27 = vpack.c.bf16 %v2781_v62, %v2779_v9 }
 0x2fb   : > { %v2524_v53 = vadd.f32 %v2523_v20, %v13090_v7  ;;  %v2525_v13 = vpop.f32.mrb[169].mxu0  ;;  %v11643_v20 = vld [vmem:[%s16756_s4 + $0x3d0] ss:$8 sps:$4 sm:$0xff]  }
 0x2fc   : > { %v2526_v10 = vadd.f32 %v2525_v13, %v13094_v41  ;;  %v2527_v57 = vpop.f32.mrb[170].mxu0  ;;  %3262 = vmatprep.mubr.bf16.mxu1 %v2922_v27  ;;  %3918 = vmatpush1.bf16.msra.mxu0 %v11643_v20 }
 0x2fd   : > { %v2528_v32 = vadd.f32 %v2527_v57, %v13090_v7  ;;  %v2529_v6 = vpop.f32.mrb[171].mxu0  ;;  %3263 = vmatmul.mubr.bf16.gmra.mrb[164].mxu1 %v2921_v5  ;;  %v2782_v52 = vmax.f32 %v2524_v53, 0.0 }
 0x2fe   : > { %v2530_v3 = vadd.f32 %v2529_v6, %v13094_v41  ;;  %v2783_v28 = vmax.f32 %v2526_v10, 0.0 }
 0x2ff   : > { %v2784_v23 = vmax.f32 %v2528_v32, 0.0  ;;  %v11648_v32 = vld [vmem:[%s16756_s4 + $0x3e4] ss:$8 sps:$4 sm:$0xff]  }
 0x300   : > { %v2785_v63 = vmax.f32 %v2530_v3, 0.0  ;;  %v11646_v3 = vld [vmem:[%s16756_s4 + $0x3e0] ss:$8 sps:$4 sm:$0xff]   ;;  %3919 = vmatprep.subr.bf16.mxu0 %v11648_v32 }
 0x301   : > { %v2923_v11 = vpack.c.bf16 %v2784_v23, %v2782_v52  ;;  %3920 = vmatpush1.bf16.msra.mxu0 %v11646_v3 }
 0x302   : > { %v2533_v33 = vpop.f32.mrb[172].mxu0  ;;  %v2924_v16 = vpack.c.bf16 %v2785_v63, %v2783_v28  ;;  %3921 = vmatprep.subr.bf16.mxu0 %v11651_v48 }
 0x303   : > { %v2534_v25 = vadd.f32 %v2533_v33, %v13090_v7  ;;  %v2535_v39 = vpop.f32.mrb[173].mxu0 }
 0x304   : > { %v2536_v8 = vadd.f32 %v2535_v39, %v13094_v41  ;;  %v2537_v9 = vpop.f32.mrb[174].mxu0  ;;  %3272 = vmatprep.mubr.bf16.mxu1 %v2924_v16  ;;  %v11649_v16 = vld [vmem:[%s16756_s4 + $0x3f0] ss:$8 sps:$4 sm:$0xff]  }
 0x305   : > { %v2538_v62 = vadd.f32 %v2537_v9, %v13090_v7  ;;  %v2539_v54 = vpop.f32.mrb[175].mxu0  ;;  %3273 = vmatmul.mubr.bf16.gmra.mrb[168].mxu1 %v2923_v11  ;;  %v2786_v27 = vmax.f32 %v2534_v25, 0.0  ;;  %3922 = vmatpush1.bf16.msra.mxu0 %v11649_v16 }
 0x306   : > { %v2540_v5 = vadd.f32 %v2539_v54, %v13094_v41  ;;  %v2787_v13 = vmax.f32 %v2536_v8, 0.0 }
 0x307   : > { %v2788_v53 = vmax.f32 %v2538_v62, 0.0 }
 0x308   : > { %v2789_v10 = vmax.f32 %v2540_v5, 0.0 }
 0x309   : > { %v2925_v57 = vpack.c.bf16 %v2788_v53, %v2786_v27 }
 0x30a   : > { %v2543_v6 = vpop.f32.mrb[176].mxu0  ;;  %v2926_v34 = vpack.c.bf16 %v2789_v10, %v2787_v13 }
 0x30b   : > { %v2544_v60 = vadd.f32 %v2543_v6, %v13090_v7  ;;  %v2545_v52 = vpop.f32.mrb[177].mxu0 }
 0x30c   : > { %v2546_v23 = vadd.f32 %v2545_v52, %v13094_v41  ;;  %v2547_v28 = vpop.f32.mrb[178].mxu0  ;;  %3282 = vmatprep.mubr.bf16.mxu1 %v2926_v34 }
 0x30d   : > { %v2548_v63 = vadd.f32 %v2547_v28, %v13090_v7  ;;  %v2549_v11 = vpop.f32.mrb[179].mxu0  ;;  %3283 = vmatmul.mubr.bf16.gmra.mrb[172].mxu1 %v2925_v57  ;;  %v2790_v44 = vmax.f32 %v2544_v60, 0.0 }
 0x30e   : > { %v2550_v33 = vadd.f32 %v2549_v11, %v13094_v41  ;;  %v2791_v39 = vmax.f32 %v2546_v23, 0.0 }
 0x30f   : > { %v2792_v25 = vmax.f32 %v2548_v63, 0.0 }
 0x310   : > { %v2793_v8 = vmax.f32 %v2550_v33, 0.0 }
 0x311   : > { %v2927_v9 = vpack.c.bf16 %v2792_v25, %v2790_v44 }
 0x312   : > { %v2553_v62 = vpop.f32.mrb[180].mxu0  ;;  %v2928_v54 = vpack.c.bf16 %v2793_v8, %v2791_v39 }
 0x313   : > { %v2554_v56 = vadd.f32 %v2553_v62, %v13090_v7  ;;  %v2555_v5 = vpop.f32.mrb[181].mxu0 }
 0x314   : > { %v2556_v20 = vadd.f32 %v2555_v5, %v13094_v41  ;;  %v2557_v27 = vpop.f32.mrb[182].mxu0  ;;  %3292 = vmatprep.mubr.bf16.mxu1 %v2928_v54 }
 0x315   : > { %v2558_v53 = vadd.f32 %v2557_v27, %v13090_v7  ;;  %v2559_v13 = vpop.f32.mrb[183].mxu0  ;;  %3293 = vmatmul.mubr.bf16.gmra.mrb[176].mxu1 %v2927_v9  ;;  %v2794_v57 = vmax.f32 %v2554_v56, 0.0 }
 0x316   : > { %v2560_v10 = vadd.f32 %v2559_v13, %v13094_v41  ;;  %v2795_v6 = vmax.f32 %v2556_v20, 0.0 }
 0x317   : > { %v2796_v32 = vmax.f32 %v2558_v53, 0.0 }
 0x318   : > { %v2797_v34 = vmax.f32 %v2560_v10, 0.0 }
 0x319   : > { %v2929_v3 = vpack.c.bf16 %v2796_v32, %v2794_v57 }
 0x31a   : > { %v2563_v60 = vpop.f32.mrb[184].mxu0  ;;  %v2930_v52 = vpack.c.bf16 %v2797_v34, %v2795_v6 }
 0x31b   : > { %v2564_v23 = vadd.f32 %v2563_v60, %v13090_v7  ;;  %v2565_v28 = vpop.f32.mrb[185].mxu0 }
 0x31c   : > { %v2566_v63 = vadd.f32 %v2565_v28, %v13094_v41  ;;  %v2567_v11 = vpop.f32.mrb[186].mxu0  ;;  %3302 = vmatprep.mubr.bf16.mxu1 %v2930_v52 }
 0x31d   : > { %v2568_v48 = vadd.f32 %v2567_v11, %v13090_v7  ;;  %v2569_v33 = vpop.f32.mrb[187].mxu0  ;;  %3303 = vmatmul.mubr.bf16.gmra.mrb[180].mxu1 %v2929_v3  ;;  %v2798_v44 = vmax.f32 %v2564_v23, 0.0 }
 0x31e   : > { %v2570_v16 = vadd.f32 %v2569_v33, %v13094_v41  ;;  %v2799_v39 = vmax.f32 %v2566_v63, 0.0 }
 0x31f   : > { %v2800_v25 = vmax.f32 %v2568_v48, 0.0 }
 0x320   : > { %v2801_v8 = vmax.f32 %v2570_v16, 0.0 }
 0x321   : > { %v2931_v9 = vpack.c.bf16 %v2800_v25, %v2798_v44 }
 0x322   : > { %v2573_v62 = vpop.f32.mrb[188].mxu0  ;;  %v2932_v54 = vpack.c.bf16 %v2801_v8, %v2799_v39 }
 0x323   : > { %v2574_v56 = vadd.f32 %v2573_v62, %v13090_v7  ;;  %v2575_v5 = vpop.f32.mrb[189].mxu0 }
 0x324   : > { %v2576_v20 = vadd.f32 %v2575_v5, %v13094_v41  ;;  %v2577_v27 = vpop.f32.mrb[190].mxu0  ;;  %3312 = vmatprep.mubr.bf16.mxu1 %v2932_v54 }
 0x325   : > { %v2578_v53 = vadd.f32 %v2577_v27, %v13090_v7  ;;  %v2579_v13 = vpop.f32.mrb[191].mxu0  ;;  %3313 = vmatmul.mubr.bf16.gmra.mrb[184].mxu1 %v2931_v9  ;;  %v2802_v57 = vmax.f32 %v2574_v56, 0.0 }
 0x326   : > { %v2580_v10 = vadd.f32 %v2579_v13, %v13094_v41  ;;  %v2803_v6 = vmax.f32 %v2576_v20, 0.0 }
 0x327   : > { %v2804_v32 = vmax.f32 %v2578_v53, 0.0 }
 0x328   : > { %v2805_v34 = vmax.f32 %v2580_v10, 0.0 }
 0x329   : > { %v2933_v3 = vpack.c.bf16 %v2804_v32, %v2802_v57 }
 0x32a   : > { %v2583_v60 = vpop.f32.mrb[192].mxu0  ;;  %v2934_v52 = vpack.c.bf16 %v2805_v34, %v2803_v6  ;;  %v11654_v6 = vld [vmem:[%s16758_s6 + $0x4] ss:$8 sps:$4 sm:$0xff]  }
 0x32b   : > { %v2584_v23 = vadd.f32 %v2583_v60, %v13090_v7  ;;  %v2585_v28 = vpop.f32.mrb[193].mxu0  ;;  %5017 = vmatprep.subr.bf16.mxu1 %v11654_v6 }
 0x32c   : > { %v2586_v63 = vadd.f32 %v2585_v28, %v13094_v41  ;;  %v2587_v11 = vpop.f32.mrb[194].mxu0  ;;  %3322 = vmatprep.mubr.bf16.mxu1 %v2934_v52 }
 0x32d   : > { %v2588_v48 = vadd.f32 %v2587_v11, %v13090_v7  ;;  %v2589_v33 = vpop.f32.mrb[195].mxu0  ;;  %3323 = vmatmul.mubr.bf16.gmra.mrb[188].mxu1 %v2933_v3  ;;  %v2806_v44 = vmax.f32 %v2584_v23, 0.0 }
 0x32e   : > { %v2590_v16 = vadd.f32 %v2589_v33, %v13094_v41  ;;  %v2807_v39 = vmax.f32 %v2586_v63, 0.0 }
 0x32f   : > { %v2808_v25 = vmax.f32 %v2588_v48, 0.0 }
 0x330   : > { %v2809_v8 = vmax.f32 %v2590_v16, 0.0 }
 0x331   : > { %v2935_v9 = vpack.c.bf16 %v2808_v25, %v2806_v44 }
 0x332   : > { %v2593_v62 = vpop.f32.mrb[196].mxu0  ;;  %v2936_v54 = vpack.c.bf16 %v2809_v8, %v2807_v39 }
 0x333   : > { %v2594_v56 = vadd.f32 %v2593_v62, %v13090_v7  ;;  %v2595_v5 = vpop.f32.mrb[197].mxu0 }
 0x334   : > { %v2596_v20 = vadd.f32 %v2595_v5, %v13094_v41  ;;  %v2597_v27 = vpop.f32.mrb[198].mxu0  ;;  %3332 = vmatprep.mubr.bf16.mxu1 %v2936_v54 }
 0x335   : > { %v2598_v53 = vadd.f32 %v2597_v27, %v13090_v7  ;;  %v2599_v13 = vpop.f32.mrb[199].mxu0  ;;  %3333 = vmatmul.mubr.bf16.gmra.mrb[192].mxu1 %v2935_v9  ;;  %v2810_v57 = vmax.f32 %v2594_v56, 0.0 }
 0x336   : > { %v2600_v10 = vadd.f32 %v2599_v13, %v13094_v41  ;;  %v2811_v34 = vmax.f32 %v2596_v20, 0.0 }
 0x337   : > { %v2812_v32 = vmax.f32 %v2598_v53, 0.0 }
 0x338   : > { %v2813_v3 = vmax.f32 %v2600_v10, 0.0 }
 0x339   : > { %v2937_v60 = vpack.c.bf16 %v2812_v32, %v2810_v57 }
 0x33a   : > { %v2603_v52 = vpop.f32.mrb[200].mxu0  ;;  %v2938_v23 = vpack.c.bf16 %v2813_v3, %v2811_v34 }
 0x33b   : > { %v2604_v28 = vadd.f32 %v2603_v52, %v13090_v7  ;;  %v2605_v63 = vpop.f32.mrb[201].mxu0 }
 0x33c   : > { %v2606_v11 = vadd.f32 %v2605_v63, %v13094_v41  ;;  %v2607_v48 = vpop.f32.mrb[202].mxu0  ;;  %3342 = vmatprep.mubr.bf16.mxu1 %v2938_v23 }
 0x33d   : > { %v2608_v33 = vadd.f32 %v2607_v48, %v13090_v7  ;;  %v2609_v16 = vpop.f32.mrb[203].mxu0  ;;  %3343 = vmatmul.mubr.bf16.gmra.mrb[196].mxu1 %v2937_v60  ;;  %v2814_v25 = vmax.f32 %v2604_v28, 0.0 }
 0x33e   : > { %v2610_v44 = vadd.f32 %v2609_v16, %v13094_v41  ;;  %v2815_v8 = vmax.f32 %v2606_v11, 0.0 }
 0x33f   : > { %v2816_v39 = vmax.f32 %v2608_v33, 0.0 }
 0x340   : > { %v2817_v9 = vmax.f32 %v2610_v44, 0.0 }
 0x341   : > { %v2939_v62 = vpack.c.bf16 %v2816_v39, %v2814_v25 }
 0x342   : > { %v2613_v54 = vpop.f32.mrb[204].mxu0  ;;  %v2940_v56 = vpack.c.bf16 %v2817_v9, %v2815_v8 }
 0x343   : > { %v2614_v5 = vadd.f32 %v2613_v54, %v13090_v7  ;;  %v2615_v20 = vpop.f32.mrb[205].mxu0 }
 0x344   : > { %v2616_v27 = vadd.f32 %v2615_v20, %v13094_v41  ;;  %v2617_v53 = vpop.f32.mrb[206].mxu0  ;;  %3352 = vmatprep.mubr.bf16.mxu1 %v2940_v56 }
 0x345   : > { %v2618_v13 = vadd.f32 %v2617_v53, %v13090_v7  ;;  %v2619_v10 = vpop.f32.mrb[207].mxu0  ;;  %3353 = vmatmul.mubr.bf16.gmra.mrb[200].mxu1 %v2939_v62  ;;  %v2818_v32 = vmax.f32 %v2614_v5, 0.0 }
 0x346   : > { %v2620_v57 = vadd.f32 %v2619_v10, %v13094_v41  ;;  %v2819_v34 = vmax.f32 %v2616_v27, 0.0 }
 0x347   : > { %v2820_v6 = vmax.f32 %v2618_v13, 0.0 }
 0x348   : > { %v2821_v3 = vmax.f32 %v2620_v57, 0.0 }
 0x349   : > { %v2941_v60 = vpack.c.bf16 %v2820_v6, %v2818_v32 }
 0x34a   : > { %v2623_v52 = vpop.f32.mrb[208].mxu0  ;;  %v2942_v23 = vpack.c.bf16 %v2821_v3, %v2819_v34 }
 0x34b   : > { %v2624_v28 = vadd.f32 %v2623_v52, %v13090_v7  ;;  %v2625_v63 = vpop.f32.mrb[209].mxu0 }
 0x34c   : > { %v2626_v11 = vadd.f32 %v2625_v63, %v13094_v41  ;;  %v2627_v48 = vpop.f32.mrb[210].mxu0  ;;  %3362 = vmatprep.mubr.bf16.mxu1 %v2942_v23 }
 0x34d   : > { %v2628_v33 = vadd.f32 %v2627_v48, %v13090_v7  ;;  %v2629_v16 = vpop.f32.mrb[211].mxu0  ;;  %3363 = vmatmul.mubr.bf16.gmra.mrb[204].mxu1 %v2941_v60  ;;  %v2822_v25 = vmax.f32 %v2624_v28, 0.0 }
 0x34e   : > { %v2630_v44 = vadd.f32 %v2629_v16, %v13094_v41  ;;  %v2823_v8 = vmax.f32 %v2626_v11, 0.0 }
 0x34f   : > { %v2824_v39 = vmax.f32 %v2628_v33, 0.0 }
 0x350   : > { %v2825_v9 = vmax.f32 %v2630_v44, 0.0 }
 0x351   : > { %v2943_v62 = vpack.c.bf16 %v2824_v39, %v2822_v25 }
 0x352   : > { %v2633_v54 = vpop.f32.mrb[212].mxu0  ;;  %v2944_v56 = vpack.c.bf16 %v2825_v9, %v2823_v8 }
 0x353   : > { %v2634_v5 = vadd.f32 %v2633_v54, %v13090_v7  ;;  %v2635_v20 = vpop.f32.mrb[213].mxu0 }
 0x354   : > { %v2636_v27 = vadd.f32 %v2635_v20, %v13094_v41  ;;  %v2637_v53 = vpop.f32.mrb[214].mxu0  ;;  %3372 = vmatprep.mubr.bf16.mxu1 %v2944_v56 }
 0x355   : > { %v2638_v13 = vadd.f32 %v2637_v53, %v13090_v7  ;;  %v2639_v10 = vpop.f32.mrb[215].mxu0  ;;  %3373 = vmatmul.mubr.bf16.gmra.mrb[208].mxu1 %v2943_v62  ;;  %v2826_v32 = vmax.f32 %v2634_v5, 0.0 }
 0x356   : > { %v2640_v57 = vadd.f32 %v2639_v10, %v13094_v41  ;;  %v2827_v34 = vmax.f32 %v2636_v27, 0.0 }
 0x357   : > { %v2828_v6 = vmax.f32 %v2638_v13, 0.0 }
 0x358   : > { %v2829_v3 = vmax.f32 %v2640_v57, 0.0 }
 0x359   : > { %v2945_v60 = vpack.c.bf16 %v2828_v6, %v2826_v32 }
 0x35a   : > { %v2643_v52 = vpop.f32.mrb[216].mxu0  ;;  %v2946_v23 = vpack.c.bf16 %v2829_v3, %v2827_v34 }
 0x35b   : > { %v2644_v28 = vadd.f32 %v2643_v52, %v13090_v7  ;;  %v2645_v63 = vpop.f32.mrb[217].mxu0 }
 0x35c   : > { %v2646_v11 = vadd.f32 %v2645_v63, %v13094_v41  ;;  %v2647_v48 = vpop.f32.mrb[218].mxu0  ;;  %3382 = vmatprep.mubr.bf16.mxu1 %v2946_v23 }
 0x35d   : > { %v2648_v33 = vadd.f32 %v2647_v48, %v13090_v7  ;;  %v2649_v16 = vpop.f32.mrb[219].mxu0  ;;  %3383 = vmatmul.mubr.bf16.gmra.mrb[212].mxu1 %v2945_v60  ;;  %v2830_v25 = vmax.f32 %v2644_v28, 0.0 }
 0x35e   : > { %v2650_v44 = vadd.f32 %v2649_v16, %v13094_v41  ;;  %v2831_v8 = vmax.f32 %v2646_v11, 0.0 }
 0x35f   : > { %v2832_v39 = vmax.f32 %v2648_v33, 0.0 }
 0x360   : > { %v2833_v9 = vmax.f32 %v2650_v44, 0.0 }
 0x361   : > { %v2947_v62 = vpack.c.bf16 %v2832_v39, %v2830_v25 }
 0x362   : > { %v2653_v54 = vpop.f32.mrb[220].mxu0  ;;  %v2948_v56 = vpack.c.bf16 %v2833_v9, %v2831_v8 }
 0x363   : > { %v2654_v5 = vadd.f32 %v2653_v54, %v13090_v7  ;;  %v2655_v20 = vpop.f32.mrb[221].mxu0 }
 0x364   : > { %v2656_v27 = vadd.f32 %v2655_v20, %v13094_v41  ;;  %v2657_v53 = vpop.f32.mrb[222].mxu0  ;;  %3392 = vmatprep.mubr.bf16.mxu1 %v2948_v56 }
 0x365   : > { %v2658_v13 = vadd.f32 %v2657_v53, %v13090_v7  ;;  %v2659_v10 = vpop.f32.mrb[223].mxu0  ;;  %3393 = vmatmul.mubr.bf16.gmra.mrb[216].mxu1 %v2947_v62  ;;  %v2834_v32 = vmax.f32 %v2654_v5, 0.0 }
 0x366   : > { %v2660_v57 = vadd.f32 %v2659_v10, %v13094_v41  ;;  %v2835_v34 = vmax.f32 %v2656_v27, 0.0 }
 0x367   : > { %v2836_v6 = vmax.f32 %v2658_v13, 0.0 }
 0x368   : > { %v2837_v3 = vmax.f32 %v2660_v57, 0.0 }
 0x369   : > { %v2949_v60 = vpack.c.bf16 %v2836_v6, %v2834_v32 }
 0x36a   : > { %v2663_v52 = vpop.f32.mrb[224].mxu0  ;;  %v2950_v23 = vpack.c.bf16 %v2837_v3, %v2835_v34 }
 0x36b   : > { %v2664_v28 = vadd.f32 %v2663_v52, %v13090_v7  ;;  %v2665_v63 = vpop.f32.mrb[225].mxu0 }
 0x36c   : > { %v2666_v11 = vadd.f32 %v2665_v63, %v13094_v41  ;;  %v2667_v48 = vpop.f32.mrb[226].mxu0  ;;  %3402 = vmatprep.mubr.bf16.mxu1 %v2950_v23 }
 0x36d   : > { %v2668_v33 = vadd.f32 %v2667_v48, %v13090_v7  ;;  %v2669_v16 = vpop.f32.mrb[227].mxu0  ;;  %3403 = vmatmul.mubr.bf16.gmra.mrb[220].mxu1 %v2949_v60  ;;  %v2838_v25 = vmax.f32 %v2664_v28, 0.0 }
 0x36e   : > { %v2670_v44 = vadd.f32 %v2669_v16, %v13094_v41  ;;  %v2839_v8 = vmax.f32 %v2666_v11, 0.0 }
 0x36f   : > { %v2840_v39 = vmax.f32 %v2668_v33, 0.0 }
 0x370   : > { %v2841_v9 = vmax.f32 %v2670_v44, 0.0 }
 0x371   : > { %v2951_v62 = vpack.c.bf16 %v2840_v39, %v2838_v25 }
 0x372   : > { %v2673_v54 = vpop.f32.mrb[228].mxu0  ;;  %v2952_v56 = vpack.c.bf16 %v2841_v9, %v2839_v8 }
 0x373   : > { %v2674_v5 = vadd.f32 %v2673_v54, %v13090_v7  ;;  %v2675_v20 = vpop.f32.mrb[229].mxu0 }
 0x374   : > { %v2676_v27 = vadd.f32 %v2675_v20, %v13094_v41  ;;  %v2677_v53 = vpop.f32.mrb[230].mxu0  ;;  %3412 = vmatprep.mubr.bf16.mxu1 %v2952_v56 }
 0x375   : > { %v2678_v13 = vadd.f32 %v2677_v53, %v13090_v7  ;;  %v2679_v10 = vpop.f32.mrb[231].mxu0  ;;  %3413 = vmatmul.mubr.bf16.gmra.mrb[224].mxu1 %v2951_v62  ;;  %v2842_v32 = vmax.f32 %v2674_v5, 0.0  ;;  %v10611_v5 = vld [vmem:[%s16757_s5 + $0x4] sm:$0x3] }
 0x376   : > { %v2680_v57 = vadd.f32 %v2679_v10, %v13094_v41  ;;  %v2843_v34 = vmax.f32 %v2676_v27, 0.0 }
 0x377   : > { %v2844_v6 = vmax.f32 %v2678_v13, 0.0 }
 0x378   : > { %v2845_v3 = vmax.f32 %v2680_v57, 0.0 }
 0x379   : > { %v2953_v60 = vpack.c.bf16 %v2844_v6, %v2842_v32  ;;  %v13310_v32 = vrot.slane %v10611_v5, %v12616_v47 }
 0x37a   : > { %v2683_v52 = vpop.f32.mrb[232].mxu0  ;;  %v2954_v23 = vpack.c.bf16 %v2845_v3, %v2843_v34  ;;  %v13314_v34 = vrot.slane %v10611_v5, %v12622_v51 }
 0x37b   : > { %v2684_v28 = vadd.f32 %v2683_v52, %v13090_v7  ;;  %v2685_v63 = vpop.f32.mrb[233].mxu0 }
 0x37c   : > { %v2686_v11 = vadd.f32 %v2685_v63, %v13094_v41  ;;  %v2687_v48 = vpop.f32.mrb[234].mxu0  ;;  %3422 = vmatprep.mubr.bf16.mxu1 %v2954_v23 }
 0x37d   : > { %v2688_v33 = vadd.f32 %v2687_v48, %v13090_v7  ;;  %v2689_v16 = vpop.f32.mrb[235].mxu0  ;;  %3423 = vmatmul.mubr.bf16.gmra.mrb[228].mxu1 %v2953_v60  ;;  %v2846_v25 = vmax.f32 %v2684_v28, 0.0 }
 0x37e   : > { %v2690_v44 = vadd.f32 %v2689_v16, %v13094_v41  ;;  %v2847_v8 = vmax.f32 %v2686_v11, 0.0 }
 0x37f   : > { %v2848_v39 = vmax.f32 %v2688_v33, 0.0 }
 0x380   : > { %v2849_v9 = vmax.f32 %v2690_v44, 0.0 }
 0x381   : > { %v2955_v62 = vpack.c.bf16 %v2848_v39, %v2846_v25 }
 0x382   : > { %v2693_v54 = vpop.f32.mrb[236].mxu0  ;;  %v2956_v56 = vpack.c.bf16 %v2849_v9, %v2847_v8 }
 0x383   : > { %v2694_v20 = vadd.f32 %v2693_v54, %v13090_v7  ;;  %v2695_v27 = vpop.f32.mrb[237].mxu0 }
 0x384   : > { %v2696_v53 = vadd.f32 %v2695_v27, %v13094_v41  ;;  %v2697_v13 = vpop.f32.mrb[238].mxu0  ;;  %3432 = vmatprep.mubr.bf16.mxu1 %v2956_v56 }
 0x385   : > { %v2698_v10 = vadd.f32 %v2697_v13, %v13090_v7  ;;  %v2699_v57 = vpop.f32.mrb[239].mxu0  ;;  %3433 = vmatmul.mubr.bf16.gmra.mrb[232].mxu1 %v2955_v62  ;;  %v2850_v3 = vmax.f32 %v2694_v20, 0.0 }
 0x386   : > { %v2700_v6 = vadd.f32 %v2699_v57, %v13094_v41  ;;  %v2851_v52 = vmax.f32 %v2696_v53, 0.0 }
 0x387   : > { %v2852_v60 = vmax.f32 %v2698_v10, 0.0 }
 0x388   : > { %v2853_v23 = vmax.f32 %v2700_v6, 0.0  ;;  %v3174_v28 = vpop.f32.mrb[128].mxu1 }
 0x389   : > { %v3175_v63 = vadd.f32 %v3174_v28, %v13310_v32  ;;  %v3176_v11 = vpop.f32.mrb[129].mxu1  ;;  %v2957_v48 = vpack.c.bf16 %v2852_v60, %v2850_v3 }
 0x38a   : > { %v3177_v33 = vadd.f32 %v3176_v11, %v13314_v34  ;;  %v2703_v16 = vpop.f32.mrb[240].mxu0  ;;  %v3178_v44 = vpop.f32.mrb[130].mxu1  ;;  %v2958_v25 = vpack.c.bf16 %v2853_v23, %v2851_v52 }
 0x38b   : > { %v2704_v39 = vadd.f32 %v2703_v16, %v13090_v7  ;;  %v3179_v8 = vadd.f32 %v3178_v44, %v13310_v32  ;;  %v2705_v9 = vpop.f32.mrb[241].mxu0  ;;  %v3180_v62 = vpop.f32.mrb[131].mxu1  ;;  %v3493_v20 = vmax.f32 %v3175_v63, 0.0 }
 0x38c   : > { %v2706_v54 = vadd.f32 %v2705_v9, %v13094_v41  ;;  %v3181_v56 = vadd.f32 %v3180_v62, %v13314_v34  ;;  %v2707_v5 = vpop.f32.mrb[242].mxu0  ;;  %3442 = vmatprep.mubr.bf16.mxu1 %v2958_v25  ;;  %v3494_v10 = vmax.f32 %v3177_v33, 0.0 }
 0x38d   : > { %v3495_v27 = vmax.f32 %v3179_v8, 0.0  ;;  %v2708_v53 = vadd.f32 %v2707_v5, %v13090_v7  ;;  %v2709_v13 = vpop.f32.mrb[243].mxu0  ;;  %3443 = vmatmul.mubr.bf16.gmra.mrb[236].mxu1 %v2957_v48  ;;  %v2854_v3 = vmax.f32 %v2704_v39, 0.0 }
 0x38e   : > { %v3496_v57 = vmax.f32 %v3181_v56, 0.0  ;;  %v2710_v6 = vadd.f32 %v2709_v13, %v13094_v41  ;;  %v2855_v23 = vmax.f32 %v2706_v54, 0.0 }
 0x38f   : > { %v3654_v60 = vpack.c.bf16 %v3495_v27, %v3493_v20  ;;  %v2856_v52 = vmax.f32 %v2708_v53, 0.0 }
 0x390   : > { %v2857_v28 = vmax.f32 %v2710_v6, 0.0  ;;  %v3184_v11 = vpop.f32.mrb[132].mxu1  ;;  %v3655_v16 = vpack.c.bf16 %v3496_v57, %v3494_v10 }
 0x391   : > { %v3185_v44 = vadd.f32 %v3184_v11, %v13310_v32  ;;  %v3186_v25 = vpop.f32.mrb[133].mxu1  ;;  %v2959_v63 = vpack.c.bf16 %v2856_v52, %v2854_v3 }
 0x392   : > { %v3187_v8 = vadd.f32 %v3186_v25, %v13314_v34  ;;  %v2713_v9 = vpop.f32.mrb[244].mxu0  ;;  %v3188_v62 = vpop.f32.mrb[134].mxu1  ;;  %3923 = vmatprep.mubr.bf16.mxu0 %v3655_v16  ;;  %v2960_v48 = vpack.c.bf16 %v2857_v28, %v2855_v23 }
 0x393   : > { %v2714_v33 = vadd.f32 %v2713_v9, %v13090_v7  ;;  %v3189_v39 = vadd.f32 %v3188_v62, %v13310_v32  ;;  %v2715_v56 = vpop.f32.mrb[245].mxu0  ;;  %v3190_v5 = vpop.f32.mrb[135].mxu1  ;;  %3924 = vmatmul.mubr.bf16.vlgmr.msra.gmra.mrb[0].mxu0 %v3654_v60  ;;  %v3497_v53 = vmax.f32 %v3185_v44, 0.0 }
 0x394   : > { %v2716_v54 = vadd.f32 %v2715_v56, %v13094_v41  ;;  %v3191_v20 = vadd.f32 %v3190_v5, %v13314_v34  ;;  %v2717_v27 = vpop.f32.mrb[246].mxu0  ;;  %3452 = vmatprep.mubr.bf16.mxu1 %v2960_v48  ;;  %v3498_v6 = vmax.f32 %v3187_v8, 0.0 }
 0x395   : > { %v3499_v13 = vmax.f32 %v3189_v39, 0.0  ;;  %v2718_v10 = vadd.f32 %v2717_v27, %v13090_v7  ;;  %v2719_v57 = vpop.f32.mrb[247].mxu0  ;;  %3453 = vmatmul.mubr.bf16.gmra.mrb[240].mxu1 %v2959_v63  ;;  %v2858_v23 = vmax.f32 %v2714_v33, 0.0 }
 0x396   : > { %v3500_v3 = vmax.f32 %v3191_v20, 0.0  ;;  %v2720_v52 = vadd.f32 %v2719_v57, %v13094_v41  ;;  %v2859_v60 = vmax.f32 %v2716_v54, 0.0 }
 0x397   : > { %v3656_v28 = vpack.c.bf16 %v3499_v13, %v3497_v53  ;;  %v2860_v11 = vmax.f32 %v2718_v10, 0.0 }
 0x398   : > { %v2861_v16 = vmax.f32 %v2720_v52, 0.0  ;;  %v3194_v25 = vpop.f32.mrb[136].mxu1  ;;  %v3657_v9 = vpack.c.bf16 %v3500_v3, %v3498_v6 }
 0x399   : > { %v3195_v62 = vadd.f32 %v3194_v25, %v13310_v32  ;;  %v3196_v48 = vpop.f32.mrb[137].mxu1  ;;  %v2961_v44 = vpack.c.bf16 %v2860_v11, %v2858_v23 }
 0x39a   : > { %v3197_v39 = vadd.f32 %v3196_v48, %v13314_v34  ;;  %v2723_v56 = vpop.f32.mrb[248].mxu0  ;;  %v3198_v5 = vpop.f32.mrb[138].mxu1  ;;  %3933 = vmatprep.mubr.bf16.mxu0 %v3657_v9  ;;  %v2962_v63 = vpack.c.bf16 %v2861_v16, %v2859_v60 }
 0x39b   : > { %v2724_v8 = vadd.f32 %v2723_v56, %v13090_v7  ;;  %v3199_v33 = vadd.f32 %v3198_v5, %v13310_v32  ;;  %v2725_v20 = vpop.f32.mrb[249].mxu0  ;;  %v3200_v27 = vpop.f32.mrb[139].mxu1  ;;  %3934 = vmatmul.mubr.bf16.gmra.mrb[4].mxu0 %v3656_v28  ;;  %v3501_v10 = vmax.f32 %v3195_v62, 0.0 }
 0x39c   : > { %v2726_v54 = vadd.f32 %v2725_v20, %v13094_v41  ;;  %v3201_v53 = vadd.f32 %v3200_v27, %v13314_v34  ;;  %v2727_v13 = vpop.f32.mrb[250].mxu0  ;;  %3462 = vmatprep.mubr.bf16.mxu1 %v2962_v63  ;;  %v3502_v52 = vmax.f32 %v3197_v39, 0.0 }
 0x39d   : > { %v3503_v57 = vmax.f32 %v3199_v33, 0.0  ;;  %v2728_v6 = vadd.f32 %v2727_v13, %v13090_v7  ;;  %v2729_v3 = vpop.f32.mrb[251].mxu0  ;;  %3463 = vmatmul.mubr.bf16.gmra.mrb[244].mxu1 %v2961_v44  ;;  %v2862_v60 = vmax.f32 %v2724_v8, 0.0 }
 0x39e   : > { %v3504_v23 = vmax.f32 %v3201_v53, 0.0  ;;  %v2730_v11 = vadd.f32 %v2729_v3, %v13094_v41  ;;  %v2863_v28 = vmax.f32 %v2726_v54, 0.0 }
 0x39f   : > { %v3658_v16 = vpack.c.bf16 %v3503_v57, %v3501_v10  ;;  %v2864_v25 = vmax.f32 %v2728_v6, 0.0 }
 0x3a0   : > { %v2865_v9 = vmax.f32 %v2730_v11, 0.0  ;;  %v3204_v48 = vpop.f32.mrb[140].mxu1  ;;  %v3659_v56 = vpack.c.bf16 %v3504_v23, %v3502_v52 }
 0x3a1   : > { %v3205_v5 = vadd.f32 %v3204_v48, %v13310_v32  ;;  %v3206_v63 = vpop.f32.mrb[141].mxu1  ;;  %v2963_v62 = vpack.c.bf16 %v2864_v25, %v2862_v60 }
 0x3a2   : > { %v3207_v33 = vadd.f32 %v3206_v63, %v13314_v34  ;;  %v2733_v20 = vpop.f32.mrb[252].mxu0  ;;  %v3208_v27 = vpop.f32.mrb[142].mxu1  ;;  %3943 = vmatprep.mubr.bf16.mxu0 %v3659_v56  ;;  %v2964_v44 = vpack.c.bf16 %v2865_v9, %v2863_v28 }
 0x3a3   : > { %v2734_v39 = vadd.f32 %v2733_v20, %v13090_v7  ;;  %v3209_v8 = vadd.f32 %v3208_v27, %v13310_v32  ;;  %v2735_v53 = vpop.f32.mrb[253].mxu0  ;;  %v3210_v13 = vpop.f32.mrb[143].mxu1  ;;  %3944 = vmatmul.mubr.bf16.gmra.mrb[8].mxu0 %v3658_v16  ;;  %v3505_v6 = vmax.f32 %v3205_v5, 0.0 }
 0x3a4   : > { %v2736_v54 = vadd.f32 %v2735_v53, %v13094_v41  ;;  %v3211_v10 = vadd.f32 %v3210_v13, %v13314_v34  ;;  %v2737_v57 = vpop.f32.mrb[254].mxu0  ;;  %3472 = vmatprep.mubr.bf16.mxu1 %v2964_v44  ;;  %v3506_v11 = vmax.f32 %v3207_v33, 0.0 }
 0x3a5   : > { %v3507_v3 = vmax.f32 %v3209_v8, 0.0  ;;  %v2738_v52 = vadd.f32 %v2737_v57, %v13090_v7  ;;  %v2739_v23 = vpop.f32.mrb[255].mxu0  ;;  %3473 = vmatmul.mubr.bf16.gmra.mrb[248].mxu1 %v2963_v62  ;;  %v2866_v28 = vmax.f32 %v2734_v39, 0.0  ;;  %v16818_v57 = vmov 0  }
 0x3a6   : > { %v3508_v60 = vmax.f32 %v3211_v10, 0.0  ;;  %v2740_v25 = vadd.f32 %v2739_v23, %v13094_v41  ;;  %v2867_v16 = vmax.f32 %v2736_v54, 0.0 }
 0x3a7   : > { %v3660_v9 = vpack.c.bf16 %v3507_v3, %v3505_v6  ;;  %v2868_v48 = vmax.f32 %v2738_v52, 0.0 }
 0x3a8   : > { %v2869_v56 = vmax.f32 %v2740_v25, 0.0  ;;  %v3214_v63 = vpop.f32.mrb[144].mxu1  ;;  %v3661_v20 = vpack.c.bf16 %v3508_v60, %v3506_v11 }
 0x3a9   : > { %v3215_v27 = vadd.f32 %v3214_v63, %v13310_v32  ;;  %v3216_v44 = vpop.f32.mrb[145].mxu1  ;;  %v2965_v5 = vpack.c.bf16 %v2868_v48, %v2866_v28  ;;  %v11652_v28 = vld [vmem:[%s16758_s6] ss:$8 sps:$4 sm:$0xff]  }
 0x3aa   : > { %v3217_v8 = vadd.f32 %v3216_v44, %v13314_v34  ;;  %v3218_v7 = vpop.f32.mrb[146].mxu1  ;;  %3953 = vmatprep.mubr.bf16.mxu0 %v3661_v20  ;;  %v2966_v62 = vpack.c.bf16 %v2869_v56, %v2867_v16  ;;  %v11657_v16 = vld [vmem:[%s16758_s6 + $0x14] ss:$8 sps:$4 sm:$0xff]  }
 0x3ab   : > { %v3219_v33 = vadd.f32 %v3218_v7, %v13310_v32  ;;  %v3220_v53 = vpop.f32.mrb[147].mxu1  ;;  %3954 = vmatmul.mubr.bf16.gmra.mrb[12].mxu0 %v3660_v9  ;;  %v3509_v39 = vmax.f32 %v3215_v27, 0.0  ;;  %v11660_v7 = vld [vmem:[%s16758_s6 + $0x24] ss:$8 sps:$4 sm:$0xff]  }
 0x3ac   : > { %v3221_v41 = vadd.f32 %v3220_v53, %v13314_v34  ;;  %3482 = vmatprep.mubr.bf16.mxu1 %v2966_v62  ;;  %v3510_v54 = vmax.f32 %v3217_v8, 0.0 }
 0x3ad   : > { %v3511_v13 = vmax.f32 %v3219_v33, 0.0  ;;  %3483 = vmatmul.mubr.bf16.gmra.mrb[252].mxu1 %v2965_v5  ;;  %v11655_v5 = vld [vmem:[%s16758_s6 + $0x10] ss:$8 sps:$4 sm:$0xff]  }
 0x3ae   : > { %v3512_v10 = vmax.f32 %v3221_v41, 0.0  ;;  %4536 = vmatprep.mubr.bf16.mxu1 %v16818_v57 }
 0x3af   : > { %v3662_v6 = vpack.c.bf16 %v3511_v13, %v3509_v39  ;;  %v11658_v13 = vld [vmem:[%s16758_s6 + $0x20] ss:$8 sps:$4 sm:$0xff]  }
 0x3b0   : > { %v3224_v3 = vpop.f32.mrb[148].mxu1  ;;  %v3663_v52 = vpack.c.bf16 %v3512_v10, %v3510_v54 }
 0x3b1   : > { %v3225_v23 = vadd.f32 %v3224_v3, %v13310_v32  ;;  %v3226_v11 = vpop.f32.mrb[149].mxu1 }
 0x3b2   : > { %v3227_v60 = vadd.f32 %v3226_v11, %v13314_v34  ;;  %v3228_v25 = vpop.f32.mrb[150].mxu1  ;;  %3963 = vmatprep.mubr.bf16.mxu0 %v3663_v52 }
 0x3b3   : > { %v3229_v9 = vadd.f32 %v3228_v25, %v13310_v32  ;;  %v3230_v48 = vpop.f32.mrb[151].mxu1  ;;  %3964 = vmatmul.mubr.bf16.gmra.mrb[16].mxu0 %v3662_v6  ;;  %v3513_v63 = vmax.f32 %v3225_v23, 0.0  ;;  %v11663_v6 = vld [vmem:[%s16758_s6 + $0x34] ss:$8 sps:$4 sm:$0xff]   ;;  %v11661_v25 = vld [vmem:[%s16758_s6 + $0x30] ss:$8 sps:$4 sm:$0xff]  }
 0x3b4   : > { %v3231_v56 = vadd.f32 %v3230_v48, %v13314_v34  ;;  %v3514_v27 = vmax.f32 %v3227_v60, 0.0 }
 0x3b5   : > { %v3515_v20 = vmax.f32 %v3229_v9, 0.0  ;;  %10715 = vmatmul.mubr.msk.bf16.vlgmr.msra.gmra.mrb[0].mxu1 %vm782_vm2, %v12279_v15  ;;  %v11666_v9 = vld [vmem:[%s16758_s6 + $0x44] ss:$8 sps:$4 sm:$0xff]  }
 0x3b6   : > { %v3516_v44 = vmax.f32 %v3231_v56, 0.0  ;;  %5018 = vmatpush1.bf16.msra.mxu1 %v11652_v28  ;;  %4546 = vmatprep.mubr.bf16.mxu1 %v16818_v57 }
 0x3b7   : > { %v3664_v8 = vpack.c.bf16 %v3515_v20, %v3513_v63  ;;  %5019 = vmatprep.subr.bf16.mxu1 %v11657_v16 }
 0x3b8   : > { %v3234_v62 = vpop.f32.mrb[152].mxu1  ;;  %v3665_v33 = vpack.c.bf16 %v3516_v44, %v3514_v27  ;;  %v11664_v27 = vld [vmem:[%s16758_s6 + $0x40] ss:$8 sps:$4 sm:$0xff]  }
 0x3b9   : > { %v3235_v53 = vadd.f32 %v3234_v62, %v13310_v32  ;;  %v3236_v15 = vpop.f32.mrb[153].mxu1 }
 0x3ba   : > { %v3237_v41 = vadd.f32 %v3236_v15, %v13314_v34  ;;  %v3238_v39 = vpop.f32.mrb[154].mxu1  ;;  %3973 = vmatprep.mubr.bf16.mxu0 %v3665_v33  ;;  %5020 = vmatpush1.bf16.msra.mxu1 %v11655_v5 }
 0x3bb   : > { %v3239_v54 = vadd.f32 %v3238_v39, %v13310_v32  ;;  %v3240_v10 = vpop.f32.mrb[155].mxu1  ;;  %3974 = vmatmul.mubr.bf16.gmra.mrb[20].mxu0 %v3664_v8  ;;  %5021 = vmatprep.subr.bf16.mxu1 %v11660_v7  ;;  %v3517_v52 = vmax.f32 %v3235_v53, 0.0  ;;  %v11669_v8 = vld [vmem:[%s16758_s6 + $0x54] ss:$8 sps:$4 sm:$0xff]  }
 0x3bc   : > { %v3241_v3 = vadd.f32 %v3240_v10, %v13314_v34  ;;  %v3518_v11 = vmax.f32 %v3237_v41, 0.0  ;;  %v11667_v41 = vld [vmem:[%s16758_s6 + $0x50] ss:$8 sps:$4 sm:$0xff]  }
 0x3bd   : > { %v3519_v23 = vmax.f32 %v3239_v54, 0.0  ;;  %10716 = vmatmul.mubr.msk.bf16.gmra.mrb[4].mxu1 %vm782_vm2, %v12286_v18 }
 0x3be   : > { %v3520_v60 = vmax.f32 %v3241_v3, 0.0  ;;  %4556 = vmatprep.mubr.bf16.mxu1 %v16818_v57  ;;  %5022 = vmatpush1.bf16.msra.mxu1 %v11658_v13  ;;  %v11672_v13 = vld [vmem:[%s16758_s6 + $0x64] ss:$8 sps:$4 sm:$0xff]  }
 0x3bf   : > { %v3666_v28 = vpack.c.bf16 %v3519_v23, %v3517_v52  ;;  %5023 = vmatprep.subr.bf16.mxu1 %v11663_v6  ;;  %v11670_v23 = vld [vmem:[%s16758_s6 + $0x60] ss:$8 sps:$4 sm:$0xff]  }
 0x3c0   : > { %v3244_v48 = vpop.f32.mrb[156].mxu1  ;;  %v3667_v16 = vpack.c.bf16 %v3520_v60, %v3518_v11 }
 0x3c1   : > { %v3245_v56 = vadd.f32 %v3244_v48, %v13310_v32  ;;  %v3246_v18 = vpop.f32.mrb[157].mxu1 }
 0x3c2   : > { %v3247_v63 = vadd.f32 %v3246_v18, %v13314_v34  ;;  %v3248_v20 = vpop.f32.mrb[158].mxu1  ;;  %3983 = vmatprep.mubr.bf16.mxu0 %v3667_v16  ;;  %5024 = vmatpush1.bf16.msra.mxu1 %v11661_v25  ;;  %v11675_v25 = vld [vmem:[%s16758_s6 + $0x74] ss:$8 sps:$4 sm:$0xff]   ;;  %v11673_v18 = vld [vmem:[%s16758_s6 + $0x70] ss:$8 sps:$4 sm:$0xff]  }
 0x3c3   : > { %v3249_v44 = vadd.f32 %v3248_v20, %v13310_v32  ;;  %v3250_v5 = vpop.f32.mrb[159].mxu1  ;;  %3984 = vmatmul.mubr.bf16.gmra.mrb[24].mxu0 %v3666_v28  ;;  %5025 = vmatprep.subr.bf16.mxu1 %v11666_v9  ;;  %v3521_v62 = vmax.f32 %v3245_v56, 0.0  ;;  %v11678_v20 = vld [vmem:[%s16758_s6 + $0x84] ss:$8 sps:$4 sm:$0xff]  }
 0x3c4   : > { %v3251_v7 = vadd.f32 %v3250_v5, %v13314_v34  ;;  %v3522_v53 = vmax.f32 %v3247_v63, 0.0 }
 0x3c5   : > { %v3523_v33 = vmax.f32 %v3249_v44, 0.0  ;;  %10717 = vmatmul.mubr.msk.bf16.gmra.mrb[8].mxu1 %vm782_vm2, %v12293_v21 }
 0x3c6   : > { %v3524_v15 = vmax.f32 %v3251_v7, 0.0  ;;  %4566 = vmatprep.mubr.bf16.mxu1 %v16818_v57  ;;  %5026 = vmatpush1.bf16.msra.mxu1 %v11664_v27 }
 0x3c7   : > { %v3668_v39 = vpack.c.bf16 %v3523_v33, %v3521_v62  ;;  %5027 = vmatprep.subr.bf16.mxu1 %v11669_v8  ;;  %v11676_v62 = vld [vmem:[%s16758_s6 + $0x80] ss:$8 sps:$4 sm:$0xff]  }
 0x3c8   : > { %v3254_v54 = vpop.f32.mrb[160].mxu1  ;;  %v3669_v10 = vpack.c.bf16 %v3524_v15, %v3522_v53  ;;  %v11681_v15 = vld [vmem:[%s16758_s6 + $0x94] ss:$8 sps:$4 sm:$0xff]  }
 0x3c9   : > { %v3255_v6 = vadd.f32 %v3254_v54, %v13310_v32  ;;  %v3256_v21 = vpop.f32.mrb[161].mxu1 }
 0x3ca   : > { %v3257_v3 = vadd.f32 %v3256_v21, %v13314_v34  ;;  %v3258_v52 = vpop.f32.mrb[162].mxu1  ;;  %3993 = vmatprep.mubr.bf16.mxu0 %v3669_v10  ;;  %5028 = vmatpush1.bf16.msra.mxu1 %v11667_v41 }
 0x3cb   : > { %v3259_v11 = vadd.f32 %v3258_v52, %v13310_v32  ;;  %v3260_v60 = vpop.f32.mrb[163].mxu1  ;;  %3994 = vmatmul.mubr.bf16.gmra.mrb[28].mxu0 %v3668_v39  ;;  %5029 = vmatprep.subr.bf16.mxu1 %v11672_v13  ;;  %v3525_v9 = vmax.f32 %v3255_v6, 0.0  ;;  %v11679_v6 = vld [vmem:[%s16758_s6 + $0x90] ss:$8 sps:$4 sm:$0xff]  }
 0x3cc   : > { %v3261_v28 = vadd.f32 %v3260_v60, %v13314_v34  ;;  %v3526_v16 = vmax.f32 %v3257_v3, 0.0  ;;  %v11684_v3 = vld [vmem:[%s16758_s6 + $0xa4] ss:$8 sps:$4 sm:$0xff]  }
 0x3cd   : > { %v3527_v48 = vmax.f32 %v3259_v11, 0.0  ;;  %10718 = vmatmul.mubr.msk.bf16.gmra.mrb[12].mxu1 %vm782_vm2, %v12300_v24 }
 0x3ce   : > { %v3528_v56 = vmax.f32 %v3261_v28, 0.0  ;;  %4576 = vmatprep.mubr.bf16.mxu1 %v16818_v57  ;;  %5030 = vmatpush1.bf16.msra.mxu1 %v11670_v23  ;;  %v11682_v28 = vld [vmem:[%s16758_s6 + $0xa0] ss:$8 sps:$4 sm:$0xff]  }
 0x3cf   : > { %v3670_v63 = vpack.c.bf16 %v3527_v48, %v3525_v9  ;;  %5031 = vmatprep.subr.bf16.mxu1 %v11675_v25 }
 0x3d0   : > { %v3264_v27 = vpop.f32.mrb[164].mxu1  ;;  %v3671_v44 = vpack.c.bf16 %v3528_v56, %v3526_v16 }
 0x3d1   : > { %v3265_v5 = vadd.f32 %v3264_v27, %v13310_v32  ;;  %v3266_v24 = vpop.f32.mrb[165].mxu1 }
 0x3d2   : > { %v3267_v8 = vadd.f32 %v3266_v24, %v13314_v34  ;;  %v3268_v7 = vpop.f32.mrb[166].mxu1  ;;  %4003 = vmatprep.mubr.bf16.mxu0 %v3671_v44  ;;  %5032 = vmatpush1.bf16.msra.mxu1 %v11673_v18 }
 0x3d3   : > { %v3269_v33 = vadd.f32 %v3268_v7, %v13310_v32  ;;  %v3270_v53 = vpop.f32.mrb[167].mxu1  ;;  %4004 = vmatmul.mubr.bf16.gmra.mrb[32].mxu0 %v3670_v63  ;;  %5033 = vmatprep.subr.bf16.mxu1 %v11678_v20  ;;  %v3529_v39 = vmax.f32 %v3265_v5, 0.0 }
 0x3d4   : > { %v3271_v41 = vadd.f32 %v3270_v53, %v13314_v34  ;;  %v3530_v54 = vmax.f32 %v3267_v8, 0.0 }
 0x3d5   : > { %v3531_v13 = vmax.f32 %v3269_v33, 0.0  ;;  %10719 = vmatmul.mubr.msk.bf16.gmra.mrb[16].mxu1 %vm782_vm2, %v12313_v29 }
 0x3d6   : > { %v3532_v10 = vmax.f32 %v3271_v41, 0.0  ;;  %4586 = vmatprep.mubr.bf16.mxu1 %v16818_v57  ;;  %5034 = vmatpush1.bf16.msra.mxu1 %v11676_v62 }
 0x3d7   : > { %v3672_v21 = vpack.c.bf16 %v3531_v13, %v3529_v39  ;;  %5035 = vmatprep.subr.bf16.mxu1 %v11681_v15 }
 0x3d8   : > { %v3274_v52 = vpop.f32.mrb[168].mxu1  ;;  %v3673_v23 = vpack.c.bf16 %v3532_v10, %v3530_v54  ;;  %v11685_v10 = vld [vmem:[%s16758_s6 + $0xb0] ss:$8 sps:$4 sm:$0xff]  }
 0x3d9   : > { %v3275_v11 = vadd.f32 %v3274_v52, %v13310_v32  ;;  %v3276_v29 = vpop.f32.mrb[169].mxu1 }
 0x3da   : > { %v3277_v60 = vadd.f32 %v3276_v29, %v13314_v34  ;;  %v3278_v25 = vpop.f32.mrb[170].mxu1  ;;  %4013 = vmatprep.mubr.bf16.mxu0 %v3673_v23  ;;  %5036 = vmatpush1.bf16.msra.mxu1 %v11679_v6  ;;  %v11687_v6 = vld [vmem:[%s16758_s6 + $0xb4] ss:$8 sps:$4 sm:$0xff]  }
 0x3db   : > { %v3279_v9 = vadd.f32 %v3278_v25, %v13310_v32  ;;  %v3280_v48 = vpop.f32.mrb[171].mxu1  ;;  %4014 = vmatmul.mubr.bf16.gmra.mrb[36].mxu0 %v3672_v21  ;;  %5037 = vmatprep.subr.bf16.mxu1 %v11684_v3  ;;  %v3533_v56 = vmax.f32 %v3275_v11, 0.0 }
 0x3dc   : > { %v3281_v16 = vadd.f32 %v3280_v48, %v13314_v34  ;;  %v3534_v63 = vmax.f32 %v3277_v60, 0.0 }
 0x3dd   : > { %v3535_v18 = vmax.f32 %v3279_v9, 0.0  ;;  %10720 = vmatmul.mubr.msk.bf16.gmra.mrb[20].mxu1 %vm782_vm2, %v12332_v36 }
 0x3de   : > { %v3536_v20 = vmax.f32 %v3281_v16, 0.0  ;;  %4596 = vmatprep.mubr.bf16.mxu1 %v16818_v57  ;;  %5038 = vmatpush1.bf16.msra.mxu1 %v11682_v28 }
 0x3df   : > { %v3674_v27 = vpack.c.bf16 %v3535_v18, %v3533_v56  ;;  %5039 = vmatprep.subr.bf16.mxu1 %v11687_v6 }
 0x3e0   : > { %v3284_v44 = vpop.f32.mrb[172].mxu1  ;;  %v3675_v5 = vpack.c.bf16 %v3536_v20, %v3534_v63 }
 0x3e1   : > { %v3285_v24 = vadd.f32 %v3284_v44, %v13310_v32  ;;  %v3286_v8 = vpop.f32.mrb[173].mxu1 }
 0x3e2   : > { %v3287_v7 = vadd.f32 %v3286_v8, %v13314_v34  ;;  %v3288_v62 = vpop.f32.mrb[174].mxu1  ;;  %4023 = vmatprep.mubr.bf16.mxu0 %v3675_v5  ;;  %5040 = vmatpush1.bf16.msra.mxu1 %v11685_v10 }
 0x3e3   : > { %v3289_v33 = vadd.f32 %v3288_v62, %v13310_v32  ;;  %v3290_v53 = vpop.f32.mrb[175].mxu1  ;;  %4024 = vmatmul.mubr.bf16.gmra.mrb[40].mxu0 %v3674_v27  ;;  %v3537_v15 = vmax.f32 %v3285_v24, 0.0 }
 0x3e4   : > { %v3291_v36 = vadd.f32 %v3290_v53, %v13314_v34  ;;  %v3538_v39 = vmax.f32 %v3287_v7, 0.0 }
 0x3e5   : > { %v3539_v41 = vmax.f32 %v3289_v33, 0.0  ;;  %10721 = vmatmul.mubr.msk.bf16.gmra.mrb[24].mxu1 %vm782_vm2, %v12351_v43 }
 0x3e6   : > { %v3540_v13 = vmax.f32 %v3291_v36, 0.0  ;;  %4606 = vmatprep.mubr.bf16.mxu1 %v16818_v57 }
 0x3e7   : > { %v3676_v54 = vpack.c.bf16 %v3539_v41, %v3537_v15  ;;  %v11688_v15 = vld [vmem:[%s16758_s6 + $0xc0] ss:$8 sps:$4 sm:$0xff]   ;;  %v11690_v41 = vld [vmem:[%s16758_s6 + $0xc4] ss:$8 sps:$4 sm:$0xff]  }
 0x3e8   : > { %v3294_v21 = vpop.f32.mrb[176].mxu1  ;;  %v3677_v3 = vpack.c.bf16 %v3540_v13, %v3538_v39  ;;  %5041 = vmatprep.subr.bf16.mxu1 %v11690_v41 }
 0x3e9   : > { %v3295_v52 = vadd.f32 %v3294_v21, %v13310_v32  ;;  %v3296_v23 = vpop.f32.mrb[177].mxu1  ;;  %5042 = vmatpush1.bf16.msra.mxu1 %v11688_v15 }
 0x3ea   : > { %v3297_v43 = vadd.f32 %v3296_v23, %v13314_v34  ;;  %v3298_v11 = vpop.f32.mrb[178].mxu1  ;;  %4033 = vmatprep.mubr.bf16.mxu0 %v3677_v3 }
 0x3eb   : > { %v3299_v29 = vadd.f32 %v3298_v11, %v13310_v32  ;;  %v3300_v60 = vpop.f32.mrb[179].mxu1  ;;  %4034 = vmatmul.mubr.bf16.gmra.mrb[44].mxu0 %v3676_v54  ;;  %v3541_v28 = vmax.f32 %v3295_v52, 0.0 }
 0x3ec   : > { %v3301_v25 = vadd.f32 %v3300_v60, %v13314_v34  ;;  %v3542_v48 = vmax.f32 %v3297_v43, 0.0 }
 0x3ed   : > { %v3543_v9 = vmax.f32 %v3299_v29, 0.0  ;;  %10722 = vmatmul.mubr.msk.bf16.gmra.mrb[28].mxu1 %vm782_vm2, %v12370_v50 }
 0x3ee   : > { %v3544_v16 = vmax.f32 %v3301_v25, 0.0  ;;  %4616 = vmatprep.mubr.bf16.mxu1 %v16818_v57 }
 0x3ef   : > { %v3678_v56 = vpack.c.bf16 %v3543_v9, %v3541_v28 }
 0x3f0   : > { %v3304_v18 = vpop.f32.mrb[180].mxu1  ;;  %v3679_v63 = vpack.c.bf16 %v3544_v16, %v3542_v48 }
 0x3f1   : > { %v3305_v20 = vadd.f32 %v3304_v18, %v13310_v32  ;;  %v3306_v27 = vpop.f32.mrb[181].mxu1 }
 0x3f2   : > { %v3307_v44 = vadd.f32 %v3306_v27, %v13314_v34  ;;  %v3308_v5 = vpop.f32.mrb[182].mxu1  ;;  %4043 = vmatprep.mubr.bf16.mxu0 %v3679_v63 }
 0x3f3   : > { %v3309_v24 = vadd.f32 %v3308_v5, %v13310_v32  ;;  %v3310_v8 = vpop.f32.mrb[183].mxu1  ;;  %4044 = vmatmul.mubr.bf16.gmra.mrb[48].mxu0 %v3678_v56  ;;  %v3545_v7 = vmax.f32 %v3305_v20, 0.0 }
 0x3f4   : > { %v3311_v50 = vadd.f32 %v3310_v8, %v13314_v34  ;;  %v3546_v33 = vmax.f32 %v3307_v44, 0.0  ;;  %v11691_v8 = vld [vmem:[%s16758_s6 + $0xd0] ss:$8 sps:$4 sm:$0xff]  }
 0x3f5   : > { %v3547_v62 = vmax.f32 %v3309_v24, 0.0  ;;  %10723 = vmatmul.mubr.msk.bf16.gmra.mrb[32].mxu1 %vm782_vm2, %v12395_v59 }
 0x3f6   : > { %v3548_v53 = vmax.f32 %v3311_v50, 0.0  ;;  %4626 = vmatprep.mubr.bf16.mxu1 %v16818_v57  ;;  %v11693_v50 = vld [vmem:[%s16758_s6 + $0xd4] ss:$8 sps:$4 sm:$0xff]  }
 0x3f7   : > { %v3680_v36 = vpack.c.bf16 %v3547_v62, %v3545_v7  ;;  %5043 = vmatprep.subr.bf16.mxu1 %v11693_v50 }
 0x3f8   : > { %v3314_v39 = vpop.f32.mrb[184].mxu1  ;;  %v3681_v13 = vpack.c.bf16 %v3548_v53, %v3546_v33  ;;  %5044 = vmatpush1.bf16.msra.mxu1 %v11691_v8 }
 0x3f9   : > { %v3315_v54 = vadd.f32 %v3314_v39, %v13310_v32  ;;  %v3316_v10 = vpop.f32.mrb[185].mxu1 }
 0x3fa   : > { %v3317_v59 = vadd.f32 %v3316_v10, %v13314_v34  ;;  %v3318_v6 = vpop.f32.mrb[186].mxu1  ;;  %4053 = vmatprep.mubr.bf16.mxu0 %v3681_v13 }
 0x3fb   : > { %v3319_v21 = vadd.f32 %v3318_v6, %v13310_v32  ;;  %v3320_v3 = vpop.f32.mrb[187].mxu1  ;;  %4054 = vmatmul.mubr.bf16.gmra.mrb[52].mxu0 %v3680_v36  ;;  %v3549_v23 = vmax.f32 %v3315_v54, 0.0 }
 0x3fc   : > { %v3321_v52 = vadd.f32 %v3320_v3, %v13314_v34  ;;  %v3550_v11 = vmax.f32 %v3317_v59, 0.0 }
 0x3fd   : > { %v3551_v43 = vmax.f32 %v3319_v21, 0.0  ;;  %10724 = vmatmul.mubr.msk.bf16.gmra.mrb[36].mxu1 %vm782_vm2, %v12414_v2 }
 0x3fe   : > { %v3552_v29 = vmax.f32 %v3321_v52, 0.0  ;;  %4636 = vmatprep.mubr.bf16.mxu1 %v16818_v57 }
 0x3ff   : > { %v3682_v60 = vpack.c.bf16 %v3551_v43, %v3549_v23 }
 0x400   : > { %v3324_v25 = vpop.f32.mrb[188].mxu1  ;;  %v3683_v28 = vpack.c.bf16 %v3552_v29, %v3550_v11 }
 0x401   : > { %v3325_v9 = vadd.f32 %v3324_v25, %v13310_v32  ;;  %v3326_v48 = vpop.f32.mrb[189].mxu1 }
 0x402   : > { %v3327_v16 = vadd.f32 %v3326_v48, %v13314_v34  ;;  %v3328_v56 = vpop.f32.mrb[190].mxu1  ;;  %4063 = vmatprep.mubr.bf16.mxu0 %v3683_v28  ;;  %v11696_v48 = vld [vmem:[%s16756_s4 + $0x404] ss:$8 sps:$4 sm:$0xff]  }
 0x403   : > { %v3329_v18 = vadd.f32 %v3328_v56, %v13310_v32  ;;  %v3330_v63 = vpop.f32.mrb[191].mxu1  ;;  %4064 = vmatmul.mubr.bf16.gmra.mrb[56].mxu0 %v3682_v60  ;;  %v3553_v20 = vmax.f32 %v3325_v9, 0.0  ;;  %v11694_v9 = vld [vmem:[%s16756_s4 + $0x400] ss:$8 sps:$4 sm:$0xff]   ;;  %5908 = vmatprep.subr.bf16.mxu0 %v11696_v48 }
 0x404   : > { %v3331_v2 = vadd.f32 %v3330_v63, %v13314_v34  ;;  %v3554_v44 = vmax.f32 %v3327_v16, 0.0  ;;  %5909 = vmatpush1.bf16.msra.mxu0 %v11694_v9 }
 0x405   : > { %v3555_v27 = vmax.f32 %v3329_v18, 0.0  ;;  %10725 = vmatmul.mubr.msk.bf16.gmra.mrb[40].mxu1 %vm782_vm2, %v12439_v14  ;;  %v11697_v18 = vld [vmem:[%s16758_s6 + $0xe0] ss:$8 sps:$4 sm:$0xff]  }
 0x406   : > { %v3556_v5 = vmax.f32 %v3331_v2, 0.0  ;;  %4646 = vmatprep.mubr.bf16.mxu1 %v16818_v57 }
 0x407   : > { %v3684_v24 = vpack.c.bf16 %v3555_v27, %v3553_v20 }
 0x408   : > { %v3334_v7 = vpop.f32.mrb[192].mxu1  ;;  %v3685_v62 = vpack.c.bf16 %v3556_v5, %v3554_v44 }
 0x409   : > { %v3335_v33 = vadd.f32 %v3334_v7, %v13310_v32  ;;  %v3336_v53 = vpop.f32.mrb[193].mxu1 }
 0x40a   : > { %v3337_v14 = vadd.f32 %v3336_v53, %v13314_v34  ;;  %v3338_v36 = vpop.f32.mrb[194].mxu1  ;;  %4073 = vmatprep.mubr.bf16.mxu0 %v3685_v62 }
 0x40b   : > { %v3339_v15 = vadd.f32 %v3338_v36, %v13310_v32  ;;  %v3340_v41 = vpop.f32.mrb[195].mxu1  ;;  %4074 = vmatmul.mubr.bf16.gmra.mrb[60].mxu0 %v3684_v24  ;;  %v3557_v13 = vmax.f32 %v3335_v33, 0.0 }
 0x40c   : > { %v3341_v39 = vadd.f32 %v3340_v41, %v13314_v34  ;;  %v3558_v10 = vmax.f32 %v3337_v14, 0.0 }
 0x40d   : > { %v3559_v54 = vmax.f32 %v3339_v15, 0.0  ;;  %10726 = vmatmul.mubr.msk.bf16.gmra.mrb[44].mxu1 %vm782_vm2, %v12452_v22 }
 0x40e   : > { %v3560_v59 = vmax.f32 %v3341_v39, 0.0  ;;  %4656 = vmatprep.mubr.bf16.mxu1 %v16818_v57 }
 0x40f   : > { %v3686_v6 = vpack.c.bf16 %v3559_v54, %v3557_v13 }
 0x410   : > { %v3344_v21 = vpop.f32.mrb[196].mxu1  ;;  %v3687_v3 = vpack.c.bf16 %v3560_v59, %v3558_v10 }
 0x411   : > { %v3345_v52 = vadd.f32 %v3344_v21, %v13310_v32  ;;  %v3346_v23 = vpop.f32.mrb[197].mxu1 }
 0x412   : > { %v3347_v43 = vadd.f32 %v3346_v23, %v13314_v34  ;;  %v3348_v11 = vpop.f32.mrb[198].mxu1  ;;  %4083 = vmatprep.mubr.bf16.mxu0 %v3687_v3  ;;  %v11702_v23 = vld [vmem:[%s16756_s4 + $0x414] ss:$8 sps:$4 sm:$0xff]  }
 0x413   : > { %v3349_v29 = vadd.f32 %v3348_v11, %v13310_v32  ;;  %v3350_v60 = vpop.f32.mrb[199].mxu1  ;;  %4084 = vmatmul.mubr.bf16.gmra.mrb[64].mxu0 %v3686_v6  ;;  %v3561_v25 = vmax.f32 %v3345_v52, 0.0  ;;  %v11700_v52 = vld [vmem:[%s16756_s4 + $0x410] ss:$8 sps:$4 sm:$0xff]   ;;  %5910 = vmatprep.subr.bf16.mxu0 %v11702_v23 }
 0x414   : > { %v3351_v22 = vadd.f32 %v3350_v60, %v13314_v34  ;;  %v3562_v16 = vmax.f32 %v3347_v43, 0.0  ;;  %5911 = vmatpush1.bf16.msra.mxu0 %v11700_v52 }
 0x415   : > { %v3563_v28 = vmax.f32 %v3349_v29, 0.0  ;;  %10727 = vmatmul.mubr.msk.bf16.gmra.mrb[48].mxu1 %vm782_vm2, %v12471_v31  ;;  %v11699_v31 = vld [vmem:[%s16758_s6 + $0xe4] ss:$8 sps:$4 sm:$0xff]   ;;  %v11703_v29 = vld [vmem:[%s16758_s6 + $0xf0] ss:$8 sps:$4 sm:$0xff]  }
 0x416   : > { %v3564_v56 = vmax.f32 %v3351_v22, 0.0  ;;  %4666 = vmatprep.mubr.bf16.mxu1 %v16818_v57  ;;  %5045 = vmatprep.subr.bf16.mxu1 %v11699_v31 }
 0x417   : > { %v3688_v63 = vpack.c.bf16 %v3563_v28, %v3561_v25  ;;  %5046 = vmatpush1.bf16.msra.mxu1 %v11697_v18 }
 0x418   : > { %v3354_v2 = vpop.f32.mrb[200].mxu1  ;;  %v3689_v20 = vpack.c.bf16 %v3564_v56, %v3562_v16 }
 0x419   : > { %v3355_v27 = vadd.f32 %v3354_v2, %v13310_v32  ;;  %v3356_v44 = vpop.f32.mrb[201].mxu1 }
 0x41a   : > { %v3357_v5 = vadd.f32 %v3356_v44, %v13314_v34  ;;  %v3358_v24 = vpop.f32.mrb[202].mxu1  ;;  %4093 = vmatprep.mubr.bf16.mxu0 %v3689_v20 }
 0x41b   : > { %v3359_v8 = vadd.f32 %v3358_v24, %v13310_v32  ;;  %v3360_v50 = vpop.f32.mrb[203].mxu1  ;;  %4094 = vmatmul.mubr.bf16.gmra.mrb[68].mxu0 %v3688_v63  ;;  %v3565_v62 = vmax.f32 %v3355_v27, 0.0 }
 0x41c   : > { %v3361_v7 = vadd.f32 %v3360_v50, %v13314_v34  ;;  %v3566_v53 = vmax.f32 %v3357_v5, 0.0 }
 0x41d   : > { %v3567_v33 = vmax.f32 %v3359_v8, 0.0  ;;  %10728 = vmatmul.mubr.msk.bf16.gmra.mrb[52].mxu1 %vm782_vm2, %v12484_v37 }
 0x41e   : > { %v3568_v14 = vmax.f32 %v3361_v7, 0.0  ;;  %4676 = vmatprep.mubr.bf16.mxu1 %v16818_v57 }
 0x41f   : > { %v3690_v36 = vpack.c.bf16 %v3567_v33, %v3565_v62 }
 0x420   : > { %v3364_v15 = vpop.f32.mrb[204].mxu1  ;;  %v3691_v41 = vpack.c.bf16 %v3568_v14, %v3566_v53 }
 0x421   : > { %v3365_v39 = vadd.f32 %v3364_v15, %v13310_v32  ;;  %v3366_v13 = vpop.f32.mrb[205].mxu1  ;;  %v11706_v15 = vld [vmem:[%s16756_s4 + $0x420] ss:$8 sps:$4 sm:$0xff]  }
 0x422   : > { %v3367_v54 = vadd.f32 %v3366_v13, %v13314_v34  ;;  %v3368_v10 = vpop.f32.mrb[206].mxu1  ;;  %4103 = vmatprep.mubr.bf16.mxu0 %v3691_v41  ;;  %v11708_v41 = vld [vmem:[%s16756_s4 + $0x424] ss:$8 sps:$4 sm:$0xff]  }
 0x423   : > { %v3369_v59 = vadd.f32 %v3368_v10, %v13310_v32  ;;  %v3370_v6 = vpop.f32.mrb[207].mxu1  ;;  %4104 = vmatmul.mubr.bf16.gmra.mrb[72].mxu0 %v3690_v36  ;;  %v3569_v21 = vmax.f32 %v3365_v39, 0.0  ;;  %5912 = vmatprep.subr.bf16.mxu0 %v11708_v41 }
 0x424   : > { %v3371_v37 = vadd.f32 %v3370_v6, %v13314_v34  ;;  %v3570_v43 = vmax.f32 %v3367_v54, 0.0  ;;  %5913 = vmatpush1.bf16.msra.mxu0 %v11706_v15 }
 0x425   : > { %v3571_v3 = vmax.f32 %v3369_v59, 0.0  ;;  %10729 = vmatmul.mubr.msk.bf16.gmra.mrb[56].mxu1 %vm782_vm2, %v12491_v40  ;;  %v11705_v40 = vld [vmem:[%s16758_s6 + $0xf4] ss:$8 sps:$4 sm:$0xff]  }
 0x426   : > { %v3572_v11 = vmax.f32 %v3371_v37, 0.0  ;;  %4686 = vmatprep.mubr.bf16.mxu1 %v16818_v57  ;;  %5047 = vmatprep.subr.bf16.mxu1 %v11705_v40 }
 0x427   : > { %v3692_v60 = vpack.c.bf16 %v3571_v3, %v3569_v21  ;;  %5048 = vmatpush1.bf16.msra.mxu1 %v11703_v29 }
 0x428   : > { %v3374_v22 = vpop.f32.mrb[208].mxu1  ;;  %v3693_v25 = vpack.c.bf16 %v3572_v11, %v3570_v43 }
 0x429   : > { %v3375_v28 = vadd.f32 %v3374_v22, %v13310_v32  ;;  %v3376_v9 = vpop.f32.mrb[209].mxu1 }
 0x42a   : > { %v3377_v48 = vadd.f32 %v3376_v9, %v13314_v34  ;;  %v3378_v16 = vpop.f32.mrb[210].mxu1  ;;  %4113 = vmatprep.mubr.bf16.mxu0 %v3693_v25 }
 0x42b   : > { %v3379_v56 = vadd.f32 %v3378_v16, %v13310_v32  ;;  %v3380_v18 = vpop.f32.mrb[211].mxu1  ;;  %4114 = vmatmul.mubr.bf16.gmra.mrb[76].mxu0 %v3692_v60  ;;  %v3573_v63 = vmax.f32 %v3375_v28, 0.0 }
 0x42c   : > { %v3381_v31 = vadd.f32 %v3380_v18, %v13314_v34  ;;  %v3574_v20 = vmax.f32 %v3377_v48, 0.0 }
 0x42d   : > { %v3575_v2 = vmax.f32 %v3379_v56, 0.0  ;;  %10730 = vmatmul.mubr.msk.bf16.gmra.mrb[60].mxu1 %vm782_vm2, %v12504_v46 }
 0x42e   : > { %v3576_v27 = vmax.f32 %v3381_v31, 0.0  ;;  %4696 = vmatprep.mubr.bf16.mxu1 %v16818_v57 }
 0x42f   : > { %v3694_v44 = vpack.c.bf16 %v3575_v2, %v3573_v63  ;;  %v11709_v2 = vld [vmem:[%s16756_s4 + $0x430] ss:$8 sps:$4 sm:$0xff]  }
 0x430   : > { %v3384_v5 = vpop.f32.mrb[212].mxu1  ;;  %v3695_v24 = vpack.c.bf16 %v3576_v27, %v3574_v20  ;;  %v11711_v20 = vld [vmem:[%s16756_s4 + $0x434] ss:$8 sps:$4 sm:$0xff]  }
 0x431   : > { %v3385_v8 = vadd.f32 %v3384_v5, %v13310_v32  ;;  %v3386_v50 = vpop.f32.mrb[213].mxu1  ;;  %5914 = vmatprep.subr.bf16.mxu0 %v11711_v20 }
 0x432   : > { %v3387_v7 = vadd.f32 %v3386_v50, %v13314_v34  ;;  %v3388_v62 = vpop.f32.mrb[214].mxu1  ;;  %4123 = vmatprep.mubr.bf16.mxu0 %v3695_v24  ;;  %5915 = vmatpush1.bf16.msra.mxu0 %v11709_v2 }
 0x433   : > { %v3389_v33 = vadd.f32 %v3388_v62, %v13310_v32  ;;  %v3390_v53 = vpop.f32.mrb[215].mxu1  ;;  %4124 = vmatmul.mubr.bf16.gmra.mrb[80].mxu0 %v3694_v44  ;;  %v3577_v14 = vmax.f32 %v3385_v8, 0.0 }
 0x434   : > { %v3391_v46 = vadd.f32 %v3390_v53, %v13314_v34  ;;  %v3578_v39 = vmax.f32 %v3387_v7, 0.0 }
 0x435   : > { %v3579_v36 = vmax.f32 %v3389_v33, 0.0  ;;  %10731 = vmatmul.mubr.msk.bf16.gmra.mrb[64].mxu1 %vm782_vm2, %v12511_v49 }
 0x436   : > { %v3580_v13 = vmax.f32 %v3391_v46, 0.0  ;;  %4706 = vmatprep.mubr.bf16.mxu1 %v16818_v57 }
 0x437   : > { %v3696_v54 = vpack.c.bf16 %v3579_v36, %v3577_v14 }
 0x438   : > { %v3394_v10 = vpop.f32.mrb[216].mxu1  ;;  %v3697_v59 = vpack.c.bf16 %v3580_v13, %v3578_v39 }
 0x439   : > { %v3395_v6 = vadd.f32 %v3394_v10, %v13310_v32  ;;  %v3396_v49 = vpop.f32.mrb[217].mxu1 }
 0x43a   : > { %v3397_v37 = vadd.f32 %v3396_v49, %v13314_v34  ;;  %v3398_v21 = vpop.f32.mrb[218].mxu1  ;;  %4133 = vmatprep.mubr.bf16.mxu0 %v3697_v59 }
 0x43b   : > { %v3399_v3 = vadd.f32 %v3398_v21, %v13310_v32  ;;  %v3400_v52 = vpop.f32.mrb[219].mxu1  ;;  %4134 = vmatmul.mubr.bf16.gmra.mrb[84].mxu0 %v3696_v54  ;;  %v3581_v43 = vmax.f32 %v3395_v6, 0.0 }
 0x43c   : > { %v3401_v23 = vadd.f32 %v3400_v52, %v13314_v34  ;;  %v3582_v29 = vmax.f32 %v3397_v37, 0.0 }
 0x43d   : > { %v3583_v11 = vmax.f32 %v3399_v3, 0.0  ;;  %10732 = vmatmul.mubr.msk.bf16.gmra.mrb[68].mxu1 %vm782_vm2, %v12524_v55 }
 0x43e   : > { %v3584_v40 = vmax.f32 %v3401_v23, 0.0  ;;  %4716 = vmatprep.mubr.bf16.mxu1 %v16818_v57  ;;  %v11712_v23 = vld [vmem:[%s16756_s4 + $0x440] ss:$8 sps:$4 sm:$0xff]  }
 0x43f   : > { %v3698_v60 = vpack.c.bf16 %v3583_v11, %v3581_v43  ;;  %v11714_v43 = vld [vmem:[%s16756_s4 + $0x444] ss:$8 sps:$4 sm:$0xff]  }
 0x440   : > { %v3404_v22 = vpop.f32.mrb[220].mxu1  ;;  %v3699_v25 = vpack.c.bf16 %v3584_v40, %v3582_v29  ;;  %5916 = vmatprep.subr.bf16.mxu0 %v11714_v43 }
 0x441   : > { %v3405_v28 = vadd.f32 %v3404_v22, %v13310_v32  ;;  %v3406_v9 = vpop.f32.mrb[221].mxu1  ;;  %5917 = vmatpush1.bf16.msra.mxu0 %v11712_v23 }
 0x442   : > { %v3407_v48 = vadd.f32 %v3406_v9, %v13314_v34  ;;  %v3408_v16 = vpop.f32.mrb[222].mxu1  ;;  %4143 = vmatprep.mubr.bf16.mxu0 %v3699_v25 }
 0x443   : > { %v3409_v56 = vadd.f32 %v3408_v16, %v13310_v32  ;;  %v3410_v18 = vpop.f32.mrb[223].mxu1  ;;  %4144 = vmatmul.mubr.bf16.gmra.mrb[88].mxu0 %v3698_v60  ;;  %v3585_v31 = vmax.f32 %v3405_v28, 0.0 }
 0x444   : > { %v3411_v55 = vadd.f32 %v3410_v18, %v13314_v34  ;;  %v3586_v27 = vmax.f32 %v3407_v48, 0.0 }
 0x445   : > { %v3587_v63 = vmax.f32 %v3409_v56, 0.0  ;;  %10733 = vmatmul.mubr.msk.bf16.gmra.mrb[72].mxu1 %vm782_vm2, %v12531_v58 }
 0x446   : > { %v3588_v44 = vmax.f32 %v3411_v55, 0.0  ;;  %4726 = vmatprep.mubr.bf16.mxu1 %v16818_v57 }
 0x447   : > { %v3700_v5 = vpack.c.bf16 %v3587_v63, %v3585_v31 }
 0x448   : > { %v3414_v24 = vpop.f32.mrb[224].mxu1  ;;  %v3701_v8 = vpack.c.bf16 %v3588_v44, %v3586_v27  ;;  %v10676_v44 = vld [vmem:[%s16757_s5 + $0x6] sm:$0x3] }
 0x449   : > { %v3415_v50 = vadd.f32 %v3414_v24, %v13310_v32  ;;  %v3416_v58 = vpop.f32.mrb[225].mxu1 }
 0x44a   : > { %v3417_v7 = vadd.f32 %v3416_v58, %v13314_v34  ;;  %v3418_v62 = vpop.f32.mrb[226].mxu1  ;;  %4153 = vmatprep.mubr.bf16.mxu0 %v3701_v8 }
 0x44b   : > { %v3419_v33 = vadd.f32 %v3418_v62, %v13310_v32  ;;  %v3420_v53 = vpop.f32.mrb[227].mxu1  ;;  %4154 = vmatmul.mubr.bf16.gmra.mrb[92].mxu0 %v3700_v5  ;;  %v3589_v14 = vmax.f32 %v3415_v50, 0.0 }
 0x44c   : > { %v3421_v46 = vadd.f32 %v3420_v53, %v13314_v34  ;;  %v3590_v15 = vmax.f32 %v3417_v7, 0.0  ;;  %v13637_v7 = vrot.slane %v10676_v44, %v12616_v47 }
 0x44d   : > { %v3591_v36 = vmax.f32 %v3419_v33, 0.0  ;;  %10734 = vmatmul.mubr.msk.bf16.gmra.mrb[76].mxu1 %vm782_vm2, %v12544_v0  ;;  %v13641_v33 = vrot.slane %v10676_v44, %v12622_v51 }
 0x44e   : > { %v3592_v41 = vmax.f32 %v3421_v46, 0.0  ;;  %4736 = vmatprep.mubr.bf16.mxu1 %v16818_v57 }
 0x44f   : > { %v3702_v39 = vpack.c.bf16 %v3591_v36, %v3589_v14  ;;  %v11715_v14 = vld [vmem:[%s16756_s4 + $0x450] ss:$8 sps:$4 sm:$0xff]   ;;  %v11717_v36 = vld [vmem:[%s16756_s4 + $0x454] ss:$8 sps:$4 sm:$0xff]  }
 0x450   : > { %v3424_v13 = vpop.f32.mrb[228].mxu1  ;;  %v3703_v54 = vpack.c.bf16 %v3592_v41, %v3590_v15  ;;  %5918 = vmatprep.subr.bf16.mxu0 %v11717_v36 }
 0x451   : > { %v3425_v10 = vadd.f32 %v3424_v13, %v13310_v32  ;;  %v3426_v59 = vpop.f32.mrb[229].mxu1  ;;  %5919 = vmatpush1.bf16.msra.mxu0 %v11715_v14 }
 0x452   : > { %v3427_v6 = vadd.f32 %v3426_v59, %v13314_v34  ;;  %v3428_v49 = vpop.f32.mrb[230].mxu1  ;;  %4163 = vmatprep.mubr.bf16.mxu0 %v3703_v54 }
 0x453   : > { %v3429_v37 = vadd.f32 %v3428_v49, %v13310_v32  ;;  %v3430_v21 = vpop.f32.mrb[231].mxu1  ;;  %4164 = vmatmul.mubr.bf16.gmra.mrb[96].mxu0 %v3702_v39  ;;  %v3593_v3 = vmax.f32 %v3425_v10, 0.0 }
 0x454   : > { %v3431_v0 = vadd.f32 %v3430_v21, %v13314_v34  ;;  %v3594_v11 = vmax.f32 %v3427_v6, 0.0 }
 0x455   : > { %v3595_v52 = vmax.f32 %v3429_v37, 0.0  ;;  %10735 = vmatmul.mubr.msk.bf16.gmra.mrb[80].mxu1 %vm782_vm2, %v12551_v4 }
 0x456   : > { %v3596_v29 = vmax.f32 %v3431_v0, 0.0  ;;  %4746 = vmatprep.mubr.bf16.mxu1 %v16818_v57 }
 0x457   : > { %v3704_v40 = vpack.c.bf16 %v3595_v52, %v3593_v3 }
 0x458   : > { %v3434_v60 = vpop.f32.mrb[232].mxu1  ;;  %v3705_v22 = vpack.c.bf16 %v3596_v29, %v3594_v11 }
 0x459   : > { %v3435_v25 = vadd.f32 %v3434_v60, %v13310_v32  ;;  %v3436_v4 = vpop.f32.mrb[233].mxu1 }
 0x45a   : > { %v3437_v28 = vadd.f32 %v3436_v4, %v13314_v34  ;;  %v3438_v9 = vpop.f32.mrb[234].mxu1  ;;  %4173 = vmatprep.mubr.bf16.mxu0 %v3705_v22 }
 0x45b   : > { %v3439_v48 = vadd.f32 %v3438_v9, %v13310_v32  ;;  %v3440_v16 = vpop.f32.mrb[235].mxu1  ;;  %4174 = vmatmul.mubr.bf16.gmra.mrb[100].mxu0 %v3704_v40  ;;  %v3597_v18 = vmax.f32 %v3435_v25, 0.0 }
 0x45c   : > { %v3441_v56 = vadd.f32 %v3440_v16, %v13314_v34  ;;  %v3598_v31 = vmax.f32 %v3437_v28, 0.0 }
 0x45d   : > { %v3599_v55 = vmax.f32 %v3439_v48, 0.0  ;;  %10736 = vmatmul.mubr.msk.bf16.gmra.mrb[84].mxu1 %vm782_vm2, %v12564_v12 }
 0x45e   : > { %v3600_v63 = vmax.f32 %v3441_v56, 0.0  ;;  %4756 = vmatprep.mubr.bf16.mxu1 %v16818_v57 }
 0x45f   : > { %v3706_v2 = vpack.c.bf16 %v3599_v55, %v3597_v18 }
 0x460   : > { %v3444_v20 = vpop.f32.mrb[236].mxu1  ;;  %v3707_v27 = vpack.c.bf16 %v3600_v63, %v3598_v31 }
 0x461   : > { %v3445_v5 = vadd.f32 %v3444_v20, %v13310_v32  ;;  %v3446_v24 = vpop.f32.mrb[237].mxu1 }
 0x462   : > { %v3447_v8 = vadd.f32 %v3446_v24, %v13314_v34  ;;  %v3448_v50 = vpop.f32.mrb[238].mxu1  ;;  %4183 = vmatprep.mubr.bf16.mxu0 %v3707_v27 }
 0x463   : > { %v3449_v12 = vadd.f32 %v3448_v50, %v13310_v32  ;;  %v3450_v58 = vpop.f32.mrb[239].mxu1  ;;  %4184 = vmatmul.mubr.bf16.gmra.mrb[104].mxu0 %v3706_v2  ;;  %v3601_v53 = vmax.f32 %v3445_v5, 0.0 }
 0x464   : > { %v3451_v62 = vadd.f32 %v3450_v58, %v13314_v34  ;;  %v3602_v15 = vmax.f32 %v3447_v8, 0.0 }
 0x465   : > { %v3603_v46 = vmax.f32 %v3449_v12, 0.0  ;;  %10737 = vmatmul.mubr.msk.bf16.gmra.mrb[88].mxu1 %vm782_vm2, %v12571_v17 }
 0x466   : > { %v3604_v41 = vmax.f32 %v3451_v62, 0.0  ;;  %v3925_v39 = vpop.f32.mrb[0].mxu0  ;;  %4766 = vmatprep.mubr.bf16.mxu1 %v16818_v57 }
 0x467   : > { %v3708_v13 = vpack.c.bf16 %v3603_v46, %v3601_v53  ;;  %v3926_v54 = vadd.f32 %v3925_v39, %v13637_v7  ;;  %v3927_v10 = vpop.f32.mrb[1].mxu0 }
 0x468   : > { %v3928_v17 = vadd.f32 %v3927_v10, %v13641_v33  ;;  %v3454_v59 = vpop.f32.mrb[240].mxu1  ;;  %v3929_v6 = vpop.f32.mrb[2].mxu0  ;;  %v3709_v49 = vpack.c.bf16 %v3604_v41, %v3602_v15 }
 0x469   : > { %v3455_v37 = vadd.f32 %v3454_v59, %v13310_v32  ;;  %v3930_v21 = vadd.f32 %v3929_v6, %v13637_v7  ;;  %v3456_v0 = vpop.f32.mrb[241].mxu1  ;;  %v3931_v3 = vpop.f32.mrb[3].mxu0  ;;  %v4244_v11 = vmax.f32 %v3926_v54, 0.0  ;;  %v11720_v59 = vld [vmem:[%s16756_s4 + $0x464] ss:$8 sps:$4 sm:$0xff]  }
 0x46a   : > { %v3457_v52 = vadd.f32 %v3456_v0, %v13314_v34  ;;  %v3932_v23 = vadd.f32 %v3931_v3, %v13641_v33  ;;  %v3458_v43 = vpop.f32.mrb[242].mxu1  ;;  %4193 = vmatprep.mubr.bf16.mxu0 %v3709_v49  ;;  %v4245_v22 = vmax.f32 %v3928_v17, 0.0  ;;  %v11718_v17 = vld [vmem:[%s16756_s4 + $0x460] ss:$8 sps:$4 sm:$0xff]   ;;  %5920 = vmatprep.subr.bf16.mxu0 %v11720_v59 }
 0x46b   : > { %v4246_v29 = vmax.f32 %v3930_v21, 0.0  ;;  %v3459_v40 = vadd.f32 %v3458_v43, %v13310_v32  ;;  %v3460_v60 = vpop.f32.mrb[243].mxu1  ;;  %4194 = vmatmul.mubr.bf16.gmra.mrb[108].mxu0 %v3708_v13  ;;  %v3605_v28 = vmax.f32 %v3455_v37, 0.0 }
 0x46c   : > { %v4247_v25 = vmax.f32 %v3932_v23, 0.0  ;;  %v3461_v4 = vadd.f32 %v3460_v60, %v13314_v34  ;;  %v3606_v16 = vmax.f32 %v3457_v52, 0.0  ;;  %5921 = vmatpush1.bf16.msra.mxu0 %v11718_v17 }
 0x46d   : > { %v13660_v9 = vpack.c.bf16 %v4246_v29, %v4244_v11  ;;  %v3607_v48 = vmax.f32 %v3459_v40, 0.0  ;;  %10738 = vmatmul.mubr.msk.bf16.gmra.mrb[92].mxu1 %vm782_vm2, %v12584_v26 }
 0x46e   : > { %v3608_v56 = vmax.f32 %v3461_v4, 0.0  ;;  %v3935_v18 = vpop.f32.mrb[4].mxu0  ;;  %4776 = vmatprep.mubr.bf16.mxu1 %v16818_v57  ;;  %v13665_v55 = vpack.c.bf16 %v4247_v25, %v4245_v22 }
 0x46f   : > { %v3710_v31 = vpack.c.bf16 %v3607_v48, %v3605_v28  ;;  %v3936_v63 = vadd.f32 %v3935_v18, %v13637_v7  ;;  %v3937_v2 = vpop.f32.mrb[5].mxu0 }
 0x470   : > { %v3938_v20 = vadd.f32 %v3937_v2, %v13641_v33  ;;  %v3464_v27 = vpop.f32.mrb[244].mxu1  ;;  %v3939_v44 = vpop.f32.mrb[6].mxu0  ;;  %v3711_v5 = vpack.c.bf16 %v3608_v56, %v3606_v16 }
 0x471   : > { %v3465_v24 = vadd.f32 %v3464_v27, %v13310_v32  ;;  %v3940_v26 = vadd.f32 %v3939_v44, %v13637_v7  ;;  %v3466_v8 = vpop.f32.mrb[245].mxu1  ;;  %v3941_v50 = vpop.f32.mrb[7].mxu0  ;;  %v4248_v53 = vmax.f32 %v3936_v63, 0.0 }
 0x472   : > { %v3467_v12 = vadd.f32 %v3466_v8, %v13314_v34  ;;  %v3942_v58 = vadd.f32 %v3941_v50, %v13641_v33  ;;  %v3468_v62 = vpop.f32.mrb[246].mxu1  ;;  %4203 = vmatprep.mubr.bf16.mxu0 %v3711_v5  ;;  %v4249_v15 = vmax.f32 %v3938_v20, 0.0 }
 0x473   : > { %v4250_v46 = vmax.f32 %v3940_v26, 0.0  ;;  %v3469_v14 = vadd.f32 %v3468_v62, %v13310_v32  ;;  %v3470_v36 = vpop.f32.mrb[247].mxu1  ;;  %4204 = vmatmul.mubr.bf16.gmra.mrb[112].mxu0 %v3710_v31  ;;  %v3609_v13 = vmax.f32 %v3465_v24, 0.0 }
 0x474   : > { %v4251_v41 = vmax.f32 %v3942_v58, 0.0  ;;  %v3471_v39 = vadd.f32 %v3470_v36, %v13314_v34  ;;  %v3610_v6 = vmax.f32 %v3467_v12, 0.0 }
 0x475   : > { %v13675_v54 = vpack.c.bf16 %v4250_v46, %v4248_v53  ;;  %v3611_v10 = vmax.f32 %v3469_v14, 0.0  ;;  %10739 = vmatmul.mubr.msk.bf16.gmra.mrb[96].mxu1 %vm782_vm2, %v12591_v30 }
 0x476   : > { %v3612_v49 = vmax.f32 %v3471_v39, 0.0  ;;  %v3945_v37 = vpop.f32.mrb[8].mxu0  ;;  %4786 = vmatprep.mubr.bf16.mxu1 %v16818_v57  ;;  %v13686_v21 = vpack.c.bf16 %v4251_v41, %v4249_v15 }
 0x477   : > { %v3712_v0 = vpack.c.bf16 %v3611_v10, %v3609_v13  ;;  %v3946_v3 = vadd.f32 %v3945_v37, %v13637_v7  ;;  %v3947_v52 = vpop.f32.mrb[9].mxu0 }
 0x478   : > { %v3948_v30 = vadd.f32 %v3947_v52, %v13641_v33  ;;  %v3474_v23 = vpop.f32.mrb[248].mxu1  ;;  %v3949_v43 = vpop.f32.mrb[10].mxu0  ;;  %v3713_v11 = vpack.c.bf16 %v3612_v49, %v3610_v6 }
 0x479   : > { %v3475_v29 = vadd.f32 %v3474_v23, %v13310_v32  ;;  %v3950_v40 = vadd.f32 %v3949_v43, %v13637_v7  ;;  %v3476_v60 = vpop.f32.mrb[249].mxu1  ;;  %v3951_v22 = vpop.f32.mrb[11].mxu0  ;;  %v4252_v48 = vmax.f32 %v3946_v3, 0.0  ;;  %v11721_v43 = vld [vmem:[%s16756_s4 + $0x470] ss:$8 sps:$4 sm:$0xff]  }
 0x47a   : > { %v3477_v25 = vadd.f32 %v3476_v60, %v13314_v34  ;;  %v3952_v4 = vadd.f32 %v3951_v22, %v13641_v33  ;;  %v3478_v28 = vpop.f32.mrb[250].mxu1  ;;  %4213 = vmatprep.mubr.bf16.mxu0 %v3713_v11  ;;  %v4253_v31 = vmax.f32 %v3948_v30, 0.0 }
 0x47b   : > { %v4254_v16 = vmax.f32 %v3950_v40, 0.0  ;;  %v3479_v56 = vadd.f32 %v3478_v28, %v13310_v32  ;;  %v3480_v18 = vpop.f32.mrb[251].mxu1  ;;  %4214 = vmatmul.mubr.bf16.gmra.mrb[116].mxu0 %v3712_v0  ;;  %v3613_v20 = vmax.f32 %v3475_v29, 0.0 }
 0x47c   : > { %v4255_v63 = vmax.f32 %v3952_v4, 0.0  ;;  %v3481_v2 = vadd.f32 %v3480_v18, %v13314_v34  ;;  %v3614_v5 = vmax.f32 %v3477_v25, 0.0 }
 0x47d   : > { %v13696_v27 = vpack.c.bf16 %v4254_v16, %v4252_v48  ;;  %v3615_v44 = vmax.f32 %v3479_v56, 0.0  ;;  %10740 = vmatmul.mubr.msk.bf16.gmra.mrb[100].mxu1 %vm782_vm2, %v12604_v38 }
 0x47e   : > { %v3616_v24 = vmax.f32 %v3481_v2, 0.0  ;;  %v3955_v26 = vpop.f32.mrb[12].mxu0  ;;  %4796 = vmatprep.mubr.bf16.mxu1 %v16818_v57  ;;  %v13701_v8 = vpack.c.bf16 %v4255_v63, %v4253_v31 }
 0x47f   : > { %v3714_v50 = vpack.c.bf16 %v3615_v44, %v3613_v20  ;;  %v3956_v12 = vadd.f32 %v3955_v26, %v13637_v7  ;;  %v3957_v58 = vpop.f32.mrb[13].mxu0 }
 0x480   : > { %v3958_v62 = vadd.f32 %v3957_v58, %v13641_v33  ;;  %v3484_v53 = vpop.f32.mrb[252].mxu1  ;;  %v3959_v46 = vpop.f32.mrb[14].mxu0  ;;  %v3715_v14 = vpack.c.bf16 %v3616_v24, %v3614_v5 }
 0x481   : > { %v3485_v36 = vadd.f32 %v3484_v53, %v13310_v32  ;;  %v3960_v38 = vadd.f32 %v3959_v46, %v13637_v7  ;;  %v3486_v15 = vpop.f32.mrb[253].mxu1  ;;  %v3961_v41 = vpop.f32.mrb[15].mxu0  ;;  %v4256_v17 = vmax.f32 %v3956_v12, 0.0 }
 0x482   : > { %v3487_v39 = vadd.f32 %v3486_v15, %v13314_v34  ;;  %v3962_v13 = vadd.f32 %v3961_v41, %v13641_v33  ;;  %v3488_v10 = vpop.f32.mrb[254].mxu1  ;;  %4223 = vmatprep.mubr.bf16.mxu0 %v3715_v14  ;;  %v4257_v37 = vmax.f32 %v3958_v62, 0.0  ;;  %v11724_v15 = vld [vmem:[%s16756_s4 + $0x480] ss:$8 sps:$4 sm:$0xff]   ;;  %v11726_v41 = vld [vmem:[%s16756_s4 + $0x484] ss:$8 sps:$4 sm:$0xff]  }
 0x483   : > { %v4258_v59 = vmax.f32 %v3960_v38, 0.0  ;;  %v3489_v6 = vadd.f32 %v3488_v10, %v13310_v32  ;;  %v3490_v49 = vpop.f32.mrb[255].mxu1  ;;  %4224 = vmatmul.mubr.bf16.gmra.mrb[120].mxu0 %v3714_v50  ;;  %v3617_v52 = vmax.f32 %v3485_v36, 0.0  ;;  %v11723_v32 = vld [vmem:[%s16756_s4 + $0x474] ss:$8 sps:$4 sm:$0xff]  }
 0x484   : > { %v4259_v0 = vmax.f32 %v3962_v13, 0.0  ;;  %v3491_v3 = vadd.f32 %v3490_v49, %v13314_v34  ;;  %v3618_v11 = vmax.f32 %v3487_v39, 0.0  ;;  %5922 = vmatprep.subr.bf16.mxu0 %v11723_v32 }
 0x485   : > { %v13711_v30 = vpack.c.bf16 %v4258_v59, %v4256_v17  ;;  %v3619_v23 = vmax.f32 %v3489_v6, 0.0  ;;  %10741 = vmatmul.mubr.msk.bf16.gmra.mrb[104].mxu1 %vm782_vm2, %v12613_v45  ;;  %5923 = vmatpush1.bf16.msra.mxu0 %v11721_v43 }
 0x486   : > { %v3620_v29 = vmax.f32 %v3491_v3, 0.0  ;;  %v3965_v40 = vpop.f32.mrb[16].mxu0  ;;  %4806 = vmatprep.mubr.bf16.mxu1 %v16818_v57  ;;  %v13722_v34 = vpack.c.bf16 %v4259_v0, %v4257_v37  ;;  %5924 = vmatprep.subr.bf16.mxu0 %v11726_v41 }
 0x487   : > { %v3716_v60 = vpack.c.bf16 %v3619_v23, %v3617_v52  ;;  %v3966_v22 = vadd.f32 %v3965_v40, %v13637_v7  ;;  %v3967_v25 = vpop.f32.mrb[17].mxu0 }
 0x488   : > { %v3968_v45 = vadd.f32 %v3967_v25, %v13641_v33  ;;  %v3969_v4 = vpop.f32.mrb[18].mxu0  ;;  %v3717_v28 = vpack.c.bf16 %v3620_v29, %v3618_v11 }
 0x489   : > { %v3970_v48 = vadd.f32 %v3969_v4, %v13637_v7  ;;  %v3971_v16 = vpop.f32.mrb[19].mxu0  ;;  %v4260_v18 = vmax.f32 %v3966_v22, 0.0  ;;  %5925 = vmatpush1.bf16.msra.mxu0 %v11724_v15 }
 0x48a   : > { %v3972_v56 = vadd.f32 %v3971_v16, %v13641_v33  ;;  %4233 = vmatprep.mubr.bf16.mxu0 %v3717_v28  ;;  %v4261_v63 = vmax.f32 %v3968_v45, 0.0 }
 0x48b   : > { %v4262_v31 = vmax.f32 %v3970_v48, 0.0  ;;  %4234 = vmatmul.mubr.bf16.gmra.mrb[124].mxu0 %v3716_v60 }
 0x48c   : > { %v4263_v2 = vmax.f32 %v3972_v56, 0.0 }
 0x48d   : > { %v13728_v20 = vpack.c.bf16 %v4262_v31, %v4260_v18  ;;  %10742 = vmatmul.mubr.msk.bf16.gmra.mrb[108].mxu1 %vm782_vm2, %v12642_v1  ;;  %v11727_v18 = vld [vmem:[%s16756_s4 + $0x490] ss:$8 sps:$4 sm:$0xff]   ;;  %v11729_v31 = vld [vmem:[%s16756_s4 + $0x494] ss:$8 sps:$4 sm:$0xff]  }
 0x48e   : > { %v3975_v44 = vpop.f32.mrb[20].mxu0  ;;  %4816 = vmatprep.mubr.bf16.mxu1 %v16818_v57  ;;  %v13733_v5 = vpack.c.bf16 %v4263_v2, %v4261_v63  ;;  %5926 = vmatprep.subr.bf16.mxu0 %v11729_v31 }
 0x48f   : > { %v3976_v24 = vadd.f32 %v3975_v44, %v13637_v7  ;;  %v3977_v26 = vpop.f32.mrb[21].mxu0  ;;  %5927 = vmatpush1.bf16.msra.mxu0 %v11727_v18 }
 0x490   : > { %v3978_v50 = vadd.f32 %v3977_v26, %v13641_v33  ;;  %v3979_v12 = vpop.f32.mrb[22].mxu0 }
 0x491   : > { %v3980_v58 = vadd.f32 %v3979_v12, %v13637_v7  ;;  %v3981_v62 = vpop.f32.mrb[23].mxu0  ;;  %v4264_v46 = vmax.f32 %v3976_v24, 0.0 }
 0x492   : > { %v3982_v53 = vadd.f32 %v3981_v62, %v13641_v33  ;;  %v4265_v36 = vmax.f32 %v3978_v50, 0.0 }
 0x493   : > { %v4266_v14 = vmax.f32 %v3980_v58, 0.0 }
 0x494   : > { %v4267_v1 = vmax.f32 %v3982_v53, 0.0 }
 0x495   : > { %v13739_v38 = vpack.c.bf16 %v4266_v14, %v4264_v46  ;;  %10743 = vmatmul.mubr.msk.bf16.gmra.mrb[112].mxu1 %vm782_vm2, %v12653_v35 }
 0x496   : > { %v3985_v39 = vpop.f32.mrb[24].mxu0  ;;  %4826 = vmatprep.mubr.bf16.mxu1 %v16818_v57  ;;  %v13750_v13 = vpack.c.bf16 %v4267_v1, %v4265_v36 }
 0x497   : > { %v3986_v10 = vadd.f32 %v3985_v39, %v13637_v7  ;;  %v3987_v17 = vpop.f32.mrb[25].mxu0 }
 0x498   : > { %v3988_v59 = vadd.f32 %v3987_v17, %v13641_v33  ;;  %v3989_v35 = vpop.f32.mrb[26].mxu0 }
 0x499   : > { %v3990_v6 = vadd.f32 %v3989_v35, %v13637_v7  ;;  %v3991_v49 = vpop.f32.mrb[27].mxu0  ;;  %v4268_v0 = vmax.f32 %v3986_v10, 0.0 }
 0x49a   : > { %v3992_v37 = vadd.f32 %v3991_v49, %v13641_v33  ;;  %v4269_v52 = vmax.f32 %v3988_v59, 0.0 }
 0x49b   : > { %v4270_v3 = vmax.f32 %v3990_v6, 0.0 }
 0x49c   : > { %v4271_v23 = vmax.f32 %v3992_v37, 0.0 }
 0x49d   : > { %v13756_v43 = vpack.c.bf16 %v4270_v3, %v4268_v0  ;;  %10744 = vmatmul.mubr.msk.bf16.gmra.mrb[116].mxu1 %vm782_vm2, %v12670_v19 }
 0x49e   : > { %v3995_v32 = vpop.f32.mrb[28].mxu0  ;;  %4836 = vmatprep.mubr.bf16.mxu1 %v16818_v57  ;;  %v13761_v11 = vpack.c.bf16 %v4271_v23, %v4269_v52  ;;  %v11732_v52 = vld [vmem:[%s16756_s4 + $0x4a4] ss:$8 sps:$4 sm:$0xff]  }
 0x49f   : > { %v3996_v29 = vadd.f32 %v3995_v32, %v13637_v7  ;;  %v3997_v40 = vpop.f32.mrb[29].mxu0  ;;  %5928 = vmatprep.subr.bf16.mxu0 %v11732_v52 }
 0x4a0   : > { %v3998_v60 = vadd.f32 %v3997_v40, %v13641_v33  ;;  %v3999_v22 = vpop.f32.mrb[30].mxu0 }
 0x4a1   : > { %v4000_v25 = vadd.f32 %v3999_v22, %v13637_v7  ;;  %v4001_v45 = vpop.f32.mrb[31].mxu0  ;;  %v4272_v28 = vmax.f32 %v3996_v29, 0.0 }
 0x4a2   : > { %v4002_v4 = vadd.f32 %v4001_v45, %v13641_v33  ;;  %v4273_v16 = vmax.f32 %v3998_v60, 0.0 }
 0x4a3   : > { %v4274_v48 = vmax.f32 %v4000_v25, 0.0 }
 0x4a4   : > { %v4275_v19 = vmax.f32 %v4002_v4, 0.0 }
 0x4a5   : > { %v13767_v56 = vpack.c.bf16 %v4274_v48, %v4272_v28  ;;  %10745 = vmatmul.mubr.msk.bf16.gmra.mrb[120].mxu1 %vm782_vm2, %v12681_v61 }
 0x4a6   : > { %v4005_v63 = vpop.f32.mrb[32].mxu0  ;;  %4846 = vmatprep.mubr.bf16.mxu1 %v16818_v57  ;;  %v13778_v2 = vpack.c.bf16 %v4275_v19, %v4273_v16 }
 0x4a7   : > { %v4006_v44 = vadd.f32 %v4005_v63, %v13637_v7  ;;  %v4007_v24 = vpop.f32.mrb[33].mxu0 }
 0x4a8   : > { %v4008_v26 = vadd.f32 %v4007_v24, %v13641_v33  ;;  %v4009_v61 = vpop.f32.mrb[34].mxu0 }
 0x4a9   : > { %v4010_v50 = vadd.f32 %v4009_v61, %v13637_v7  ;;  %v4011_v12 = vpop.f32.mrb[35].mxu0  ;;  %v4276_v62 = vmax.f32 %v4006_v44, 0.0 }
 0x4aa   : > { %v4012_v58 = vadd.f32 %v4011_v12, %v13641_v33  ;;  %v4277_v46 = vmax.f32 %v4008_v26, 0.0 }
 0x4ab   : > { %v4278_v53 = vmax.f32 %v4010_v50, 0.0 }
 0x4ac   : > { %v4279_v14 = vmax.f32 %v4012_v58, 0.0 }
 0x4ad   : > { %v13784_v36 = vpack.c.bf16 %v4278_v53, %v4276_v62  ;;  %10746 = vmatmul.mubr.msk.bf16.gmra.mrb[124].mxu1 %vm782_vm2, %v12698_v42 }
 0x4ae   : > { %v4015_v1 = vpop.f32.mrb[36].mxu0  ;;  %5049 = vmatprep.mubr.bf16.mxu1 %v13665_v55  ;;  %v13789_v15 = vpack.c.bf16 %v4279_v14, %v4277_v46  ;;  %v11730_v55 = vld [vmem:[%s16756_s4 + $0x4a0] ss:$8 sps:$4 sm:$0xff]   ;;  %v11735_v46 = vld [vmem:[%s16756_s4 + $0x4b4] ss:$8 sps:$4 sm:$0xff]  }
 0x4af   : > { %v4016_v41 = vadd.f32 %v4015_v1, %v13637_v7  ;;  %v4017_v39 = vpop.f32.mrb[37].mxu0  ;;  %5929 = vmatpush1.bf16.msra.mxu0 %v11730_v55 }
 0x4b0   : > { %v4018_v10 = vadd.f32 %v4017_v39, %v13641_v33  ;;  %v4019_v17 = vpop.f32.mrb[38].mxu0  ;;  %5930 = vmatprep.subr.bf16.mxu0 %v11735_v46 }
 0x4b1   : > { %v4020_v59 = vadd.f32 %v4019_v17, %v13637_v7  ;;  %v4021_v35 = vpop.f32.mrb[39].mxu0  ;;  %v4280_v49 = vmax.f32 %v4016_v41, 0.0 }
 0x4b2   : > { %v4022_v6 = vadd.f32 %v4021_v35, %v13641_v33  ;;  %v4281_v0 = vmax.f32 %v4018_v10, 0.0 }
 0x4b3   : > { %v4282_v37 = vmax.f32 %v4020_v59, 0.0 }
 0x4b4   : > { %v4283_v42 = vmax.f32 %v4022_v6, 0.0 }
 0x4b5   : > { %v13795_v3 = vpack.c.bf16 %v4282_v37, %v4280_v49  ;;  %5050 = vmatmul.mubr.bf16.vlgmr.msra.gmra.mrb[0].mxu1 %v13660_v9 }
 0x4b6   : > { %v4025_v23 = vpop.f32.mrb[40].mxu0  ;;  %5059 = vmatprep.mubr.bf16.mxu1 %v13686_v21  ;;  %v13805_v32 = vpack.c.bf16 %v4283_v42, %v4281_v0 }
 0x4b7   : > { %v4026_v29 = vadd.f32 %v4025_v23, %v13637_v7  ;;  %v4027_v40 = vpop.f32.mrb[41].mxu0 }
 0x4b8   : > { %v4028_v60 = vadd.f32 %v4027_v40, %v13641_v33  ;;  %v4029_v9 = vpop.f32.mrb[42].mxu0 }
 0x4b9   : > { %v4030_v22 = vadd.f32 %v4029_v9, %v13637_v7  ;;  %v4031_v25 = vpop.f32.mrb[43].mxu0  ;;  %v4284_v4 = vmax.f32 %v4026_v29, 0.0 }
 0x4ba   : > { %v4032_v45 = vadd.f32 %v4031_v25, %v13641_v33  ;;  %v4285_v48 = vmax.f32 %v4028_v60, 0.0 }
 0x4bb   : > { %v4286_v28 = vmax.f32 %v4030_v22, 0.0 }
 0x4bc   : > { %v4287_v16 = vmax.f32 %v4032_v45, 0.0 }
 0x4bd   : > { %v13811_v21 = vpack.c.bf16 %v4286_v28, %v4284_v4  ;;  %5060 = vmatmul.mubr.bf16.gmra.mrb[4].mxu1 %v13675_v54 }
 0x4be   : > { %v4035_v19 = vpop.f32.mrb[44].mxu0  ;;  %5069 = vmatprep.mubr.bf16.mxu1 %v13701_v8  ;;  %v13815_v18 = vpack.c.bf16 %v4287_v16, %v4285_v48  ;;  %v11733_v8 = vld [vmem:[%s16756_s4 + $0x4b0] ss:$8 sps:$4 sm:$0xff]   ;;  %v11738_v48 = vld [vmem:[%s16756_s4 + $0x4c4] ss:$8 sps:$4 sm:$0xff]  }
 0x4bf   : > { %v4036_v31 = vadd.f32 %v4035_v19, %v13637_v7  ;;  %v4037_v63 = vpop.f32.mrb[45].mxu0  ;;  %5931 = vmatpush1.bf16.msra.mxu0 %v11733_v8 }
 0x4c0   : > { %v4038_v44 = vadd.f32 %v4037_v63, %v13641_v33  ;;  %v4039_v24 = vpop.f32.mrb[46].mxu0  ;;  %5932 = vmatprep.subr.bf16.mxu0 %v11738_v48  ;;  %v11742_v48 = vld [vmem:[%s16756_s4 + $0x4e0] ss:$8 sps:$4 sm:$0xff]  }
 0x4c1   : > { %v4040_v26 = vadd.f32 %v4039_v24, %v13637_v7  ;;  %v4041_v61 = vpop.f32.mrb[47].mxu0  ;;  %v4288_v12 = vmax.f32 %v4036_v31, 0.0 }
 0x4c2   : > { %v4042_v50 = vadd.f32 %v4041_v61, %v13641_v33  ;;  %v4289_v62 = vmax.f32 %v4038_v44, 0.0 }
 0x4c3   : > { %v4290_v58 = vmax.f32 %v4040_v26, 0.0 }
 0x4c4   : > { %v4291_v54 = vmax.f32 %v4042_v50, 0.0 }
 0x4c5   : > { %v13821_v53 = vpack.c.bf16 %v4290_v58, %v4288_v12  ;;  %5070 = vmatmul.mubr.bf16.gmra.mrb[8].mxu1 %v13696_v27 }
 0x4c6   : > { %v4045_v14 = vpop.f32.mrb[48].mxu0  ;;  %5079 = vmatprep.mubr.bf16.mxu1 %v13722_v34  ;;  %v13831_v1 = vpack.c.bf16 %v4291_v54, %v4289_v62 }
 0x4c7   : > { %v4046_v41 = vadd.f32 %v4045_v14, %v13637_v7  ;;  %v4047_v39 = vpop.f32.mrb[49].mxu0 }
 0x4c8   : > { %v4048_v10 = vadd.f32 %v4047_v39, %v13641_v33  ;;  %v4049_v27 = vpop.f32.mrb[50].mxu0 }
 0x4c9   : > { %v4050_v17 = vadd.f32 %v4049_v27, %v13637_v7  ;;  %v4051_v59 = vpop.f32.mrb[51].mxu0  ;;  %v4292_v6 = vmax.f32 %v4046_v41, 0.0 }
 0x4ca   : > { %v4052_v35 = vadd.f32 %v4051_v59, %v13641_v33  ;;  %v4293_v37 = vmax.f32 %v4048_v10, 0.0 }
 0x4cb   : > { %v4294_v49 = vmax.f32 %v4050_v17, 0.0 }
 0x4cc   : > { %v4295_v0 = vmax.f32 %v4052_v35, 0.0 }
 0x4cd   : > { %v13837_v34 = vpack.c.bf16 %v4294_v49, %v4292_v6  ;;  %5080 = vmatmul.mubr.bf16.gmra.mrb[12].mxu1 %v13711_v30 }
 0x4ce   : > { %v4055_v42 = vpop.f32.mrb[52].mxu0  ;;  %5089 = vmatprep.mubr.bf16.mxu1 %v13733_v5  ;;  %v13841_v55 = vpack.c.bf16 %v4295_v0, %v4293_v37  ;;  %v11736_v5 = vld [vmem:[%s16756_s4 + $0x4c0] ss:$8 sps:$4 sm:$0xff]   ;;  %v11741_v37 = vld [vmem:[%s16756_s4 + $0x4d4] ss:$8 sps:$4 sm:$0xff]  }
 0x4cf   : > { %v4056_v52 = vadd.f32 %v4055_v42, %v13637_v7  ;;  %v4057_v23 = vpop.f32.mrb[53].mxu0  ;;  %5933 = vmatpush1.bf16.msra.mxu0 %v11736_v5 }
 0x4d0   : > { %v4058_v29 = vadd.f32 %v4057_v23, %v13641_v33  ;;  %v4059_v40 = vpop.f32.mrb[54].mxu0  ;;  %5934 = vmatprep.subr.bf16.mxu0 %v11741_v37  ;;  %v11745_v37 = vld [vmem:[%s16756_s4 + $0x4f0] ss:$8 sps:$4 sm:$0xff]  }
 0x4d1   : > { %v4060_v60 = vadd.f32 %v4059_v40, %v13637_v7  ;;  %v4061_v9 = vpop.f32.mrb[55].mxu0  ;;  %v4296_v25 = vmax.f32 %v4056_v52, 0.0 }
 0x4d2   : > { %v4062_v22 = vadd.f32 %v4061_v9, %v13641_v33  ;;  %v4297_v4 = vmax.f32 %v4058_v29, 0.0 }
 0x4d3   : > { %v4298_v45 = vmax.f32 %v4060_v60, 0.0 }
 0x4d4   : > { %v4299_v30 = vmax.f32 %v4062_v22, 0.0 }
 0x4d5   : > { %v13847_v28 = vpack.c.bf16 %v4298_v45, %v4296_v25  ;;  %5090 = vmatmul.mubr.bf16.gmra.mrb[16].mxu1 %v13728_v20 }
 0x4d6   : > { %v4065_v16 = vpop.f32.mrb[56].mxu0  ;;  %5099 = vmatprep.mubr.bf16.mxu1 %v13750_v13  ;;  %v13857_v19 = vpack.c.bf16 %v4299_v30, %v4297_v4 }
 0x4d7   : > { %v4066_v31 = vadd.f32 %v4065_v16, %v13637_v7  ;;  %v4067_v63 = vpop.f32.mrb[57].mxu0  ;;  %v11744_v16 = vld [vmem:[%s16756_s4 + $0x4e4] ss:$8 sps:$4 sm:$0xff]  }
 0x4d8   : > { %v4068_v44 = vadd.f32 %v4067_v63, %v13641_v33  ;;  %v4069_v20 = vpop.f32.mrb[58].mxu0 }
 0x4d9   : > { %v4070_v24 = vadd.f32 %v4069_v20, %v13637_v7  ;;  %v4071_v26 = vpop.f32.mrb[59].mxu0  ;;  %v4300_v50 = vmax.f32 %v4066_v31, 0.0 }
 0x4da   : > { %v4072_v61 = vadd.f32 %v4071_v26, %v13641_v33  ;;  %v4301_v58 = vmax.f32 %v4068_v44, 0.0 }
 0x4db   : > { %v4302_v12 = vmax.f32 %v4070_v24, 0.0 }
 0x4dc   : > { %v4303_v62 = vmax.f32 %v4072_v61, 0.0 }
 0x4dd   : > { %v13863_v13 = vpack.c.bf16 %v4302_v12, %v4300_v50  ;;  %5100 = vmatmul.mubr.bf16.gmra.mrb[20].mxu1 %v13739_v38 }
 0x4de   : > { %v4075_v54 = vpop.f32.mrb[60].mxu0  ;;  %5109 = vmatprep.mubr.bf16.mxu1 %v13761_v11  ;;  %v13867_v8 = vpack.c.bf16 %v4303_v62, %v4301_v58  ;;  %v11739_v11 = vld [vmem:[%s16756_s4 + $0x4d0] ss:$8 sps:$4 sm:$0xff]  }
 0x4df   : > { %v4076_v46 = vadd.f32 %v4075_v54, %v13637_v7  ;;  %v4077_v14 = vpop.f32.mrb[61].mxu0  ;;  %5935 = vmatpush1.bf16.msra.mxu0 %v11739_v11 }
 0x4e0   : > { %v4078_v41 = vadd.f32 %v4077_v14, %v13641_v33  ;;  %v4079_v39 = vpop.f32.mrb[62].mxu0  ;;  %5936 = vmatprep.subr.bf16.mxu0 %v11744_v16 }
 0x4e1   : > { %v4080_v10 = vadd.f32 %v4079_v39, %v13637_v7  ;;  %v4081_v27 = vpop.f32.mrb[63].mxu0  ;;  %v4304_v59 = vmax.f32 %v4076_v46, 0.0 }
 0x4e2   : > { %v4082_v17 = vadd.f32 %v4081_v27, %v13641_v33  ;;  %v4305_v6 = vmax.f32 %v4078_v41, 0.0 }
 0x4e3   : > { %v4306_v35 = vmax.f32 %v4080_v10, 0.0  ;;  %5937 = vmatpush1.bf16.msra.mxu0 %v11742_v48 }
 0x4e4   : > { %v4307_v38 = vmax.f32 %v4082_v17, 0.0 }
 0x4e5   : > { %v13873_v49 = vpack.c.bf16 %v4306_v35, %v4304_v59  ;;  %5110 = vmatmul.mubr.bf16.gmra.mrb[24].mxu1 %v13756_v43 }
 0x4e6   : > { %v4085_v0 = vpop.f32.mrb[64].mxu0  ;;  %5119 = vmatprep.mubr.bf16.mxu1 %v13778_v2  ;;  %v13883_v42 = vpack.c.bf16 %v4307_v38, %v4305_v6 }
 0x4e7   : > { %v4086_v52 = vadd.f32 %v4085_v0, %v13637_v7  ;;  %v4087_v23 = vpop.f32.mrb[65].mxu0  ;;  %v11747_v0 = vld [vmem:[%s16756_s4 + $0x4f4] ss:$8 sps:$4 sm:$0xff]  }
 0x4e8   : > { %v4088_v29 = vadd.f32 %v4087_v23, %v13641_v33  ;;  %v4089_v43 = vpop.f32.mrb[66].mxu0  ;;  %5938 = vmatprep.subr.bf16.mxu0 %v11747_v0 }
 0x4e9   : > { %v4090_v40 = vadd.f32 %v4089_v43, %v13637_v7  ;;  %v4091_v60 = vpop.f32.mrb[67].mxu0  ;;  %v4308_v22 = vmax.f32 %v4086_v52, 0.0  ;;  %5939 = vmatpush1.bf16.msra.mxu0 %v11745_v37  ;;  %v11750_v37 = vld [vmem:[%s16756_s4 + $0x504] ss:$8 sps:$4 sm:$0xff]  }
 0x4ea   : > { %v4092_v9 = vadd.f32 %v4091_v60, %v13641_v33  ;;  %v4309_v45 = vmax.f32 %v4088_v29, 0.0  ;;  %6659 = vmatprep.subr.bf16.mxu0 %v11750_v37 }
 0x4eb   : > { %v4310_v25 = vmax.f32 %v4090_v40, 0.0 }
 0x4ec   : > { %v4311_v4 = vmax.f32 %v4092_v9, 0.0 }
 0x4ed   : > { %v13889_v2 = vpack.c.bf16 %v4310_v25, %v4308_v22  ;;  %5120 = vmatmul.mubr.bf16.gmra.mrb[28].mxu1 %v13767_v56 }
 0x4ee   : > { %v4095_v30 = vpop.f32.mrb[68].mxu0  ;;  %5129 = vmatprep.mubr.bf16.mxu1 %v13789_v15  ;;  %v13893_v5 = vpack.c.bf16 %v4311_v4, %v4309_v45 }
 0x4ef   : > { %v4096_v31 = vadd.f32 %v4095_v30, %v13637_v7  ;;  %v4097_v63 = vpop.f32.mrb[69].mxu0 }
 0x4f0   : > { %v4098_v44 = vadd.f32 %v4097_v63, %v13641_v33  ;;  %v4099_v20 = vpop.f32.mrb[70].mxu0 }
 0x4f1   : > { %v4100_v56 = vadd.f32 %v4099_v20, %v13637_v7  ;;  %v4101_v15 = vpop.f32.mrb[71].mxu0  ;;  %v4312_v26 = vmax.f32 %v4096_v31, 0.0 }
 0x4f2   : > { %v4102_v24 = vadd.f32 %v4101_v15, %v13641_v33  ;;  %v4313_v50 = vmax.f32 %v4098_v44, 0.0 }
 0x4f3   : > { %v4314_v61 = vmax.f32 %v4100_v56, 0.0 }
 0x4f4   : > { %v4315_v12 = vmax.f32 %v4102_v24, 0.0 }
 0x4f5   : > { %v13905_v58 = vpack.c.bf16 %v4314_v61, %v4312_v26  ;;  %5130 = vmatmul.mubr.bf16.gmra.mrb[32].mxu1 %v13784_v36 }
 0x4f6   : > { %v4105_v62 = vpop.f32.mrb[72].mxu0  ;;  %5139 = vmatprep.mubr.bf16.mxu1 %v13805_v32  ;;  %v13909_v54 = vpack.c.bf16 %v4315_v12, %v4313_v50 }
 0x4f7   : > { %v4106_v46 = vadd.f32 %v4105_v62, %v13637_v7  ;;  %v4107_v14 = vpop.f32.mrb[73].mxu0 }
 0x4f8   : > { %v4108_v41 = vadd.f32 %v4107_v14, %v13641_v33  ;;  %v4109_v39 = vpop.f32.mrb[74].mxu0 }
 0x4f9   : > { %v4110_v10 = vadd.f32 %v4109_v39, %v13637_v7  ;;  %v4111_v27 = vpop.f32.mrb[75].mxu0  ;;  %v4316_v59 = vmax.f32 %v4106_v46, 0.0 }
 0x4fa   : > { %v4112_v17 = vadd.f32 %v4111_v27, %v13641_v33  ;;  %v4317_v6 = vmax.f32 %v4108_v41, 0.0 }
 0x4fb   : > { %v4318_v35 = vmax.f32 %v4110_v10, 0.0 }
 0x4fc   : > { %v4319_v36 = vmax.f32 %v4112_v17, 0.0 }
 0x4fd   : > { %v13915_v38 = vpack.c.bf16 %v4318_v35, %v4316_v59  ;;  %5140 = vmatmul.mubr.bf16.gmra.mrb[36].mxu1 %v13795_v3 }
 0x4fe   : > { %v4115_v32 = vpop.f32.mrb[76].mxu0  ;;  %5149 = vmatprep.mubr.bf16.mxu1 %v13815_v18  ;;  %v13919_v11 = vpack.c.bf16 %v4319_v36, %v4317_v6 }
 0x4ff   : > { %v4116_v52 = vadd.f32 %v4115_v32, %v13637_v7  ;;  %v4117_v23 = vpop.f32.mrb[77].mxu0 }
 0x500   : > { %v4118_v29 = vadd.f32 %v4117_v23, %v13641_v33  ;;  %v4119_v43 = vpop.f32.mrb[78].mxu0 }
 0x501   : > { %v4120_v3 = vadd.f32 %v4119_v43, %v13637_v7  ;;  %v4121_v18 = vpop.f32.mrb[79].mxu0  ;;  %v4320_v60 = vmax.f32 %v4116_v52, 0.0 }
 0x502   : > { %v4122_v40 = vadd.f32 %v4121_v18, %v13641_v33  ;;  %v4321_v22 = vmax.f32 %v4118_v29, 0.0 }
 0x503   : > { %v4322_v9 = vmax.f32 %v4120_v3, 0.0 }
 0x504   : > { %v4323_v25 = vmax.f32 %v4122_v40, 0.0 }
 0x505   : > { %v13931_v45 = vpack.c.bf16 %v4322_v9, %v4320_v60  ;;  %5150 = vmatmul.mubr.bf16.gmra.mrb[40].mxu1 %v13811_v21 }
 0x506   : > { %v4125_v4 = vpop.f32.mrb[80].mxu0  ;;  %5159 = vmatprep.mubr.bf16.mxu1 %v13831_v1  ;;  %v13935_v30 = vpack.c.bf16 %v4323_v25, %v4321_v22 }
 0x507   : > { %v4126_v48 = vadd.f32 %v4125_v4, %v13637_v7  ;;  %v4127_v16 = vpop.f32.mrb[81].mxu0 }
 0x508   : > { %v4128_v31 = vadd.f32 %v4127_v16, %v13641_v33  ;;  %v4129_v63 = vpop.f32.mrb[82].mxu0 }
 0x509   : > { %v4130_v44 = vadd.f32 %v4129_v63, %v13637_v7  ;;  %v4131_v20 = vpop.f32.mrb[83].mxu0  ;;  %v4324_v15 = vmax.f32 %v4126_v48, 0.0 }
 0x50a   : > { %v4132_v56 = vadd.f32 %v4131_v20, %v13641_v33  ;;  %v4325_v26 = vmax.f32 %v4128_v31, 0.0 }
 0x50b   : > { %v4326_v24 = vmax.f32 %v4130_v44, 0.0 }
 0x50c   : > { %v4327_v21 = vmax.f32 %v4132_v56, 0.0 }
 0x50d   : > { %v13941_v61 = vpack.c.bf16 %v4326_v24, %v4324_v15  ;;  %5160 = vmatmul.mubr.bf16.gmra.mrb[44].mxu1 %v13821_v53 }
 0x50e   : > { %v4135_v1 = vpop.f32.mrb[84].mxu0  ;;  %5169 = vmatprep.mubr.bf16.mxu1 %v13841_v55  ;;  %v13945_v50 = vpack.c.bf16 %v4327_v21, %v4325_v26 }
 0x50f   : > { %v4136_v12 = vadd.f32 %v4135_v1, %v13637_v7  ;;  %v4137_v62 = vpop.f32.mrb[85].mxu0 }
 0x510   : > { %v4138_v46 = vadd.f32 %v4137_v62, %v13641_v33  ;;  %v4139_v14 = vpop.f32.mrb[86].mxu0 }
 0x511   : > { %v4140_v41 = vadd.f32 %v4139_v14, %v13637_v7  ;;  %v4141_v39 = vpop.f32.mrb[87].mxu0  ;;  %v4328_v27 = vmax.f32 %v4136_v12, 0.0 }
 0x512   : > { %v4142_v10 = vadd.f32 %v4141_v39, %v13641_v33  ;;  %v4329_v59 = vmax.f32 %v4138_v46, 0.0 }
 0x513   : > { %v4330_v17 = vmax.f32 %v4140_v41, 0.0 }
 0x514   : > { %v4331_v53 = vmax.f32 %v4142_v10, 0.0 }
 0x515   : > { %v13951_v35 = vpack.c.bf16 %v4330_v17, %v4328_v27  ;;  %5170 = vmatmul.mubr.bf16.gmra.mrb[48].mxu1 %v13837_v34 }
 0x516   : > { %v4145_v55 = vpop.f32.mrb[88].mxu0  ;;  %5179 = vmatprep.mubr.bf16.mxu1 %v13857_v19  ;;  %v13955_v6 = vpack.c.bf16 %v4331_v53, %v4329_v59 }
 0x517   : > { %v4146_v36 = vadd.f32 %v4145_v55, %v13637_v7  ;;  %v4147_v32 = vpop.f32.mrb[89].mxu0 }
 0x518   : > { %v4148_v0 = vadd.f32 %v4147_v32, %v13641_v33  ;;  %v4149_v52 = vpop.f32.mrb[90].mxu0 }
 0x519   : > { %v4150_v23 = vadd.f32 %v4149_v52, %v13637_v7  ;;  %v4151_v29 = vpop.f32.mrb[91].mxu0  ;;  %v4332_v43 = vmax.f32 %v4146_v36, 0.0 }
 0x51a   : > { %v4152_v34 = vadd.f32 %v4151_v29, %v13641_v33  ;;  %v4333_v3 = vmax.f32 %v4148_v0, 0.0 }
 0x51b   : > { %v4334_v19 = vmax.f32 %v4150_v23, 0.0 }
 0x51c   : > { %v4335_v18 = vmax.f32 %v4152_v34, 0.0 }
 0x51d   : > { %v13964_v40 = vpack.c.bf16 %v4334_v19, %v4332_v43  ;;  %5180 = vmatmul.mubr.bf16.gmra.mrb[52].mxu1 %v13847_v28 }
 0x51e   : > { %v4155_v60 = vpop.f32.mrb[92].mxu0  ;;  %5189 = vmatprep.mubr.bf16.mxu1 %v13867_v8  ;;  %v13968_v9 = vpack.c.bf16 %v4335_v18, %v4333_v3 }
 0x51f   : > { %v4156_v22 = vadd.f32 %v4155_v60, %v13637_v7  ;;  %v4157_v25 = vpop.f32.mrb[93].mxu0 }
 0x520   : > { %v4158_v4 = vadd.f32 %v4157_v25, %v13641_v33  ;;  %v4159_v48 = vpop.f32.mrb[94].mxu0 }
 0x521   : > { %v4160_v16 = vadd.f32 %v4159_v48, %v13637_v7  ;;  %v4161_v31 = vpop.f32.mrb[95].mxu0  ;;  %v4336_v44 = vmax.f32 %v4156_v22, 0.0 }
 0x522   : > { %v4162_v63 = vadd.f32 %v4161_v31, %v13641_v33  ;;  %v4337_v56 = vmax.f32 %v4158_v4, 0.0 }
 0x523   : > { %v4338_v20 = vmax.f32 %v4160_v16, 0.0 }
 0x524   : > { %v4339_v28 = vmax.f32 %v4162_v63, 0.0 }
 0x525   : > { %v13974_v15 = vpack.c.bf16 %v4338_v20, %v4336_v44  ;;  %5190 = vmatmul.mubr.bf16.gmra.mrb[56].mxu1 %v13863_v13 }
 0x526   : > { %v4165_v8 = vpop.f32.mrb[96].mxu0  ;;  %5199 = vmatprep.mubr.bf16.mxu1 %v13883_v42  ;;  %v13978_v24 = vpack.c.bf16 %v4339_v28, %v4337_v56 }
 0x527   : > { %v4166_v26 = vadd.f32 %v4165_v8, %v13637_v7  ;;  %v4167_v21 = vpop.f32.mrb[97].mxu0 }
 0x528   : > { %v4168_v1 = vadd.f32 %v4167_v21, %v13641_v33  ;;  %v4169_v12 = vpop.f32.mrb[98].mxu0 }
 0x529   : > { %v4170_v62 = vadd.f32 %v4169_v12, %v13637_v7  ;;  %v4171_v46 = vpop.f32.mrb[99].mxu0  ;;  %v4340_v41 = vmax.f32 %v4166_v26, 0.0 }
 0x52a   : > { %v4172_v14 = vadd.f32 %v4171_v46, %v13641_v33  ;;  %v4341_v10 = vmax.f32 %v4168_v1, 0.0 }
 0x52b   : > { %v4342_v39 = vmax.f32 %v4170_v62, 0.0 }
 0x52c   : > { %v4343_v13 = vmax.f32 %v4172_v14, 0.0 }
 0x52d   : > { %v13984_v27 = vpack.c.bf16 %v4342_v39, %v4340_v41  ;;  %5200 = vmatmul.mubr.bf16.gmra.mrb[60].mxu1 %v13873_v49 }
 0x52e   : > { %v4175_v42 = vpop.f32.mrb[100].mxu0  ;;  %5209 = vmatprep.mubr.bf16.mxu1 %v13893_v5  ;;  %v13988_v17 = vpack.c.bf16 %v4343_v13, %v4341_v10 }
 0x52f   : > { %v4176_v59 = vadd.f32 %v4175_v42, %v13637_v7  ;;  %v4177_v53 = vpop.f32.mrb[101].mxu0 }
 0x530   : > { %v4178_v55 = vadd.f32 %v4177_v53, %v13641_v33  ;;  %v4179_v36 = vpop.f32.mrb[102].mxu0 }
 0x531   : > { %v4180_v32 = vadd.f32 %v4179_v36, %v13637_v7  ;;  %v4181_v37 = vpop.f32.mrb[103].mxu0  ;;  %v4344_v52 = vmax.f32 %v4176_v59, 0.0 }
 0x532   : > { %v4182_v0 = vadd.f32 %v4181_v37, %v13641_v33  ;;  %v4345_v29 = vmax.f32 %v4178_v55, 0.0 }
 0x533   : > { %v4346_v23 = vmax.f32 %v4180_v32, 0.0 }
 0x534   : > { %v4347_v49 = vmax.f32 %v4182_v0, 0.0 }
 0x535   : > { %v13994_v34 = vpack.c.bf16 %v4346_v23, %v4344_v52  ;;  %5210 = vmatmul.mubr.bf16.gmra.mrb[64].mxu1 %v13889_v2 }
 0x536   : > { %v4185_v5 = vpop.f32.mrb[104].mxu0  ;;  %5219 = vmatprep.mubr.bf16.mxu1 %v13909_v54  ;;  %v13998_v43 = vpack.c.bf16 %v4347_v49, %v4345_v29 }
 0x537   : > { %v4186_v19 = vadd.f32 %v4185_v5, %v13637_v7  ;;  %v4187_v3 = vpop.f32.mrb[105].mxu0 }
 0x538   : > { %v4188_v18 = vadd.f32 %v4187_v3, %v13641_v33  ;;  %v4189_v60 = vpop.f32.mrb[106].mxu0 }
 0x539   : > { %v4190_v22 = vadd.f32 %v4189_v60, %v13637_v7  ;;  %v4191_v25 = vpop.f32.mrb[107].mxu0  ;;  %v4348_v48 = vmax.f32 %v4186_v19, 0.0 }
 0x53a   : > { %v4192_v4 = vadd.f32 %v4191_v25, %v13641_v33  ;;  %v4349_v31 = vmax.f32 %v4188_v18, 0.0 }
 0x53b   : > { %v4350_v16 = vmax.f32 %v4190_v22, 0.0 }
 0x53c   : > { %v4351_v2 = vmax.f32 %v4192_v4, 0.0 }
 0x53d   : > { %v14004_v63 = vpack.c.bf16 %v4350_v16, %v4348_v48  ;;  %5220 = vmatmul.mubr.bf16.gmra.mrb[68].mxu1 %v13905_v58 }
 0x53e   : > { %v4195_v54 = vpop.f32.mrb[108].mxu0  ;;  %5229 = vmatprep.mubr.bf16.mxu1 %v13919_v11  ;;  %v14008_v44 = vpack.c.bf16 %v4351_v2, %v4349_v31 }
 0x53f   : > { %v4196_v20 = vadd.f32 %v4195_v54, %v13637_v7  ;;  %v4197_v56 = vpop.f32.mrb[109].mxu0 }
 0x540   : > { %v4198_v28 = vadd.f32 %v4197_v56, %v13641_v33  ;;  %v4199_v8 = vpop.f32.mrb[110].mxu0 }
 0x541   : > { %v4200_v26 = vadd.f32 %v4199_v8, %v13637_v7  ;;  %v4201_v21 = vpop.f32.mrb[111].mxu0  ;;  %v4352_v12 = vmax.f32 %v4196_v20, 0.0 }
 0x542   : > { %v4202_v1 = vadd.f32 %v4201_v21, %v13641_v33  ;;  %v4353_v46 = vmax.f32 %v4198_v28, 0.0 }
 0x543   : > { %v4354_v62 = vmax.f32 %v4200_v26, 0.0 }
 0x544   : > { %v4355_v58 = vmax.f32 %v4202_v1, 0.0 }
 0x545   : > { %v14014_v14 = vpack.c.bf16 %v4354_v62, %v4352_v12  ;;  %5230 = vmatmul.mubr.bf16.gmra.mrb[72].mxu1 %v13915_v38 }
 0x546   : > { %v4205_v11 = vpop.f32.mrb[112].mxu0  ;;  %5239 = vmatprep.mubr.bf16.mxu1 %v13935_v30  ;;  %v14018_v41 = vpack.c.bf16 %v4355_v58, %v4353_v46 }
 0x547   : > { %v4206_v39 = vadd.f32 %v4205_v11, %v13637_v7  ;;  %v4207_v10 = vpop.f32.mrb[113].mxu0 }
 0x548   : > { %v4208_v13 = vadd.f32 %v4207_v10, %v13641_v33  ;;  %v4209_v42 = vpop.f32.mrb[114].mxu0 }
 0x549   : > { %v4210_v59 = vadd.f32 %v4209_v42, %v13637_v7  ;;  %v4211_v53 = vpop.f32.mrb[115].mxu0  ;;  %v4356_v36 = vmax.f32 %v4206_v39, 0.0 }
 0x54a   : > { %v4212_v55 = vadd.f32 %v4211_v53, %v13641_v33  ;;  %v4357_v37 = vmax.f32 %v4208_v13, 0.0 }
 0x54b   : > { %v4358_v32 = vmax.f32 %v4210_v59, 0.0 }
 0x54c   : > { %v4359_v38 = vmax.f32 %v4212_v55, 0.0 }
 0x54d   : > { %v14024_v0 = vpack.c.bf16 %v4358_v32, %v4356_v36  ;;  %5240 = vmatmul.mubr.bf16.gmra.mrb[76].mxu1 %v13931_v45 }
 0x54e   : > { %v4215_v30 = vpop.f32.mrb[116].mxu0  ;;  %5249 = vmatprep.mubr.bf16.mxu1 %v13945_v50  ;;  %v14028_v52 = vpack.c.bf16 %v4359_v38, %v4357_v37 }
 0x54f   : > { %v4216_v23 = vadd.f32 %v4215_v30, %v13637_v7  ;;  %v4217_v29 = vpop.f32.mrb[117].mxu0 }
 0x550   : > { %v4218_v49 = vadd.f32 %v4217_v29, %v13641_v33  ;;  %v4219_v5 = vpop.f32.mrb[118].mxu0  ;;  %v11748_v29 = vld [vmem:[%s16756_s4 + $0x500] ss:$8 sps:$4 sm:$0xff]  }
 0x551   : > { %v4220_v19 = vadd.f32 %v4219_v5, %v13637_v7  ;;  %v4221_v3 = vpop.f32.mrb[119].mxu0  ;;  %v4360_v60 = vmax.f32 %v4216_v23, 0.0 }
 0x552   : > { %v4222_v18 = vadd.f32 %v4221_v3, %v13641_v33  ;;  %v4361_v25 = vmax.f32 %v4218_v49, 0.0 }
 0x553   : > { %v4362_v22 = vmax.f32 %v4220_v19, 0.0  ;;  %v11753_v19 = vld [vmem:[%s16756_s4 + $0x514] ss:$8 sps:$4 sm:$0xff]  }
 0x554   : > { %v4363_v45 = vmax.f32 %v4222_v18, 0.0 }
 0x555   : > { %v14034_v4 = vpack.c.bf16 %v4362_v22, %v4360_v60  ;;  %5250 = vmatmul.mubr.bf16.gmra.mrb[80].mxu1 %v13941_v61  ;;  %v11751_v22 = vld [vmem:[%s16756_s4 + $0x510] ss:$8 sps:$4 sm:$0xff]  }
 0x556   : > { %v4225_v50 = vpop.f32.mrb[120].mxu0  ;;  %5259 = vmatprep.mubr.bf16.mxu1 %v13955_v6  ;;  %v14038_v48 = vpack.c.bf16 %v4363_v45, %v4361_v25 }
 0x557   : > { %v4226_v16 = vadd.f32 %v4225_v50, %v13637_v7  ;;  %v4227_v31 = vpop.f32.mrb[121].mxu0  ;;  %v11756_v50 = vld [vmem:[%s16756_s4 + $0x524] ss:$8 sps:$4 sm:$0xff]  }
 0x558   : > { %v4228_v2 = vadd.f32 %v4227_v31, %v13641_v33  ;;  %v4229_v54 = vpop.f32.mrb[122].mxu0 }
 0x559   : > { %v4230_v20 = vadd.f32 %v4229_v54, %v13637_v7  ;;  %v4231_v56 = vpop.f32.mrb[123].mxu0  ;;  %v4364_v8 = vmax.f32 %v4226_v16, 0.0 }
 0x55a   : > { %v4232_v28 = vadd.f32 %v4231_v56, %v13641_v33  ;;  %v4365_v21 = vmax.f32 %v4228_v2, 0.0  ;;  %v11754_v56 = vld [vmem:[%s16756_s4 + $0x520] ss:$8 sps:$4 sm:$0xff]  }
 0x55b   : > { %v4366_v26 = vmax.f32 %v4230_v20, 0.0 }
 0x55c   : > { %v4367_v61 = vmax.f32 %v4232_v28, 0.0 }
 0x55d   : > { %v14044_v1 = vpack.c.bf16 %v4366_v26, %v4364_v8  ;;  %5260 = vmatmul.mubr.bf16.gmra.mrb[84].mxu1 %v13951_v35  ;;  %v11759_v8 = vld [vmem:[%s16756_s4 + $0x534] ss:$8 sps:$4 sm:$0xff]  }
 0x55e   : > { %v4235_v6 = vpop.f32.mrb[124].mxu0  ;;  %5269 = vmatprep.mubr.bf16.mxu1 %v13968_v9  ;;  %v14048_v12 = vpack.c.bf16 %v4367_v61, %v4365_v21 }
 0x55f   : > { %v4236_v62 = vadd.f32 %v4235_v6, %v13637_v7  ;;  %v4237_v46 = vpop.f32.mrb[125].mxu0 }
 0x560   : > { %v4238_v58 = vadd.f32 %v4237_v46, %v13641_v33  ;;  %v4239_v11 = vpop.f32.mrb[126].mxu0 }
 0x561   : > { %v4240_v39 = vadd.f32 %v4239_v11, %v13637_v7  ;;  %v4241_v10 = vpop.f32.mrb[127].mxu0  ;;  %v4368_v42 = vmax.f32 %v4236_v62, 0.0  ;;  %v5370_v7 = vld [vmem:[%s16760_s8] sm:$0x3]  ;;  %v11757_v62 = vld [vmem:[%s16756_s4 + $0x530] ss:$8 sps:$4 sm:$0xff]  }
 0x562   : > { %v4242_v13 = vadd.f32 %v4241_v10, %v13641_v33  ;;  %v4369_v53 = vmax.f32 %v4238_v58, 0.0  ;;  %v14071_v33 = vrot.slane %v5370_v7, %v12616_v47  ;;  %v11762_v11 = vld [vmem:[%s16756_s4 + $0x544] ss:$8 sps:$4 sm:$0xff]  }
 0x563   : > { %v4370_v59 = vmax.f32 %v4240_v39, 0.0 }
 0x564   : > { %v4371_v35 = vmax.f32 %v4242_v13, 0.0 }
 0x565   : > { %v14054_v55 = vpack.c.bf16 %v4370_v59, %v4368_v42  ;;  %5270 = vmatmul.mubr.bf16.gmra.mrb[88].mxu1 %v13964_v40  ;;  %v14075_v40 = vrot.slane %v5370_v7, %v12622_v51  ;;  %v11765_v7 = vld [vmem:[%s16756_s4 + $0x554] ss:$8 sps:$4 sm:$0xff]  }
 0x566   : > { %5279 = vmatprep.mubr.bf16.mxu1 %v13978_v24  ;;  %v14058_v9 = vpack.c.bf16 %v4371_v35, %v4369_v53  ;;  %v11760_v53 = vld [vmem:[%s16756_s4 + $0x540] ss:$8 sps:$4 sm:$0xff]  }
 0x56d   : > { %5280 = vmatmul.mubr.bf16.gmra.mrb[92].mxu1 %v13974_v15 }
 0x56e   : > { %5289 = vmatprep.mubr.bf16.mxu1 %v13988_v17 }
 0x575   : > { %5290 = vmatmul.mubr.bf16.gmra.mrb[96].mxu1 %v13984_v27 }
 0x576   : > { %5299 = vmatprep.mubr.bf16.mxu1 %v13998_v43 }
 0x57d   : > { %5300 = vmatmul.mubr.bf16.gmra.mrb[100].mxu1 %v13994_v34 }
 0x57e   : > { %5309 = vmatprep.mubr.bf16.mxu1 %v14008_v44 }
 0x585   : > { %5310 = vmatmul.mubr.bf16.gmra.mrb[104].mxu1 %v14004_v63 }
 0x586   : > { %5319 = vmatprep.mubr.bf16.mxu1 %v14018_v41 }
 0x588   : > { %v5051_v15 = vpop.f32.mrb[0].mxu1 }
 0x589   : > { %v5382_v24 = vadd.f32 %v14071_v33, %v5051_v15  ;;  %v5053_v27 = vpop.f32.mrb[1].mxu1 }
 0x58a   : > { %v5383_v17 = vadd.f32 %v14075_v40, %v5053_v27  ;;  %v5055_v34 = vpop.f32.mrb[2].mxu1 }
 0x58b   : > { %v5384_v43 = vadd.f32 %v14071_v33, %v5055_v34  ;;  %v5057_v44 = vpop.f32.mrb[3].mxu1  ;;  %v5510_v36 = vmax.f32 %v5382_v24, 0.0  ;;  %v11763_v34 = vld [vmem:[%s16756_s4 + $0x550] ss:$8 sps:$4 sm:$0xff]  }
 0x58c   : > { %v5385_v63 = vadd.f32 %v14075_v40, %v5057_v44  ;;  %v5511_v41 = vmax.f32 %v5383_v17, 0.0 }
 0x58d   : > { %v5512_v32 = vmax.f32 %v5384_v43, 0.0  ;;  %5320 = vmatmul.mubr.bf16.gmra.mrb[108].mxu1 %v14014_v14 }
 0x58e   : > { %v5513_v37 = vmax.f32 %v5385_v63, 0.0  ;;  %5329 = vmatprep.mubr.bf16.mxu1 %v14028_v52  ;;  %v11768_v63 = vld [vmem:[%s16756_s4 + $0x564] ss:$8 sps:$4 sm:$0xff]  }
 0x58f   : > { %v5671_v38 = vpack.c.bf16 %v5512_v32, %v5510_v36 }
 0x590   : > { %v5061_v30 = vpop.f32.mrb[4].mxu1  ;;  %v5672_v23 = vpack.c.bf16 %v5513_v37, %v5511_v41 }
 0x591   : > { %v5386_v49 = vadd.f32 %v14071_v33, %v5061_v30  ;;  %v5063_v5 = vpop.f32.mrb[5].mxu1  ;;  %v11766_v30 = vld [vmem:[%s16756_s4 + $0x560] ss:$8 sps:$4 sm:$0xff]  }
 0x592   : > { %v5387_v14 = vadd.f32 %v14075_v40, %v5063_v5  ;;  %v5065_v3 = vpop.f32.mrb[6].mxu1  ;;  %5940 = vmatprep.mubr.bf16.mxu0 %v5672_v23 }
 0x593   : > { %v5388_v52 = vadd.f32 %v14071_v33, %v5065_v3  ;;  %v5067_v18 = vpop.f32.mrb[7].mxu1  ;;  %5941 = vmatmul.mubr.bf16.vlgmr.msra.gmra.mrb[128].mxu0 %v5671_v38  ;;  %v5514_v25 = vmax.f32 %v5386_v49, 0.0  ;;  %v11769_v3 = vld [vmem:[%s16756_s4 + $0x570] ss:$8 sps:$4 sm:$0xff]  }
 0x594   : > { %v5389_v60 = vadd.f32 %v14075_v40, %v5067_v18  ;;  %6660 = vmatpush1.bf16.msra.mxu0 %v11748_v29  ;;  %v5515_v16 = vmax.f32 %v5387_v14, 0.0  ;;  %v11771_v29 = vld [vmem:[%s16756_s4 + $0x574] ss:$8 sps:$4 sm:$0xff]  }
 0x595   : > { %v5516_v45 = vmax.f32 %v5388_v52, 0.0  ;;  %5330 = vmatmul.mubr.bf16.gmra.mrb[112].mxu1 %v14024_v0  ;;  %6661 = vmatprep.subr.bf16.mxu0 %v11753_v19 }
 0x596   : > { %v5517_v31 = vmax.f32 %v5389_v60, 0.0  ;;  %5339 = vmatprep.mubr.bf16.mxu1 %v14038_v48  ;;  %v11774_v60 = vld [vmem:[%s16756_s4 + $0x584] ss:$8 sps:$4 sm:$0xff]  }
 0x597   : > { %v5673_v2 = vpack.c.bf16 %v5516_v45, %v5514_v25 }
 0x598   : > { %v5071_v54 = vpop.f32.mrb[8].mxu1  ;;  %v5674_v20 = vpack.c.bf16 %v5517_v31, %v5515_v16  ;;  %6662 = vmatpush1.bf16.msra.mxu0 %v11751_v22  ;;  %v11772_v31 = vld [vmem:[%s16756_s4 + $0x580] ss:$8 sps:$4 sm:$0xff]  }
 0x599   : > { %v5390_v28 = vadd.f32 %v14071_v33, %v5071_v54  ;;  %v5073_v0 = vpop.f32.mrb[9].mxu1  ;;  %6663 = vmatprep.subr.bf16.mxu0 %v11756_v50 }
 0x59a   : > { %v5391_v26 = vadd.f32 %v14075_v40, %v5073_v0  ;;  %v5075_v21 = vpop.f32.mrb[10].mxu1  ;;  %5950 = vmatprep.mubr.bf16.mxu0 %v5674_v20 }
 0x59b   : > { %v5392_v48 = vadd.f32 %v14071_v33, %v5075_v21  ;;  %v5077_v61 = vpop.f32.mrb[11].mxu1  ;;  %5951 = vmatmul.mubr.bf16.gmra.mrb[132].mxu0 %v5673_v2  ;;  %v5518_v46 = vmax.f32 %v5390_v28, 0.0 }
 0x59c   : > { %v5393_v6 = vadd.f32 %v14075_v40, %v5077_v61  ;;  %6664 = vmatpush1.bf16.msra.mxu0 %v11754_v56  ;;  %v5519_v39 = vmax.f32 %v5391_v26, 0.0  ;;  %v11775_v26 = vld [vmem:[%s16756_s4 + $0x590] ss:$8 sps:$4 sm:$0xff]  }
 0x59d   : > { %v5520_v58 = vmax.f32 %v5392_v48, 0.0  ;;  %5340 = vmatmul.mubr.bf16.gmra.mrb[116].mxu1 %v14034_v4  ;;  %6665 = vmatprep.subr.bf16.mxu0 %v11759_v8 }
 0x59e   : > { %v5521_v10 = vmax.f32 %v5393_v6, 0.0  ;;  %5349 = vmatprep.mubr.bf16.mxu1 %v14048_v12 }
 0x59f   : > { %v5675_v13 = vpack.c.bf16 %v5520_v58, %v5518_v46  ;;  %v11780_v46 = vld [vmem:[%s16756_s4 + $0x5a4] ss:$8 sps:$4 sm:$0xff]  }
 0x5a0   : > { %v5081_v42 = vpop.f32.mrb[12].mxu1  ;;  %v5676_v59 = vpack.c.bf16 %v5521_v10, %v5519_v39  ;;  %6666 = vmatpush1.bf16.msra.mxu0 %v11757_v62  ;;  %v11778_v39 = vld [vmem:[%s16756_s4 + $0x5a0] ss:$8 sps:$4 sm:$0xff]  }
 0x5a1   : > { %v5394_v35 = vadd.f32 %v14071_v33, %v5081_v42  ;;  %v5083_v4 = vpop.f32.mrb[13].mxu1  ;;  %6667 = vmatprep.subr.bf16.mxu0 %v11762_v11 }
 0x5a2   : > { %v5395_v15 = vadd.f32 %v14075_v40, %v5083_v4  ;;  %v5085_v24 = vpop.f32.mrb[14].mxu1  ;;  %5960 = vmatprep.mubr.bf16.mxu0 %v5676_v59 }
 0x5a3   : > { %v5396_v12 = vadd.f32 %v14071_v33, %v5085_v24  ;;  %v5087_v27 = vpop.f32.mrb[15].mxu1  ;;  %5961 = vmatmul.mubr.bf16.gmra.mrb[136].mxu0 %v5675_v13  ;;  %v5522_v43 = vmax.f32 %v5394_v35, 0.0 }
 0x5a4   : > { %v5397_v17 = vadd.f32 %v14075_v40, %v5087_v27  ;;  %6668 = vmatpush1.bf16.msra.mxu0 %v11760_v53  ;;  %v5523_v36 = vmax.f32 %v5395_v15, 0.0 }
 0x5a5   : > { %v5524_v44 = vmax.f32 %v5396_v12, 0.0  ;;  %5350 = vmatmul.mubr.bf16.gmra.mrb[120].mxu1 %v14044_v1  ;;  %6669 = vmatprep.subr.bf16.mxu0 %v11765_v7 }
 0x5a6   : > { %v5525_v32 = vmax.f32 %v5397_v17, 0.0  ;;  %5359 = vmatprep.mubr.bf16.mxu1 %v14058_v9 }
 0x5a7   : > { %v5677_v41 = vpack.c.bf16 %v5524_v44, %v5522_v43 }
 0x5a8   : > { %v5091_v37 = vpop.f32.mrb[16].mxu1  ;;  %v5678_v38 = vpack.c.bf16 %v5525_v32, %v5523_v36  ;;  %6670 = vmatpush1.bf16.msra.mxu0 %v11763_v34 }
 0x5a9   : > { %v5398_v23 = vadd.f32 %v14071_v33, %v5091_v37  ;;  %v5093_v1 = vpop.f32.mrb[17].mxu1  ;;  %6671 = vmatprep.subr.bf16.mxu0 %v11768_v63 }
 0x5aa   : > { %v5399_v49 = vadd.f32 %v14075_v40, %v5093_v1  ;;  %v5095_v5 = vpop.f32.mrb[18].mxu1  ;;  %5970 = vmatprep.mubr.bf16.mxu0 %v5678_v38 }
 0x5ab   : > { %v5400_v9 = vadd.f32 %v14071_v33, %v5095_v5  ;;  %v5097_v19 = vpop.f32.mrb[19].mxu1  ;;  %5971 = vmatmul.mubr.bf16.gmra.mrb[140].mxu0 %v5677_v41  ;;  %v5526_v52 = vmax.f32 %v5398_v23, 0.0  ;;  %v11783_v5 = vld [vmem:[%s16756_s4 + $0x5b4] ss:$8 sps:$4 sm:$0xff]  }
 0x5ac   : > { %v5401_v14 = vadd.f32 %v14075_v40, %v5097_v19  ;;  %6672 = vmatpush1.bf16.msra.mxu0 %v11766_v30  ;;  %v5527_v22 = vmax.f32 %v5399_v49, 0.0  ;;  %v11781_v49 = vld [vmem:[%s16756_s4 + $0x5b0] ss:$8 sps:$4 sm:$0xff]  }
 0x5ad   : > { %v5528_v18 = vmax.f32 %v5400_v9, 0.0  ;;  %5360 = vmatmul.mubr.bf16.gmra.mrb[124].mxu1 %v14054_v55  ;;  %6673 = vmatprep.subr.bf16.mxu0 %v11771_v29  ;;  %v11777_v55 = vld [vmem:[%s16756_s4 + $0x594] ss:$8 sps:$4 sm:$0xff]  }
 0x5ae   : > { %v5529_v25 = vmax.f32 %v5401_v14, 0.0 }
 0x5af   : > { %v5679_v45 = vpack.c.bf16 %v5528_v18, %v5526_v52 }
 0x5b0   : > { %v5101_v50 = vpop.f32.mrb[20].mxu1  ;;  %v5680_v16 = vpack.c.bf16 %v5529_v25, %v5527_v22  ;;  %6674 = vmatpush1.bf16.msra.mxu0 %v11769_v3 }
 0x5b1   : > { %v5402_v2 = vadd.f32 %v14071_v33, %v5101_v50  ;;  %v5103_v54 = vpop.f32.mrb[21].mxu1  ;;  %6675 = vmatprep.subr.bf16.mxu0 %v11774_v60 }
 0x5b2   : > { %v5403_v20 = vadd.f32 %v14075_v40, %v5103_v54  ;;  %v5105_v56 = vpop.f32.mrb[22].mxu1  ;;  %5980 = vmatprep.mubr.bf16.mxu0 %v5680_v16 }
 0x5b3   : > { %v5404_v28 = vadd.f32 %v14071_v33, %v5105_v56  ;;  %v5107_v0 = vpop.f32.mrb[23].mxu1  ;;  %5981 = vmatmul.mubr.bf16.gmra.mrb[144].mxu0 %v5679_v45  ;;  %v5530_v21 = vmax.f32 %v5402_v2, 0.0 }
 0x5b4   : > { %v5405_v8 = vadd.f32 %v14075_v40, %v5107_v0  ;;  %6676 = vmatpush1.bf16.msra.mxu0 %v11772_v31  ;;  %v5531_v61 = vmax.f32 %v5403_v20, 0.0 }
 0x5b5   : > { %v5532_v48 = vmax.f32 %v5404_v28, 0.0  ;;  %6677 = vmatprep.subr.bf16.mxu0 %v11777_v55 }
 0x5b6   : > { %v5533_v6 = vmax.f32 %v5405_v8, 0.0 }
 0x5b7   : > { %v5681_v62 = vpack.c.bf16 %v5532_v48, %v5530_v21 }
 0x5b8   : > { %v5111_v58 = vpop.f32.mrb[24].mxu1  ;;  %v5682_v11 = vpack.c.bf16 %v5533_v6, %v5531_v61  ;;  %6678 = vmatpush1.bf16.msra.mxu0 %v11775_v26 }
 0x5b9   : > { %v5406_v10 = vadd.f32 %v14071_v33, %v5111_v58  ;;  %v5113_v13 = vpop.f32.mrb[25].mxu1  ;;  %6679 = vmatprep.subr.bf16.mxu0 %v11780_v46  ;;  %v11784_v58 = vld [vmem:[%s16756_s4 + $0x5c0] ss:$8 sps:$4 sm:$0xff]  }
 0x5ba   : > { %v5407_v42 = vadd.f32 %v14075_v40, %v5113_v13  ;;  %v5115_v59 = vpop.f32.mrb[26].mxu1  ;;  %5990 = vmatprep.mubr.bf16.mxu0 %v5682_v11  ;;  %v11786_v11 = vld [vmem:[%s16756_s4 + $0x5c4] ss:$8 sps:$4 sm:$0xff]  }
 0x5bb   : > { %v5408_v53 = vadd.f32 %v14071_v33, %v5115_v59  ;;  %v5117_v35 = vpop.f32.mrb[27].mxu1  ;;  %5991 = vmatmul.mubr.bf16.gmra.mrb[148].mxu0 %v5681_v62  ;;  %v5534_v7 = vmax.f32 %v5406_v10, 0.0 }
 0x5bc   : > { %v5409_v4 = vadd.f32 %v14075_v40, %v5117_v35  ;;  %6680 = vmatpush1.bf16.msra.mxu0 %v11778_v39  ;;  %v5535_v24 = vmax.f32 %v5407_v42, 0.0 }
 0x5bd   : > { %v5536_v15 = vmax.f32 %v5408_v53, 0.0  ;;  %6681 = vmatprep.subr.bf16.mxu0 %v11783_v5  ;;  %v11787_v5 = vld [vmem:[%s16756_s4 + $0x5d0] ss:$8 sps:$4 sm:$0xff]  }
 0x5be   : > { %v5537_v12 = vmax.f32 %v5409_v4, 0.0 }
 0x5bf   : > { %v5683_v27 = vpack.c.bf16 %v5536_v15, %v5534_v7 }
 0x5c0   : > { %v5121_v17 = vpop.f32.mrb[28].mxu1  ;;  %v5684_v34 = vpack.c.bf16 %v5537_v12, %v5535_v24  ;;  %6682 = vmatpush1.bf16.msra.mxu0 %v11781_v49 }
 0x5c1   : > { %v5410_v43 = vadd.f32 %v14071_v33, %v5121_v17  ;;  %v5123_v44 = vpop.f32.mrb[29].mxu1  ;;  %6683 = vmatprep.subr.bf16.mxu0 %v11786_v11 }
 0x5c2   : > { %v5411_v63 = vadd.f32 %v14075_v40, %v5123_v44  ;;  %v5125_v36 = vpop.f32.mrb[30].mxu1  ;;  %6000 = vmatprep.mubr.bf16.mxu0 %v5684_v34 }
 0x5c3   : > { %v5412_v32 = vadd.f32 %v14071_v33, %v5125_v36  ;;  %v5127_v41 = vpop.f32.mrb[31].mxu1  ;;  %6001 = vmatmul.mubr.bf16.gmra.mrb[152].mxu0 %v5683_v27  ;;  %v5538_v38 = vmax.f32 %v5410_v43, 0.0 }
 0x5c4   : > { %v5413_v37 = vadd.f32 %v14075_v40, %v5127_v41  ;;  %v5539_v23 = vmax.f32 %v5411_v63, 0.0  ;;  %6684 = vmatpush1.bf16.msra.mxu0 %v11784_v58 }
 0x5c5   : > { %v5540_v30 = vmax.f32 %v5412_v32, 0.0 }
 0x5c6   : > { %v5541_v1 = vmax.f32 %v5413_v37, 0.0 }
 0x5c7   : > { %v5685_v29 = vpack.c.bf16 %v5540_v30, %v5538_v38 }
 0x5c8   : > { %v5131_v9 = vpop.f32.mrb[32].mxu1  ;;  %v5686_v19 = vpack.c.bf16 %v5541_v1, %v5539_v23 }
 0x5c9   : > { %v5414_v14 = vadd.f32 %v14071_v33, %v5131_v9  ;;  %v5133_v3 = vpop.f32.mrb[33].mxu1  ;;  %v11789_v9 = vld [vmem:[%s16756_s4 + $0x5d4] ss:$8 sps:$4 sm:$0xff]  }
 0x5ca   : > { %v5415_v52 = vadd.f32 %v14075_v40, %v5133_v3  ;;  %v5135_v18 = vpop.f32.mrb[34].mxu1  ;;  %6010 = vmatprep.mubr.bf16.mxu0 %v5686_v19  ;;  %6685 = vmatprep.subr.bf16.mxu0 %v11789_v9  ;;  %v11798_v9 = vld [vmem:[%s16761_s9 + $0x1c] ss:$12 sps:$4 sm:$0xff]  }
 0x5cb   : > { %v5416_v60 = vadd.f32 %v14071_v33, %v5135_v18  ;;  %v5137_v22 = vpop.f32.mrb[35].mxu1  ;;  %6011 = vmatmul.mubr.bf16.gmra.mrb[156].mxu0 %v5685_v29  ;;  %v5542_v45 = vmax.f32 %v5414_v14, 0.0 }
 0x5cc   : > { %v5417_v25 = vadd.f32 %v14075_v40, %v5137_v22  ;;  %v5543_v16 = vmax.f32 %v5415_v52, 0.0  ;;  %6686 = vmatpush1.bf16.msra.mxu0 %v11787_v5  ;;  %v11796_v5 = vld [vmem:[%s16761_s9 + $0x18] ss:$12 sps:$4 sm:$0xff]  }
 0x5cd   : > { %v5544_v50 = vmax.f32 %v5416_v60, 0.0 }
 0x5ce   : > { %v5545_v31 = vmax.f32 %v5417_v25, 0.0 }
 0x5cf   : > { %v5687_v2 = vpack.c.bf16 %v5544_v50, %v5542_v45 }
 0x5d0   : > { %v5141_v54 = vpop.f32.mrb[36].mxu1  ;;  %v5688_v55 = vpack.c.bf16 %v5545_v31, %v5543_v16 }
 0x5d1   : > { %v5418_v20 = vadd.f32 %v14071_v33, %v5141_v54  ;;  %v5143_v56 = vpop.f32.mrb[37].mxu1 }
 0x5d2   : > { %v5419_v28 = vadd.f32 %v14075_v40, %v5143_v56  ;;  %v5145_v0 = vpop.f32.mrb[38].mxu1  ;;  %6020 = vmatprep.mubr.bf16.mxu0 %v5688_v55 }
 0x5d3   : > { %v5420_v8 = vadd.f32 %v14071_v33, %v5145_v0  ;;  %v5147_v26 = vpop.f32.mrb[39].mxu1  ;;  %6021 = vmatmul.mubr.bf16.gmra.mrb[160].mxu0 %v5687_v2  ;;  %v5546_v48 = vmax.f32 %v5418_v20, 0.0 }
 0x5d4   : > { %v5421_v21 = vadd.f32 %v14075_v40, %v5147_v26  ;;  %v5547_v6 = vmax.f32 %v5419_v28, 0.0 }
 0x5d5   : > { %v5548_v61 = vmax.f32 %v5420_v8, 0.0 }
 0x5d6   : > { %v5549_v62 = vmax.f32 %v5421_v21, 0.0 }
 0x5d7   : > { %v5689_v46 = vpack.c.bf16 %v5548_v61, %v5546_v48 }
 0x5d8   : > { %v5151_v39 = vpop.f32.mrb[40].mxu1  ;;  %v5690_v10 = vpack.c.bf16 %v5549_v62, %v5547_v6  ;;  %v11790_v62 = vld [vmem:[%s16761_s9] ss:$12 sps:$4 sm:$0xff]  }
 0x5d9   : > { %v5422_v13 = vadd.f32 %v14071_v33, %v5151_v39  ;;  %v5153_v42 = vpop.f32.mrb[41].mxu1 }
 0x5da   : > { %v5423_v59 = vadd.f32 %v14075_v40, %v5153_v42  ;;  %v5155_v53 = vpop.f32.mrb[42].mxu1  ;;  %6030 = vmatprep.mubr.bf16.mxu0 %v5690_v10  ;;  %v11793_v10 = vld [vmem:[%s16756_s4 + $0x5e0] ss:$8 sps:$4 sm:$0xff]  }
 0x5db   : > { %v5424_v35 = vadd.f32 %v14071_v33, %v5155_v53  ;;  %v5157_v4 = vpop.f32.mrb[43].mxu1  ;;  %6031 = vmatmul.mubr.bf16.gmra.mrb[164].mxu0 %v5689_v46  ;;  %v5550_v15 = vmax.f32 %v5422_v13, 0.0  ;;  %v11792_v46 = vld [vmem:[%s16761_s9 + $0x4] ss:$12 sps:$4 sm:$0xff]  }
 0x5dc   : > { %v5425_v7 = vadd.f32 %v14075_v40, %v5157_v4  ;;  %v5551_v12 = vmax.f32 %v5423_v59, 0.0  ;;  %7541 = vmatprep.subr.bf16.mxu1 %v11792_v46  ;;  %v11795_v13 = vld [vmem:[%s16756_s4 + $0x5e4] ss:$8 sps:$4 sm:$0xff]  }
 0x5dd   : > { %v5552_v24 = vmax.f32 %v5424_v35, 0.0  ;;  %7542 = vmatpush1.bf16.msra.mxu1 %v11790_v62  ;;  %6687 = vmatprep.subr.bf16.mxu0 %v11795_v13  ;;  %v11804_v13 = vld [vmem:[%s16761_s9 + $0x34] ss:$12 sps:$4 sm:$0xff]  }
 0x5de   : > { %v5553_v27 = vmax.f32 %v5425_v7, 0.0  ;;  %6688 = vmatpush1.bf16.msra.mxu0 %v11793_v10  ;;  %7543 = vmatprep.subr.bf16.mxu1 %v11798_v9  ;;  %v11802_v10 = vld [vmem:[%s16761_s9 + $0x30] ss:$12 sps:$4 sm:$0xff]  }
 0x5df   : > { %v5691_v17 = vpack.c.bf16 %v5552_v24, %v5550_v15 }
 0x5e0   : > { %v5161_v34 = vpop.f32.mrb[44].mxu1  ;;  %v5692_v43 = vpack.c.bf16 %v5553_v27, %v5551_v12 }
 0x5e1   : > { %v5426_v44 = vadd.f32 %v14071_v33, %v5161_v34  ;;  %v5163_v63 = vpop.f32.mrb[45].mxu1  ;;  %7544 = vmatpush1.bf16.msra.mxu1 %v11796_v5 }
 0x5e2   : > { %v5427_v36 = vadd.f32 %v14075_v40, %v5163_v63  ;;  %v5165_v32 = vpop.f32.mrb[46].mxu1  ;;  %6040 = vmatprep.mubr.bf16.mxu0 %v5692_v43  ;;  %7545 = vmatprep.subr.bf16.mxu1 %v11804_v13  ;;  %v11808_v13 = vld [vmem:[%s16761_s9 + $0x60] ss:$12 sps:$4 sm:$0xff]  }
 0x5e3   : > { %v5428_v41 = vadd.f32 %v14071_v33, %v5165_v32  ;;  %v5167_v37 = vpop.f32.mrb[47].mxu1  ;;  %6041 = vmatmul.mubr.bf16.gmra.mrb[168].mxu0 %v5691_v17  ;;  %v5554_v30 = vmax.f32 %v5426_v44, 0.0 }
 0x5e4   : > { %v5429_v38 = vadd.f32 %v14075_v40, %v5167_v37  ;;  %v5555_v1 = vmax.f32 %v5427_v36, 0.0 }
 0x5e5   : > { %v5556_v23 = vmax.f32 %v5428_v41, 0.0  ;;  %7546 = vmatpush1.bf16.msra.mxu1 %v11802_v10 }
 0x5e6   : > { %v5557_v29 = vmax.f32 %v5429_v38, 0.0 }
 0x5e7   : > { %v5693_v49 = vpack.c.bf16 %v5556_v23, %v5554_v30 }
 0x5e8   : > { %v5171_v19 = vpop.f32.mrb[48].mxu1  ;;  %v5694_v14 = vpack.c.bf16 %v5557_v29, %v5555_v1 }
 0x5e9   : > { %v5430_v3 = vadd.f32 %v14071_v33, %v5171_v19  ;;  %v5173_v52 = vpop.f32.mrb[49].mxu1 }
 0x5ea   : > { %v5431_v18 = vadd.f32 %v14075_v40, %v5173_v52  ;;  %v5175_v60 = vpop.f32.mrb[50].mxu1  ;;  %6050 = vmatprep.mubr.bf16.mxu0 %v5694_v14  ;;  %v11799_v52 = vld [vmem:[%s16756_s4 + $0x5f0] ss:$8 sps:$4 sm:$0xff]  }
 0x5eb   : > { %v5432_v22 = vadd.f32 %v14071_v33, %v5175_v60  ;;  %v5177_v25 = vpop.f32.mrb[51].mxu1  ;;  %6051 = vmatmul.mubr.bf16.gmra.mrb[172].mxu0 %v5693_v49  ;;  %v5558_v50 = vmax.f32 %v5430_v3, 0.0 }
 0x5ec   : > { %v5433_v45 = vadd.f32 %v14075_v40, %v5177_v25  ;;  %v5559_v31 = vmax.f32 %v5431_v18, 0.0  ;;  %v11801_v18 = vld [vmem:[%s16756_s4 + $0x5f4] ss:$8 sps:$4 sm:$0xff]  }
 0x5ed   : > { %v5560_v16 = vmax.f32 %v5432_v22, 0.0  ;;  %6689 = vmatprep.subr.bf16.mxu0 %v11801_v18 }
 0x5ee   : > { %v5561_v2 = vmax.f32 %v5433_v45, 0.0  ;;  %6690 = vmatpush1.bf16.msra.mxu0 %v11799_v52 }
 0x5ef   : > { %v5695_v54 = vpack.c.bf16 %v5560_v16, %v5558_v50  ;;  %7894 = vmatprep.subr.bf16.mxu0 %v16818_v57 }
 0x5f0   : > { %v5181_v55 = vpop.f32.mrb[52].mxu1  ;;  %v5696_v20 = vpack.c.bf16 %v5561_v2, %v5559_v31 }
 0x5f1   : > { %v5434_v56 = vadd.f32 %v14071_v33, %v5181_v55  ;;  %v5183_v28 = vpop.f32.mrb[53].mxu1 }
 0x5f2   : > { %v5435_v0 = vadd.f32 %v14075_v40, %v5183_v28  ;;  %v5185_v8 = vpop.f32.mrb[54].mxu1  ;;  %6060 = vmatprep.mubr.bf16.mxu0 %v5696_v20 }
 0x5f3   : > { %v5436_v26 = vadd.f32 %v14071_v33, %v5185_v8  ;;  %v5187_v21 = vpop.f32.mrb[55].mxu1  ;;  %6061 = vmatmul.mubr.bf16.gmra.mrb[176].mxu0 %v5695_v54  ;;  %v5562_v61 = vmax.f32 %v5434_v56, 0.0 }
 0x5f4   : > { %v5437_v48 = vadd.f32 %v14075_v40, %v5187_v21  ;;  %v5563_v58 = vmax.f32 %v5435_v0, 0.0 }
 0x5f5   : > { %v5564_v6 = vmax.f32 %v5436_v26, 0.0 }
 0x5f6   : > { %v5565_v11 = vmax.f32 %v5437_v48, 0.0 }
 0x5f7   : > { %v5697_v39 = vpack.c.bf16 %v5564_v6, %v5562_v61 }
 0x5f8   : > { %v5191_v42 = vpop.f32.mrb[56].mxu1  ;;  %v5698_v59 = vpack.c.bf16 %v5565_v11, %v5563_v58 }
 0x5f9   : > { %v5438_v53 = vadd.f32 %v14071_v33, %v5191_v42  ;;  %v5193_v35 = vpop.f32.mrb[57].mxu1 }
 0x5fa   : > { %v5439_v4 = vadd.f32 %v14075_v40, %v5193_v35  ;;  %v5195_v7 = vpop.f32.mrb[58].mxu1  ;;  %6070 = vmatprep.mubr.bf16.mxu0 %v5698_v59 }
 0x5fb   : > { %v5440_v15 = vadd.f32 %v14071_v33, %v5195_v7  ;;  %v5197_v24 = vpop.f32.mrb[59].mxu1  ;;  %6071 = vmatmul.mubr.bf16.gmra.mrb[180].mxu0 %v5697_v39  ;;  %v5566_v27 = vmax.f32 %v5438_v53, 0.0 }
 0x5fc   : > { %v5441_v12 = vadd.f32 %v14075_v40, %v5197_v24  ;;  %v5567_v34 = vmax.f32 %v5439_v4, 0.0 }
 0x5fd   : > { %v5568_v17 = vmax.f32 %v5440_v15, 0.0 }
 0x5fe   : > { %v5569_v43 = vmax.f32 %v5441_v12, 0.0 }
 0x5ff   : > { %v5699_v44 = vpack.c.bf16 %v5568_v17, %v5566_v27 }
 0x600   : > { %v5201_v63 = vpop.f32.mrb[60].mxu1  ;;  %v5700_v36 = vpack.c.bf16 %v5569_v43, %v5567_v34 }
 0x601   : > { %v5442_v32 = vadd.f32 %v14071_v33, %v5201_v63  ;;  %v5203_v41 = vpop.f32.mrb[61].mxu1 }
 0x602   : > { %v5443_v37 = vadd.f32 %v14075_v40, %v5203_v41  ;;  %v5205_v38 = vpop.f32.mrb[62].mxu1  ;;  %6080 = vmatprep.mubr.bf16.mxu0 %v5700_v36 }
 0x603   : > { %v5444_v30 = vadd.f32 %v14071_v33, %v5205_v38  ;;  %v5207_v23 = vpop.f32.mrb[63].mxu1  ;;  %6081 = vmatmul.mubr.bf16.gmra.mrb[184].mxu0 %v5699_v44  ;;  %v5570_v29 = vmax.f32 %v5442_v32, 0.0 }
 0x604   : > { %v5445_v1 = vadd.f32 %v14075_v40, %v5207_v23  ;;  %v5571_v19 = vmax.f32 %v5443_v37, 0.0 }
 0x605   : > { %v5572_v49 = vmax.f32 %v5444_v30, 0.0 }
 0x606   : > { %v5573_v14 = vmax.f32 %v5445_v1, 0.0 }
 0x607   : > { %v5701_v3 = vpack.c.bf16 %v5572_v49, %v5570_v29 }
 0x608   : > { %v5211_v60 = vpop.f32.mrb[64].mxu1  ;;  %v5702_v22 = vpack.c.bf16 %v5573_v14, %v5571_v19  ;;  %v11805_v14 = vld [vmem:[%s16761_s9 + $0x48] ss:$12 sps:$4 sm:$0xff]  }
 0x609   : > { %v5446_v25 = vadd.f32 %v14071_v33, %v5211_v60  ;;  %v5213_v45 = vpop.f32.mrb[65].mxu1 }
 0x60a   : > { %v5447_v50 = vadd.f32 %v14075_v40, %v5213_v45  ;;  %v5215_v16 = vpop.f32.mrb[66].mxu1  ;;  %6090 = vmatprep.mubr.bf16.mxu0 %v5702_v22 }
 0x60b   : > { %v5448_v31 = vadd.f32 %v14071_v33, %v5215_v16  ;;  %v5217_v2 = vpop.f32.mrb[67].mxu1  ;;  %6091 = vmatmul.mubr.bf16.gmra.mrb[188].mxu0 %v5701_v3  ;;  %v5574_v55 = vmax.f32 %v5446_v25, 0.0  ;;  %v11807_v3 = vld [vmem:[%s16761_s9 + $0x4c] ss:$12 sps:$4 sm:$0xff]  }
 0x60c   : > { %v5449_v54 = vadd.f32 %v14075_v40, %v5217_v2  ;;  %v5575_v56 = vmax.f32 %v5447_v50, 0.0  ;;  %7547 = vmatprep.subr.bf16.mxu1 %v11807_v3  ;;  %v11811_v3 = vld [vmem:[%s16761_s9 + $0x78] ss:$12 sps:$4 sm:$0xff]  }
 0x60d   : > { %v5576_v20 = vmax.f32 %v5448_v31, 0.0  ;;  %7548 = vmatpush1.bf16.msra.mxu1 %v11805_v14 }
 0x60e   : > { %v5577_v28 = vmax.f32 %v5449_v54, 0.0 }
 0x60f   : > { %v5703_v0 = vpack.c.bf16 %v5576_v20, %v5574_v55 }
 0x610   : > { %v5221_v8 = vpop.f32.mrb[68].mxu1  ;;  %v5704_v26 = vpack.c.bf16 %v5577_v28, %v5575_v56 }
 0x611   : > { %v5450_v21 = vadd.f32 %v14071_v33, %v5221_v8  ;;  %v5223_v48 = vpop.f32.mrb[69].mxu1 }
 0x612   : > { %v5451_v61 = vadd.f32 %v14075_v40, %v5223_v48  ;;  %v5225_v6 = vpop.f32.mrb[70].mxu1  ;;  %6100 = vmatprep.mubr.bf16.mxu0 %v5704_v26 }
 0x613   : > { %v5452_v62 = vadd.f32 %v14071_v33, %v5225_v6  ;;  %v5227_v46 = vpop.f32.mrb[71].mxu1  ;;  %6101 = vmatmul.mubr.bf16.gmra.mrb[192].mxu0 %v5703_v0  ;;  %v5578_v11 = vmax.f32 %v5450_v21, 0.0 }
 0x614   : > { %v5453_v58 = vadd.f32 %v14075_v40, %v5227_v46  ;;  %v5579_v42 = vmax.f32 %v5451_v61, 0.0 }
 0x615   : > { %v5580_v39 = vmax.f32 %v5452_v62, 0.0 }
 0x616   : > { %v5581_v59 = vmax.f32 %v5453_v58, 0.0 }
 0x617   : > { %v5705_v53 = vpack.c.bf16 %v5580_v39, %v5578_v11 }
 0x618   : > { %v5231_v35 = vpop.f32.mrb[72].mxu1  ;;  %v5706_v4 = vpack.c.bf16 %v5581_v59, %v5579_v42  ;;  %v11810_v42 = vld [vmem:[%s16761_s9 + $0x64] ss:$12 sps:$4 sm:$0xff]  }
 0x619   : > { %v5454_v7 = vadd.f32 %v14071_v33, %v5231_v35  ;;  %v5233_v15 = vpop.f32.mrb[73].mxu1  ;;  %7549 = vmatprep.subr.bf16.mxu1 %v11810_v42  ;;  %v11814_v42 = vld [vmem:[%s16761_s9 + $0x90] ss:$12 sps:$4 sm:$0xff]  }
 0x61a   : > { %v5455_v24 = vadd.f32 %v14075_v40, %v5233_v15  ;;  %v5235_v12 = vpop.f32.mrb[74].mxu1  ;;  %6110 = vmatprep.mubr.bf16.mxu0 %v5706_v4  ;;  %7550 = vmatpush1.bf16.msra.mxu1 %v11808_v13 }
 0x61b   : > { %v5456_v27 = vadd.f32 %v14071_v33, %v5235_v12  ;;  %v5237_v17 = vpop.f32.mrb[75].mxu1  ;;  %6111 = vmatmul.mubr.bf16.gmra.mrb[196].mxu0 %v5705_v53  ;;  %v5582_v43 = vmax.f32 %v5454_v7, 0.0 }
 0x61c   : > { %v5457_v34 = vadd.f32 %v14075_v40, %v5237_v17  ;;  %v5583_v63 = vmax.f32 %v5455_v24, 0.0 }
 0x61d   : > { %v5584_v44 = vmax.f32 %v5456_v27, 0.0 }
 0x61e   : > { %v5585_v36 = vmax.f32 %v5457_v34, 0.0 }
 0x61f   : > { %v5707_v32 = vpack.c.bf16 %v5584_v44, %v5582_v43 }
 0x620   : > { %v5241_v41 = vpop.f32.mrb[76].mxu1  ;;  %v5708_v37 = vpack.c.bf16 %v5585_v36, %v5583_v63 }
 0x621   : > { %v5458_v38 = vadd.f32 %v14071_v33, %v5241_v41  ;;  %v5243_v30 = vpop.f32.mrb[77].mxu1 }
 0x622   : > { %v5459_v23 = vadd.f32 %v14075_v40, %v5243_v30  ;;  %v5245_v1 = vpop.f32.mrb[78].mxu1  ;;  %6120 = vmatprep.mubr.bf16.mxu0 %v5708_v37 }
 0x623   : > { %v5460_v29 = vadd.f32 %v14071_v33, %v5245_v1  ;;  %v5247_v49 = vpop.f32.mrb[79].mxu1  ;;  %6121 = vmatmul.mubr.bf16.gmra.mrb[200].mxu0 %v5707_v32  ;;  %v5586_v9 = vmax.f32 %v5458_v38, 0.0 }
 0x624   : > { %v5461_v5 = vadd.f32 %v14075_v40, %v5247_v49  ;;  %v5587_v52 = vmax.f32 %v5459_v23, 0.0 }
 0x625   : > { %v5588_v19 = vmax.f32 %v5460_v29, 0.0 }
 0x626   : > { %v5589_v18 = vmax.f32 %v5461_v5, 0.0 }
 0x627   : > { %v5709_v60 = vpack.c.bf16 %v5588_v19, %v5586_v9 }
 0x628   : > { %v5251_v22 = vpop.f32.mrb[80].mxu1  ;;  %v5710_v25 = vpack.c.bf16 %v5589_v18, %v5587_v52  ;;  %v11813_v52 = vld [vmem:[%s16761_s9 + $0x7c] ss:$12 sps:$4 sm:$0xff]  }
 0x629   : > { %v5462_v45 = vadd.f32 %v14071_v33, %v5251_v22  ;;  %v5253_v50 = vpop.f32.mrb[81].mxu1  ;;  %7551 = vmatprep.subr.bf16.mxu1 %v11813_v52 }
 0x62a   : > { %v5463_v16 = vadd.f32 %v14075_v40, %v5253_v50  ;;  %v5255_v31 = vpop.f32.mrb[82].mxu1  ;;  %6130 = vmatprep.mubr.bf16.mxu0 %v5710_v25  ;;  %7552 = vmatpush1.bf16.msra.mxu1 %v11811_v3 }
 0x62b   : > { %v5464_v2 = vadd.f32 %v14071_v33, %v5255_v31  ;;  %v5257_v54 = vpop.f32.mrb[83].mxu1  ;;  %6131 = vmatmul.mubr.bf16.gmra.mrb[204].mxu0 %v5709_v60  ;;  %v5590_v20 = vmax.f32 %v5462_v45, 0.0 }
 0x62c   : > { %v5465_v55 = vadd.f32 %v14075_v40, %v5257_v54  ;;  %v5591_v28 = vmax.f32 %v5463_v16, 0.0 }
 0x62d   : > { %v5592_v56 = vmax.f32 %v5464_v2, 0.0 }
 0x62e   : > { %v5593_v0 = vmax.f32 %v5465_v55, 0.0 }
 0x62f   : > { %v5711_v8 = vpack.c.bf16 %v5592_v56, %v5590_v20 }
 0x630   : > { %v5261_v26 = vpop.f32.mrb[84].mxu1  ;;  %v5712_v21 = vpack.c.bf16 %v5593_v0, %v5591_v28 }
 0x631   : > { %v5466_v48 = vadd.f32 %v14071_v33, %v5261_v26  ;;  %v5263_v61 = vpop.f32.mrb[85].mxu1 }
 0x632   : > { %v5467_v6 = vadd.f32 %v14075_v40, %v5263_v61  ;;  %v5265_v62 = vpop.f32.mrb[86].mxu1  ;;  %6140 = vmatprep.mubr.bf16.mxu0 %v5712_v21 }
 0x633   : > { %v5468_v46 = vadd.f32 %v14071_v33, %v5265_v62  ;;  %v5267_v58 = vpop.f32.mrb[87].mxu1  ;;  %6141 = vmatmul.mubr.bf16.gmra.mrb[208].mxu0 %v5711_v8  ;;  %v5594_v39 = vmax.f32 %v5466_v48, 0.0 }
 0x634   : > { %v5469_v11 = vadd.f32 %v14075_v40, %v5267_v58  ;;  %v5595_v59 = vmax.f32 %v5467_v6, 0.0 }
 0x635   : > { %v5596_v10 = vmax.f32 %v5468_v46, 0.0 }
 0x636   : > { %v5597_v53 = vmax.f32 %v5469_v11, 0.0 }
 0x637   : > { %v5713_v35 = vpack.c.bf16 %v5596_v10, %v5594_v39 }
 0x638   : > { %v5271_v4 = vpop.f32.mrb[88].mxu1  ;;  %v5714_v7 = vpack.c.bf16 %v5597_v53, %v5595_v59  ;;  %v11816_v59 = vld [vmem:[%s16761_s9 + $0x94] ss:$12 sps:$4 sm:$0xff]  }
 0x639   : > { %v5470_v15 = vadd.f32 %v14071_v33, %v5271_v4  ;;  %v5273_v24 = vpop.f32.mrb[89].mxu1  ;;  %7553 = vmatprep.subr.bf16.mxu1 %v11816_v59 }
 0x63a   : > { %v5471_v12 = vadd.f32 %v14075_v40, %v5273_v24  ;;  %v5275_v27 = vpop.f32.mrb[90].mxu1  ;;  %6150 = vmatprep.mubr.bf16.mxu0 %v5714_v7  ;;  %7554 = vmatpush1.bf16.msra.mxu1 %v11814_v42 }
 0x63b   : > { %v5472_v17 = vadd.f32 %v14071_v33, %v5275_v27  ;;  %v5277_v34 = vpop.f32.mrb[91].mxu1  ;;  %6151 = vmatmul.mubr.bf16.gmra.mrb[212].mxu0 %v5713_v35  ;;  %v5598_v44 = vmax.f32 %v5470_v15, 0.0 }
 0x63c   : > { %v5473_v43 = vadd.f32 %v14075_v40, %v5277_v34  ;;  %v5599_v36 = vmax.f32 %v5471_v12, 0.0 }
 0x63d   : > { %v5600_v63 = vmax.f32 %v5472_v17, 0.0 }
 0x63e   : > { %v5601_v32 = vmax.f32 %v5473_v43, 0.0 }
 0x63f   : > { %v5715_v41 = vpack.c.bf16 %v5600_v63, %v5598_v44 }
 0x640   : > { %v5281_v37 = vpop.f32.mrb[92].mxu1  ;;  %v5716_v38 = vpack.c.bf16 %v5601_v32, %v5599_v36 }
 0x641   : > { %v5474_v30 = vadd.f32 %v14071_v33, %v5281_v37  ;;  %v5283_v23 = vpop.f32.mrb[93].mxu1 }
 0x642   : > { %v5475_v1 = vadd.f32 %v14075_v40, %v5283_v23  ;;  %v5285_v29 = vpop.f32.mrb[94].mxu1  ;;  %6160 = vmatprep.mubr.bf16.mxu0 %v5716_v38  ;;  %v10811_v23 = vld [vmem:[%s16757_s5 + $0x8] sm:$0x3] }
 0x643   : > { %v5476_v49 = vadd.f32 %v14071_v33, %v5285_v29  ;;  %v5287_v5 = vpop.f32.mrb[95].mxu1  ;;  %6161 = vmatmul.mubr.bf16.gmra.mrb[216].mxu0 %v5715_v41  ;;  %v5602_v19 = vmax.f32 %v5474_v30, 0.0  ;;  %v14341_v52 = vrot.slane %v10811_v23, %v12622_v51 }
 0x644   : > { %v5477_v9 = vadd.f32 %v14075_v40, %v5287_v5  ;;  %v5603_v18 = vmax.f32 %v5475_v1, 0.0 }
 0x645   : > { %v5604_v14 = vmax.f32 %v5476_v49, 0.0 }
 0x646   : > { %v5605_v60 = vmax.f32 %v5477_v9, 0.0 }
 0x647   : > { %v5717_v22 = vpack.c.bf16 %v5604_v14, %v5602_v19  ;;  %v14337_v14 = vrot.slane %v10811_v23, %v12616_v47 }
 0x648   : > { %v5291_v25 = vpop.f32.mrb[96].mxu1  ;;  %v5718_v45 = vpack.c.bf16 %v5605_v60, %v5603_v18 }
 0x649   : > { %v5478_v50 = vadd.f32 %v14071_v33, %v5291_v25  ;;  %v5293_v16 = vpop.f32.mrb[97].mxu1  ;;  %v11819_v25 = vld [vmem:[%s16761_s9 + $0xac] ss:$12 sps:$4 sm:$0xff]  }
 0x64a   : > { %v5479_v31 = vadd.f32 %v14075_v40, %v5293_v16  ;;  %v5295_v2 = vpop.f32.mrb[98].mxu1  ;;  %6170 = vmatprep.mubr.bf16.mxu0 %v5718_v45  ;;  %7555 = vmatprep.subr.bf16.mxu1 %v11819_v25  ;;  %v11822_v25 = vld [vmem:[%s16761_s9 + $0xc4] ss:$12 sps:$4 sm:$0xff]  }
 0x64b   : > { %v5480_v54 = vadd.f32 %v14071_v33, %v5295_v2  ;;  %v5297_v55 = vpop.f32.mrb[99].mxu1  ;;  %6171 = vmatmul.mubr.bf16.gmra.mrb[220].mxu0 %v5717_v22  ;;  %v5606_v56 = vmax.f32 %v5478_v50, 0.0  ;;  %v11817_v22 = vld [vmem:[%s16761_s9 + $0xa8] ss:$12 sps:$4 sm:$0xff]  }
 0x64c   : > { %v5481_v20 = vadd.f32 %v14075_v40, %v5297_v55  ;;  %v5607_v0 = vmax.f32 %v5479_v31, 0.0  ;;  %7556 = vmatpush1.bf16.msra.mxu1 %v11817_v22  ;;  %v11820_v22 = vld [vmem:[%s16761_s9 + $0xc0] ss:$12 sps:$4 sm:$0xff]  }
 0x64d   : > { %v5608_v28 = vmax.f32 %v5480_v54, 0.0  ;;  %7557 = vmatprep.subr.bf16.mxu1 %v11822_v25 }
 0x64e   : > { %v5609_v8 = vmax.f32 %v5481_v20, 0.0 }
 0x64f   : > { %v5719_v26 = vpack.c.bf16 %v5608_v28, %v5606_v56 }
 0x650   : > { %v5301_v21 = vpop.f32.mrb[100].mxu1  ;;  %v5720_v48 = vpack.c.bf16 %v5609_v8, %v5607_v0  ;;  %7558 = vmatpush1.bf16.msra.mxu1 %v11820_v22 }
 0x651   : > { %v5482_v61 = vadd.f32 %v14071_v33, %v5301_v21  ;;  %v5303_v6 = vpop.f32.mrb[101].mxu1 }
 0x652   : > { %v5483_v62 = vadd.f32 %v14075_v40, %v5303_v6  ;;  %v5305_v46 = vpop.f32.mrb[102].mxu1  ;;  %6180 = vmatprep.mubr.bf16.mxu0 %v5720_v48 }
 0x653   : > { %v5484_v58 = vadd.f32 %v14071_v33, %v5305_v46  ;;  %v5307_v11 = vpop.f32.mrb[103].mxu1  ;;  %6181 = vmatmul.mubr.bf16.gmra.mrb[224].mxu0 %v5719_v26  ;;  %v5610_v10 = vmax.f32 %v5482_v61, 0.0 }
 0x654   : > { %v5485_v39 = vadd.f32 %v14075_v40, %v5307_v11  ;;  %v5611_v53 = vmax.f32 %v5483_v62, 0.0 }
 0x655   : > { %v5612_v13 = vmax.f32 %v5484_v58, 0.0 }
 0x656   : > { %v5613_v35 = vmax.f32 %v5485_v39, 0.0 }
 0x657   : > { %v5721_v4 = vpack.c.bf16 %v5612_v13, %v5610_v10 }
 0x658   : > { %v5311_v7 = vpop.f32.mrb[104].mxu1  ;;  %v5722_v15 = vpack.c.bf16 %v5613_v35, %v5611_v53 }
 0x659   : > { %v5486_v24 = vadd.f32 %v14071_v33, %v5311_v7  ;;  %v5313_v12 = vpop.f32.mrb[105].mxu1 }
 0x65a   : > { %v5487_v27 = vadd.f32 %v14075_v40, %v5313_v12  ;;  %v5315_v17 = vpop.f32.mrb[106].mxu1  ;;  %6190 = vmatprep.mubr.bf16.mxu0 %v5722_v15 }
 0x65b   : > { %v5488_v34 = vadd.f32 %v14071_v33, %v5315_v17  ;;  %v5317_v43 = vpop.f32.mrb[107].mxu1  ;;  %6191 = vmatmul.mubr.bf16.gmra.mrb[228].mxu0 %v5721_v4  ;;  %v5614_v63 = vmax.f32 %v5486_v24, 0.0 }
 0x65c   : > { %v5489_v44 = vadd.f32 %v14075_v40, %v5317_v43  ;;  %v5615_v32 = vmax.f32 %v5487_v27, 0.0 }
 0x65d   : > { %v5616_v36 = vmax.f32 %v5488_v34, 0.0 }
 0x65e   : > { %v5617_v41 = vmax.f32 %v5489_v44, 0.0 }
 0x65f   : > { %v5723_v37 = vpack.c.bf16 %v5616_v36, %v5614_v63 }
 0x660   : > { %v5321_v38 = vpop.f32.mrb[108].mxu1  ;;  %v5724_v30 = vpack.c.bf16 %v5617_v41, %v5615_v32 }
 0x661   : > { %v5490_v1 = vadd.f32 %v14071_v33, %v5321_v38  ;;  %v5323_v29 = vpop.f32.mrb[109].mxu1 }
 0x662   : > { %v5491_v49 = vadd.f32 %v14075_v40, %v5323_v29  ;;  %v5325_v5 = vpop.f32.mrb[110].mxu1  ;;  %6200 = vmatprep.mubr.bf16.mxu0 %v5724_v30 }
 0x663   : > { %v5492_v9 = vadd.f32 %v14071_v33, %v5325_v5  ;;  %v5327_v19 = vpop.f32.mrb[111].mxu1  ;;  %6201 = vmatmul.mubr.bf16.gmra.mrb[232].mxu0 %v5723_v37  ;;  %v5618_v18 = vmax.f32 %v5490_v1, 0.0 }
 0x664   : > { %v5493_v3 = vadd.f32 %v14075_v40, %v5327_v19  ;;  %v5619_v45 = vmax.f32 %v5491_v49, 0.0 }
 0x665   : > { %v5620_v60 = vmax.f32 %v5492_v9, 0.0 }
 0x666   : > { %v5621_v50 = vmax.f32 %v5493_v3, 0.0  ;;  %v5942_v16 = vpop.f32.mrb[128].mxu0 }
 0x667   : > { %v5725_v31 = vpack.c.bf16 %v5620_v60, %v5618_v18  ;;  %v5943_v2 = vadd.f32 %v5942_v16, %v14337_v14  ;;  %v5944_v54 = vpop.f32.mrb[129].mxu0 }
 0x668   : > { %v5945_v55 = vadd.f32 %v5944_v54, %v14341_v52  ;;  %v5331_v20 = vpop.f32.mrb[112].mxu1  ;;  %v5946_v56 = vpop.f32.mrb[130].mxu0  ;;  %v5726_v28 = vpack.c.bf16 %v5621_v50, %v5619_v45 }
 0x669   : > { %v5494_v0 = vadd.f32 %v14071_v33, %v5331_v20  ;;  %v5947_v8 = vadd.f32 %v5946_v56, %v14337_v14  ;;  %v5333_v26 = vpop.f32.mrb[113].mxu1  ;;  %v5948_v21 = vpop.f32.mrb[131].mxu0  ;;  %v6261_v62 = vmax.f32 %v5943_v2, 0.0 }
 0x66a   : > { %v5495_v48 = vadd.f32 %v14075_v40, %v5333_v26  ;;  %v5949_v61 = vadd.f32 %v5948_v21, %v14341_v52  ;;  %v5335_v6 = vpop.f32.mrb[114].mxu1  ;;  %6210 = vmatprep.mubr.bf16.mxu0 %v5726_v28  ;;  %v6262_v39 = vmax.f32 %v5945_v55, 0.0 }
 0x66b   : > { %v6263_v46 = vmax.f32 %v5947_v8, 0.0  ;;  %v5496_v58 = vadd.f32 %v14071_v33, %v5335_v6  ;;  %v5337_v11 = vpop.f32.mrb[115].mxu1  ;;  %6211 = vmatmul.mubr.bf16.gmra.mrb[236].mxu0 %v5725_v31  ;;  %v5622_v42 = vmax.f32 %v5494_v0, 0.0 }
 0x66c   : > { %v6264_v10 = vmax.f32 %v5949_v61, 0.0  ;;  %v5497_v13 = vadd.f32 %v14075_v40, %v5337_v11  ;;  %v5623_v35 = vmax.f32 %v5495_v48, 0.0 }
 0x66d   : > { %v14357_v59 = vpack.c.bf16 %v6263_v46, %v6261_v62  ;;  %v5624_v53 = vmax.f32 %v5496_v58, 0.0 }
 0x66e   : > { %v5625_v4 = vmax.f32 %v5497_v13, 0.0  ;;  %v5952_v7 = vpop.f32.mrb[132].mxu0  ;;  %v14359_v15 = vpack.c.bf16 %v6264_v10, %v6262_v39 }
 0x66f   : > { %v5727_v24 = vpack.c.bf16 %v5624_v53, %v5622_v42  ;;  %v5953_v12 = vadd.f32 %v5952_v7, %v14337_v14  ;;  %v5954_v27 = vpop.f32.mrb[133].mxu0 }
 0x670   : > { %v5955_v17 = vadd.f32 %v5954_v27, %v14341_v52  ;;  %v5341_v34 = vpop.f32.mrb[116].mxu1  ;;  %v5956_v43 = vpop.f32.mrb[134].mxu0  ;;  %v5728_v44 = vpack.c.bf16 %v5625_v4, %v5623_v35 }
 0x671   : > { %v5498_v63 = vadd.f32 %v14071_v33, %v5341_v34  ;;  %v5957_v36 = vadd.f32 %v5956_v43, %v14337_v14  ;;  %v5343_v32 = vpop.f32.mrb[117].mxu1  ;;  %v5958_v41 = vpop.f32.mrb[135].mxu0  ;;  %v6265_v23 = vmax.f32 %v5953_v12, 0.0 }
 0x672   : > { %v5499_v37 = vadd.f32 %v14075_v40, %v5343_v32  ;;  %v5959_v38 = vadd.f32 %v5958_v41, %v14341_v52  ;;  %v5345_v30 = vpop.f32.mrb[118].mxu1  ;;  %6220 = vmatprep.mubr.bf16.mxu0 %v5728_v44  ;;  %v6266_v5 = vmax.f32 %v5955_v17, 0.0 }
 0x673   : > { %v6267_v1 = vmax.f32 %v5957_v36, 0.0  ;;  %v5500_v29 = vadd.f32 %v14071_v33, %v5345_v30  ;;  %v5347_v49 = vpop.f32.mrb[119].mxu1  ;;  %6221 = vmatmul.mubr.bf16.gmra.mrb[240].mxu0 %v5727_v24  ;;  %v5626_v3 = vmax.f32 %v5498_v63, 0.0 }
 0x674   : > { %v6268_v9 = vmax.f32 %v5959_v38, 0.0  ;;  %v5501_v19 = vadd.f32 %v14075_v40, %v5347_v49  ;;  %v5627_v45 = vmax.f32 %v5499_v37, 0.0 }
 0x675   : > { %v14369_v18 = vpack.c.bf16 %v6267_v1, %v6265_v23  ;;  %v5628_v60 = vmax.f32 %v5500_v29, 0.0 }
 0x676   : > { %v5629_v50 = vmax.f32 %v5501_v19, 0.0  ;;  %v5962_v16 = vpop.f32.mrb[136].mxu0  ;;  %v14377_v31 = vpack.c.bf16 %v6268_v9, %v6266_v5 }
 0x677   : > { %v5729_v2 = vpack.c.bf16 %v5628_v60, %v5626_v3  ;;  %v5963_v54 = vadd.f32 %v5962_v16, %v14337_v14  ;;  %v5964_v55 = vpop.f32.mrb[137].mxu0  ;;  %v11823_v16 = vld [vmem:[%s16761_s9 + $0xd8] ss:$12 sps:$4 sm:$0xff]  }
 0x678   : > { %v5965_v20 = vadd.f32 %v5964_v55, %v14341_v52  ;;  %v5351_v56 = vpop.f32.mrb[120].mxu1  ;;  %v5966_v28 = vpop.f32.mrb[138].mxu0  ;;  %v5730_v0 = vpack.c.bf16 %v5629_v50, %v5627_v45 }
 0x679   : > { %v5502_v8 = vadd.f32 %v14071_v33, %v5351_v56  ;;  %v5967_v26 = vadd.f32 %v5966_v28, %v14337_v14  ;;  %v5353_v21 = vpop.f32.mrb[121].mxu1  ;;  %v5968_v48 = vpop.f32.mrb[139].mxu0  ;;  %v6269_v46 = vmax.f32 %v5963_v54, 0.0 }
 0x67a   : > { %v5503_v61 = vadd.f32 %v14075_v40, %v5353_v21  ;;  %v5969_v6 = vadd.f32 %v5968_v48, %v14341_v52  ;;  %v5355_v62 = vpop.f32.mrb[122].mxu1  ;;  %6230 = vmatprep.mubr.bf16.mxu0 %v5730_v0  ;;  %v6270_v10 = vmax.f32 %v5965_v20, 0.0 }
 0x67b   : > { %v6271_v58 = vmax.f32 %v5967_v26, 0.0  ;;  %v5504_v11 = vadd.f32 %v14071_v33, %v5355_v62  ;;  %v5357_v39 = vpop.f32.mrb[123].mxu1  ;;  %6231 = vmatmul.mubr.bf16.gmra.mrb[244].mxu0 %v5729_v2  ;;  %v5630_v53 = vmax.f32 %v5502_v8, 0.0  ;;  %v11825_v2 = vld [vmem:[%s16761_s9 + $0xdc] ss:$12 sps:$4 sm:$0xff]  }
 0x67c   : > { %v6272_v13 = vmax.f32 %v5969_v6, 0.0  ;;  %v5505_v42 = vadd.f32 %v14075_v40, %v5357_v39  ;;  %v5631_v7 = vmax.f32 %v5503_v61, 0.0  ;;  %7559 = vmatprep.subr.bf16.mxu1 %v11825_v2 }
 0x67d   : > { %v14387_v35 = vpack.c.bf16 %v6271_v58, %v6269_v46  ;;  %v5632_v4 = vmax.f32 %v5504_v11, 0.0  ;;  %7560 = vmatpush1.bf16.msra.mxu1 %v11823_v16 }
 0x67e   : > { %v5633_v24 = vmax.f32 %v5505_v42, 0.0  ;;  %v5972_v12 = vpop.f32.mrb[140].mxu0  ;;  %v14389_v27 = vpack.c.bf16 %v6272_v13, %v6270_v10 }
 0x67f   : > { %v5731_v17 = vpack.c.bf16 %v5632_v4, %v5630_v53  ;;  %v5973_v34 = vadd.f32 %v5972_v12, %v14337_v14  ;;  %v5974_v43 = vpop.f32.mrb[141].mxu0 }
 0x680   : > { %v5975_v44 = vadd.f32 %v5974_v43, %v14341_v52  ;;  %v5361_v63 = vpop.f32.mrb[124].mxu1  ;;  %v5976_v36 = vpop.f32.mrb[142].mxu0  ;;  %v5732_v32 = vpack.c.bf16 %v5633_v24, %v5631_v7 }
 0x681   : > { %v5506_v41 = vadd.f32 %v14071_v33, %v5361_v63  ;;  %v5977_v37 = vadd.f32 %v5976_v36, %v14337_v14  ;;  %v5363_v38 = vpop.f32.mrb[125].mxu1  ;;  %v5978_v30 = vpop.f32.mrb[143].mxu0  ;;  %v6273_v49 = vmax.f32 %v5973_v34, 0.0  ;;  %v11826_v63 = vld [vmem:[%s16761_s9 + $0xf0] ss:$12 sps:$4 sm:$0xff]  }
 0x682   : > { %v5507_v23 = vadd.f32 %v14075_v40, %v5363_v38  ;;  %v5979_v1 = vadd.f32 %v5978_v30, %v14341_v52  ;;  %v5365_v29 = vpop.f32.mrb[126].mxu1  ;;  %6240 = vmatprep.mubr.bf16.mxu0 %v5732_v32  ;;  %v6274_v3 = vmax.f32 %v5975_v44, 0.0  ;;  %v11828_v36 = vld [vmem:[%s16761_s9 + $0xf4] ss:$12 sps:$4 sm:$0xff]  }
 0x683   : > { %v6275_v5 = vmax.f32 %v5977_v37, 0.0  ;;  %v5508_v9 = vadd.f32 %v14071_v33, %v5365_v29  ;;  %v5367_v19 = vpop.f32.mrb[127].mxu1  ;;  %6241 = vmatmul.mubr.bf16.gmra.mrb[248].mxu0 %v5731_v17  ;;  %v5634_v25 = vmax.f32 %v5506_v41, 0.0  ;;  %7561 = vmatprep.subr.bf16.mxu1 %v11828_v36 }
 0x684   : > { %v6276_v60 = vmax.f32 %v5979_v1, 0.0  ;;  %v5509_v22 = vadd.f32 %v14075_v40, %v5367_v19  ;;  %v5635_v54 = vmax.f32 %v5507_v23, 0.0  ;;  %7562 = vmatpush1.bf16.msra.mxu1 %v11826_v63 }
 0x685   : > { %v14399_v45 = vpack.c.bf16 %v6275_v5, %v6273_v49  ;;  %v5636_v50 = vmax.f32 %v5508_v9, 0.0 }
 0x686   : > { %v5637_v33 = vmax.f32 %v5509_v22, 0.0  ;;  %v5982_v55 = vpop.f32.mrb[144].mxu0  ;;  %v14407_v20 = vpack.c.bf16 %v6276_v60, %v6274_v3 }
 0x687   : > { %v5733_v56 = vpack.c.bf16 %v5636_v50, %v5634_v25  ;;  %v5983_v40 = vadd.f32 %v5982_v55, %v14337_v14  ;;  %v5984_v28 = vpop.f32.mrb[145].mxu0 }
 0x688   : > { %v5985_v0 = vadd.f32 %v5984_v28, %v14341_v52  ;;  %v5986_v8 = vpop.f32.mrb[146].mxu0  ;;  %v5734_v26 = vpack.c.bf16 %v5637_v33, %v5635_v54  ;;  %v11829_v28 = vld [vmem:[%s16761_s9 + $0x108] ss:$12 sps:$4 sm:$0xff]  }
 0x689   : > { %v5987_v21 = vadd.f32 %v5986_v8, %v14337_v14  ;;  %v5988_v48 = vpop.f32.mrb[147].mxu0  ;;  %v6277_v6 = vmax.f32 %v5983_v40, 0.0 }
 0x68a   : > { %v5989_v61 = vadd.f32 %v5988_v48, %v14341_v52  ;;  %6250 = vmatprep.mubr.bf16.mxu0 %v5734_v26  ;;  %v6278_v46 = vmax.f32 %v5985_v0, 0.0  ;;  %v11831_v0 = vld [vmem:[%s16761_s9 + $0x10c] ss:$12 sps:$4 sm:$0xff]  }
 0x68b   : > { %v6279_v62 = vmax.f32 %v5987_v21, 0.0  ;;  %6251 = vmatmul.mubr.bf16.gmra.mrb[252].mxu0 %v5733_v56  ;;  %7563 = vmatprep.subr.bf16.mxu1 %v11831_v0 }
 0x68c   : > { %v6280_v58 = vmax.f32 %v5989_v61, 0.0  ;;  %6691 = vmatprep.mubr.bf16.mxu0 %v14359_v15  ;;  %7564 = vmatpush1.bf16.msra.mxu1 %v11829_v28 }
 0x68d   : > { %v14414_v11 = vpack.c.bf16 %v6279_v62, %v6277_v6 }
 0x68e   : > { %v5992_v39 = vpop.f32.mrb[148].mxu0  ;;  %v14416_v10 = vpack.c.bf16 %v6280_v58, %v6278_v46 }
 0x68f   : > { %v5993_v13 = vadd.f32 %v5992_v39, %v14337_v14  ;;  %v5994_v42 = vpop.f32.mrb[149].mxu0 }
 0x690   : > { %v5995_v53 = vadd.f32 %v5994_v42, %v14341_v52  ;;  %v5996_v4 = vpop.f32.mrb[150].mxu0 }
 0x691   : > { %v5997_v7 = vadd.f32 %v5996_v4, %v14337_v14  ;;  %v5998_v24 = vpop.f32.mrb[151].mxu0  ;;  %v6281_v17 = vmax.f32 %v5993_v13, 0.0 }
 0x692   : > { %v5999_v12 = vadd.f32 %v5998_v24, %v14341_v52  ;;  %v6282_v15 = vmax.f32 %v5995_v53, 0.0 }
 0x693   : > { %v6283_v34 = vmax.f32 %v5997_v7, 0.0  ;;  %6692 = vmatmul.mubr.bf16.vlgmr.msra.gmra.mrb[0].mxu0 %v14357_v59 }
 0x694   : > { %v6284_v43 = vmax.f32 %v5999_v12, 0.0  ;;  %6701 = vmatprep.mubr.bf16.mxu0 %v14377_v31 }
 0x695   : > { %v14424_v44 = vpack.c.bf16 %v6283_v34, %v6281_v17 }
 0x696   : > { %v6002_v32 = vpop.f32.mrb[152].mxu0  ;;  %v14432_v41 = vpack.c.bf16 %v6284_v43, %v6282_v15 }
 0x697   : > { %v6003_v37 = vadd.f32 %v6002_v32, %v14337_v14  ;;  %v6004_v59 = vpop.f32.mrb[153].mxu0 }
 0x698   : > { %v6005_v38 = vadd.f32 %v6004_v59, %v14341_v52  ;;  %v6006_v31 = vpop.f32.mrb[154].mxu0  ;;  %v11834_v59 = vld [vmem:[%s16761_s9 + $0x124] ss:$12 sps:$4 sm:$0xff]  }
 0x699   : > { %v6007_v30 = vadd.f32 %v6006_v31, %v14337_v14  ;;  %v6008_v23 = vpop.f32.mrb[155].mxu0  ;;  %v6285_v29 = vmax.f32 %v6003_v37, 0.0  ;;  %v11832_v37 = vld [vmem:[%s16761_s9 + $0x120] ss:$12 sps:$4 sm:$0xff]   ;;  %7565 = vmatprep.subr.bf16.mxu1 %v11834_v59 }
 0x69a   : > { %v6009_v1 = vadd.f32 %v6008_v23, %v14341_v52  ;;  %v6286_v5 = vmax.f32 %v6005_v38, 0.0  ;;  %7566 = vmatpush1.bf16.msra.mxu1 %v11832_v37 }
 0x69b   : > { %v6287_v49 = vmax.f32 %v6007_v30, 0.0  ;;  %6702 = vmatmul.mubr.bf16.gmra.mrb[4].mxu0 %v14369_v18 }
 0x69c   : > { %v6288_v9 = vmax.f32 %v6009_v1, 0.0  ;;  %6711 = vmatprep.mubr.bf16.mxu0 %v14389_v27 }
 0x69d   : > { %v14440_v19 = vpack.c.bf16 %v6287_v49, %v6285_v29 }
 0x69e   : > { %v6012_v3 = vpop.f32.mrb[156].mxu0  ;;  %v14442_v60 = vpack.c.bf16 %v6288_v9, %v6286_v5 }
 0x69f   : > { %v6013_v22 = vadd.f32 %v6012_v3, %v14337_v14  ;;  %v6014_v25 = vpop.f32.mrb[157].mxu0 }
 0x6a0   : > { %v6015_v50 = vadd.f32 %v6014_v25, %v14341_v52  ;;  %v6016_v16 = vpop.f32.mrb[158].mxu0 }
 0x6a1   : > { %v6017_v2 = vadd.f32 %v6016_v16, %v14337_v14  ;;  %v6018_v54 = vpop.f32.mrb[159].mxu0  ;;  %v6289_v33 = vmax.f32 %v6013_v22, 0.0 }
 0x6a2   : > { %v6019_v18 = vadd.f32 %v6018_v54, %v14341_v52  ;;  %v6290_v27 = vmax.f32 %v6015_v50, 0.0 }
 0x6a3   : > { %v6291_v55 = vmax.f32 %v6017_v2, 0.0  ;;  %6712 = vmatmul.mubr.bf16.gmra.mrb[8].mxu0 %v14387_v35 }
 0x6a4   : > { %v6292_v56 = vmax.f32 %v6019_v18, 0.0  ;;  %6721 = vmatprep.mubr.bf16.mxu0 %v14407_v20 }
 0x6a5   : > { %v14450_v40 = vpack.c.bf16 %v6291_v55, %v6289_v33 }
 0x6a6   : > { %v6022_v8 = vpop.f32.mrb[160].mxu0  ;;  %v14458_v26 = vpack.c.bf16 %v6292_v56, %v6290_v27 }
 0x6a7   : > { %v6023_v21 = vadd.f32 %v6022_v8, %v14337_v14  ;;  %v6024_v35 = vpop.f32.mrb[161].mxu0 }
 0x6a8   : > { %v6025_v48 = vadd.f32 %v6024_v35, %v14341_v52  ;;  %v6026_v20 = vpop.f32.mrb[162].mxu0  ;;  %v11837_v35 = vld [vmem:[%s16761_s9 + $0x13c] ss:$12 sps:$4 sm:$0xff]  }
 0x6a9   : > { %v6027_v61 = vadd.f32 %v6026_v20, %v14337_v14  ;;  %v6028_v6 = vpop.f32.mrb[163].mxu0  ;;  %v6293_v46 = vmax.f32 %v6023_v21, 0.0  ;;  %v11835_v21 = vld [vmem:[%s16761_s9 + $0x138] ss:$12 sps:$4 sm:$0xff]   ;;  %7567 = vmatprep.subr.bf16.mxu1 %v11837_v35 }
 0x6aa   : > { %v6029_v62 = vadd.f32 %v6028_v6, %v14341_v52  ;;  %v6294_v39 = vmax.f32 %v6025_v48, 0.0  ;;  %7568 = vmatpush1.bf16.msra.mxu1 %v11835_v21 }
 0x6ab   : > { %v6295_v58 = vmax.f32 %v6027_v61, 0.0  ;;  %6722 = vmatmul.mubr.bf16.gmra.mrb[12].mxu0 %v14399_v45 }
 0x6ac   : > { %v6296_v13 = vmax.f32 %v6029_v62, 0.0  ;;  %6731 = vmatprep.mubr.bf16.mxu0 %v14416_v10 }
 0x6ad   : > { %v14466_v42 = vpack.c.bf16 %v6295_v58, %v6293_v46 }
 0x6ae   : > { %v6032_v53 = vpop.f32.mrb[164].mxu0  ;;  %v14468_v4 = vpack.c.bf16 %v6296_v13, %v6294_v39 }
 0x6af   : > { %v6033_v7 = vadd.f32 %v6032_v53, %v14337_v14  ;;  %v6034_v24 = vpop.f32.mrb[165].mxu0 }
 0x6b0   : > { %v6035_v12 = vadd.f32 %v6034_v24, %v14341_v52  ;;  %v6036_v17 = vpop.f32.mrb[166].mxu0 }
 0x6b1   : > { %v6037_v34 = vadd.f32 %v6036_v17, %v14337_v14  ;;  %v6038_v15 = vpop.f32.mrb[167].mxu0  ;;  %v6297_v43 = vmax.f32 %v6033_v7, 0.0 }
 0x6b2   : > { %v6039_v45 = vadd.f32 %v6038_v15, %v14341_v52  ;;  %v6298_v10 = vmax.f32 %v6035_v12, 0.0 }
 0x6b3   : > { %v6299_v63 = vmax.f32 %v6037_v34, 0.0  ;;  %6732 = vmatmul.mubr.bf16.gmra.mrb[16].mxu0 %v14414_v11 }
 0x6b4   : > { %v6300_v36 = vmax.f32 %v6039_v45, 0.0  ;;  %6741 = vmatprep.mubr.bf16.mxu0 %v14432_v41 }
 0x6b5   : > { %v14476_v32 = vpack.c.bf16 %v6299_v63, %v6297_v43 }
 0x6b6   : > { %v6042_v38 = vpop.f32.mrb[168].mxu0  ;;  %v14484_v31 = vpack.c.bf16 %v6300_v36, %v6298_v10 }
 0x6b7   : > { %v6043_v30 = vadd.f32 %v6042_v38, %v14337_v14  ;;  %v6044_v11 = vpop.f32.mrb[169].mxu0 }
 0x6b8   : > { %v6045_v23 = vadd.f32 %v6044_v11, %v14341_v52  ;;  %v6046_v41 = vpop.f32.mrb[170].mxu0  ;;  %v11838_v11 = vld [vmem:[%s16761_s9 + $0x150] ss:$12 sps:$4 sm:$0xff]  }
 0x6b9   : > { %v6047_v1 = vadd.f32 %v6046_v41, %v14337_v14  ;;  %v6048_v29 = vpop.f32.mrb[171].mxu0  ;;  %v6301_v5 = vmax.f32 %v6043_v30, 0.0 }
 0x6ba   : > { %v6049_v49 = vadd.f32 %v6048_v29, %v14341_v52  ;;  %v6302_v3 = vmax.f32 %v6045_v23, 0.0  ;;  %v11840_v23 = vld [vmem:[%s16761_s9 + $0x154] ss:$12 sps:$4 sm:$0xff]  }
 0x6bb   : > { %v6303_v9 = vmax.f32 %v6047_v1, 0.0  ;;  %6742 = vmatmul.mubr.bf16.gmra.mrb[20].mxu0 %v14424_v44  ;;  %7569 = vmatprep.subr.bf16.mxu1 %v11840_v23 }
 0x6bc   : > { %v6304_v22 = vmax.f32 %v6049_v49, 0.0  ;;  %6751 = vmatprep.mubr.bf16.mxu0 %v14442_v60  ;;  %7570 = vmatpush1.bf16.msra.mxu1 %v11838_v11 }
 0x6bd   : > { %v14492_v25 = vpack.c.bf16 %v6303_v9, %v6301_v5 }
 0x6be   : > { %v6052_v50 = vpop.f32.mrb[172].mxu0  ;;  %v14494_v16 = vpack.c.bf16 %v6304_v22, %v6302_v3 }
 0x6bf   : > { %v6053_v2 = vadd.f32 %v6052_v50, %v14337_v14  ;;  %v6054_v54 = vpop.f32.mrb[173].mxu0  ;;  %v11843_v50 = vld [vmem:[%s16761_s9 + $0x38] ss:$12 sps:$4 sm:$0xff]  }
 0x6c0   : > { %v6055_v18 = vadd.f32 %v6054_v54, %v14341_v52  ;;  %v6056_v33 = vpop.f32.mrb[174].mxu0 }
 0x6c1   : > { %v6057_v55 = vadd.f32 %v6056_v33, %v14337_v14  ;;  %v6058_v27 = vpop.f32.mrb[175].mxu0  ;;  %v6305_v56 = vmax.f32 %v6053_v2, 0.0 }
 0x6c2   : > { %v6059_v44 = vadd.f32 %v6058_v27, %v14341_v52  ;;  %v6306_v60 = vmax.f32 %v6055_v18, 0.0 }
 0x6c3   : > { %v6307_v28 = vmax.f32 %v6057_v55, 0.0  ;;  %6752 = vmatmul.mubr.bf16.gmra.mrb[24].mxu0 %v14440_v19 }
 0x6c4   : > { %v6308_v0 = vmax.f32 %v6059_v44, 0.0  ;;  %6761 = vmatprep.mubr.bf16.mxu0 %v14458_v26 }
 0x6c5   : > { %v14502_v8 = vpack.c.bf16 %v6307_v28, %v6305_v56  ;;  %v11847_v56 = vld [vmem:[%s16761_s9 + $0x50] ss:$12 sps:$4 sm:$0xff]  }
 0x6c6   : > { %v6062_v48 = vpop.f32.mrb[176].mxu0  ;;  %v14510_v20 = vpack.c.bf16 %v6308_v0, %v6306_v60 }
 0x6c7   : > { %v6063_v61 = vadd.f32 %v6062_v48, %v14337_v14  ;;  %v6064_v19 = vpop.f32.mrb[177].mxu0  ;;  %v11848_v48 = vld [vmem:[%s16761_s9 + $0x68] ss:$12 sps:$4 sm:$0xff]  }
 0x6c8   : > { %v6065_v6 = vadd.f32 %v6064_v19, %v14341_v52  ;;  %v6066_v26 = vpop.f32.mrb[178].mxu0 }
 0x6c9   : > { %v6067_v62 = vadd.f32 %v6066_v26, %v14337_v14  ;;  %v6068_v46 = vpop.f32.mrb[179].mxu0  ;;  %v6309_v39 = vmax.f32 %v6063_v61, 0.0 }
 0x6ca   : > { %v6069_v58 = vadd.f32 %v6068_v46, %v14341_v52  ;;  %v6310_v53 = vmax.f32 %v6065_v6, 0.0  ;;  %v11844_v46 = vld [vmem:[%s16761_s9 + $0x168] ss:$12 sps:$4 sm:$0xff]  }
 0x6cb   : > { %v6311_v13 = vmax.f32 %v6067_v62, 0.0  ;;  %6762 = vmatmul.mubr.bf16.gmra.mrb[28].mxu0 %v14450_v40 }
 0x6cc   : > { %v6312_v7 = vmax.f32 %v6069_v58, 0.0  ;;  %6771 = vmatprep.mubr.bf16.mxu0 %v14468_v4  ;;  %v11841_v4 = vld [vmem:[%s16761_s9 + $0x8] ss:$12 sps:$4 sm:$0xff]   ;;  %v11846_v58 = vld [vmem:[%s16761_s9 + $0x16c] ss:$12 sps:$4 sm:$0xff]  }
 0x6cd   : > { %v14518_v24 = vpack.c.bf16 %v6311_v13, %v6309_v39  ;;  %7895 = vmatpush1.bf16.msra.mxu0 %v11841_v4  ;;  %7571 = vmatprep.subr.bf16.mxu1 %v11846_v58 }
 0x6ce   : > { %v6072_v12 = vpop.f32.mrb[180].mxu0  ;;  %v14520_v17 = vpack.c.bf16 %v6312_v7, %v6310_v53  ;;  %7896 = vmatprep.subr.bf16.mxu0 %v16818_v57  ;;  %7572 = vmatpush1.bf16.msra.mxu1 %v11844_v46 }
 0x6cf   : > { %v6073_v34 = vadd.f32 %v6072_v12, %v14337_v14  ;;  %v6074_v15 = vpop.f32.mrb[181].mxu0 }
 0x6d0   : > { %v6075_v45 = vadd.f32 %v6074_v15, %v14341_v52  ;;  %v6076_v43 = vpop.f32.mrb[182].mxu0 }
 0x6d1   : > { %v6077_v63 = vadd.f32 %v6076_v43, %v14337_v14  ;;  %v6078_v10 = vpop.f32.mrb[183].mxu0  ;;  %v6313_v36 = vmax.f32 %v6073_v34, 0.0  ;;  %v11850_v43 = vld [vmem:[%s16761_s9 + $0x98] ss:$12 sps:$4 sm:$0xff]  }
 0x6d2   : > { %v6079_v40 = vadd.f32 %v6078_v10, %v14341_v52  ;;  %v6314_v59 = vmax.f32 %v6075_v45, 0.0 }
 0x6d3   : > { %v6315_v37 = vmax.f32 %v6077_v63, 0.0  ;;  %6772 = vmatmul.mubr.bf16.gmra.mrb[32].mxu0 %v14466_v42  ;;  %v11842_v42 = vld [vmem:[%s16761_s9 + $0x20] ss:$12 sps:$4 sm:$0xff]  }
 0x6d4   : > { %v6316_v38 = vmax.f32 %v6079_v40, 0.0  ;;  %6781 = vmatprep.mubr.bf16.mxu0 %v14484_v31  ;;  %7897 = vmatpush1.bf16.msra.mxu0 %v11842_v42 }
 0x6d5   : > { %v14531_v30 = vpack.c.bf16 %v6315_v37, %v6313_v36  ;;  %7898 = vmatprep.subr.bf16.mxu0 %v16818_v57 }
 0x6d6   : > { %v6082_v41 = vpop.f32.mrb[184].mxu0  ;;  %v14540_v1 = vpack.c.bf16 %v6316_v38, %v6314_v59  ;;  %v11851_v38 = vld [vmem:[%s16761_s9 + $0xb0] ss:$12 sps:$4 sm:$0xff]  }
 0x6d7   : > { %v6083_v31 = vadd.f32 %v6082_v41, %v14337_v14  ;;  %v6084_v29 = vpop.f32.mrb[185].mxu0 }
 0x6d8   : > { %v6085_v49 = vadd.f32 %v6084_v29, %v14341_v52  ;;  %v6086_v5 = vpop.f32.mrb[186].mxu0  ;;  %7899 = vmatpush1.bf16.msra.mxu0 %v11843_v50  ;;  %v11853_v29 = vld [vmem:[%s16761_s9 + $0xc8] ss:$12 sps:$4 sm:$0xff]   ;;  %v14620_v50 = vld [vmem:[%s16764_s12] sm:$0xff]  }
 0x6d9   : > { %v6087_v9 = vadd.f32 %v6086_v5, %v14337_v14  ;;  %v6088_v3 = vpop.f32.mrb[187].mxu0  ;;  %v6317_v2 = vmax.f32 %v6083_v31, 0.0  ;;  %7900 = vmatprep.subr.bf16.mxu0 %v16818_v57  ;;  %11157 = vmatprep.subr.bf16.mxu1 %v14620_v50 }
 0x6da   : > { %v6089_v22 = vadd.f32 %v6088_v3, %v14341_v52  ;;  %v6318_v18 = vmax.f32 %v6085_v49, 0.0 }
 0x6db   : > { %v6319_v54 = vmax.f32 %v6087_v9, 0.0  ;;  %6782 = vmatmul.mubr.bf16.gmra.mrb[36].mxu0 %v14476_v32 }
 0x6dc   : > { %v6320_v33 = vmax.f32 %v6089_v22, 0.0  ;;  %6791 = vmatprep.mubr.bf16.mxu0 %v14494_v16  ;;  %7901 = vmatpush1.bf16.msra.mxu0 %v11847_v56 }
 0x6dd   : > { %v14555_v55 = vpack.c.bf16 %v6319_v54, %v6317_v2  ;;  %7902 = vmatprep.subr.bf16.mxu0 %v16818_v57 }
 0x6de   : > { %v6092_v27 = vpop.f32.mrb[188].mxu0  ;;  %v14558_v44 = vpack.c.bf16 %v6320_v33, %v6318_v18 }
 0x6df   : > { %v6093_v28 = vadd.f32 %v6092_v27, %v14337_v14  ;;  %v6094_v60 = vpop.f32.mrb[189].mxu0 }
 0x6e0   : > { %v6095_v32 = vadd.f32 %v6094_v60, %v14341_v52  ;;  %v6096_v0 = vpop.f32.mrb[190].mxu0  ;;  %7903 = vmatpush1.bf16.msra.mxu0 %v11848_v48 }
 0x6e1   : > { %v6097_v16 = vadd.f32 %v6096_v0, %v14337_v14  ;;  %v6098_v21 = vpop.f32.mrb[191].mxu0  ;;  %v6321_v61 = vmax.f32 %v6093_v28, 0.0  ;;  %7904 = vmatprep.subr.bf16.mxu0 %v16818_v57 }
 0x6e2   : > { %v6099_v35 = vadd.f32 %v6098_v21, %v14341_v52  ;;  %v6322_v6 = vmax.f32 %v6095_v32, 0.0  ;;  %v11855_v32 = vld [vmem:[%s16761_s9 + $0xf8] ss:$12 sps:$4 sm:$0xff]  }
 0x6e3   : > { %v6323_v19 = vmax.f32 %v6097_v16, 0.0  ;;  %6792 = vmatmul.mubr.bf16.gmra.mrb[40].mxu0 %v14492_v25  ;;  %v11849_v25 = vld [vmem:[%s16761_s9 + $0x80] ss:$12 sps:$4 sm:$0xff]  }
 0x6e4   : > { %v6324_v26 = vmax.f32 %v6099_v35, 0.0  ;;  %6801 = vmatprep.mubr.bf16.mxu0 %v14510_v20  ;;  %7905 = vmatpush1.bf16.msra.mxu0 %v11849_v25 }
 0x6e5   : > { %v14573_v62 = vpack.c.bf16 %v6323_v19, %v6321_v61  ;;  %7906 = vmatprep.subr.bf16.mxu0 %v16818_v57 }
 0x6e6   : > { %v6102_v39 = vpop.f32.mrb[192].mxu0  ;;  %v14582_v13 = vpack.c.bf16 %v6324_v26, %v6322_v6  ;;  %v11856_v6 = vld [vmem:[%s16761_s9 + $0x110] ss:$12 sps:$4 sm:$0xff]  }
 0x6e7   : > { %v6103_v20 = vadd.f32 %v6102_v39, %v14337_v14  ;;  %v6104_v53 = vpop.f32.mrb[193].mxu0 }
 0x6e8   : > { %v6105_v7 = vadd.f32 %v6104_v53, %v14341_v52  ;;  %v6106_v12 = vpop.f32.mrb[194].mxu0  ;;  %7907 = vmatpush1.bf16.msra.mxu0 %v11850_v43 }
 0x6e9   : > { %v6107_v34 = vadd.f32 %v6106_v12, %v14337_v14  ;;  %v6108_v15 = vpop.f32.mrb[195].mxu0  ;;  %v6325_v63 = vmax.f32 %v6103_v20, 0.0  ;;  %7908 = vmatprep.subr.bf16.mxu0 %v16818_v57  ;;  %v11857_v20 = vld [vmem:[%s16761_s9 + $0x128] ss:$12 sps:$4 sm:$0xff]  }
 0x6ea   : > { %v6109_v45 = vadd.f32 %v6108_v15, %v14341_v52  ;;  %v6326_v40 = vmax.f32 %v6105_v7, 0.0 }
 0x6eb   : > { %v6327_v10 = vmax.f32 %v6107_v34, 0.0  ;;  %6802 = vmatmul.mubr.bf16.gmra.mrb[44].mxu0 %v14502_v8 }
 0x6ec   : > { %v6328_v4 = vmax.f32 %v6109_v45, 0.0  ;;  %6811 = vmatprep.mubr.bf16.mxu0 %v14520_v17  ;;  %7909 = vmatpush1.bf16.msra.mxu0 %v11851_v38 }
 0x6ed   : > { %v14597_v36 = vpack.c.bf16 %v6327_v10, %v6325_v63  ;;  %7910 = vmatprep.subr.bf16.mxu0 %v16818_v57  ;;  %v11858_v63 = vld [vmem:[%s16761_s9 + $0x140] ss:$12 sps:$4 sm:$0xff]  }
 0x6ee   : > { %v6112_v37 = vpop.f32.mrb[196].mxu0  ;;  %v14600_v59 = vpack.c.bf16 %v6328_v4, %v6326_v40 }
 0x6ef   : > { %v6113_v11 = vadd.f32 %v6112_v37, %v14337_v14  ;;  %v6114_v23 = vpop.f32.mrb[197].mxu0 }
 0x6f0   : > { %v6115_v8 = vadd.f32 %v6114_v23, %v14341_v52  ;;  %v6116_v41 = vpop.f32.mrb[198].mxu0  ;;  %7911 = vmatpush1.bf16.msra.mxu0 %v11853_v29 }
 0x6f1   : > { %v6117_v17 = vadd.f32 %v6116_v41, %v14337_v14  ;;  %v6118_v42 = vpop.f32.mrb[199].mxu0  ;;  %v6329_v49 = vmax.f32 %v6113_v11, 0.0  ;;  %7912 = vmatprep.subr.bf16.mxu0 %v16818_v57  ;;  %v11859_v11 = vld [vmem:[%s16761_s9 + $0x158] ss:$12 sps:$4 sm:$0xff]  }
 0x6f2   : > { %v6119_v31 = vadd.f32 %v6118_v42, %v14341_v52  ;;  %v6330_v9 = vmax.f32 %v6115_v8, 0.0 }
 0x6f3   : > { %v6331_v5 = vmax.f32 %v6117_v17, 0.0  ;;  %6812 = vmatmul.mubr.bf16.gmra.mrb[48].mxu0 %v14518_v24  ;;  %v11854_v24 = vld [vmem:[%s16761_s9 + $0xe0] ss:$12 sps:$4 sm:$0xff]  }
 0x6f4   : > { %v6332_v3 = vmax.f32 %v6119_v31, 0.0  ;;  %6821 = vmatprep.mubr.bf16.mxu0 %v14540_v1  ;;  %7913 = vmatpush1.bf16.msra.mxu0 %v11854_v24 }
 0x6f5   : > { %v14615_v22 = vpack.c.bf16 %v6331_v5, %v6329_v49  ;;  %7914 = vmatprep.subr.bf16.mxu0 %v16818_v57  ;;  %v11860_v49 = vld [vmem:[%s16761_s9 + $0x170] ss:$12 sps:$4 sm:$0xff]  }
 0x6f6   : > { %v6122_v2 = vpop.f32.mrb[200].mxu0  ;;  %v14623_v54 = vpack.c.bf16 %v6332_v3, %v6330_v9 }
 0x6f7   : > { %v6123_v18 = vadd.f32 %v6122_v2, %v14337_v14  ;;  %v6124_v1 = vpop.f32.mrb[201].mxu0 }
 0x6f8   : > { %v6125_v33 = vadd.f32 %v6124_v1, %v14341_v52  ;;  %v6126_v27 = vpop.f32.mrb[202].mxu0  ;;  %7915 = vmatpush1.bf16.msra.mxu0 %v11855_v32 }
 0x6f9   : > { %v6127_v56 = vadd.f32 %v6126_v27, %v14337_v14  ;;  %v6128_v28 = vpop.f32.mrb[203].mxu0  ;;  %v6333_v0 = vmax.f32 %v6123_v18, 0.0  ;;  %7916 = vmatprep.subr.bf16.mxu0 %v16818_v57 }
 0x6fa   : > { %v6129_v60 = vadd.f32 %v6128_v28, %v14341_v52  ;;  %v6334_v21 = vmax.f32 %v6125_v33, 0.0 }
 0x6fb   : > { %v6335_v16 = vmax.f32 %v6127_v56, 0.0  ;;  %6822 = vmatmul.mubr.bf16.gmra.mrb[52].mxu0 %v14531_v30 }
 0x6fc   : > { %v6336_v35 = vmax.f32 %v6129_v60, 0.0  ;;  %6831 = vmatprep.mubr.bf16.mxu0 %v14558_v44  ;;  %7917 = vmatpush1.bf16.msra.mxu0 %v11856_v6 }
 0x6fd   : > { %v14639_v48 = vpack.c.bf16 %v6335_v16, %v6333_v0  ;;  %7918 = vmatprep.subr.bf16.mxu0 %v16818_v57 }
 0x6fe   : > { %v6132_v61 = vpop.f32.mrb[204].mxu0  ;;  %v14642_v19 = vpack.c.bf16 %v6336_v35, %v6334_v21 }
 0x6ff   : > { %v6133_v26 = vadd.f32 %v6132_v61, %v14337_v14  ;;  %v6134_v46 = vpop.f32.mrb[205].mxu0 }
 0x700   : > { %v6135_v30 = vadd.f32 %v6134_v46, %v14341_v52  ;;  %v6136_v58 = vpop.f32.mrb[206].mxu0  ;;  %7919 = vmatpush1.bf16.msra.mxu0 %v11857_v20 }
 0x701   : > { %v6137_v44 = vadd.f32 %v6136_v58, %v14337_v14  ;;  %v6138_v39 = vpop.f32.mrb[207].mxu0  ;;  %v6337_v53 = vmax.f32 %v6133_v26, 0.0  ;;  %7920 = vmatprep.subr.bf16.mxu0 %v16818_v57 }
 0x702   : > { %v6139_v25 = vadd.f32 %v6138_v39, %v14341_v52  ;;  %v6338_v12 = vmax.f32 %v6135_v30, 0.0 }
 0x703   : > { %v6339_v7 = vmax.f32 %v6137_v44, 0.0  ;;  %6832 = vmatmul.mubr.bf16.gmra.mrb[56].mxu0 %v14555_v55 }
 0x704   : > { %v6340_v34 = vmax.f32 %v6139_v25, 0.0  ;;  %6841 = vmatprep.mubr.bf16.mxu0 %v14582_v13  ;;  %7921 = vmatpush1.bf16.msra.mxu0 %v11858_v63 }
 0x705   : > { %v14657_v15 = vpack.c.bf16 %v6339_v7, %v6337_v53  ;;  %7922 = vmatprep.subr.bf16.mxu0 %v16818_v57 }
 0x706   : > { %v6142_v45 = vpop.f32.mrb[208].mxu0  ;;  %v14660_v43 = vpack.c.bf16 %v6340_v34, %v6338_v12 }
 0x707   : > { %v6143_v10 = vadd.f32 %v6142_v45, %v14337_v14  ;;  %v6144_v40 = vpop.f32.mrb[209].mxu0 }
 0x708   : > { %v6145_v55 = vadd.f32 %v6144_v40, %v14341_v52  ;;  %v6146_v4 = vpop.f32.mrb[210].mxu0  ;;  %7923 = vmatpush1.bf16.msra.mxu0 %v11859_v11 }
 0x709   : > { %v6147_v13 = vadd.f32 %v6146_v4, %v14337_v14  ;;  %v6148_v37 = vpop.f32.mrb[211].mxu0  ;;  %v6341_v23 = vmax.f32 %v6143_v10, 0.0  ;;  %7924 = vmatprep.subr.bf16.mxu0 %v16818_v57 }
 0x70a   : > { %v6149_v38 = vadd.f32 %v6148_v37, %v14341_v52  ;;  %v6342_v41 = vmax.f32 %v6145_v55, 0.0 }
 0x70b   : > { %v6343_v8 = vmax.f32 %v6147_v13, 0.0  ;;  %6842 = vmatmul.mubr.bf16.gmra.mrb[60].mxu0 %v14573_v62 }
 0x70c   : > { %v6344_v17 = vmax.f32 %v6149_v38, 0.0  ;;  %6851 = vmatprep.mubr.bf16.mxu0 %v14600_v59  ;;  %7925 = vmatpush1.bf16.msra.mxu0 %v11860_v49 }
 0x70d   : > { %v14675_v42 = vpack.c.bf16 %v6343_v8, %v6341_v23 }
 0x70e   : > { %v6152_v31 = vpop.f32.mrb[212].mxu0  ;;  %v6463_v29 = vpack.c.bf16 %v6344_v17, %v6342_v41 }
 0x70f   : > { %v6153_v5 = vadd.f32 %v6152_v31, %v14337_v14  ;;  %v6154_v9 = vpop.f32.mrb[213].mxu0 }
 0x710   : > { %v6155_v62 = vadd.f32 %v6154_v9, %v14341_v52  ;;  %v6156_v3 = vpop.f32.mrb[214].mxu0 }
 0x711   : > { %v6157_v59 = vadd.f32 %v6156_v3, %v14337_v14  ;;  %v6158_v2 = vpop.f32.mrb[215].mxu0  ;;  %v6345_v18 = vmax.f32 %v6153_v5, 0.0 }
 0x712   : > { %v6159_v24 = vadd.f32 %v6158_v2, %v14341_v52  ;;  %v6346_v33 = vmax.f32 %v6155_v62, 0.0 }
 0x713   : > { %v6347_v1 = vmax.f32 %v6157_v59, 0.0  ;;  %6852 = vmatmul.mubr.bf16.gmra.mrb[64].mxu0 %v14597_v36 }
 0x714   : > { %v6348_v27 = vmax.f32 %v6159_v24, 0.0  ;;  %6861 = vmatprep.mubr.bf16.mxu0 %v14623_v54 }
 0x715   : > { %v14687_v56 = vpack.c.bf16 %v6347_v1, %v6345_v18 }
 0x716   : > { %v6162_v28 = vpop.f32.mrb[216].mxu0  ;;  %v6465_v60 = vpack.c.bf16 %v6348_v27, %v6346_v33 }
 0x717   : > { %v6163_v32 = vadd.f32 %v6162_v28, %v14337_v14  ;;  %v6164_v0 = vpop.f32.mrb[217].mxu0 }
 0x718   : > { %v6165_v16 = vadd.f32 %v6164_v0, %v14341_v52  ;;  %v6166_v21 = vpop.f32.mrb[218].mxu0 }
 0x719   : > { %v6167_v35 = vadd.f32 %v6166_v21, %v14337_v14  ;;  %v6168_v61 = vpop.f32.mrb[219].mxu0  ;;  %v6349_v36 = vmax.f32 %v6163_v32, 0.0 }
 0x71a   : > { %v6169_v6 = vadd.f32 %v6168_v61, %v14341_v52  ;;  %v6350_v54 = vmax.f32 %v6165_v16, 0.0 }
 0x71b   : > { %v6351_v26 = vmax.f32 %v6167_v35, 0.0  ;;  %6862 = vmatmul.mubr.bf16.gmra.mrb[68].mxu0 %v14615_v22 }
 0x71c   : > { %v6352_v46 = vmax.f32 %v6169_v6, 0.0  ;;  %6871 = vmatprep.mubr.bf16.mxu0 %v14642_v19 }
 0x71d   : > { %v14695_v30 = vpack.c.bf16 %v6351_v26, %v6349_v36 }
 0x71e   : > { %v6172_v58 = vpop.f32.mrb[220].mxu0  ;;  %v6467_v44 = vpack.c.bf16 %v6352_v46, %v6350_v54 }
 0x71f   : > { %v6173_v39 = vadd.f32 %v6172_v58, %v14337_v14  ;;  %v6174_v25 = vpop.f32.mrb[221].mxu0 }
 0x720   : > { %v6175_v20 = vadd.f32 %v6174_v25, %v14341_v52  ;;  %v6176_v53 = vpop.f32.mrb[222].mxu0 }
 0x721   : > { %v6177_v7 = vadd.f32 %v6176_v53, %v14337_v14  ;;  %v6178_v12 = vpop.f32.mrb[223].mxu0  ;;  %v6353_v22 = vmax.f32 %v6173_v39, 0.0 }
 0x722   : > { %v6179_v34 = vadd.f32 %v6178_v12, %v14341_v52  ;;  %v6354_v19 = vmax.f32 %v6175_v20, 0.0 }
 0x723   : > { %v6355_v45 = vmax.f32 %v6177_v7, 0.0  ;;  %6872 = vmatmul.mubr.bf16.gmra.mrb[72].mxu0 %v14639_v48 }
 0x724   : > { %v6356_v63 = vmax.f32 %v6179_v34, 0.0  ;;  %6881 = vmatprep.mubr.bf16.mxu0 %v14660_v43 }
 0x725   : > { %v14703_v10 = vpack.c.bf16 %v6355_v45, %v6353_v22 }
 0x726   : > { %v6182_v40 = vpop.f32.mrb[224].mxu0  ;;  %v6469_v55 = vpack.c.bf16 %v6356_v63, %v6354_v19 }
 0x727   : > { %v6183_v4 = vadd.f32 %v6182_v40, %v14337_v14  ;;  %v6184_v13 = vpop.f32.mrb[225].mxu0 }
 0x728   : > { %v6185_v37 = vadd.f32 %v6184_v13, %v14341_v52  ;;  %v6186_v38 = vpop.f32.mrb[226].mxu0 }
 0x729   : > { %v6187_v11 = vadd.f32 %v6186_v38, %v14337_v14  ;;  %v6188_v23 = vpop.f32.mrb[227].mxu0  ;;  %v6357_v48 = vmax.f32 %v6183_v4, 0.0 }
 0x72a   : > { %v6189_v8 = vadd.f32 %v6188_v23, %v14341_v52  ;;  %v6358_v43 = vmax.f32 %v6185_v37, 0.0 }
 0x72b   : > { %v6359_v41 = vmax.f32 %v6187_v11, 0.0  ;;  %6882 = vmatmul.mubr.bf16.gmra.mrb[76].mxu0 %v14657_v15 }
 0x72c   : > { %v6360_v17 = vmax.f32 %v6189_v8, 0.0  ;;  %6891 = vmatprep.mubr.bf16.mxu0 %v6463_v29 }
 0x72d   : > { %v14710_v31 = vpack.c.bf16 %v6359_v41, %v6357_v48 }
 0x72e   : > { %v6192_v49 = vpop.f32.mrb[228].mxu0  ;;  %v6471_v5 = vpack.c.bf16 %v6360_v17, %v6358_v43 }
 0x72f   : > { %v6193_v9 = vadd.f32 %v6192_v49, %v14337_v14  ;;  %v6194_v62 = vpop.f32.mrb[229].mxu0 }
 0x730   : > { %v6195_v3 = vadd.f32 %v6194_v62, %v14341_v52  ;;  %v6196_v59 = vpop.f32.mrb[230].mxu0 }
 0x731   : > { %v6197_v2 = vadd.f32 %v6196_v59, %v14337_v14  ;;  %v6198_v24 = vpop.f32.mrb[231].mxu0  ;;  %v6361_v1 = vmax.f32 %v6193_v9, 0.0 }
 0x732   : > { %v6199_v18 = vadd.f32 %v6198_v24, %v14341_v52  ;;  %v6362_v29 = vmax.f32 %v6195_v3, 0.0 }
 0x733   : > { %v6363_v15 = vmax.f32 %v6197_v2, 0.0  ;;  %6892 = vmatmul.mubr.bf16.gmra.mrb[80].mxu0 %v14675_v42 }
 0x734   : > { %v6364_v33 = vmax.f32 %v6199_v18, 0.0  ;;  %6901 = vmatprep.mubr.bf16.mxu0 %v6465_v60 }
 0x735   : > { %v14717_v27 = vpack.c.bf16 %v6363_v15, %v6361_v1 }
 0x736   : > { %v6202_v28 = vpop.f32.mrb[232].mxu0  ;;  %v6473_v32 = vpack.c.bf16 %v6364_v33, %v6362_v29 }
 0x737   : > { %v6203_v0 = vadd.f32 %v6202_v28, %v14337_v14  ;;  %v6204_v16 = vpop.f32.mrb[233].mxu0 }
 0x738   : > { %v6205_v21 = vadd.f32 %v6204_v16, %v14341_v52  ;;  %v6206_v35 = vpop.f32.mrb[234].mxu0 }
 0x739   : > { %v6207_v61 = vadd.f32 %v6206_v35, %v14337_v14  ;;  %v6208_v6 = vpop.f32.mrb[235].mxu0  ;;  %v6365_v26 = vmax.f32 %v6203_v0, 0.0 }
 0x73a   : > { %v6209_v36 = vadd.f32 %v6208_v6, %v14341_v52  ;;  %v6366_v60 = vmax.f32 %v6205_v21, 0.0 }
 0x73b   : > { %v6367_v42 = vmax.f32 %v6207_v61, 0.0  ;;  %6902 = vmatmul.mubr.bf16.gmra.mrb[84].mxu0 %v14687_v56 }
 0x73c   : > { %v6368_v54 = vmax.f32 %v6209_v36, 0.0  ;;  %6911 = vmatprep.mubr.bf16.mxu0 %v6467_v44 }
 0x73d   : > { %v14724_v46 = vpack.c.bf16 %v6367_v42, %v6365_v26 }
 0x73e   : > { %v6212_v58 = vpop.f32.mrb[236].mxu0  ;;  %v6475_v39 = vpack.c.bf16 %v6368_v54, %v6366_v60 }
 0x73f   : > { %v6213_v25 = vadd.f32 %v6212_v58, %v14337_v14  ;;  %v6214_v20 = vpop.f32.mrb[237].mxu0 }
 0x740   : > { %v6215_v53 = vadd.f32 %v6214_v20, %v14341_v52  ;;  %v6216_v7 = vpop.f32.mrb[238].mxu0 }
 0x741   : > { %v6217_v12 = vadd.f32 %v6216_v7, %v14337_v14  ;;  %v6218_v34 = vpop.f32.mrb[239].mxu0  ;;  %v6369_v45 = vmax.f32 %v6213_v25, 0.0 }
 0x742   : > { %v6219_v22 = vadd.f32 %v6218_v34, %v14341_v52  ;;  %v6370_v44 = vmax.f32 %v6215_v53, 0.0  ;;  %v10876_v34 = vld [vmem:[%s16757_s5 + $0xa] sm:$0x3] }
 0x743   : > { %v6371_v56 = vmax.f32 %v6217_v12, 0.0  ;;  %6912 = vmatmul.mubr.bf16.gmra.mrb[88].mxu0 %v14695_v30 }
 0x744   : > { %v6372_v19 = vmax.f32 %v6219_v22, 0.0  ;;  %6921 = vmatprep.mubr.bf16.mxu0 %v6469_v55 }
 0x745   : > { %v14731_v63 = vpack.c.bf16 %v6371_v56, %v6369_v45 }
 0x746   : > { %v6222_v40 = vpop.f32.mrb[240].mxu0  ;;  %v6477_v4 = vpack.c.bf16 %v6372_v19, %v6370_v44  ;;  %v14769_v44 = vrot.slane %v10876_v34, %v12616_v47 }
 0x747   : > { %v6223_v13 = vadd.f32 %v6222_v40, %v14337_v14  ;;  %v6224_v37 = vpop.f32.mrb[241].mxu0 }
 0x748   : > { %v6225_v38 = vadd.f32 %v6224_v37, %v14341_v52  ;;  %v6226_v11 = vpop.f32.mrb[242].mxu0 }
 0x749   : > { %v6227_v23 = vadd.f32 %v6226_v11, %v14337_v14  ;;  %v6228_v8 = vpop.f32.mrb[243].mxu0  ;;  %v6373_v41 = vmax.f32 %v6223_v13, 0.0  ;;  %v14772_v13 = vrot.slane %v10876_v34, %v12622_v51 }
 0x74a   : > { %v6229_v48 = vadd.f32 %v6228_v8, %v14341_v52  ;;  %v6374_v55 = vmax.f32 %v6225_v38, 0.0 }
 0x74b   : > { %v6375_v30 = vmax.f32 %v6227_v23, 0.0  ;;  %6922 = vmatmul.mubr.bf16.gmra.mrb[92].mxu0 %v14703_v10 }
 0x74c   : > { %v6376_v43 = vmax.f32 %v6229_v48, 0.0  ;;  %6931 = vmatprep.mubr.bf16.mxu0 %v6471_v5 }
 0x74d   : > { %v14738_v17 = vpack.c.bf16 %v6375_v30, %v6373_v41 }
 0x74e   : > { %v6232_v49 = vpop.f32.mrb[244].mxu0  ;;  %v14740_v9 = vpack.c.bf16 %v6376_v43, %v6374_v55 }
 0x74f   : > { %v6233_v62 = vadd.f32 %v6232_v49, %v14337_v14  ;;  %v6234_v3 = vpop.f32.mrb[245].mxu0 }
 0x750   : > { %v6235_v59 = vadd.f32 %v6234_v3, %v14341_v52  ;;  %v6236_v2 = vpop.f32.mrb[246].mxu0 }
 0x751   : > { %v6237_v24 = vadd.f32 %v6236_v2, %v14337_v14  ;;  %v6238_v18 = vpop.f32.mrb[247].mxu0  ;;  %v6377_v10 = vmax.f32 %v6233_v62, 0.0 }
 0x752   : > { %v6239_v1 = vadd.f32 %v6238_v18, %v14341_v52  ;;  %v6378_v5 = vmax.f32 %v6235_v59, 0.0 }
 0x753   : > { %v6379_v15 = vmax.f32 %v6237_v24, 0.0  ;;  %6932 = vmatmul.mubr.bf16.gmra.mrb[96].mxu0 %v14710_v31 }
 0x754   : > { %v6380_v29 = vmax.f32 %v6239_v1, 0.0  ;;  %6941 = vmatprep.mubr.bf16.mxu0 %v6473_v32 }
 0x755   : > { %v14747_v33 = vpack.c.bf16 %v6379_v15, %v6377_v10 }
 0x756   : > { %v6242_v28 = vpop.f32.mrb[248].mxu0  ;;  %v14749_v0 = vpack.c.bf16 %v6380_v29, %v6378_v5 }
 0x757   : > { %v6243_v16 = vadd.f32 %v6242_v28, %v14337_v14  ;;  %v6244_v21 = vpop.f32.mrb[249].mxu0 }
 0x758   : > { %v6245_v35 = vadd.f32 %v6244_v21, %v14341_v52  ;;  %v6246_v61 = vpop.f32.mrb[250].mxu0 }
 0x759   : > { %v6247_v6 = vadd.f32 %v6246_v61, %v14337_v14  ;;  %v6248_v36 = vpop.f32.mrb[251].mxu0  ;;  %v6381_v31 = vmax.f32 %v6243_v16, 0.0  ;;  %v11861_v16 = vld [vmem:[%s16764_s12 + $0x8] ss:$0 sps:$4 sm:$0x77]   ;;  %v16819_v61 = vmov 65535  }
 0x75a   : > { %v6249_v26 = vadd.f32 %v6248_v36, %v14341_v52  ;;  %v6382_v32 = vmax.f32 %v6245_v35, 0.0 }
 0x75b   : > { %v6383_v42 = vmax.f32 %v6247_v6, 0.0  ;;  %6942 = vmatmul.mubr.bf16.gmra.mrb[100].mxu0 %v14717_v27 }
 0x75c   : > { %v6384_v60 = vmax.f32 %v6249_v26, 0.0  ;;  %6951 = vmatprep.mubr.bf16.mxu0 %v6475_v39 }
 0x75d   : > { %v14756_v54 = vpack.c.bf16 %v6383_v42, %v6381_v31 }
 0x75e   : > { %v6252_v58 = vpop.f32.mrb[252].mxu0  ;;  %v14758_v25 = vpack.c.bf16 %v6384_v60, %v6382_v32 }
 0x75f   : > { %v6253_v20 = vadd.f32 %v6252_v58, %v14337_v14  ;;  %v6254_v53 = vpop.f32.mrb[253].mxu0 }
 0x760   : > { %v6255_v7 = vadd.f32 %v6254_v53, %v14341_v52  ;;  %v6256_v12 = vpop.f32.mrb[254].mxu0 }
 0x761   : > { %v6257_v27 = vadd.f32 %v6256_v12, %v14337_v14  ;;  %v6258_v22 = vpop.f32.mrb[255].mxu0  ;;  %v6385_v45 = vmax.f32 %v6253_v20, 0.0 }
 0x762   : > { %v6259_v39 = vadd.f32 %v6258_v22, %v14341_v52  ;;  %v6386_v19 = vmax.f32 %v6255_v7, 0.0 }
 0x763   : > { %v6387_v56 = vmax.f32 %v6257_v27, 0.0  ;;  %6952 = vmatmul.mubr.bf16.gmra.mrb[104].mxu0 %v14724_v46 }
 0x764   : > { %v6388_v40 = vmax.f32 %v6259_v39, 0.0  ;;  %6961 = vmatprep.mubr.bf16.mxu0 %v6477_v4 }
 0x765   : > { %v14774_v37 = vpack.c.bf16 %v6387_v56, %v6385_v45 }
 0x766   : > { %v6693_v38 = vpop.f32.mrb[0].mxu0  ;;  %v14776_v14 = vpack.c.bf16 %v6388_v40, %v6386_v19 }
 0x767   : > { %v6694_v52 = vadd.f32 %v6693_v38, %v14769_v44  ;;  %v6695_v11 = vpop.f32.mrb[1].mxu0 }
 0x768   : > { %v6696_v23 = vadd.f32 %v6695_v11, %v14772_v13  ;;  %v6697_v46 = vpop.f32.mrb[2].mxu0 }
 0x769   : > { %v6698_v8 = vadd.f32 %v6697_v46, %v14769_v44  ;;  %v6699_v48 = vpop.f32.mrb[3].mxu0  ;;  %v7012_v4 = vmax.f32 %v6694_v52, 0.0 }
 0x76a   : > { %v6700_v41 = vadd.f32 %v6699_v48, %v14772_v13  ;;  %v7013_v55 = vmax.f32 %v6696_v23, 0.0 }
 0x76b   : > { %v7014_v30 = vmax.f32 %v6698_v8, 0.0  ;;  %6962 = vmatmul.mubr.bf16.gmra.mrb[108].mxu0 %v14731_v63 }
 0x76c   : > { %v7015_v43 = vmax.f32 %v6700_v41, 0.0  ;;  %6971 = vmatprep.mubr.bf16.mxu0 %v14740_v9 }
 0x76d   : > { %v14784_v49 = vpack.c.bf16 %v7014_v30, %v7012_v4 }
 0x76e   : > { %v6703_v62 = vpop.f32.mrb[4].mxu0  ;;  %v14786_v3 = vpack.c.bf16 %v7015_v43, %v7013_v55 }
 0x76f   : > { %v6704_v59 = vadd.f32 %v6703_v62, %v14769_v44  ;;  %v6705_v2 = vpop.f32.mrb[5].mxu0 }
 0x770   : > { %v6706_v24 = vadd.f32 %v6705_v2, %v14772_v13  ;;  %v6707_v18 = vpop.f32.mrb[6].mxu0  ;;  %7573 = vmatprep.mubr.bf16.mxu1 %v14786_v3 }
 0x771   : > { %v6708_v1 = vadd.f32 %v6707_v18, %v14769_v44  ;;  %v6709_v63 = vpop.f32.mrb[7].mxu0  ;;  %7574 = vmatmul.mubr.bf16.vlgmr.msra.gmra.mrb[128].mxu1 %v14784_v49  ;;  %v7016_v10 = vmax.f32 %v6704_v59, 0.0 }
 0x772   : > { %v6710_v9 = vadd.f32 %v6709_v63, %v14772_v13  ;;  %11158 = vmatpush3.bf16.msra.mxu1 %v14620_v50  ;;  %v7017_v5 = vmax.f32 %v6706_v24, 0.0  ;;  %v8389_v50 = vsel %vm8388_vm3, 4294967295, %v16819_v61 }
 0x773   : > { %v7018_v15 = vmax.f32 %v6708_v1, 0.0  ;;  %6972 = vmatmul.mubr.bf16.gmra.mrb[112].mxu0 %v14738_v17  ;;  %v8390_v17 = vsel %vm879_vm0, %v8389_v50, 0 }
 0x774   : > { %v7019_v29 = vmax.f32 %v6710_v9, 0.0  ;;  %6981 = vmatprep.mubr.bf16.mxu0 %v14749_v0  ;;  %v8392_v31 = vand.u32 %v11861_v16, %v8390_v17 }
 0x775   : > { %v14797_v28 = vpack.c.bf16 %v7018_v15, %v7016_v10 }
 0x776   : > { %v6713_v21 = vpop.f32.mrb[8].mxu0  ;;  %v14802_v35 = vpack.c.bf16 %v7019_v29, %v7017_v5  ;;  %11159 = vmatprep.subr.bf16.mxu1 %v8392_v31 }
 0x777   : > { %v6714_v6 = vadd.f32 %v6713_v21, %v14769_v44  ;;  %v6715_v36 = vpop.f32.mrb[9].mxu0  ;;  %11160 = vmatpush3.bf16.msra.mxu1 %v8392_v31 }
 0x778   : > { %v6716_v26 = vadd.f32 %v6715_v36, %v14772_v13  ;;  %v6717_v0 = vpop.f32.mrb[10].mxu0  ;;  %7583 = vmatprep.mubr.bf16.mxu1 %v14802_v35  ;;  %8779 = vmatprep.subr.bf16.mxu1 %v16818_v57 }
 0x779   : > { %v6718_v42 = vadd.f32 %v6717_v0, %v14769_v44  ;;  %v6719_v32 = vpop.f32.mrb[11].mxu0  ;;  %7584 = vmatmul.mubr.bf16.gmra.mrb[132].mxu1 %v14797_v28  ;;  %v7020_v58 = vmax.f32 %v6714_v6, 0.0 }
 0x77a   : > { %v6720_v60 = vadd.f32 %v6719_v32, %v14772_v13  ;;  %v7021_v53 = vmax.f32 %v6716_v26, 0.0 }
 0x77b   : > { %v7022_v20 = vmax.f32 %v6718_v42, 0.0  ;;  %6982 = vmatmul.mubr.bf16.gmra.mrb[116].mxu0 %v14747_v33 }
 0x77c   : > { %v7023_v7 = vmax.f32 %v6720_v60, 0.0  ;;  %6991 = vmatprep.mubr.bf16.mxu0 %v14758_v25 }
 0x77d   : > { %v14815_v12 = vpack.c.bf16 %v7022_v20, %v7020_v58 }
 0x77e   : > { %v6723_v34 = vpop.f32.mrb[12].mxu0  ;;  %v14817_v27 = vpack.c.bf16 %v7023_v7, %v7021_v53 }
 0x77f   : > { %v6724_v22 = vadd.f32 %v6723_v34, %v14769_v44  ;;  %v6725_v39 = vpop.f32.mrb[13].mxu0 }
 0x780   : > { %v6726_v45 = vadd.f32 %v6725_v39, %v14772_v13  ;;  %v6727_v56 = vpop.f32.mrb[14].mxu0  ;;  %7593 = vmatprep.mubr.bf16.mxu1 %v14817_v27 }
 0x781   : > { %v6728_v33 = vadd.f32 %v6727_v56, %v14769_v44  ;;  %v6729_v19 = vpop.f32.mrb[15].mxu0  ;;  %7594 = vmatmul.mubr.bf16.gmra.mrb[136].mxu1 %v14815_v12  ;;  %v7024_v40 = vmax.f32 %v6724_v22, 0.0 }
 0x782   : > { %v6730_v25 = vadd.f32 %v6729_v19, %v14772_v13  ;;  %v7025_v52 = vmax.f32 %v6726_v45, 0.0 }
 0x783   : > { %v7026_v38 = vmax.f32 %v6728_v33, 0.0  ;;  %6992 = vmatmul.mubr.bf16.gmra.mrb[120].mxu0 %v14756_v54 }
 0x784   : > { %v7027_v11 = vmax.f32 %v6730_v25, 0.0  ;;  %7001 = vmatprep.mubr.bf16.mxu0 %v14776_v14 }
 0x785   : > { %v14827_v23 = vpack.c.bf16 %v7026_v38, %v7024_v40 }
 0x786   : > { %v6733_v46 = vpop.f32.mrb[16].mxu0  ;;  %v14829_v8 = vpack.c.bf16 %v7027_v11, %v7025_v52 }
 0x787   : > { %v6734_v48 = vadd.f32 %v6733_v46, %v14769_v44  ;;  %v6735_v41 = vpop.f32.mrb[17].mxu0 }
 0x788   : > { %v6736_v4 = vadd.f32 %v6735_v41, %v14772_v13  ;;  %v6737_v30 = vpop.f32.mrb[18].mxu0  ;;  %7603 = vmatprep.mubr.bf16.mxu1 %v14829_v8 }
 0x789   : > { %v6738_v55 = vadd.f32 %v6737_v30, %v14769_v44  ;;  %v6739_v54 = vpop.f32.mrb[19].mxu0  ;;  %7604 = vmatmul.mubr.bf16.gmra.mrb[140].mxu1 %v14827_v23  ;;  %v7028_v43 = vmax.f32 %v6734_v48, 0.0 }
 0x78a   : > { %v6740_v14 = vadd.f32 %v6739_v54, %v14772_v13  ;;  %v7029_v59 = vmax.f32 %v6736_v4, 0.0 }
 0x78b   : > { %v7030_v62 = vmax.f32 %v6738_v55, 0.0  ;;  %7002 = vmatmul.mubr.bf16.gmra.mrb[124].mxu0 %v14774_v37 }
 0x78c   : > { %v7031_v2 = vmax.f32 %v6740_v14, 0.0  ;;  %7926 = vmatprep.mubr.bf16.mxu0 %v14786_v3 }
 0x78d   : > { %v14839_v24 = vpack.c.bf16 %v7030_v62, %v7028_v43 }
 0x78e   : > { %v6743_v18 = vpop.f32.mrb[20].mxu0  ;;  %v14841_v1 = vpack.c.bf16 %v7031_v2, %v7029_v59 }
 0x78f   : > { %v6744_v63 = vadd.f32 %v6743_v18, %v14769_v44  ;;  %v6745_v9 = vpop.f32.mrb[21].mxu0 }
 0x790   : > { %v6746_v10 = vadd.f32 %v6745_v9, %v14772_v13  ;;  %v6747_v15 = vpop.f32.mrb[22].mxu0  ;;  %7613 = vmatprep.mubr.bf16.mxu1 %v14841_v1 }
 0x791   : > { %v6748_v5 = vadd.f32 %v6747_v15, %v14769_v44  ;;  %v6749_v37 = vpop.f32.mrb[23].mxu0  ;;  %7614 = vmatmul.mubr.bf16.gmra.mrb[144].mxu1 %v14839_v24  ;;  %v7032_v29 = vmax.f32 %v6744_v63, 0.0 }
 0x792   : > { %v6750_v3 = vadd.f32 %v6749_v37, %v14772_v13  ;;  %v7033_v21 = vmax.f32 %v6746_v10, 0.0 }
 0x793   : > { %v7034_v16 = vmax.f32 %v6748_v5, 0.0  ;;  %7927 = vmatmul.mubr.bf16.vlgmr.msra.gmra.mrb[128].mxu0 %v14784_v49 }
 0x794   : > { %v7035_v61 = vmax.f32 %v6750_v3, 0.0  ;;  %7934 = vmatprep.mubr.bf16.mxu0 %v14802_v35 }
 0x795   : > { %v14851_v50 = vpack.c.bf16 %v7034_v16, %v7032_v29 }
 0x796   : > { %v6753_v6 = vpop.f32.mrb[24].mxu0  ;;  %v14853_v36 = vpack.c.bf16 %v7035_v61, %v7033_v21 }
 0x797   : > { %v6754_v17 = vadd.f32 %v6753_v6, %v14769_v44  ;;  %v6755_v26 = vpop.f32.mrb[25].mxu0 }
 0x798   : > { %v6756_v0 = vadd.f32 %v6755_v26, %v14772_v13  ;;  %v6757_v31 = vpop.f32.mrb[26].mxu0  ;;  %7623 = vmatprep.mubr.bf16.mxu1 %v14853_v36 }
 0x799   : > { %v6758_v42 = vadd.f32 %v6757_v31, %v14769_v44  ;;  %v6759_v49 = vpop.f32.mrb[27].mxu0  ;;  %7624 = vmatmul.mubr.bf16.gmra.mrb[148].mxu1 %v14851_v50  ;;  %v7036_v32 = vmax.f32 %v6754_v17, 0.0 }
 0x79a   : > { %v6760_v35 = vadd.f32 %v6759_v49, %v14772_v13  ;;  %v7037_v58 = vmax.f32 %v6756_v0, 0.0 }
 0x79b   : > { %v7038_v60 = vmax.f32 %v6758_v42, 0.0  ;;  %7935 = vmatmul.mubr.bf16.gmra.mrb[132].mxu0 %v14797_v28 }
 0x79c   : > { %v7039_v20 = vmax.f32 %v6760_v35, 0.0  ;;  %7942 = vmatprep.mubr.bf16.mxu0 %v14817_v27 }
 0x79d   : > { %v14863_v53 = vpack.c.bf16 %v7038_v60, %v7036_v32 }
 0x79e   : > { %v6763_v7 = vpop.f32.mrb[28].mxu0  ;;  %v14865_v34 = vpack.c.bf16 %v7039_v20, %v7037_v58 }
 0x79f   : > { %v6764_v22 = vadd.f32 %v6763_v7, %v14769_v44  ;;  %v6765_v39 = vpop.f32.mrb[29].mxu0 }
 0x7a0   : > { %v6766_v45 = vadd.f32 %v6765_v39, %v14772_v13  ;;  %v6767_v56 = vpop.f32.mrb[30].mxu0  ;;  %7633 = vmatprep.mubr.bf16.mxu1 %v14865_v34 }
 0x7a1   : > { %v6768_v33 = vadd.f32 %v6767_v56, %v14769_v44  ;;  %v6769_v28 = vpop.f32.mrb[31].mxu0  ;;  %7634 = vmatmul.mubr.bf16.gmra.mrb[152].mxu1 %v14863_v53  ;;  %v7040_v19 = vmax.f32 %v6764_v22, 0.0 }
 0x7a2   : > { %v6770_v27 = vadd.f32 %v6769_v28, %v14772_v13  ;;  %v7041_v40 = vmax.f32 %v6766_v45, 0.0 }
 0x7a3   : > { %v7042_v25 = vmax.f32 %v6768_v33, 0.0  ;;  %7943 = vmatmul.mubr.bf16.gmra.mrb[136].mxu0 %v14815_v12 }
 0x7a4   : > { %v7043_v38 = vmax.f32 %v6770_v27, 0.0  ;;  %7950 = vmatprep.mubr.bf16.mxu0 %v14829_v8 }
 0x7a5   : > { %v14875_v52 = vpack.c.bf16 %v7042_v25, %v7040_v19 }
 0x7a6   : > { %v6773_v11 = vpop.f32.mrb[32].mxu0  ;;  %v14877_v46 = vpack.c.bf16 %v7043_v38, %v7041_v40 }
 0x7a7   : > { %v6774_v48 = vadd.f32 %v6773_v11, %v14769_v44  ;;  %v6775_v41 = vpop.f32.mrb[33].mxu0 }
 0x7a8   : > { %v6776_v4 = vadd.f32 %v6775_v41, %v14772_v13  ;;  %v6777_v30 = vpop.f32.mrb[34].mxu0  ;;  %7643 = vmatprep.mubr.bf16.mxu1 %v14877_v46 }
 0x7a9   : > { %v6778_v55 = vadd.f32 %v6777_v30, %v14769_v44  ;;  %v6779_v12 = vpop.f32.mrb[35].mxu0  ;;  %7644 = vmatmul.mubr.bf16.gmra.mrb[156].mxu1 %v14875_v52  ;;  %v7044_v54 = vmax.f32 %v6774_v48, 0.0 }
 0x7aa   : > { %v6780_v8 = vadd.f32 %v6779_v12, %v14772_v13  ;;  %v7045_v43 = vmax.f32 %v6776_v4, 0.0 }
 0x7ab   : > { %v7046_v14 = vmax.f32 %v6778_v55, 0.0  ;;  %7951 = vmatmul.mubr.bf16.gmra.mrb[140].mxu0 %v14827_v23 }
 0x7ac   : > { %v7047_v62 = vmax.f32 %v6780_v8, 0.0  ;;  %7958 = vmatprep.mubr.bf16.mxu0 %v14841_v1 }
 0x7ad   : > { %v14887_v59 = vpack.c.bf16 %v7046_v14, %v7044_v54 }
 0x7ae   : > { %v6783_v2 = vpop.f32.mrb[36].mxu0  ;;  %v14889_v18 = vpack.c.bf16 %v7047_v62, %v7045_v43 }
 0x7af   : > { %v6784_v63 = vadd.f32 %v6783_v2, %v14769_v44  ;;  %v6785_v9 = vpop.f32.mrb[37].mxu0 }
 0x7b0   : > { %v6786_v10 = vadd.f32 %v6785_v9, %v14772_v13  ;;  %v6787_v15 = vpop.f32.mrb[38].mxu0  ;;  %7653 = vmatprep.mubr.bf16.mxu1 %v14889_v18 }
 0x7b1   : > { %v6788_v5 = vadd.f32 %v6787_v15, %v14769_v44  ;;  %v6789_v23 = vpop.f32.mrb[39].mxu0  ;;  %7654 = vmatmul.mubr.bf16.gmra.mrb[160].mxu1 %v14887_v59  ;;  %v7048_v37 = vmax.f32 %v6784_v63, 0.0 }
 0x7b2   : > { %v6790_v1 = vadd.f32 %v6789_v23, %v14772_v13  ;;  %v7049_v29 = vmax.f32 %v6786_v10, 0.0 }
 0x7b3   : > { %v7050_v3 = vmax.f32 %v6788_v5, 0.0  ;;  %7959 = vmatmul.mubr.bf16.gmra.mrb[144].mxu0 %v14839_v24 }
 0x7b4   : > { %v7051_v16 = vmax.f32 %v6790_v1, 0.0  ;;  %7966 = vmatprep.mubr.bf16.mxu0 %v14853_v36 }
 0x7b5   : > { %v14899_v21 = vpack.c.bf16 %v7050_v3, %v7048_v37 }
 0x7b6   : > { %v6793_v61 = vpop.f32.mrb[40].mxu0  ;;  %v14901_v6 = vpack.c.bf16 %v7051_v16, %v7049_v29 }
 0x7b7   : > { %v6794_v17 = vadd.f32 %v6793_v61, %v14769_v44  ;;  %v6795_v26 = vpop.f32.mrb[41].mxu0 }
 0x7b8   : > { %v6796_v0 = vadd.f32 %v6795_v26, %v14772_v13  ;;  %v6797_v31 = vpop.f32.mrb[42].mxu0  ;;  %7663 = vmatprep.mubr.bf16.mxu1 %v14901_v6 }
 0x7b9   : > { %v6798_v42 = vadd.f32 %v6797_v31, %v14769_v44  ;;  %v6799_v24 = vpop.f32.mrb[43].mxu0  ;;  %7664 = vmatmul.mubr.bf16.gmra.mrb[164].mxu1 %v14899_v21  ;;  %v7052_v49 = vmax.f32 %v6794_v17, 0.0 }
 0x7ba   : > { %v6800_v36 = vadd.f32 %v6799_v24, %v14772_v13  ;;  %v7053_v32 = vmax.f32 %v6796_v0, 0.0 }
 0x7bb   : > { %v7054_v35 = vmax.f32 %v6798_v42, 0.0  ;;  %7967 = vmatmul.mubr.bf16.gmra.mrb[148].mxu0 %v14851_v50 }
 0x7bc   : > { %v7055_v60 = vmax.f32 %v6800_v36, 0.0  ;;  %7974 = vmatprep.mubr.bf16.mxu0 %v14865_v34 }
 0x7bd   : > { %v14911_v58 = vpack.c.bf16 %v7054_v35, %v7052_v49 }
 0x7be   : > { %v6803_v20 = vpop.f32.mrb[44].mxu0  ;;  %v14913_v7 = vpack.c.bf16 %v7055_v60, %v7053_v32 }
 0x7bf   : > { %v6804_v22 = vadd.f32 %v6803_v20, %v14769_v44  ;;  %v6805_v39 = vpop.f32.mrb[45].mxu0 }
 0x7c0   : > { %v6806_v45 = vadd.f32 %v6805_v39, %v14772_v13  ;;  %v6807_v56 = vpop.f32.mrb[46].mxu0  ;;  %7673 = vmatprep.mubr.bf16.mxu1 %v14913_v7 }
 0x7c1   : > { %v6808_v33 = vadd.f32 %v6807_v56, %v14769_v44  ;;  %v6809_v50 = vpop.f32.mrb[47].mxu0  ;;  %7674 = vmatmul.mubr.bf16.gmra.mrb[168].mxu1 %v14911_v58  ;;  %v7056_v28 = vmax.f32 %v6804_v22, 0.0 }
 0x7c2   : > { %v6810_v34 = vadd.f32 %v6809_v50, %v14772_v13  ;;  %v7057_v19 = vmax.f32 %v6806_v45, 0.0 }
 0x7c3   : > { %v7058_v27 = vmax.f32 %v6808_v33, 0.0  ;;  %7975 = vmatmul.mubr.bf16.gmra.mrb[152].mxu0 %v14863_v53 }
 0x7c4   : > { %v7059_v25 = vmax.f32 %v6810_v34, 0.0  ;;  %7982 = vmatprep.mubr.bf16.mxu0 %v14877_v46 }
 0x7c5   : > { %v14923_v40 = vpack.c.bf16 %v7058_v27, %v7056_v28 }
 0x7c6   : > { %v6813_v38 = vpop.f32.mrb[48].mxu0  ;;  %v14925_v11 = vpack.c.bf16 %v7059_v25, %v7057_v19 }
 0x7c7   : > { %v6814_v48 = vadd.f32 %v6813_v38, %v14769_v44  ;;  %v6815_v41 = vpop.f32.mrb[49].mxu0 }
 0x7c8   : > { %v6816_v4 = vadd.f32 %v6815_v41, %v14772_v13  ;;  %v6817_v30 = vpop.f32.mrb[50].mxu0  ;;  %7683 = vmatprep.mubr.bf16.mxu1 %v14925_v11 }
 0x7c9   : > { %v6818_v55 = vadd.f32 %v6817_v30, %v14769_v44  ;;  %v6819_v53 = vpop.f32.mrb[51].mxu0  ;;  %7684 = vmatmul.mubr.bf16.gmra.mrb[172].mxu1 %v14923_v40  ;;  %v7060_v12 = vmax.f32 %v6814_v48, 0.0 }
 0x7ca   : > { %v6820_v46 = vadd.f32 %v6819_v53, %v14772_v13  ;;  %v7061_v54 = vmax.f32 %v6816_v4, 0.0 }
 0x7cb   : > { %v7062_v8 = vmax.f32 %v6818_v55, 0.0  ;;  %7983 = vmatmul.mubr.bf16.gmra.mrb[156].mxu0 %v14875_v52 }
 0x7cc   : > { %v7063_v14 = vmax.f32 %v6820_v46, 0.0  ;;  %7990 = vmatprep.mubr.bf16.mxu0 %v14889_v18 }
 0x7cd   : > { %v14935_v43 = vpack.c.bf16 %v7062_v8, %v7060_v12 }
 0x7ce   : > { %v6823_v62 = vpop.f32.mrb[52].mxu0  ;;  %v14937_v2 = vpack.c.bf16 %v7063_v14, %v7061_v54 }
 0x7cf   : > { %v6824_v63 = vadd.f32 %v6823_v62, %v14769_v44  ;;  %v6825_v9 = vpop.f32.mrb[53].mxu0 }
 0x7d0   : > { %v6826_v10 = vadd.f32 %v6825_v9, %v14772_v13  ;;  %v6827_v15 = vpop.f32.mrb[54].mxu0  ;;  %7693 = vmatprep.mubr.bf16.mxu1 %v14937_v2 }
 0x7d1   : > { %v6828_v5 = vadd.f32 %v6827_v15, %v14769_v44  ;;  %v6829_v52 = vpop.f32.mrb[55].mxu0  ;;  %7694 = vmatmul.mubr.bf16.gmra.mrb[176].mxu1 %v14935_v43  ;;  %v7064_v23 = vmax.f32 %v6824_v63, 0.0 }
 0x7d2   : > { %v6830_v18 = vadd.f32 %v6829_v52, %v14772_v13  ;;  %v7065_v37 = vmax.f32 %v6826_v10, 0.0 }
 0x7d3   : > { %v7066_v1 = vmax.f32 %v6828_v5, 0.0  ;;  %7991 = vmatmul.mubr.bf16.gmra.mrb[160].mxu0 %v14887_v59 }
 0x7d4   : > { %v7067_v3 = vmax.f32 %v6830_v18, 0.0  ;;  %7998 = vmatprep.mubr.bf16.mxu0 %v14901_v6 }
 0x7d5   : > { %v14947_v29 = vpack.c.bf16 %v7066_v1, %v7064_v23 }
 0x7d6   : > { %v6833_v16 = vpop.f32.mrb[56].mxu0  ;;  %v14949_v61 = vpack.c.bf16 %v7067_v3, %v7065_v37 }
 0x7d7   : > { %v6834_v17 = vadd.f32 %v6833_v16, %v14769_v44  ;;  %v6835_v26 = vpop.f32.mrb[57].mxu0 }
 0x7d8   : > { %v6836_v0 = vadd.f32 %v6835_v26, %v14772_v13  ;;  %v6837_v31 = vpop.f32.mrb[58].mxu0  ;;  %7703 = vmatprep.mubr.bf16.mxu1 %v14949_v61 }
 0x7d9   : > { %v6838_v42 = vadd.f32 %v6837_v31, %v14769_v44  ;;  %v6839_v59 = vpop.f32.mrb[59].mxu0  ;;  %7704 = vmatmul.mubr.bf16.gmra.mrb[180].mxu1 %v14947_v29  ;;  %v7068_v24 = vmax.f32 %v6834_v17, 0.0 }
 0x7da   : > { %v6840_v6 = vadd.f32 %v6839_v59, %v14772_v13  ;;  %v7069_v49 = vmax.f32 %v6836_v0, 0.0 }
 0x7db   : > { %v7070_v36 = vmax.f32 %v6838_v42, 0.0  ;;  %7999 = vmatmul.mubr.bf16.gmra.mrb[164].mxu0 %v14899_v21 }
 0x7dc   : > { %v7071_v35 = vmax.f32 %v6840_v6, 0.0  ;;  %8006 = vmatprep.mubr.bf16.mxu0 %v14913_v7 }
 0x7dd   : > { %v14959_v32 = vpack.c.bf16 %v7070_v36, %v7068_v24 }
 0x7de   : > { %v6843_v60 = vpop.f32.mrb[60].mxu0  ;;  %v14961_v20 = vpack.c.bf16 %v7071_v35, %v7069_v49 }
 0x7df   : > { %v6844_v22 = vadd.f32 %v6843_v60, %v14769_v44  ;;  %v6845_v39 = vpop.f32.mrb[61].mxu0 }
 0x7e0   : > { %v6846_v45 = vadd.f32 %v6845_v39, %v14772_v13  ;;  %v6847_v56 = vpop.f32.mrb[62].mxu0  ;;  %7713 = vmatprep.mubr.bf16.mxu1 %v14961_v20 }
 0x7e1   : > { %v6848_v33 = vadd.f32 %v6847_v56, %v14769_v44  ;;  %v6849_v21 = vpop.f32.mrb[63].mxu0  ;;  %7714 = vmatmul.mubr.bf16.gmra.mrb[184].mxu1 %v14959_v32  ;;  %v7072_v50 = vmax.f32 %v6844_v22, 0.0 }
 0x7e2   : > { %v6850_v7 = vadd.f32 %v6849_v21, %v14772_v13  ;;  %v7073_v28 = vmax.f32 %v6846_v45, 0.0 }
 0x7e3   : > { %v7074_v34 = vmax.f32 %v6848_v33, 0.0  ;;  %8007 = vmatmul.mubr.bf16.gmra.mrb[168].mxu0 %v14911_v58 }
 0x7e4   : > { %v7075_v27 = vmax.f32 %v6850_v7, 0.0  ;;  %8014 = vmatprep.mubr.bf16.mxu0 %v14925_v11 }
 0x7e5   : > { %v14971_v19 = vpack.c.bf16 %v7074_v34, %v7072_v50 }
 0x7e6   : > { %v6853_v25 = vpop.f32.mrb[64].mxu0  ;;  %v14973_v38 = vpack.c.bf16 %v7075_v27, %v7073_v28 }
 0x7e7   : > { %v6854_v48 = vadd.f32 %v6853_v25, %v14769_v44  ;;  %v6855_v41 = vpop.f32.mrb[65].mxu0 }
 0x7e8   : > { %v6856_v4 = vadd.f32 %v6855_v41, %v14772_v13  ;;  %v6857_v30 = vpop.f32.mrb[66].mxu0  ;;  %7723 = vmatprep.mubr.bf16.mxu1 %v14973_v38 }
 0x7e9   : > { %v6858_v55 = vadd.f32 %v6857_v30, %v14769_v44  ;;  %v6859_v58 = vpop.f32.mrb[67].mxu0  ;;  %7724 = vmatmul.mubr.bf16.gmra.mrb[188].mxu1 %v14971_v19  ;;  %v7076_v53 = vmax.f32 %v6854_v48, 0.0 }
 0x7ea   : > { %v6860_v11 = vadd.f32 %v6859_v58, %v14772_v13  ;;  %v7077_v12 = vmax.f32 %v6856_v4, 0.0 }
 0x7eb   : > { %v7078_v46 = vmax.f32 %v6858_v55, 0.0  ;;  %8015 = vmatmul.mubr.bf16.gmra.mrb[172].mxu0 %v14923_v40 }
 0x7ec   : > { %v7079_v8 = vmax.f32 %v6860_v11, 0.0  ;;  %8022 = vmatprep.mubr.bf16.mxu0 %v14937_v2 }
 0x7ed   : > { %v14983_v54 = vpack.c.bf16 %v7078_v46, %v7076_v53 }
 0x7ee   : > { %v14985_v14 = vpack.c.bf16 %v7079_v8, %v7077_v12  ;;  %v6863_v62 = vpop.f32.mrb[68].mxu0 }
 0x7ef   : > { %v6864_v63 = vadd.f32 %v6863_v62, %v14769_v44  ;;  %v6865_v9 = vpop.f32.mrb[69].mxu0 }
 0x7f0   : > { %v6866_v10 = vadd.f32 %v6865_v9, %v14772_v13  ;;  %v6867_v15 = vpop.f32.mrb[70].mxu0  ;;  %7733 = vmatprep.mubr.bf16.mxu1 %v14985_v14 }
 0x7f1   : > { %v6868_v5 = vadd.f32 %v6867_v15, %v14769_v44  ;;  %v6869_v40 = vpop.f32.mrb[71].mxu0  ;;  %7734 = vmatmul.mubr.bf16.gmra.mrb[192].mxu1 %v14983_v54  ;;  %v7080_v52 = vmax.f32 %v6864_v63, 0.0 }
 0x7f2   : > { %v6870_v2 = vadd.f32 %v6869_v40, %v14772_v13  ;;  %v7081_v23 = vmax.f32 %v6866_v10, 0.0 }
 0x7f3   : > { %v7082_v18 = vmax.f32 %v6868_v5, 0.0  ;;  %8023 = vmatmul.mubr.bf16.gmra.mrb[176].mxu0 %v14935_v43 }
 0x7f4   : > { %v7083_v1 = vmax.f32 %v6870_v2, 0.0  ;;  %8030 = vmatprep.mubr.bf16.mxu0 %v14949_v61 }
 0x7f5   : > { %v14995_v37 = vpack.c.bf16 %v7082_v18, %v7080_v52 }
 0x7f6   : > { %v14997_v3 = vpack.c.bf16 %v7083_v1, %v7081_v23  ;;  %v6873_v16 = vpop.f32.mrb[72].mxu0 }
 0x7f7   : > { %v6874_v17 = vadd.f32 %v6873_v16, %v14769_v44  ;;  %v6875_v26 = vpop.f32.mrb[73].mxu0 }
 0x7f8   : > { %v6876_v0 = vadd.f32 %v6875_v26, %v14772_v13  ;;  %v6877_v31 = vpop.f32.mrb[74].mxu0  ;;  %7743 = vmatprep.mubr.bf16.mxu1 %v14997_v3 }
 0x7f9   : > { %v6878_v42 = vadd.f32 %v6877_v31, %v14769_v44  ;;  %v6879_v43 = vpop.f32.mrb[75].mxu0  ;;  %7744 = vmatmul.mubr.bf16.gmra.mrb[196].mxu1 %v14995_v37  ;;  %v7084_v59 = vmax.f32 %v6874_v17, 0.0 }
 0x7fa   : > { %v6880_v61 = vadd.f32 %v6879_v43, %v14772_v13  ;;  %v7085_v24 = vmax.f32 %v6876_v0, 0.0 }
 0x7fb   : > { %v7086_v6 = vmax.f32 %v6878_v42, 0.0  ;;  %8031 = vmatmul.mubr.bf16.gmra.mrb[180].mxu0 %v14947_v29 }
 0x7fc   : > { %v7087_v36 = vmax.f32 %v6880_v61, 0.0  ;;  %8038 = vmatprep.mubr.bf16.mxu0 %v14961_v20 }
 0x7fd   : > { %v15007_v49 = vpack.c.bf16 %v7086_v6, %v7084_v59 }
 0x7fe   : > { %v15009_v35 = vpack.c.bf16 %v7087_v36, %v7085_v24  ;;  %v6883_v60 = vpop.f32.mrb[76].mxu0 }
 0x7ff   : > { %v6884_v22 = vadd.f32 %v6883_v60, %v14769_v44  ;;  %v6885_v39 = vpop.f32.mrb[77].mxu0 }
 0x800   : > { %v6886_v45 = vadd.f32 %v6885_v39, %v14772_v13  ;;  %v6887_v56 = vpop.f32.mrb[78].mxu0  ;;  %7753 = vmatprep.mubr.bf16.mxu1 %v15009_v35 }
 0x801   : > { %v6888_v33 = vadd.f32 %v6887_v56, %v14769_v44  ;;  %v6889_v29 = vpop.f32.mrb[79].mxu0  ;;  %7754 = vmatmul.mubr.bf16.gmra.mrb[200].mxu1 %v15007_v49  ;;  %v7088_v21 = vmax.f32 %v6884_v22, 0.0 }
 0x802   : > { %v6890_v20 = vadd.f32 %v6889_v29, %v14772_v13  ;;  %v7089_v50 = vmax.f32 %v6886_v45, 0.0 }
 0x803   : > { %v7090_v7 = vmax.f32 %v6888_v33, 0.0  ;;  %8039 = vmatmul.mubr.bf16.gmra.mrb[184].mxu0 %v14959_v32 }
 0x804   : > { %v7091_v34 = vmax.f32 %v6890_v20, 0.0  ;;  %8046 = vmatprep.mubr.bf16.mxu0 %v14973_v38 }
 0x805   : > { %v15019_v28 = vpack.c.bf16 %v7090_v7, %v7088_v21 }
 0x806   : > { %v15021_v27 = vpack.c.bf16 %v7091_v34, %v7089_v50  ;;  %v6893_v25 = vpop.f32.mrb[80].mxu0 }
 0x807   : > { %v6894_v48 = vadd.f32 %v6893_v25, %v14769_v44  ;;  %v6895_v41 = vpop.f32.mrb[81].mxu0 }
 0x808   : > { %v6896_v4 = vadd.f32 %v6895_v41, %v14772_v13  ;;  %v6897_v30 = vpop.f32.mrb[82].mxu0  ;;  %7763 = vmatprep.mubr.bf16.mxu1 %v15021_v27 }
 0x809   : > { %v6898_v55 = vadd.f32 %v6897_v30, %v14769_v44  ;;  %v6899_v32 = vpop.f32.mrb[83].mxu0  ;;  %7764 = vmatmul.mubr.bf16.gmra.mrb[204].mxu1 %v15019_v28  ;;  %v7092_v58 = vmax.f32 %v6894_v48, 0.0 }
 0x80a   : > { %v6900_v38 = vadd.f32 %v6899_v32, %v14772_v13  ;;  %v7093_v53 = vmax.f32 %v6896_v4, 0.0 }
 0x80b   : > { %v7094_v11 = vmax.f32 %v6898_v55, 0.0  ;;  %8047 = vmatmul.mubr.bf16.gmra.mrb[188].mxu0 %v14971_v19 }
 0x80c   : > { %v7095_v46 = vmax.f32 %v6900_v38, 0.0  ;;  %8054 = vmatprep.mubr.bf16.mxu0 %v14985_v14 }
 0x80d   : > { %v15031_v12 = vpack.c.bf16 %v7094_v11, %v7092_v58 }
 0x80e   : > { %v15033_v8 = vpack.c.bf16 %v7095_v46, %v7093_v53  ;;  %v6903_v62 = vpop.f32.mrb[84].mxu0 }
 0x80f   : > { %v6904_v63 = vadd.f32 %v6903_v62, %v14769_v44  ;;  %v6905_v9 = vpop.f32.mrb[85].mxu0 }
 0x810   : > { %v6906_v10 = vadd.f32 %v6905_v9, %v14772_v13  ;;  %v6907_v15 = vpop.f32.mrb[86].mxu0  ;;  %7773 = vmatprep.mubr.bf16.mxu1 %v15033_v8 }
 0x811   : > { %v6908_v5 = vadd.f32 %v6907_v15, %v14769_v44  ;;  %v6909_v19 = vpop.f32.mrb[87].mxu0  ;;  %7774 = vmatmul.mubr.bf16.gmra.mrb[208].mxu1 %v15031_v12  ;;  %v7096_v40 = vmax.f32 %v6904_v63, 0.0 }
 0x812   : > { %v6910_v14 = vadd.f32 %v6909_v19, %v14772_v13  ;;  %v7097_v52 = vmax.f32 %v6906_v10, 0.0 }
 0x813   : > { %v7098_v2 = vmax.f32 %v6908_v5, 0.0  ;;  %8055 = vmatmul.mubr.bf16.gmra.mrb[192].mxu0 %v14983_v54 }
 0x814   : > { %v7099_v18 = vmax.f32 %v6910_v14, 0.0  ;;  %8062 = vmatprep.mubr.bf16.mxu0 %v14997_v3 }
 0x815   : > { %v15043_v23 = vpack.c.bf16 %v7098_v2, %v7096_v40 }
 0x816   : > { %v15045_v1 = vpack.c.bf16 %v7099_v18, %v7097_v52  ;;  %v6913_v16 = vpop.f32.mrb[88].mxu0 }
 0x817   : > { %v6914_v17 = vadd.f32 %v6913_v16, %v14769_v44  ;;  %v6915_v26 = vpop.f32.mrb[89].mxu0 }
 0x818   : > { %v6916_v0 = vadd.f32 %v6915_v26, %v14772_v13  ;;  %v6917_v31 = vpop.f32.mrb[90].mxu0  ;;  %7783 = vmatprep.mubr.bf16.mxu1 %v15045_v1 }
 0x819   : > { %v6918_v42 = vadd.f32 %v6917_v31, %v14769_v44  ;;  %v6919_v54 = vpop.f32.mrb[91].mxu0  ;;  %7784 = vmatmul.mubr.bf16.gmra.mrb[212].mxu1 %v15043_v23  ;;  %v7100_v43 = vmax.f32 %v6914_v17, 0.0 }
 0x81a   : > { %v6920_v3 = vadd.f32 %v6919_v54, %v14772_v13  ;;  %v7101_v59 = vmax.f32 %v6916_v0, 0.0 }
 0x81b   : > { %v7102_v61 = vmax.f32 %v6918_v42, 0.0  ;;  %8063 = vmatmul.mubr.bf16.gmra.mrb[196].mxu0 %v14995_v37 }
 0x81c   : > { %v7103_v6 = vmax.f32 %v6920_v3, 0.0  ;;  %8070 = vmatprep.mubr.bf16.mxu0 %v15009_v35 }
 0x81d   : > { %v15055_v24 = vpack.c.bf16 %v7102_v61, %v7100_v43 }
 0x81e   : > { %v15057_v36 = vpack.c.bf16 %v7103_v6, %v7101_v59  ;;  %v6923_v60 = vpop.f32.mrb[92].mxu0 }
 0x81f   : > { %v6924_v22 = vadd.f32 %v6923_v60, %v14769_v44  ;;  %v6925_v39 = vpop.f32.mrb[93].mxu0 }
 0x820   : > { %v6926_v45 = vadd.f32 %v6925_v39, %v14772_v13  ;;  %v6927_v56 = vpop.f32.mrb[94].mxu0  ;;  %7793 = vmatprep.mubr.bf16.mxu1 %v15057_v36 }
 0x821   : > { %v6928_v33 = vadd.f32 %v6927_v56, %v14769_v44  ;;  %v6929_v37 = vpop.f32.mrb[95].mxu0  ;;  %7794 = vmatmul.mubr.bf16.gmra.mrb[216].mxu1 %v15055_v24  ;;  %v7104_v29 = vmax.f32 %v6924_v22, 0.0 }
 0x822   : > { %v6930_v35 = vadd.f32 %v6929_v37, %v14772_v13  ;;  %v7105_v21 = vmax.f32 %v6926_v45, 0.0 }
 0x823   : > { %v7106_v20 = vmax.f32 %v6928_v33, 0.0  ;;  %8071 = vmatmul.mubr.bf16.gmra.mrb[200].mxu0 %v15007_v49 }
 0x824   : > { %v7107_v7 = vmax.f32 %v6930_v35, 0.0  ;;  %8078 = vmatprep.mubr.bf16.mxu0 %v15021_v27 }
 0x825   : > { %v15067_v50 = vpack.c.bf16 %v7106_v20, %v7104_v29 }
 0x826   : > { %v15069_v34 = vpack.c.bf16 %v7107_v7, %v7105_v21  ;;  %v6933_v25 = vpop.f32.mrb[96].mxu0 }
 0x827   : > { %v6934_v48 = vadd.f32 %v6933_v25, %v14769_v44  ;;  %v6935_v41 = vpop.f32.mrb[97].mxu0 }
 0x828   : > { %v6936_v4 = vadd.f32 %v6935_v41, %v14772_v13  ;;  %v6937_v30 = vpop.f32.mrb[98].mxu0  ;;  %7803 = vmatprep.mubr.bf16.mxu1 %v15069_v34 }
 0x829   : > { %v6938_v55 = vadd.f32 %v6937_v30, %v14769_v44  ;;  %v6939_v49 = vpop.f32.mrb[99].mxu0  ;;  %7804 = vmatmul.mubr.bf16.gmra.mrb[220].mxu1 %v15067_v50  ;;  %v7108_v32 = vmax.f32 %v6934_v48, 0.0 }
 0x82a   : > { %v6940_v27 = vadd.f32 %v6939_v49, %v14772_v13  ;;  %v7109_v58 = vmax.f32 %v6936_v4, 0.0 }
 0x82b   : > { %v7110_v38 = vmax.f32 %v6938_v55, 0.0  ;;  %8079 = vmatmul.mubr.bf16.gmra.mrb[204].mxu0 %v15019_v28 }
 0x82c   : > { %v7111_v11 = vmax.f32 %v6940_v27, 0.0  ;;  %8086 = vmatprep.mubr.bf16.mxu0 %v15033_v8 }
 0x82d   : > { %v15079_v53 = vpack.c.bf16 %v7110_v38, %v7108_v32 }
 0x82e   : > { %v15081_v46 = vpack.c.bf16 %v7111_v11, %v7109_v58  ;;  %v6943_v62 = vpop.f32.mrb[100].mxu0 }
 0x82f   : > { %v6944_v63 = vadd.f32 %v6943_v62, %v14769_v44  ;;  %v6945_v9 = vpop.f32.mrb[101].mxu0 }
 0x830   : > { %v6946_v10 = vadd.f32 %v6945_v9, %v14772_v13  ;;  %v6947_v15 = vpop.f32.mrb[102].mxu0  ;;  %7813 = vmatprep.mubr.bf16.mxu1 %v15081_v46 }
 0x831   : > { %v6948_v5 = vadd.f32 %v6947_v15, %v14769_v44  ;;  %v6949_v28 = vpop.f32.mrb[103].mxu0  ;;  %7814 = vmatmul.mubr.bf16.gmra.mrb[224].mxu1 %v15079_v53  ;;  %v7112_v19 = vmax.f32 %v6944_v63, 0.0 }
 0x832   : > { %v6950_v8 = vadd.f32 %v6949_v28, %v14772_v13  ;;  %v7113_v40 = vmax.f32 %v6946_v10, 0.0 }
 0x833   : > { %v7114_v14 = vmax.f32 %v6948_v5, 0.0  ;;  %8087 = vmatmul.mubr.bf16.gmra.mrb[208].mxu0 %v15031_v12 }
 0x834   : > { %v7115_v2 = vmax.f32 %v6950_v8, 0.0  ;;  %8094 = vmatprep.mubr.bf16.mxu0 %v15045_v1 }
 0x835   : > { %v15091_v52 = vpack.c.bf16 %v7114_v14, %v7112_v19 }
 0x836   : > { %v15093_v18 = vpack.c.bf16 %v7115_v2, %v7113_v40  ;;  %v6953_v16 = vpop.f32.mrb[104].mxu0 }
 0x837   : > { %v6954_v17 = vadd.f32 %v6953_v16, %v14769_v44  ;;  %v6955_v26 = vpop.f32.mrb[105].mxu0 }
 0x838   : > { %v6956_v0 = vadd.f32 %v6955_v26, %v14772_v13  ;;  %v6957_v31 = vpop.f32.mrb[106].mxu0  ;;  %7823 = vmatprep.mubr.bf16.mxu1 %v15093_v18 }
 0x839   : > { %v6958_v42 = vadd.f32 %v6957_v31, %v14769_v44  ;;  %v6959_v12 = vpop.f32.mrb[107].mxu0  ;;  %7824 = vmatmul.mubr.bf16.gmra.mrb[228].mxu1 %v15091_v52  ;;  %v7116_v54 = vmax.f32 %v6954_v17, 0.0 }
 0x83a   : > { %v6960_v1 = vadd.f32 %v6959_v12, %v14772_v13  ;;  %v7117_v43 = vmax.f32 %v6956_v0, 0.0 }
 0x83b   : > { %v7118_v3 = vmax.f32 %v6958_v42, 0.0  ;;  %8095 = vmatmul.mubr.bf16.gmra.mrb[212].mxu0 %v15043_v23  ;;  %v15113_v23 = vld [vmem:[%s16762_s10] sm:$0x7] }
 0x83c   : > { %v7119_v61 = vmax.f32 %v6960_v1, 0.0  ;;  %8102 = vmatprep.mubr.bf16.mxu0 %v15057_v36  ;;  %v15121_v20 = vrot.slane %v15113_v23, %v12616_v47  ;;  %v15126_v48 = vrot.slane %v15113_v23, %v12622_v51 }
 0x83d   : > { %v15103_v59 = vpack.c.bf16 %v7118_v3, %v7116_v54 }
 0x83e   : > { %v15105_v6 = vpack.c.bf16 %v7119_v61, %v7117_v43  ;;  %v6963_v60 = vpop.f32.mrb[108].mxu0 }
 0x83f   : > { %v6964_v22 = vadd.f32 %v6963_v60, %v14769_v44  ;;  %v6965_v39 = vpop.f32.mrb[109].mxu0 }
 0x840   : > { %v6966_v45 = vadd.f32 %v6965_v39, %v14772_v13  ;;  %v6967_v56 = vpop.f32.mrb[110].mxu0  ;;  %7833 = vmatprep.mubr.bf16.mxu1 %v15105_v6 }
 0x841   : > { %v6968_v36 = vadd.f32 %v6967_v56, %v14769_v44  ;;  %v6969_v33 = vpop.f32.mrb[111].mxu0  ;;  %7834 = vmatmul.mubr.bf16.gmra.mrb[232].mxu1 %v15103_v59  ;;  %v7120_v35 = vmax.f32 %v6964_v22, 0.0 }
 0x842   : > { %v6970_v37 = vadd.f32 %v6969_v33, %v14772_v13  ;;  %v7121_v21 = vmax.f32 %v6966_v45, 0.0 }
 0x843   : > { %v7122_v29 = vmax.f32 %v6968_v36, 0.0  ;;  %8103 = vmatmul.mubr.bf16.gmra.mrb[216].mxu0 %v15055_v24 }
 0x844   : > { %v7123_v7 = vmax.f32 %v6970_v37, 0.0  ;;  %v7575_v25 = vpop.f32.mrb[128].mxu1  ;;  %8110 = vmatprep.mubr.bf16.mxu0 %v15069_v34 }
 0x845   : > { %v15128_v41 = vpack.c.bf16 %v7122_v29, %v7120_v35  ;;  %v7577_v4 = vpop.f32.mrb[129].mxu1  ;;  %v15133_v49 = vadd.f32 %v7575_v25, %v15121_v20 }
 0x846   : > { %v15130_v30 = vpack.c.bf16 %v7123_v7, %v7121_v21  ;;  %v6973_v55 = vpop.f32.mrb[112].mxu0  ;;  %v7579_v24 = vpop.f32.mrb[130].mxu1  ;;  %v15140_v51 = vadd.f32 %v7577_v4, %v15126_v48 }
 0x847   : > { %v6974_v47 = vadd.f32 %v6973_v55, %v14769_v44  ;;  %v15137_v27 = vadd.f32 %v7579_v24, %v15121_v20  ;;  %v6975_v34 = vpop.f32.mrb[113].mxu0  ;;  %v7581_v32 = vpop.f32.mrb[131].mxu1 }
 0x848   : > { %v6976_v38 = vadd.f32 %v6975_v34, %v14772_v13  ;;  %v15144_v58 = vadd.f32 %v7581_v32, %v15126_v48  ;;  %v6977_v11 = vpop.f32.mrb[114].mxu0  ;;  %7843 = vmatprep.mubr.bf16.mxu1 %v15130_v30 }
 0x849   : > { %v6978_v63 = vadd.f32 %v6977_v11, %v14769_v44  ;;  %v6979_v9 = vpop.f32.mrb[115].mxu0  ;;  %7844 = vmatmul.mubr.bf16.gmra.mrb[236].mxu1 %v15128_v41  ;;  %v7124_v5 = vmax.f32 %v6974_v47, 0.0 }
 0x84a   : > { %v6980_v10 = vadd.f32 %v6979_v9, %v14772_v13  ;;  %v7125_v8 = vmax.f32 %v6976_v38, 0.0 }
 0x84b   : > { %v7126_v28 = vmax.f32 %v6978_v63, 0.0  ;;  %8111 = vmatmul.mubr.bf16.gmra.mrb[220].mxu0 %v15067_v50 }
 0x84c   : > { %v7127_v19 = vmax.f32 %v6980_v10, 0.0  ;;  %v7585_v14 = vpop.f32.mrb[132].mxu1  ;;  %8118 = vmatprep.mubr.bf16.mxu0 %v15081_v46 }
 0x84d   : > { %v15156_v40 = vpack.c.bf16 %v7126_v28, %v7124_v5  ;;  %v7587_v2 = vpop.f32.mrb[133].mxu1  ;;  %v15161_v0 = vadd.f32 %v7585_v14, %v15121_v20 }
 0x84e   : > { %v15158_v16 = vpack.c.bf16 %v7127_v19, %v7125_v8  ;;  %v6983_v17 = vpop.f32.mrb[116].mxu0  ;;  %v7589_v26 = vpop.f32.mrb[134].mxu1  ;;  %v15168_v1 = vadd.f32 %v7587_v2, %v15126_v48 }
 0x84f   : > { %v6984_v31 = vadd.f32 %v6983_v17, %v14769_v44  ;;  %v15165_v42 = vadd.f32 %v7589_v26, %v15121_v20  ;;  %v6985_v50 = vpop.f32.mrb[117].mxu0  ;;  %v7591_v12 = vpop.f32.mrb[135].mxu1 }
 0x850   : > { %v6986_v46 = vadd.f32 %v6985_v50, %v14772_v13  ;;  %v15172_v54 = vadd.f32 %v7591_v12, %v15126_v48  ;;  %v6987_v3 = vpop.f32.mrb[118].mxu0  ;;  %7853 = vmatprep.mubr.bf16.mxu1 %v15158_v16 }
 0x851   : > { %v6988_v61 = vadd.f32 %v6987_v3, %v14769_v44  ;;  %v6989_v60 = vpop.f32.mrb[119].mxu0  ;;  %7854 = vmatmul.mubr.bf16.gmra.mrb[240].mxu1 %v15156_v40  ;;  %v7128_v45 = vmax.f32 %v6984_v31, 0.0 }
 0x852   : > { %v6990_v22 = vadd.f32 %v6989_v60, %v14772_v13  ;;  %v7129_v36 = vmax.f32 %v6986_v46, 0.0 }
 0x853   : > { %v7130_v56 = vmax.f32 %v6988_v61, 0.0  ;;  %8119 = vmatmul.mubr.bf16.gmra.mrb[224].mxu0 %v15079_v53 }
 0x854   : > { %v7131_v33 = vmax.f32 %v6990_v22, 0.0  ;;  %v7595_v37 = vpop.f32.mrb[136].mxu1  ;;  %8126 = vmatprep.mubr.bf16.mxu0 %v15093_v18  ;;  %v16820_v22 = vld [vmem:[#allocation2_spill] sm:$0xff] }
 0x855   : > { %v15184_v35 = vpack.c.bf16 %v7130_v56, %v7128_v45  ;;  %v7597_v29 = vpop.f32.mrb[137].mxu1  ;;  %v15189_v4 = vadd.f32 %v7595_v37, %v15121_v20 }
 0x856   : > { %v15186_v21 = vpack.c.bf16 %v7131_v33, %v7129_v36  ;;  %v6993_v7 = vpop.f32.mrb[120].mxu0  ;;  %v7599_v25 = vpop.f32.mrb[138].mxu1  ;;  %v15196_v34 = vadd.f32 %v7597_v29, %v15126_v48 }
 0x857   : > { %v6994_v55 = vadd.f32 %v6993_v7, %v14769_v44  ;;  %v15193_v24 = vadd.f32 %v7599_v25, %v15121_v20  ;;  %v6995_v53 = vpop.f32.mrb[121].mxu0  ;;  %v7601_v47 = vpop.f32.mrb[139].mxu1 }
 0x858   : > { %v6996_v18 = vadd.f32 %v6995_v53, %v14772_v13  ;;  %v15200_v32 = vadd.f32 %v7601_v47, %v15126_v48  ;;  %v6997_v38 = vpop.f32.mrb[122].mxu0  ;;  %7863 = vmatprep.mubr.bf16.mxu1 %v15186_v21 }
 0x859   : > { %v6998_v63 = vadd.f32 %v6997_v38, %v14769_v44  ;;  %v6999_v9 = vpop.f32.mrb[123].mxu0  ;;  %7864 = vmatmul.mubr.bf16.gmra.mrb[244].mxu1 %v15184_v35  ;;  %v7132_v28 = vmax.f32 %v6994_v55, 0.0  ;;  %v644_v38 = vld [vmem:[%s15236_s27] sm:$0xff] }
 0x85a   : > { %v7000_v10 = vadd.f32 %v6999_v9, %v14772_v13  ;;  %v7133_v19 = vmax.f32 %v6996_v18, 0.0 }
 0x85b   : > { %v7134_v8 = vmax.f32 %v6998_v63, 0.0  ;;  %8127 = vmatmul.mubr.bf16.gmra.mrb[228].mxu0 %v15091_v52  ;;  %v645_v63 = vld [vmem:[%s15236_s27 + $0x8] sm:$0xff] }
 0x85c   : > { %v7135_v14 = vmax.f32 %v7000_v10, 0.0  ;;  %v7605_v2 = vpop.f32.mrb[140].mxu1  ;;  %8134 = vmatprep.mubr.bf16.mxu0 %v15105_v6  ;;  %v7280_v6 = vsub.s32 2, %v16820_v22 }
 0x85d   : > { %v15212_v17 = vpack.c.bf16 %v7134_v8, %v7132_v28  ;;  %v7607_v26 = vpop.f32.mrb[141].mxu1  ;;  %v15217_v46 = vadd.f32 %v7605_v2, %v15121_v20  ;;  %v708_v2 = vpack.c.bf16 %v645_v63, %v644_v38 }
 0x85e   : > { %v15214_v31 = vpack.c.bf16 %v7135_v14, %v7133_v19  ;;  %v7003_v50 = vpop.f32.mrb[124].mxu0  ;;  %v7609_v12 = vpop.f32.mrb[142].mxu1  ;;  %v15225_v45 = vadd.f32 %v7607_v26, %v15126_v48  ;;  %v15247_v18 = vrot.slane %v15113_v23, %v7280_v6  ;;  %v646_v6 = vld [vmem:[%s15236_s27 + $0x10] sm:$0xff] }
 0x85f   : > { %v7004_v3 = vadd.f32 %v7003_v50, %v14769_v44  ;;  %v15221_v52 = vadd.f32 %v7609_v12, %v15121_v20  ;;  %v7005_v61 = vpop.f32.mrb[125].mxu0  ;;  %v7611_v60 = vpop.f32.mrb[143].mxu1 }
 0x860   : > { %v7006_v56 = vadd.f32 %v7005_v61, %v14772_v13  ;;  %v15229_v36 = vadd.f32 %v7611_v60, %v15126_v48  ;;  %v7007_v33 = vpop.f32.mrb[126].mxu0  ;;  %7873 = vmatprep.mubr.bf16.mxu1 %v15214_v31  ;;  %v11870_v60 = vld [vmem:[%s16763_s11 + $0x40] sm:$0xff]  }
 0x861   : > { %v7008_v29 = vadd.f32 %v7007_v33, %v14769_v44  ;;  %v7009_v7 = vpop.f32.mrb[127].mxu0  ;;  %7874 = vmatmul.mubr.bf16.gmra.mrb[248].mxu1 %v15212_v17  ;;  %v7136_v53 = vmax.f32 %v7004_v3, 0.0 }
 0x862   : > { %v7010_v25 = vadd.f32 %v7009_v7, %v14772_v13  ;;  %v7137_v9 = vmax.f32 %v7006_v56, 0.0  ;;  %v647_v56 = vld [vmem:[%s15236_s27 + $0x18] sm:$0xff]  ;;  %v648_v7 = vld [vmem:[%s15236_s27 + $0x20] sm:$0xff] }
 0x863   : > { %v7138_v47 = vmax.f32 %v7008_v29, 0.0  ;;  %8135 = vmatmul.mubr.bf16.gmra.mrb[232].mxu0 %v15103_v59  ;;  %v709_v38 = vpack.c.bf16 %v647_v56, %v646_v6  ;;  %v651_v6 = vld [vmem:[%s15236_s27 + $0x38] sm:$0xff]  ;;  %v11863_v56 = vld [vmem:[%s16763_s11 + $0x8] sm:$0xff]  }
 0x864   : > { %v7139_v10 = vmax.f32 %v7010_v25, 0.0  ;;  %v7615_v44 = vpop.f32.mrb[144].mxu1  ;;  %8142 = vmatprep.mubr.bf16.mxu0 %v15130_v30  ;;  %v649_v25 = vld [vmem:[%s15236_s27 + $0x28] sm:$0xff] }
 0x865   : > { %v15252_v28 = vpack.c.bf16 %v7138_v47, %v7136_v53  ;;  %v7617_v13 = vpop.f32.mrb[145].mxu1  ;;  %v15257_v59 = vadd.f32 %v7615_v44, %v15121_v20  ;;  %v710_v44 = vpack.c.bf16 %v649_v25, %v648_v7  ;;  %v652_v25 = vld [vmem:[%s15236_s27 + $0x40] sm:$0xff] }
 0x866   : > { %v15254_v8 = vpack.c.bf16 %v7139_v10, %v7137_v9  ;;  %v7619_v19 = vpop.f32.mrb[146].mxu1  ;;  %v7928_v14 = vpop.f32.mrb[128].mxu0  ;;  %v15264_v12 = vadd.f32 %v7617_v13, %v15126_v48  ;;  %v11862_v10 = vld [vmem:[%s16763_s11] sm:$0xff]  }
 0x867   : > { %v15260_v23 = vadd.f32 %v7619_v19, %v15121_v20  ;;  %v7929_v26 = vadd.f32 %v7928_v14, %v15247_v18  ;;  %v7621_v50 = vpop.f32.mrb[147].mxu1  ;;  %v7930_v30 = vpop.f32.mrb[129].mxu0 }
 0x868   : > { %v15267_v3 = vadd.f32 %v7621_v50, %v15126_v48  ;;  %7883 = vmatprep.mubr.bf16.mxu1 %v15254_v8  ;;  %v7931_v61 = vpop.f32.mrb[130].mxu0 }
 0x869   : > { %v7933_v22 = vpop.f32.mrb[131].mxu0  ;;  %10043 = vrot.lane.b32.xlu0 %v7929_v26, %s12153_s28  ;;  %7884 = vmatmul.mubr.bf16.gmra.mrb[252].mxu1 %v15252_v28  ;;  %v7932_v29 = vadd.f32 %v7931_v61, %v15247_v18 }
 0x86a   : > { %11161 = vmatprep.mubr.msk.bf16.mxu1 %vm8291_vm4, %v708_v2  ;;  %v650_v22 = vld [vmem:[%s15236_s27 + $0x30] sm:$0xff] }
 0x86b   : > { %8143 = vmatmul.mubr.bf16.gmra.mrb[236].mxu0 %v15128_v41 }
 0x86c   : > { %v7625_v53 = vpop.f32.mrb[148].mxu1  ;;  %8150 = vmatprep.mubr.bf16.mxu0 %v15158_v16 }
 0x86d   : > { %v7627_v47 = vpop.f32.mrb[149].mxu1  ;;  %10045 = vrot.lane.b32.xlu0 %v7932_v29, %s12153_s28  ;;  %v15289_v41 = vadd.f32 %v7625_v53, %v15121_v20  ;;  %v653_v53 = vld [vmem:[%s15236_s27 + $0x48] sm:$0xff] }
 0x86e   : > { %v7629_v63 = vpop.f32.mrb[150].mxu1  ;;  %v7936_v9 = vpop.f32.mrb[132].mxu0  ;;  %v15296_v2 = vadd.f32 %v7627_v47, %v15126_v48 }
 0x86f   : > { %v15292_v13 = vadd.f32 %v7629_v63, %v15121_v20  ;;  %v7937_v16 = vadd.f32 %v7936_v9, %v15247_v18  ;;  %v7631_v19 = vpop.f32.mrb[151].mxu1  ;;  %v7938_v14 = vpop.f32.mrb[133].mxu0  ;;  %v711_v63 = vpack.c.bf16 %v651_v6, %v650_v22 }
 0x870   : > { %v15299_v26 = vadd.f32 %v7631_v19, %v15126_v48  ;;  %v7939_v50 = vpop.f32.mrb[134].mxu0 }
 0x871   : > { %v7941_v61 = vpop.f32.mrb[135].mxu0  ;;  %10047 = vrot.lane.b32.xlu1 %v7937_v16, %s12153_s28  ;;  %11162 = vmatmul.mubr.msk.bf16.vlgmr.msra.gmra.mrb[0].mxu1 %vm8291_vm4, %v709_v38  ;;  %v7940_v7 = vadd.f32 %v7939_v50, %v15247_v18  ;;  %v11864_v16 = vld [vmem:[%s16763_s11 + $0x10] sm:$0xff]  }
 0x872   : > { %8780 = vmatpush1.bf16.msra.mxu1 %v11862_v10  ;;  %11165 = vmatprep.mubr.msk.bf16.mxu1 %vm8291_vm4, %v710_v44  ;;  %v712_v44 = vpack.c.bf16 %v653_v53, %v652_v25  ;;  %v654_v53 = vld [vmem:[%s15236_s27 + $0x50] sm:$0xff] }
 0x873   : > { %8151 = vmatmul.mubr.bf16.gmra.mrb[240].mxu0 %v15156_v40  ;;  %8781 = vmatprep.subr.bf16.mxu1 %v16818_v57 }
 0x874   : > { %v7635_v47 = vpop.f32.mrb[152].mxu1  ;;  %8158 = vmatprep.mubr.bf16.mxu0 %v15186_v21 }
 0x875   : > { %v7637_v38 = vpop.f32.mrb[153].mxu1  ;;  %10049 = vrot.lane.b32.xlu1 %v7940_v7, %s12153_s28  ;;  %v15324_v40 = vadd.f32 %v7635_v47, %v15121_v20  ;;  %v655_v47 = vld [vmem:[%s15236_s27 + $0x58] sm:$0xff] }
 0x876   : > { %v7639_v9 = vpop.f32.mrb[154].mxu1  ;;  %v7944_v10 = vpop.f32.mrb[136].mxu0  ;;  %8782 = vmatpush1.bf16.msra.mxu1 %v11863_v56  ;;  %v15332_v61 = vadd.f32 %v7637_v38, %v15126_v48  ;;  %v11865_v38 = vld [vmem:[%s16763_s11 + $0x18] sm:$0xff]  }
 0x877   : > { %v15327_v19 = vadd.f32 %v7639_v9, %v15121_v20  ;;  %v7945_v21 = vadd.f32 %v7944_v10, %v15247_v18  ;;  %v7641_v14 = vpop.f32.mrb[155].mxu1  ;;  %v7946_v50 = vpop.f32.mrb[137].mxu0  ;;  %8783 = vmatprep.subr.bf16.mxu1 %v16818_v57  ;;  %v656_v10 = vld [vmem:[%s15236_s27 + $0x60] sm:$0xff] }
 0x878   : > { %v15335_v22 = vadd.f32 %v7641_v14, %v15126_v48  ;;  %v7947_v6 = vpop.f32.mrb[138].mxu0 }
 0x879   : > { %v7948_v7 = vadd.f32 %v7947_v6, %v15247_v18  ;;  %v7949_v25 = vpop.f32.mrb[139].mxu0  ;;  %10051 = vrot.lane.b32.xlu0 %v7945_v21, %s12153_s28  ;;  %11166 = vmatmul.mubr.msk.bf16.gmra.mrb[4].mxu1 %vm8291_vm4, %v711_v63  ;;  %v657_v21 = vld [vmem:[%s15236_s27 + $0x68] sm:$0xff] }
 0x87a   : > { %11169 = vmatprep.mubr.msk.bf16.mxu1 %vm8291_vm4, %v712_v44  ;;  %8784 = vmatpush1.bf16.msra.mxu1 %v11864_v16  ;;  %v713_v44 = vpack.c.bf16 %v655_v47, %v654_v53  ;;  %v714_v6 = vpack.c.bf16 %v657_v21, %v656_v10  ;;  %v11866_v25 = vld [vmem:[%s16763_s11 + $0x20] sm:$0xff]  }
 0x87b   : > { %8159 = vmatmul.mubr.bf16.gmra.mrb[244].mxu0 %v15184_v35  ;;  %10053 = vrot.lane.b32.xlu1 %v7948_v7, %s12153_s28 }
 0x87c   : > { %v7645_v14 = vpop.f32.mrb[156].mxu1  ;;  %8166 = vmatprep.mubr.bf16.mxu0 %v15214_v31  ;;  %8785 = vmatprep.subr.bf16.mxu1 %v16818_v57 }
 0x87d   : > { %v7647_v63 = vpop.f32.mrb[157].mxu1  ;;  %v15360_v35 = vadd.f32 %v7645_v14, %v15121_v20 }
 0x87e   : > { %v7649_v16 = vpop.f32.mrb[158].mxu1  ;;  %v7952_v50 = vpop.f32.mrb[140].mxu0  ;;  %8786 = vmatpush1.bf16.msra.mxu1 %v11865_v38  ;;  %v15368_v47 = vadd.f32 %v7647_v63, %v15126_v48  ;;  %v658_v63 = vld [vmem:[%s15236_s27 + $0x70] sm:$0xff] }
 0x87f   : > { %v15363_v7 = vadd.f32 %v7649_v16, %v15121_v20  ;;  %v7953_v31 = vadd.f32 %v7952_v50, %v15247_v18  ;;  %v7651_v56 = vpop.f32.mrb[159].mxu1  ;;  %v7954_v53 = vpop.f32.mrb[141].mxu0  ;;  %8787 = vmatprep.subr.bf16.mxu1 %v16818_v57  ;;  %v659_v50 = vld [vmem:[%s15236_s27 + $0x78] sm:$0xff] }
 0x880   : > { %v15371_v38 = vadd.f32 %v7651_v56, %v15126_v48  ;;  %v7955_v10 = vpop.f32.mrb[142].mxu0  ;;  %v11867_v56 = vld [vmem:[%s16763_s11 + $0x28] sm:$0xff]   ;;  %v11868_v53 = vld [vmem:[%s16763_s11 + $0x30] sm:$0xff]  }
 0x881   : > { %v7956_v14 = vadd.f32 %v7955_v10, %v15247_v18  ;;  %v7957_v16 = vpop.f32.mrb[143].mxu0  ;;  %10055 = vrot.lane.b32.xlu0 %v7953_v31, %s12153_s28  ;;  %11170 = vmatmul.mubr.msk.bf16.gmra.mrb[8].mxu1 %vm8291_vm4, %v713_v44  ;;  %v660_v10 = vld [vmem:[%s15236_s27 + $0x80] sm:$0xff]  ;;  %v661_v31 = vld [vmem:[%s15236_s27 + $0x88] sm:$0xff] }
 0x882   : > { %11173 = vmatprep.mubr.msk.bf16.mxu1 %vm8291_vm4, %v714_v6  ;;  %8788 = vmatpush1.bf16.msra.mxu1 %v11866_v25  ;;  %v715_v6 = vpack.c.bf16 %v659_v50, %v658_v63  ;;  %v716_v9 = vpack.c.bf16 %v661_v31, %v660_v10 }
 0x883   : > { %8167 = vmatmul.mubr.bf16.gmra.mrb[248].mxu0 %v15212_v17  ;;  %10057 = vrot.lane.b32.xlu1 %v7956_v14, %s12153_s28 }
 0x884   : > { %v7655_v16 = vpop.f32.mrb[160].mxu1  ;;  %8174 = vmatprep.mubr.bf16.mxu0 %v15254_v8  ;;  %8789 = vmatprep.subr.bf16.mxu1 %v16818_v57 }
 0x885   : > { %v7657_v44 = vpop.f32.mrb[161].mxu1  ;;  %v15396_v17 = vadd.f32 %v7655_v16, %v15121_v20 }
 0x886   : > { %v7659_v25 = vpop.f32.mrb[162].mxu1  ;;  %v7960_v21 = vpop.f32.mrb[144].mxu0  ;;  %8790 = vmatpush1.bf16.msra.mxu1 %v11867_v56  ;;  %v15404_v50 = vadd.f32 %v7657_v44, %v15126_v48  ;;  %v663_v44 = vld [vmem:[%s15236_s27 + $0x98] sm:$0xff] }
 0x887   : > { %v15399_v14 = vadd.f32 %v7659_v25, %v15121_v20  ;;  %v7961_v8 = vadd.f32 %v7960_v21, %v15247_v18  ;;  %v7661_v30 = vpop.f32.mrb[163].mxu1  ;;  %v7962_v63 = vpop.f32.mrb[145].mxu0  ;;  %8791 = vmatprep.subr.bf16.mxu1 %v16818_v57  ;;  %v662_v21 = vld [vmem:[%s15236_s27 + $0x90] sm:$0xff] }
 0x888   : > { %v15407_v56 = vadd.f32 %v7661_v30, %v15126_v48  ;;  %v7963_v10 = vpop.f32.mrb[146].mxu0  ;;  %v11869_v30 = vld [vmem:[%s16763_s11 + $0x38] sm:$0xff]  }
 0x889   : > { %v7964_v16 = vadd.f32 %v7963_v10, %v15247_v18  ;;  %v7965_v25 = vpop.f32.mrb[147].mxu0  ;;  %10059 = vrot.lane.b32.xlu0 %v7961_v8, %s12153_s28  ;;  %11174 = vmatmul.mubr.msk.bf16.gmra.mrb[12].mxu1 %vm8291_vm4, %v715_v6  ;;  %v664_v10 = vld [vmem:[%s15236_s27 + $0xa0] sm:$0xff]  ;;  %v665_v8 = vld [vmem:[%s15236_s27 + $0xa8] sm:$0xff]  ;;  %v717_v6 = vpack.c.bf16 %v663_v44, %v662_v21 }
 0x88a   : > { %11177 = vmatprep.mubr.msk.bf16.mxu1 %vm8291_vm4, %v716_v9  ;;  %8792 = vmatpush1.bf16.msra.mxu1 %v11868_v53  ;;  %v718_v29 = vpack.c.bf16 %v665_v8, %v664_v10 }
 0x88b   : > { %10061 = vrot.lane.b32.xlu1 %v7964_v16, %s12153_s28  ;;  %8175 = vmatmul.mubr.bf16.gmra.mrb[252].mxu0 %v15252_v28 }
 0x88c   : > { %v7665_v25 = vpop.f32.mrb[164].mxu1  ;;  %8793 = vmatprep.subr.bf16.mxu1 %v16818_v57 }
 0x88d   : > { %v7667_v9 = vpop.f32.mrb[165].mxu1  ;;  %v15431_v16 = vadd.f32 %v7665_v25, %v15121_v20 }
 0x88e   : > { %v7669_v31 = vpop.f32.mrb[166].mxu1  ;;  %v7968_v53 = vpop.f32.mrb[148].mxu0  ;;  %8794 = vmatpush1.bf16.msra.mxu1 %v11869_v30  ;;  %v15439_v44 = vadd.f32 %v7667_v9, %v15126_v48  ;;  %v667_v9 = vld [vmem:[%s15236_s27 + $0xb8] sm:$0xff] }
 0x88f   : > { %v15434_v28 = vadd.f32 %v7669_v31, %v15121_v20  ;;  %v7969_v63 = vadd.f32 %v7968_v53, %v15247_v18  ;;  %v7671_v33 = vpop.f32.mrb[167].mxu1  ;;  %v7970_v21 = vpop.f32.mrb[149].mxu0  ;;  %8795 = vmatprep.subr.bf16.mxu1 %v16818_v57  ;;  %v666_v53 = vld [vmem:[%s15236_s27 + $0xb0] sm:$0xff] }
 0x890   : > { %v15442_v30 = vadd.f32 %v7671_v33, %v15126_v48  ;;  %v7971_v10 = vpop.f32.mrb[150].mxu0  ;;  %v11871_v33 = vld [vmem:[%s16763_s11 + $0x48] sm:$0xff]   ;;  %v719_v8 = vpack.c.bf16 %v667_v9, %v666_v53 }
 0x891   : > { %v7972_v31 = vadd.f32 %v7971_v10, %v15247_v18  ;;  %v7973_v25 = vpop.f32.mrb[151].mxu0  ;;  %10063 = vrot.lane.b32.xlu0 %v7969_v63, %s12153_s28  ;;  %11178 = vmatmul.mubr.msk.bf16.gmra.mrb[16].mxu1 %vm8291_vm4, %v717_v6  ;;  %v668_v10 = vld [vmem:[%s15236_s27 + $0xc0] sm:$0xff] }
 0x892   : > { %11181 = vmatprep.mubr.msk.bf16.mxu1 %vm8291_vm4, %v718_v29  ;;  %8796 = vmatpush1.bf16.msra.mxu1 %v11870_v60  ;;  %v669_v25 = vld [vmem:[%s15236_s27 + $0xc8] sm:$0xff]  ;;  %v11872_v60 = vld [vmem:[%s16763_s11 + $0x50] sm:$0xff]  }
 0x893   : > { %10065 = vrot.lane.b32.xlu1 %v7972_v31, %s12153_s28  ;;  %8797 = vmatprep.subr.bf16.mxu1 %v16818_v57  ;;  %v720_v55 = vpack.c.bf16 %v669_v25, %v668_v10 }
 0x894   : > { %v7675_v63 = vpop.f32.mrb[168].mxu1 }
 0x895   : > { %v7677_v6 = vpop.f32.mrb[169].mxu1  ;;  %v15465_v21 = vadd.f32 %v7675_v63, %v15121_v20 }
 0x896   : > { %v7679_v29 = vpop.f32.mrb[170].mxu1  ;;  %v7976_v37 = vpop.f32.mrb[152].mxu0  ;;  %8798 = vmatpush1.bf16.msra.mxu1 %v11871_v33  ;;  %v15473_v9 = vadd.f32 %v7677_v6, %v15126_v48  ;;  %v671_v6 = vld [vmem:[%s15236_s27 + $0xd8] sm:$0xff] }
 0x897   : > { %v15468_v31 = vadd.f32 %v7679_v29, %v15121_v20  ;;  %v7977_v11 = vadd.f32 %v7976_v37, %v15247_v18  ;;  %v7681_v5 = vpop.f32.mrb[171].mxu1  ;;  %v7978_v53 = vpop.f32.mrb[153].mxu0  ;;  %8799 = vmatprep.subr.bf16.mxu1 %v16818_v57  ;;  %v670_v37 = vld [vmem:[%s15236_s27 + $0xd0] sm:$0xff] }
 0x898   : > { %v15476_v33 = vadd.f32 %v7681_v5, %v15126_v48  ;;  %v7979_v10 = vpop.f32.mrb[154].mxu0  ;;  %v11873_v5 = vld [vmem:[%s16763_s11 + $0x58] sm:$0xff]   ;;  %v721_v25 = vpack.c.bf16 %v671_v6, %v670_v37 }
 0x899   : > { %v7980_v63 = vadd.f32 %v7979_v10, %v15247_v18  ;;  %v7981_v29 = vpop.f32.mrb[155].mxu0  ;;  %10067 = vrot.lane.b32.xlu0 %v7977_v11, %s12153_s28  ;;  %11182 = vmatmul.mubr.msk.bf16.gmra.mrb[20].mxu1 %vm8291_vm4, %v719_v8  ;;  %v672_v10 = vld [vmem:[%s15236_s27 + $0xe0] sm:$0xff] }
 0x89a   : > { %11185 = vmatprep.mubr.msk.bf16.mxu1 %vm8291_vm4, %v720_v55  ;;  %8800 = vmatpush1.bf16.msra.mxu1 %v11872_v60  ;;  %v673_v29 = vld [vmem:[%s15236_s27 + $0xe8] sm:$0xff]  ;;  %v11874_v60 = vld [vmem:[%s16763_s11 + $0x60] sm:$0xff]  }
 0x89b   : > { %10069 = vrot.lane.b32.xlu1 %v7980_v63, %s12153_s28  ;;  %8801 = vmatprep.subr.bf16.mxu1 %v16818_v57  ;;  %v722_v39 = vpack.c.bf16 %v673_v29, %v672_v10 }
 0x89c   : > { %v7685_v11 = vpop.f32.mrb[172].mxu1 }
 0x89d   : > { %v7687_v8 = vpop.f32.mrb[173].mxu1  ;;  %v15499_v53 = vadd.f32 %v7685_v11, %v15121_v20 }
 0x89e   : > { %v7689_v55 = vpop.f32.mrb[174].mxu1  ;;  %v7984_v43 = vpop.f32.mrb[156].mxu0  ;;  %8802 = vmatpush1.bf16.msra.mxu1 %v11873_v5  ;;  %v15507_v6 = vadd.f32 %v7687_v8, %v15126_v48  ;;  %v675_v8 = vld [vmem:[%s15236_s27 + $0xf8] sm:$0xff] }
 0x89f   : > { %16821 = vst [vmem:[#allocation2_spill] sm:$0xff] %v15499_v53  ;;  %v15502_v63 = vadd.f32 %v7689_v55, %v15121_v20  ;;  %v7985_v62 = vadd.f32 %v7984_v43, %v15247_v18  ;;  %v7691_v15 = vpop.f32.mrb[175].mxu1  ;;  %v7986_v37 = vpop.f32.mrb[157].mxu0  ;;  %8803 = vmatprep.subr.bf16.mxu1 %v16818_v57  ;;  %v674_v43 = vld [vmem:[%s15236_s27 + $0xf0] sm:$0xff] }
 0x8a0   : > { %16823 = vst [vmem:[#allocation4_spill] sm:$0xff] %v15507_v6  ;;  %v15510_v5 = vadd.f32 %v7691_v15, %v15126_v48  ;;  %v7987_v10 = vpop.f32.mrb[158].mxu0  ;;  %v11875_v15 = vld [vmem:[%s16763_s11 + $0x68] sm:$0xff]   ;;  %v723_v29 = vpack.c.bf16 %v675_v8, %v674_v43 }
 0x8a1   : > { %16822 = vst [vmem:[#allocation3_spill] sm:$0xff] %v15502_v63  ;;  %v7988_v11 = vadd.f32 %v7987_v10, %v15247_v18  ;;  %v7989_v55 = vpop.f32.mrb[159].mxu0  ;;  %10071 = vrot.lane.b32.xlu0 %v7985_v62, %s12153_s28  ;;  %11186 = vmatmul.mubr.msk.bf16.gmra.mrb[24].mxu1 %vm8291_vm4, %v721_v25  ;;  %v676_v10 = vld [vmem:[%s15236_s27 + $0x100] sm:$0xff] }
 0x8a2   : > { %16824 = vst [vmem:[#allocation5_spill] sm:$0xff] %v15510_v5  ;;  %11189 = vmatprep.mubr.msk.bf16.mxu1 %vm8291_vm4, %v722_v39  ;;  %8804 = vmatpush1.bf16.msra.mxu1 %v11874_v60  ;;  %v677_v55 = vld [vmem:[%s15236_s27 + $0x108] sm:$0xff]  ;;  %v11876_v60 = vld [vmem:[%s16763_s11 + $0x70] sm:$0xff]  }
 0x8a3   : > { %10073 = vrot.lane.b32.xlu1 %v7988_v11, %s12153_s28  ;;  %8805 = vmatprep.subr.bf16.mxu1 %v16818_v57  ;;  %v724_v63 = vpack.c.bf16 %v677_v55, %v676_v10 }
 0x8a4   : > { %v7695_v62 = vpop.f32.mrb[176].mxu1 }
 0x8a5   : > { %v7697_v25 = vpop.f32.mrb[177].mxu1  ;;  %v15533_v37 = vadd.f32 %v7695_v62, %v15121_v20 }
 0x8a6   : > { %v7699_v39 = vpop.f32.mrb[178].mxu1  ;;  %v7992_v53 = vpop.f32.mrb[160].mxu0  ;;  %8806 = vmatpush1.bf16.msra.mxu1 %v11875_v15  ;;  %v15541_v8 = vadd.f32 %v7697_v25, %v15126_v48  ;;  %v679_v25 = vld [vmem:[%s15236_s27 + $0x118] sm:$0xff] }
 0x8a7   : > { %16825 = vst [vmem:[#allocation6_spill] sm:$0xff] %v15533_v37  ;;  %v15536_v11 = vadd.f32 %v7699_v39, %v15121_v20  ;;  %v7993_v6 = vadd.f32 %v7992_v53, %v15247_v18  ;;  %v7701_v5 = vpop.f32.mrb[179].mxu1  ;;  %v7994_v43 = vpop.f32.mrb[161].mxu0  ;;  %8807 = vmatprep.subr.bf16.mxu1 %v16818_v57  ;;  %v678_v53 = vld [vmem:[%s15236_s27 + $0x110] sm:$0xff] }
 0x8a8   : > { %16827 = vst [vmem:[#allocation8_spill] sm:$0xff] %v15541_v8  ;;  %v15544_v15 = vadd.f32 %v7701_v5, %v15126_v48  ;;  %v7995_v10 = vpop.f32.mrb[162].mxu0  ;;  %v11877_v5 = vld [vmem:[%s16763_s11 + $0x78] sm:$0xff]   ;;  %v725_v55 = vpack.c.bf16 %v679_v25, %v678_v53 }
 0x8a9   : > { %16826 = vst [vmem:[#allocation7_spill] sm:$0xff] %v15536_v11  ;;  %v7996_v62 = vadd.f32 %v7995_v10, %v15247_v18  ;;  %v7997_v39 = vpop.f32.mrb[163].mxu0  ;;  %10075 = vrot.lane.b32.xlu0 %v7993_v6, %s12153_s28  ;;  %11190 = vmatmul.mubr.msk.bf16.gmra.mrb[28].mxu1 %vm8291_vm4, %v723_v29  ;;  %v680_v10 = vld [vmem:[%s15236_s27 + $0x120] sm:$0xff] }
 0x8aa   : > { %16828 = vst [vmem:[#allocation9_spill] sm:$0xff] %v15544_v15  ;;  %11193 = vmatprep.mubr.msk.bf16.mxu1 %vm8291_vm4, %v724_v63  ;;  %8808 = vmatpush1.bf16.msra.mxu1 %v11876_v60  ;;  %v681_v39 = vld [vmem:[%s15236_s27 + $0x128] sm:$0xff] }
 0x8ab   : > { %10077 = vrot.lane.b32.xlu1 %v7996_v62, %s12153_s28  ;;  %8809 = vmatprep.subr.bf16.mxu1 %v16818_v57  ;;  %v726_v11 = vpack.c.bf16 %v681_v39, %v680_v10 }
 0x8ac   : > { %v7705_v6 = vpop.f32.mrb[180].mxu1 }
 0x8ad   : > { %v7707_v29 = vpop.f32.mrb[181].mxu1  ;;  %v15564_v60 = vadd.f32 %v7705_v6, %v15121_v20 }
 0x8ae   : > { %v7709_v63 = vpop.f32.mrb[182].mxu1  ;;  %v8000_v37 = vpop.f32.mrb[164].mxu0  ;;  %8810 = vmatpush1.bf16.msra.mxu1 %v11877_v5  ;;  %v15571_v53 = vadd.f32 %v7707_v29, %v15126_v48 }
 0x8af   : > { %16829 = vst [vmem:[#allocation10_spill] sm:$0xff] %v15564_v60  ;;  %v15567_v43 = vadd.f32 %v7709_v63, %v15121_v20  ;;  %v8001_v62 = vadd.f32 %v8000_v37, %v15247_v18  ;;  %v7711_v8 = vpop.f32.mrb[183].mxu1  ;;  %v8002_v57 = vpop.f32.mrb[165].mxu0  ;;  %v682_v37 = vld [vmem:[%s15236_s27 + $0x130] sm:$0xff]  ;;  %v683_v63 = vld [vmem:[%s15236_s27 + $0x138] sm:$0xff] }
 0x8b0   : > { %16831 = vst [vmem:[#allocation12_spill] sm:$0xff] %v15571_v53  ;;  %v15574_v25 = vadd.f32 %v7711_v8, %v15126_v48  ;;  %v8003_v5 = vpop.f32.mrb[166].mxu0  ;;  %v684_v8 = vld [vmem:[%s15236_s27 + $0x140] sm:$0xff]  ;;  %v685_v57 = vld [vmem:[%s15236_s27 + $0x148] sm:$0xff]  ;;  %v727_v60 = vpack.c.bf16 %v683_v63, %v682_v37 }
 0x8b1   : > { %16830 = vst [vmem:[#allocation11_spill] sm:$0xff] %v15567_v43  ;;  %v8004_v39 = vadd.f32 %v8003_v5, %v15247_v18  ;;  %v8005_v6 = vpop.f32.mrb[167].mxu0  ;;  %10079 = vrot.lane.b32.xlu0 %v8001_v62, %s12153_s28  ;;  %11194 = vmatmul.mubr.msk.bf16.gmra.mrb[32].mxu1 %vm8291_vm4, %v725_v55  ;;  %v728_v62 = vpack.c.bf16 %v685_v57, %v684_v8 }
 0x8b2   : > { %16832 = vst [vmem:[#allocation13_spill] sm:$0xff] %v15574_v25  ;;  %11197 = vmatprep.mubr.msk.bf16.mxu1 %vm8291_vm4, %v726_v11 }
 0x8b3   : > { %10081 = vrot.lane.b32.xlu1 %v8004_v39, %s12153_s28 }
 0x8b4   : > { %v7715_v15 = vpop.f32.mrb[184].mxu1 }
 0x8b5   : > { %v7717_v10 = vpop.f32.mrb[185].mxu1  ;;  %v15590_v55 = vadd.f32 %v7715_v15, %v15121_v20 }
 0x8b6   : > { %v7719_v5 = vpop.f32.mrb[186].mxu1  ;;  %v8008_v6 = vpop.f32.mrb[168].mxu0  ;;  %v15597_v53 = vadd.f32 %v7717_v10, %v15126_v48 }
 0x8b7   : > { %16833 = vst [vmem:[#allocation14_spill] sm:$0xff] %v15590_v55  ;;  %v15593_v11 = vadd.f32 %v7719_v5, %v15121_v20  ;;  %v8009_v29 = vadd.f32 %v8008_v6, %v15247_v18  ;;  %v7721_v39 = vpop.f32.mrb[187].mxu1  ;;  %v8010_v43 = vpop.f32.mrb[169].mxu0  ;;  %v687_v5 = vld [vmem:[%s15236_s27 + $0x158] sm:$0xff]  ;;  %v688_v6 = vld [vmem:[%s15236_s27 + $0x160] sm:$0xff] }
 0x8b8   : > { %16835 = vst [vmem:[#allocation16_spill] sm:$0xff] %v15597_v53  ;;  %v15600_v37 = vadd.f32 %v7721_v39, %v15126_v48  ;;  %v8011_v63 = vpop.f32.mrb[170].mxu0  ;;  %v686_v43 = vld [vmem:[%s15236_s27 + $0x150] sm:$0xff]  ;;  %v689_v39 = vld [vmem:[%s15236_s27 + $0x168] sm:$0xff] }
 0x8b9   : > { %16834 = vst [vmem:[#allocation15_spill] sm:$0xff] %v15593_v11  ;;  %v8012_v8 = vadd.f32 %v8011_v63, %v15247_v18  ;;  %v8013_v57 = vpop.f32.mrb[171].mxu0  ;;  %10083 = vrot.lane.b32.xlu0 %v8009_v29, %s12153_s28  ;;  %11198 = vmatmul.mubr.msk.bf16.gmra.mrb[36].mxu1 %vm8291_vm4, %v727_v60  ;;  %v729_v55 = vpack.c.bf16 %v687_v5, %v686_v43 }
 0x8ba   : > { %16836 = vst [vmem:[#allocation17_spill] sm:$0xff] %v15600_v37  ;;  %11201 = vmatprep.mubr.msk.bf16.mxu1 %vm8291_vm4, %v728_v62  ;;  %v730_v29 = vpack.c.bf16 %v689_v39, %v688_v6 }
 0x8bb   : > { %10085 = vrot.lane.b32.xlu1 %v8012_v8, %s12153_s28 }
 0x8bc   : > { %v7725_v25 = vpop.f32.mrb[188].mxu1 }
 0x8bd   : > { %v7727_v15 = vpop.f32.mrb[189].mxu1  ;;  %v15616_v60 = vadd.f32 %v7725_v25, %v15121_v20 }
 0x8be   : > { %v7729_v63 = vpop.f32.mrb[190].mxu1  ;;  %v8016_v57 = vpop.f32.mrb[172].mxu0  ;;  %v15623_v53 = vadd.f32 %v7727_v15, %v15126_v48 }
 0x8bf   : > { %16837 = vst [vmem:[#allocation18_spill] sm:$0xff] %v15616_v60  ;;  %v15619_v62 = vadd.f32 %v7729_v63, %v15121_v20  ;;  %v8017_v10 = vadd.f32 %v8016_v57, %v15247_v18  ;;  %v7731_v8 = vpop.f32.mrb[191].mxu1  ;;  %v8018_v11 = vpop.f32.mrb[173].mxu0  ;;  %v691_v63 = vld [vmem:[%s15236_s27 + $0x178] sm:$0xff]  ;;  %v692_v57 = vld [vmem:[%s15236_s27 + $0x180] sm:$0xff] }
 0x8c0   : > { %16839 = vst [vmem:[#allocation20_spill] sm:$0xff] %v15623_v53  ;;  %v15626_v43 = vadd.f32 %v7731_v8, %v15126_v48  ;;  %v8019_v5 = vpop.f32.mrb[174].mxu0  ;;  %v690_v11 = vld [vmem:[%s15236_s27 + $0x170] sm:$0xff]  ;;  %v693_v8 = vld [vmem:[%s15236_s27 + $0x188] sm:$0xff] }
 0x8c1   : > { %16838 = vst [vmem:[#allocation19_spill] sm:$0xff] %v15619_v62  ;;  %v8020_v6 = vadd.f32 %v8019_v5, %v15247_v18  ;;  %v8021_v39 = vpop.f32.mrb[175].mxu0  ;;  %10087 = vrot.lane.b32.xlu0 %v8017_v10, %s12153_s28  ;;  %11202 = vmatmul.mubr.msk.bf16.gmra.mrb[40].mxu1 %vm8291_vm4, %v729_v55  ;;  %v731_v60 = vpack.c.bf16 %v691_v63, %v690_v11 }
 0x8c2   : > { %16840 = vst [vmem:[#allocation21_spill] sm:$0xff] %v15626_v43  ;;  %11205 = vmatprep.mubr.msk.bf16.mxu1 %vm8291_vm4, %v730_v29  ;;  %v732_v62 = vpack.c.bf16 %v693_v8, %v692_v57 }
 0x8c3   : > { %10089 = vrot.lane.b32.xlu1 %v8020_v6, %s12153_s28 }
 0x8c4   : > { %v7735_v37 = vpop.f32.mrb[192].mxu1 }
 0x8c5   : > { %v7737_v25 = vpop.f32.mrb[193].mxu1  ;;  %v15642_v55 = vadd.f32 %v7735_v37, %v15121_v20 }
 0x8c6   : > { %v7739_v5 = vpop.f32.mrb[194].mxu1  ;;  %v8024_v39 = vpop.f32.mrb[176].mxu0  ;;  %v15649_v53 = vadd.f32 %v7737_v25, %v15126_v48  ;;  %v694_v25 = vld [vmem:[%s15236_s27 + $0x190] sm:$0xff] }
 0x8c7   : > { %16841 = vst [vmem:[#allocation22_spill] sm:$0xff] %v15642_v55  ;;  %v15645_v10 = vadd.f32 %v7739_v5, %v15121_v20  ;;  %v8025_v29 = vadd.f32 %v8024_v39, %v15247_v18  ;;  %v7741_v6 = vpop.f32.mrb[195].mxu1  ;;  %v8026_v15 = vpop.f32.mrb[177].mxu0  ;;  %v695_v5 = vld [vmem:[%s15236_s27 + $0x198] sm:$0xff]  ;;  %v696_v39 = vld [vmem:[%s15236_s27 + $0x1a0] sm:$0xff] }
 0x8c8   : > { %16843 = vst [vmem:[#allocation24_spill] sm:$0xff] %v15649_v53  ;;  %v15652_v11 = vadd.f32 %v7741_v6, %v15126_v48  ;;  %v8027_v63 = vpop.f32.mrb[178].mxu0  ;;  %v697_v6 = vld [vmem:[%s15236_s27 + $0x1a8] sm:$0xff]  ;;  %v733_v55 = vpack.c.bf16 %v695_v5, %v694_v25  ;;  %v11878_v25 = vld [vmem:[%s16766_s14] sm:$0xff]   ;;  %v699_v53 = vld [vmem:[%s15236_s27 + $0x1b8] sm:$0xff] }
 0x8c9   : > { %16842 = vst [vmem:[#allocation23_spill] sm:$0xff] %v15645_v10  ;;  %v8028_v57 = vadd.f32 %v8027_v63, %v15247_v18  ;;  %v8029_v8 = vpop.f32.mrb[179].mxu0  ;;  %10091 = vrot.lane.b32.xlu0 %v8025_v29, %s12153_s28  ;;  %11206 = vmatmul.mubr.msk.bf16.gmra.mrb[44].mxu1 %vm8291_vm4, %v731_v60  ;;  %v734_v10 = vpack.c.bf16 %v697_v6, %v696_v39 }
 0x8ca   : > { %16844 = vst [vmem:[#allocation25_spill] sm:$0xff] %v15652_v11  ;;  %11209 = vmatprep.mubr.msk.bf16.mxu1 %vm8291_vm4, %v732_v62  ;;  %11225 = vmatprep.subr.bf16.mxu0 %v11878_v25  ;;  %v701_v11 = vld [vmem:[%s15236_s27 + $0x1c8] sm:$0xff] }
 0x8cb   : > { %10093 = vrot.lane.b32.xlu1 %v8028_v57, %s12153_s28  ;;  %11226 = vmatpush3.bf16.msra.mxu0 %v11878_v25 }
 0x8cc   : > { %v7745_v43 = vpop.f32.mrb[196].mxu1 }
 0x8cd   : > { %v7747_v37 = vpop.f32.mrb[197].mxu1  ;;  %v15668_v29 = vadd.f32 %v7745_v43, %v15121_v20 }
 0x8ce   : > { %v7749_v63 = vpop.f32.mrb[198].mxu1  ;;  %v8032_v8 = vpop.f32.mrb[180].mxu0  ;;  %v15678_v5 = vadd.f32 %v7747_v37, %v15126_v48  ;;  %v698_v37 = vld [vmem:[%s15236_s27 + $0x1b0] sm:$0xff] }
 0x8cf   : > { %16845 = vst [vmem:[#allocation26_spill] sm:$0xff] %v15668_v29  ;;  %v15671_v60 = vadd.f32 %v7749_v63, %v15121_v20  ;;  %v8033_v62 = vadd.f32 %v8032_v8, %v15247_v18  ;;  %v7751_v15 = vpop.f32.mrb[199].mxu1  ;;  %v8034_v57 = vpop.f32.mrb[181].mxu0 }
 0x8d0   : > { %16847 = vst [vmem:[#allocation28_spill] sm:$0xff] %v15678_v5  ;;  %v15681_v43 = vadd.f32 %v7751_v15, %v15126_v48  ;;  %v8035_v39 = vpop.f32.mrb[182].mxu0  ;;  %v700_v15 = vld [vmem:[%s15236_s27 + $0x1c0] sm:$0xff] }
 0x8d1   : > { %16846 = vst [vmem:[#allocation27_spill] sm:$0xff] %v15671_v60  ;;  %v8036_v63 = vadd.f32 %v8035_v39, %v15247_v18  ;;  %v8037_v8 = vpop.f32.mrb[183].mxu0  ;;  %10095 = vrot.lane.b32.xlu0 %v8033_v62, %s12153_s28  ;;  %11210 = vmatmul.mubr.msk.bf16.gmra.mrb[48].mxu1 %vm8291_vm4, %v733_v55  ;;  %v736_v60 = vpack.c.bf16 %v701_v11, %v700_v15 }
 0x8d2   : > { %16848 = vst [vmem:[#allocation29_spill] sm:$0xff] %v15681_v43  ;;  %11213 = vmatprep.mubr.msk.bf16.mxu1 %vm8291_vm4, %v734_v10  ;;  %v735_v8 = vpack.c.bf16 %v699_v53, %v698_v37 }
 0x8d3   : > { %10097 = vrot.lane.b32.xlu1 %v8036_v63, %s12153_s28 }
 0x8d4   : > { %v7755_v6 = vpop.f32.mrb[200].mxu1 }
 0x8d5   : > { %v7757_v39 = vpop.f32.mrb[201].mxu1  ;;  %v15697_v55 = vadd.f32 %v7755_v6, %v15121_v20 }
 0x8d6   : > { %v7759_v29 = vpop.f32.mrb[202].mxu1  ;;  %v8040_v62 = vpop.f32.mrb[184].mxu0  ;;  %v15704_v5 = vadd.f32 %v7757_v39, %v15126_v48  ;;  %v702_v39 = vld [vmem:[%s15236_s27 + $0x1d0] sm:$0xff] }
 0x8d7   : > { %16849 = vst [vmem:[#allocation30_spill] sm:$0xff] %v15697_v55  ;;  %v15700_v10 = vadd.f32 %v7759_v29, %v15121_v20  ;;  %v8041_v57 = vadd.f32 %v8040_v62, %v15247_v18  ;;  %v7761_v63 = vpop.f32.mrb[203].mxu1  ;;  %v8042_v25 = vpop.f32.mrb[185].mxu0  ;;  %v703_v62 = vld [vmem:[%s15236_s27 + $0x1d8] sm:$0xff] }
 0x8d8   : > { %16851 = vst [vmem:[#allocation32_spill] sm:$0xff] %v15704_v5  ;;  %v15707_v53 = vadd.f32 %v7761_v63, %v15126_v48  ;;  %v8043_v11 = vpop.f32.mrb[186].mxu0  ;;  %v704_v63 = vld [vmem:[%s15236_s27 + $0x1e0] sm:$0xff]  ;;  %v705_v25 = vld [vmem:[%s15236_s27 + $0x1e8] sm:$0xff]  ;;  %v737_v55 = vpack.c.bf16 %v703_v62, %v702_v39 }
 0x8d9   : > { %16850 = vst [vmem:[#allocation31_spill] sm:$0xff] %v15700_v10  ;;  %v8044_v37 = vadd.f32 %v8043_v11, %v15247_v18  ;;  %v8045_v29 = vpop.f32.mrb[187].mxu0  ;;  %10099 = vrot.lane.b32.xlu0 %v8041_v57, %s12153_s28  ;;  %11214 = vmatmul.mubr.msk.bf16.gmra.mrb[52].mxu1 %vm8291_vm4, %v735_v8  ;;  %v738_v10 = vpack.c.bf16 %v705_v25, %v704_v63 }
 0x8da   : > { %16852 = vst [vmem:[#allocation33_spill] sm:$0xff] %v15707_v53  ;;  %11217 = vmatprep.mubr.msk.bf16.mxu1 %vm8291_vm4, %v736_v60 }
 0x8db   : > { %10101 = vrot.lane.b32.xlu1 %v8044_v37, %s12153_s28 }
 0x8dc   : > { %v7765_v43 = vpop.f32.mrb[204].mxu1 }
 0x8dd   : > { %v7767_v6 = vpop.f32.mrb[205].mxu1  ;;  %v15723_v57 = vadd.f32 %v7765_v43, %v15121_v20 }
 0x8de   : > { %v7769_v11 = vpop.f32.mrb[206].mxu1  ;;  %v8048_v29 = vpop.f32.mrb[188].mxu0  ;;  %v15730_v5 = vadd.f32 %v7767_v6, %v15126_v48  ;;  %v706_v6 = vld [vmem:[%s15236_s27 + $0x1f0] sm:$0xff] }
 0x8df   : > { %16853 = vst [vmem:[#allocation34_spill] sm:$0xff] %v15723_v57  ;;  %v15726_v8 = vadd.f32 %v7769_v11, %v15121_v20  ;;  %v8049_v60 = vadd.f32 %v8048_v29, %v15247_v18  ;;  %v7771_v15 = vpop.f32.mrb[207].mxu1  ;;  %v8050_v37 = vpop.f32.mrb[189].mxu0  ;;  %v707_v29 = vld [vmem:[%s15236_s27 + $0x1f8] sm:$0xff] }
 0x8e0   : > { %v15733_v39 = vadd.f32 %v7771_v15, %v15126_v48  ;;  %v8051_v62 = vpop.f32.mrb[190].mxu0  ;;  %v739_v53 = vpack.c.bf16 %v707_v29, %v706_v6 }
 0x8e1   : > { %16854 = vst [vmem:[#allocation35_spill] sm:$0xff] %v15726_v8  ;;  %v8052_v43 = vadd.f32 %v8051_v62, %v15247_v18  ;;  %v8053_v25 = vpop.f32.mrb[191].mxu0  ;;  %10103 = vrot.lane.b32.xlu0 %v8049_v60, %s12153_s28  ;;  %11218 = vmatmul.mubr.msk.bf16.gmra.mrb[56].mxu1 %vm8291_vm4, %v737_v55 }
 0x8e2   : > { %11221 = vmatprep.mubr.msk.bf16.mxu1 %vm8291_vm4, %v738_v10 }
 0x8e3   : > { %10105 = vrot.lane.b32.xlu1 %v8052_v43, %s12153_s28 }
 0x8e4   : > { %v7775_v15 = vpop.f32.mrb[208].mxu1 }
 0x8e5   : > { %v7777_v37 = vpop.f32.mrb[209].mxu1  ;;  %v15747_v62 = vadd.f32 %v7775_v15, %v15121_v20 }
 0x8e6   : > { %v7779_v63 = vpop.f32.mrb[210].mxu1  ;;  %v8056_v57 = vpop.f32.mrb[192].mxu0  ;;  %v15754_v10 = vadd.f32 %v7777_v37, %v15126_v48 }
 0x8e7   : > { %16855 = vst [vmem:[#allocation36_spill] sm:$0xff] %v15747_v62  ;;  %v15750_v60 = vadd.f32 %v7779_v63, %v15121_v20  ;;  %v8057_v55 = vadd.f32 %v8056_v57, %v15247_v18  ;;  %v7781_v25 = vpop.f32.mrb[211].mxu1  ;;  %v8058_v11 = vpop.f32.mrb[193].mxu0  ;;  %v16857_v63 = vpack.c.bf16 %v15144_v58, %v15140_v51 }
 0x8e8   : > { %v15757_v43 = vadd.f32 %v7781_v25, %v15126_v48  ;;  %v8059_v8 = vpop.f32.mrb[194].mxu0 }
 0x8e9   : > { %16856 = vst [vmem:[#allocation37_spill] sm:$0xff] %v15750_v60  ;;  %v8060_v29 = vadd.f32 %v8059_v8, %v15247_v18  ;;  %v8061_v15 = vpop.f32.mrb[195].mxu0  ;;  %10107 = vrot.lane.b32.xlu0 %v8057_v55, %s12153_s28  ;;  %11222 = vmatmul.mubr.msk.bf16.gmra.mrb[60].mxu1 %vm8291_vm4, %v739_v53  ;;  %v11879_v8 = vld [vmem:[%s16766_s14 + $0x8] sm:$0xff]  }
 0x8ea   : > { %8811 = vmatprep.mubr.bf16.mxu1 %v16857_v63  ;;  %11227 = vmatprep.subr.bf16.mxu0 %v11879_v8 }
 0x8eb   : > { %10109 = vrot.lane.b32.xlu1 %v8060_v29, %s12153_s28  ;;  %11228 = vmatpush3.bf16.msra.mxu0 %v11879_v8 }
 0x8ec   : > { %v7785_v11 = vpop.f32.mrb[212].mxu1 }
 0x8ed   : > { %v7787_v37 = vpop.f32.mrb[213].mxu1  ;;  %v15774_v55 = vadd.f32 %v7785_v11, %v15121_v20 }
 0x8ee   : > { %v7789_v25 = vpop.f32.mrb[214].mxu1  ;;  %v8064_v6 = vpop.f32.mrb[196].mxu0  ;;  %v15781_v29 = vadd.f32 %v7787_v37, %v15126_v48 }
 0x8ef   : > { %v15777_v53 = vadd.f32 %v7789_v25, %v15121_v20  ;;  %v8065_v15 = vadd.f32 %v8064_v6, %v15247_v18  ;;  %v7791_v51 = vpop.f32.mrb[215].mxu1  ;;  %v8066_v58 = vpop.f32.mrb[197].mxu0  ;;  %v16858_v6 = vpack.c.bf16 %v15137_v27, %v15133_v49  ;;  %v16859_v25 = vpack.c.bf16 %v15172_v54, %v15168_v1 }
 0x8f0   : > { %v15784_v63 = vadd.f32 %v7791_v51, %v15126_v48  ;;  %v8067_v57 = vpop.f32.mrb[198].mxu0 }
 0x8f1   : > { %v8068_v11 = vadd.f32 %v8067_v57, %v15247_v18  ;;  %v8069_v60 = vpop.f32.mrb[199].mxu0  ;;  %10111 = vrot.lane.b32.xlu0 %v8065_v15, %s12153_s28  ;;  %8812 = vmatmul.mubr.bf16.vlgmr.msra.gmra.mrb[64].mxu1 %v16858_v6 }
 0x8f2   : > { %8819 = vmatprep.mubr.bf16.mxu1 %v16859_v25 }
 0x8f3   : > { %10113 = vrot.lane.b32.xlu1 %v8068_v11, %s12153_s28 }
 0x8f4   : > { %v7795_v51 = vpop.f32.mrb[216].mxu1 }
 0x8f5   : > { %v7797_v58 = vpop.f32.mrb[217].mxu1  ;;  %v15800_v15 = vadd.f32 %v7795_v51, %v15121_v20 }
 0x8f6   : > { %v7799_v57 = vpop.f32.mrb[218].mxu1  ;;  %v8072_v60 = vpop.f32.mrb[200].mxu0  ;;  %v15807_v1 = vadd.f32 %v7797_v58, %v15126_v48  ;;  %v16861_v58 = vpack.c.bf16 %v15200_v32, %v15196_v34 }
 0x8f7   : > { %v15803_v49 = vadd.f32 %v7799_v57, %v15121_v20  ;;  %v8073_v27 = vadd.f32 %v8072_v60, %v15247_v18  ;;  %v7801_v6 = vpop.f32.mrb[219].mxu1  ;;  %v8074_v62 = vpop.f32.mrb[201].mxu0  ;;  %v16860_v57 = vpack.c.bf16 %v15165_v42, %v15161_v0 }
 0x8f8   : > { %v15810_v54 = vadd.f32 %v7801_v6, %v15126_v48  ;;  %v8075_v8 = vpop.f32.mrb[202].mxu0 }
 0x8f9   : > { %v8076_v25 = vadd.f32 %v8075_v8, %v15247_v18  ;;  %v8077_v51 = vpop.f32.mrb[203].mxu0  ;;  %10115 = vrot.lane.b32.xlu0 %v8073_v27, %s12153_s28  ;;  %8820 = vmatmul.mubr.bf16.gmra.mrb[68].mxu1 %v16860_v57 }
 0x8fa   : > { %8827 = vmatprep.mubr.bf16.mxu1 %v16861_v58 }
 0x8fb   : > { %10117 = vrot.lane.b32.xlu1 %v8076_v25, %s12153_s28 }
 0x8fc   : > { %v7805_v60 = vpop.f32.mrb[220].mxu1 }
 0x8fd   : > { %v7807_v6 = vpop.f32.mrb[221].mxu1  ;;  %v15826_v51 = vadd.f32 %v7805_v60, %v15121_v20 }
 0x8fe   : > { %v7809_v11 = vpop.f32.mrb[222].mxu1  ;;  %v8080_v8 = vpop.f32.mrb[204].mxu0  ;;  %v15833_v62 = vadd.f32 %v7807_v6, %v15126_v48 }
 0x8ff   : > { %v15829_v27 = vadd.f32 %v7809_v11, %v15121_v20  ;;  %v8081_v0 = vadd.f32 %v8080_v8, %v15247_v18  ;;  %v7811_v42 = vpop.f32.mrb[223].mxu1  ;;  %v8082_v57 = vpop.f32.mrb[205].mxu0  ;;  %v16862_v11 = vpack.c.bf16 %v15193_v24, %v15189_v4  ;;  %v16863_v8 = vpack.c.bf16 %v15229_v36, %v15225_v45 }
 0x900   : > { %v15836_v34 = vadd.f32 %v7811_v42, %v15126_v48  ;;  %v8083_v32 = vpop.f32.mrb[206].mxu0 }
 0x901   : > { %v8084_v58 = vadd.f32 %v8083_v32, %v15247_v18  ;;  %v8085_v60 = vpop.f32.mrb[207].mxu0  ;;  %10119 = vrot.lane.b32.xlu0 %v8081_v0, %s12153_s28  ;;  %8828 = vmatmul.mubr.bf16.gmra.mrb[72].mxu1 %v16862_v11 }
 0x902   : > { %8835 = vmatprep.mubr.bf16.mxu1 %v16863_v8 }
 0x903   : > { %10121 = vrot.lane.b32.xlu1 %v8084_v58, %s12153_s28 }
 0x904   : > { %v7815_v42 = vpop.f32.mrb[224].mxu1 }
 0x905   : > { %v7817_v57 = vpop.f32.mrb[225].mxu1  ;;  %v15852_v60 = vadd.f32 %v7815_v42, %v15121_v20 }
 0x906   : > { %v7819_v25 = vpop.f32.mrb[226].mxu1  ;;  %v8088_v32 = vpop.f32.mrb[208].mxu0  ;;  %v15859_v6 = vadd.f32 %v7817_v57, %v15126_v48 }
 0x907   : > { %v15855_v0 = vadd.f32 %v7819_v25, %v15121_v20  ;;  %v8089_v4 = vadd.f32 %v8088_v32, %v15247_v18  ;;  %v7821_v24 = vpop.f32.mrb[227].mxu1  ;;  %v8090_v11 = vpop.f32.mrb[209].mxu0  ;;  %v16864_v25 = vpack.c.bf16 %v15221_v52, %v15217_v46  ;;  %v16865_v32 = vpack.c.bf16 %v15267_v3, %v15264_v12 }
 0x908   : > { %v15862_v45 = vadd.f32 %v7821_v24, %v15126_v48  ;;  %v8091_v36 = vpop.f32.mrb[210].mxu0 }
 0x909   : > { %v8092_v8 = vadd.f32 %v8091_v36, %v15247_v18  ;;  %v8093_v42 = vpop.f32.mrb[211].mxu0  ;;  %10123 = vrot.lane.b32.xlu0 %v8089_v4, %s12153_s28  ;;  %8836 = vmatmul.mubr.bf16.gmra.mrb[76].mxu1 %v16864_v25  ;;  %v11880_v4 = vld [vmem:[%s16766_s14 + $0x10] sm:$0xff]  }
 0x90a   : > { %8843 = vmatprep.mubr.bf16.mxu1 %v16865_v32  ;;  %11229 = vmatprep.subr.bf16.mxu0 %v11880_v4 }
 0x90b   : > { %10125 = vrot.lane.b32.xlu1 %v8092_v8, %s12153_s28  ;;  %11230 = vmatpush3.bf16.msra.mxu0 %v11880_v4 }
 0x90c   : > { %v7825_v24 = vpop.f32.mrb[228].mxu1 }
 0x90d   : > { %v7827_v11 = vpop.f32.mrb[229].mxu1  ;;  %v15881_v46 = vadd.f32 %v7825_v24, %v15121_v20 }
 0x90e   : > { %v7829_v58 = vpop.f32.mrb[230].mxu1  ;;  %v8096_v36 = vpop.f32.mrb[212].mxu0  ;;  %v15888_v8 = vadd.f32 %v7827_v11, %v15126_v48 }
 0x90f   : > { %v15884_v52 = vadd.f32 %v7829_v58, %v15121_v20  ;;  %v8097_v42 = vadd.f32 %v8096_v36, %v15247_v18  ;;  %v7831_v12 = vpop.f32.mrb[231].mxu1  ;;  %v8098_v3 = vpop.f32.mrb[213].mxu0  ;;  %v16866_v58 = vpack.c.bf16 %v15260_v23, %v15257_v59  ;;  %v16867_v36 = vpack.c.bf16 %v15299_v26, %v15296_v2 }
 0x910   : > { %v15891_v25 = vadd.f32 %v7831_v12, %v15126_v48  ;;  %v8099_v32 = vpop.f32.mrb[214].mxu0 }
 0x911   : > { %v8100_v24 = vadd.f32 %v8099_v32, %v15247_v18  ;;  %v8101_v37 = vpop.f32.mrb[215].mxu0  ;;  %10127 = vrot.lane.b32.xlu0 %v8097_v42, %s12153_s28  ;;  %8844 = vmatmul.mubr.bf16.gmra.mrb[80].mxu1 %v16866_v58 }
 0x912   : > { %8851 = vmatprep.mubr.bf16.mxu1 %v16867_v36 }
 0x913   : > { %10129 = vrot.lane.b32.xlu1 %v8100_v24, %s12153_s28 }
 0x914   : > { %v7835_v12 = vpop.f32.mrb[232].mxu1 }
 0x915   : > { %v7837_v3 = vpop.f32.mrb[233].mxu1  ;;  %v15907_v42 = vadd.f32 %v7835_v12, %v15121_v20 }
 0x916   : > { %v7839_v32 = vpop.f32.mrb[234].mxu1  ;;  %v8104_v37 = vpop.f32.mrb[216].mxu0  ;;  %v15914_v2 = vadd.f32 %v7837_v3, %v15126_v48  ;;  %v16869_v3 = vpack.c.bf16 %v15335_v22, %v15332_v61 }
 0x917   : > { %v15910_v59 = vadd.f32 %v7839_v32, %v15121_v20  ;;  %v8105_v23 = vadd.f32 %v8104_v37, %v15247_v18  ;;  %v7841_v58 = vpop.f32.mrb[235].mxu1  ;;  %v8106_v57 = vpop.f32.mrb[217].mxu0  ;;  %v16868_v32 = vpack.c.bf16 %v15292_v13, %v15289_v41 }
 0x918   : > { %v15917_v26 = vadd.f32 %v7841_v58, %v15126_v48  ;;  %v8107_v4 = vpop.f32.mrb[218].mxu0 }
 0x919   : > { %v8108_v36 = vadd.f32 %v8107_v4, %v15247_v18  ;;  %v8109_v12 = vpop.f32.mrb[219].mxu0  ;;  %10131 = vrot.lane.b32.xlu0 %v8105_v23, %s12153_s28  ;;  %8852 = vmatmul.mubr.bf16.gmra.mrb[84].mxu1 %v16868_v32 }
 0x91a   : > { %8859 = vmatprep.mubr.bf16.mxu1 %v16869_v3 }
 0x91b   : > { %10133 = vrot.lane.b32.xlu1 %v8108_v36, %s12153_s28 }
 0x91c   : > { %v7845_v37 = vpop.f32.mrb[236].mxu1 }
 0x91d   : > { %v7847_v58 = vpop.f32.mrb[237].mxu1  ;;  %v15933_v12 = vadd.f32 %v7845_v37, %v15121_v20 }
 0x91e   : > { %v7849_v24 = vpop.f32.mrb[238].mxu1  ;;  %v8112_v4 = vpop.f32.mrb[220].mxu0  ;;  %v15940_v57 = vadd.f32 %v7847_v58, %v15126_v48 }
 0x91f   : > { %v15936_v23 = vadd.f32 %v7849_v24, %v15121_v20  ;;  %v8113_v41 = vadd.f32 %v8112_v4, %v15247_v18  ;;  %v7851_v13 = vpop.f32.mrb[239].mxu1  ;;  %v8114_v32 = vpop.f32.mrb[221].mxu0  ;;  %v16870_v24 = vpack.c.bf16 %v15327_v19, %v15324_v40  ;;  %v16871_v4 = vpack.c.bf16 %v15371_v38, %v15368_v47 }
 0x920   : > { %v15943_v61 = vadd.f32 %v7851_v13, %v15126_v48  ;;  %v8115_v22 = vpop.f32.mrb[222].mxu0 }
 0x921   : > { %v8116_v3 = vadd.f32 %v8115_v22, %v15247_v18  ;;  %v8117_v37 = vpop.f32.mrb[223].mxu0  ;;  %10135 = vrot.lane.b32.xlu0 %v8113_v41, %s12153_s28  ;;  %8860 = vmatmul.mubr.bf16.gmra.mrb[88].mxu1 %v16870_v24 }
 0x922   : > { %8867 = vmatprep.mubr.bf16.mxu1 %v16871_v4 }
 0x923   : > { %10137 = vrot.lane.b32.xlu1 %v8116_v3, %s12153_s28 }
 0x924   : > { %v7855_v13 = vpop.f32.mrb[240].mxu1 }
 0x925   : > { %v7857_v32 = vpop.f32.mrb[241].mxu1  ;;  %v15959_v37 = vadd.f32 %v7855_v13, %v15121_v20 }
 0x926   : > { %v7859_v36 = vpop.f32.mrb[242].mxu1  ;;  %v8120_v22 = vpop.f32.mrb[224].mxu0  ;;  %v15966_v58 = vadd.f32 %v7857_v32, %v15126_v48 }
 0x927   : > { %v15962_v41 = vadd.f32 %v7859_v36, %v15121_v20  ;;  %v8121_v40 = vadd.f32 %v8120_v22, %v15247_v18  ;;  %v7861_v19 = vpop.f32.mrb[243].mxu1  ;;  %v8122_v24 = vpop.f32.mrb[225].mxu0  ;;  %v16872_v36 = vpack.c.bf16 %v15363_v7, %v15360_v35  ;;  %v16873_v22 = vpack.c.bf16 %v15407_v56, %v15404_v50 }
 0x928   : > { %v15969_v47 = vadd.f32 %v7861_v19, %v15126_v48  ;;  %v8123_v38 = vpop.f32.mrb[226].mxu0 }
 0x929   : > { %v8124_v4 = vadd.f32 %v8123_v38, %v15247_v18  ;;  %v8125_v13 = vpop.f32.mrb[227].mxu0  ;;  %10139 = vrot.lane.b32.xlu0 %v8121_v40, %s12153_s28  ;;  %8868 = vmatmul.mubr.bf16.gmra.mrb[92].mxu1 %v16872_v36  ;;  %v11881_v40 = vld [vmem:[%s16766_s14 + $0x18] sm:$0xff]  }
 0x92a   : > { %8875 = vmatprep.mubr.bf16.mxu1 %v16873_v22  ;;  %11231 = vmatprep.subr.bf16.mxu0 %v11881_v40 }
 0x92b   : > { %10141 = vrot.lane.b32.xlu1 %v8124_v4, %s12153_s28  ;;  %11232 = vmatpush3.bf16.msra.mxu0 %v11881_v40 }
 0x92c   : > { %v7865_v19 = vpop.f32.mrb[244].mxu1 }
 0x92d   : > { %v7867_v24 = vpop.f32.mrb[245].mxu1  ;;  %v15988_v35 = vadd.f32 %v7865_v19, %v15121_v20 }
 0x92e   : > { %v7869_v3 = vpop.f32.mrb[246].mxu1  ;;  %v8128_v38 = vpop.f32.mrb[228].mxu0  ;;  %v15995_v4 = vadd.f32 %v7867_v24, %v15126_v48  ;;  %v16891_v24 = vld [vmem:[#allocation9_spill] sm:$0xff] }
 0x92f   : > { %v15991_v7 = vadd.f32 %v7869_v3, %v15121_v20  ;;  %v8129_v13 = vadd.f32 %v8128_v38, %v15247_v18  ;;  %v7871_v50 = vpop.f32.mrb[247].mxu1  ;;  %v8130_v56 = vpop.f32.mrb[229].mxu0  ;;  %v16874_v3 = vpack.c.bf16 %v15399_v14, %v15396_v17  ;;  %v16875_v38 = vpack.c.bf16 %v15442_v30, %v15439_v44 }
 0x930   : > { %v15998_v36 = vadd.f32 %v7871_v50, %v15126_v48  ;;  %v8131_v22 = vpop.f32.mrb[230].mxu0 }
 0x931   : > { %v8132_v19 = vadd.f32 %v8131_v22, %v15247_v18  ;;  %v8133_v11 = vpop.f32.mrb[231].mxu0  ;;  %10143 = vrot.lane.b32.xlu0 %v8129_v13, %s12153_s28  ;;  %8876 = vmatmul.mubr.bf16.gmra.mrb[96].mxu1 %v16874_v3 }
 0x932   : > { %8883 = vmatprep.mubr.bf16.mxu1 %v16875_v38 }
 0x933   : > { %10145 = vrot.lane.b32.xlu1 %v8132_v19, %s12153_s28 }
 0x934   : > { %v7875_v50 = vpop.f32.mrb[248].mxu1 }
 0x935   : > { %v7877_v56 = vpop.f32.mrb[249].mxu1  ;;  %v16014_v13 = vadd.f32 %v7875_v50, %v15121_v20 }
 0x936   : > { %v7879_v22 = vpop.f32.mrb[250].mxu1  ;;  %v8136_v11 = vpop.f32.mrb[232].mxu0  ;;  %v16021_v44 = vadd.f32 %v7877_v56, %v15126_v48  ;;  %v16879_v56 = vpack.c.bf16 %v15476_v33, %v15473_v9 }
 0x937   : > { %16876 = vst [vmem:[#allocation38_spill] sm:$0xff] %v16014_v13  ;;  %v16017_v17 = vadd.f32 %v7879_v22, %v15121_v20  ;;  %v8137_v14 = vadd.f32 %v8136_v11, %v15247_v18  ;;  %v7881_v3 = vpop.f32.mrb[251].mxu1  ;;  %v8138_v32 = vpop.f32.mrb[233].mxu0  ;;  %v16878_v22 = vpack.c.bf16 %v15434_v28, %v15431_v16  ;;  %v16900_v13 = vld [vmem:[#allocation12_spill] sm:$0xff] }
 0x938   : > { %v16024_v30 = vadd.f32 %v7881_v3, %v15126_v48  ;;  %v8139_v40 = vpop.f32.mrb[234].mxu0 }
 0x939   : > { %16877 = vst [vmem:[#allocation39_spill] sm:$0xff] %v16017_v17  ;;  %v8140_v38 = vadd.f32 %v8139_v40, %v15247_v18  ;;  %v8141_v50 = vpop.f32.mrb[235].mxu0  ;;  %10147 = vrot.lane.b32.xlu0 %v8137_v14, %s12153_s28  ;;  %8884 = vmatmul.mubr.bf16.gmra.mrb[100].mxu1 %v16878_v22 }
 0x93a   : > { %8891 = vmatprep.mubr.bf16.mxu1 %v16879_v56 }
 0x93b   : > { %10149 = vrot.lane.b32.xlu1 %v8140_v38, %s12153_s28  ;;  %v16889_v38 = vld [vmem:[#allocation2_spill] sm:$0xff] }
 0x93c   : > { %v7885_v11 = vpop.f32.mrb[252].mxu1 }
 0x93d   : > { %v7887_v3 = vpop.f32.mrb[253].mxu1  ;;  %v16040_v50 = vadd.f32 %v7885_v11, %v15121_v20 }
 0x93e   : > { %v7889_v19 = vpop.f32.mrb[254].mxu1  ;;  %v8144_v40 = vpop.f32.mrb[236].mxu0  ;;  %v16047_v32 = vadd.f32 %v7887_v3, %v15126_v48  ;;  %v16885_v3 = vld [vmem:[#allocation5_spill] sm:$0xff] }
 0x93f   : > { %16880 = vst [vmem:[#allocation40_spill] sm:$0xff] %v16040_v50  ;;  %v16043_v14 = vadd.f32 %v7889_v19, %v15121_v20  ;;  %v8145_v16 = vadd.f32 %v8144_v40, %v15247_v18  ;;  %v7891_v28 = vpop.f32.mrb[255].mxu1  ;;  %v8146_v22 = vpop.f32.mrb[237].mxu0  ;;  %v16884_v20 = vpack.c.bf16 %v15468_v31, %v15465_v21  ;;  %v16886_v40 = vld [vmem:[#allocation4_spill] sm:$0xff]  ;;  %v11882_v21 = vld [vmem:[%s16766_s14 + $0x20] sm:$0xff]  }
 0x940   : > { %16882 = vst [vmem:[#allocation42_spill] sm:$0xff] %v16047_v32  ;;  %v16050_v9 = vadd.f32 %v7891_v28, %v15126_v48  ;;  %v8147_v33 = vpop.f32.mrb[238].mxu0  ;;  %v16887_v48 = vpack.c.bf16 %v16885_v3, %v16886_v40  ;;  %11233 = vmatprep.subr.bf16.mxu0 %v11882_v21  ;;  %v16892_v50 = vld [vmem:[#allocation8_spill] sm:$0xff]  ;;  %v16897_v32 = vld [vmem:[#allocation6_spill] sm:$0xff] }
 0x941   : > { %16881 = vst [vmem:[#allocation41_spill] sm:$0xff] %v16043_v14  ;;  %v8148_v56 = vadd.f32 %v8147_v33, %v15247_v18  ;;  %v8149_v11 = vpop.f32.mrb[239].mxu0  ;;  %10151 = vrot.lane.b32.xlu0 %v8145_v16, %s12153_s28  ;;  %8892 = vmatmul.mubr.bf16.gmra.mrb[104].mxu1 %v16884_v20  ;;  %v16893_v14 = vpack.c.bf16 %v16891_v24, %v16892_v50  ;;  %v11884_v24 = vld [vmem:[%s16766_s14 + $0x30] sm:$0xff]  }
 0x942   : > { %16883 = vst [vmem:[#allocation43_spill] sm:$0xff] %v16050_v9  ;;  %8899 = vmatprep.mubr.bf16.mxu1 %v16887_v48  ;;  %v16888_v48 = vld [vmem:[#allocation3_spill] sm:$0xff]  ;;  %11234 = vmatpush3.bf16.msra.mxu0 %v11882_v21 }
 0x943   : > { %10153 = vrot.lane.b32.xlu1 %v8148_v56, %s12153_s28  ;;  %v16890_v19 = vpack.c.bf16 %v16888_v48, %v16889_v38  ;;  %v16896_v48 = vld [vmem:[#allocation7_spill] sm:$0xff] }
 0x944   : > { %v16065_v28 = vpop.f32.mrb[0].mxu1  ;;  %v16898_v9 = vpack.c.bf16 %v16896_v48, %v16897_v32 }
 0x945   : > { %v16067_v22 = vpop.f32.mrb[1].mxu1 }
 0x946   : > { %v8152_v33 = vpop.f32.mrb[240].mxu0  ;;  %v16069_v11 = vpop.f32.mrb[2].mxu1 }
 0x947   : > { %v8153_v31 = vadd.f32 %v8152_v33, %v15247_v18  ;;  %v8154_v16 = vpop.f32.mrb[241].mxu0  ;;  %v16075_v20 = vpop.f32.mrb[3].mxu1  ;;  %v11883_v33 = vld [vmem:[%s16766_s14 + $0x28] sm:$0xff]  }
 0x948   : > { %v8155_v3 = vpop.f32.mrb[242].mxu0  ;;  %11235 = vmatprep.subr.bf16.mxu0 %v11883_v33 }
 0x949   : > { %v8156_v56 = vadd.f32 %v8155_v3, %v15247_v18  ;;  %v8157_v40 = vpop.f32.mrb[243].mxu0  ;;  %10155 = vrot.lane.b32.xlu0 %v8153_v31, %s12153_s28  ;;  %8900 = vmatmul.mubr.bf16.gmra.mrb[108].mxu1 %v16890_v19 }
 0x94a   : > { %8907 = vmatprep.mubr.bf16.mxu1 %v16893_v14  ;;  %11236 = vmatpush3.bf16.msra.mxu0 %v11883_v33  ;;  %v16899_v33 = vld [vmem:[#allocation13_spill] sm:$0xff] }
 0x94b   : > { %10157 = vrot.lane.b32.xlu1 %v8156_v56, %s12153_s28  ;;  %11237 = vmatprep.subr.bf16.mxu0 %v11884_v24  ;;  %v16901_v17 = vpack.c.bf16 %v16899_v33, %v16900_v13  ;;  %v16906_v33 = vld [vmem:[#allocation10_spill] sm:$0xff] }
 0x94c   : > { %v16089_v16 = vpop.f32.mrb[4].mxu1 }
 0x94d   : > { %16894 = vst [vmem:[#allocation5_spill] sm:$0xff] %v16089_v16  ;;  %v16091_v3 = vpop.f32.mrb[5].mxu1 }
 0x94e   : > { %v8160_v31 = vpop.f32.mrb[244].mxu0  ;;  %v16093_v40 = vpop.f32.mrb[6].mxu1  ;;  %11238 = vmatpush3.bf16.msra.mxu0 %v11884_v24 }
 0x94f   : > { %16895 = vst [vmem:[#allocation4_spill] sm:$0xff] %v16093_v40  ;;  %v8161_v50 = vadd.f32 %v8160_v31, %v15247_v18  ;;  %v8162_v14 = vpop.f32.mrb[245].mxu0  ;;  %v16099_v38 = vpop.f32.mrb[7].mxu1  ;;  %v11885_v31 = vld [vmem:[%s16766_s14 + $0x38] sm:$0xff]   ;;  %v16909_v40 = vld [vmem:[#allocation16_spill] sm:$0xff] }
 0x950   : > { %v8163_v19 = vpop.f32.mrb[246].mxu0  ;;  %11239 = vmatprep.subr.bf16.mxu0 %v11885_v31 }
 0x951   : > { %v8164_v21 = vadd.f32 %v8163_v19, %v15247_v18  ;;  %v8165_v56 = vpop.f32.mrb[247].mxu0  ;;  %10159 = vrot.lane.b32.xlu0 %v8161_v50, %s12153_s28  ;;  %8908 = vmatmul.mubr.bf16.gmra.mrb[112].mxu1 %v16898_v9 }
 0x952   : > { %8915 = vmatprep.mubr.bf16.mxu1 %v16901_v17  ;;  %11240 = vmatpush3.bf16.msra.mxu0 %v11885_v31 }
 0x953   : > { %10161 = vrot.lane.b32.xlu1 %v8164_v21, %s12153_s28  ;;  %v16905_v21 = vld [vmem:[#allocation11_spill] sm:$0xff] }
 0x954   : > { %v16113_v14 = vpop.f32.mrb[8].mxu1 }
 0x955   : > { %16902 = vst [vmem:[#allocation3_spill] sm:$0xff] %v16113_v14  ;;  %v16115_v19 = vpop.f32.mrb[9].mxu1  ;;  %v16907_v14 = vpack.c.bf16 %v16905_v21, %v16906_v33 }
 0x956   : > { %16903 = vst [vmem:[#allocation2_spill] sm:$0xff] %v16115_v19  ;;  %v8168_v50 = vpop.f32.mrb[248].mxu0  ;;  %v16117_v56 = vpop.f32.mrb[10].mxu1  ;;  %v16908_v19 = vld [vmem:[#allocation17_spill] sm:$0xff] }
 0x957   : > { %16904 = vst [vmem:[#allocation9_spill] sm:$0xff] %v16117_v56  ;;  %v8169_v32 = vadd.f32 %v8168_v50, %v15247_v18  ;;  %v8170_v13 = vpop.f32.mrb[249].mxu0  ;;  %v16120_v17 = vpop.f32.mrb[11].mxu1  ;;  %v16910_v16 = vpack.c.bf16 %v16908_v19, %v16909_v40  ;;  %v16916_v40 = vld [vmem:[#allocation14_spill] sm:$0xff] }
 0x958   : > { %v8171_v9 = vpop.f32.mrb[250].mxu0 }
 0x959   : > { %v8172_v24 = vadd.f32 %v8171_v9, %v15247_v18  ;;  %v8173_v48 = vpop.f32.mrb[251].mxu0  ;;  %10163 = vrot.lane.b32.xlu0 %v8169_v32, %s12153_s28  ;;  %8916 = vmatmul.mubr.bf16.gmra.mrb[116].mxu1 %v16907_v14 }
 0x95a   : > { %8923 = vmatprep.mubr.bf16.mxu1 %v16910_v16  ;;  %v16915_v16 = vld [vmem:[#allocation15_spill] sm:$0xff] }
 0x95b   : > { %10165 = vrot.lane.b32.xlu1 %v8172_v24, %s12153_s28  ;;  %v16917_v19 = vpack.c.bf16 %v16915_v16, %v16916_v40  ;;  %v16918_v24 = vld [vmem:[#allocation21_spill] sm:$0xff]  ;;  %v16929_v40 = vld [vmem:[#allocation24_spill] sm:$0xff] }
 0x95c   : > { %v16131_v31 = vpop.f32.mrb[12].mxu1  ;;  %v16928_v16 = vld [vmem:[#allocation25_spill] sm:$0xff] }
 0x95d   : > { %16911 = vst [vmem:[#allocation8_spill] sm:$0xff] %v16131_v31  ;;  %v16133_v50 = vpop.f32.mrb[13].mxu1  ;;  %v16919_v31 = vld [vmem:[#allocation20_spill] sm:$0xff] }
 0x95e   : > { %16912 = vst [vmem:[#allocation7_spill] sm:$0xff] %v16133_v50  ;;  %v8176_v13 = vpop.f32.mrb[252].mxu0  ;;  %v16135_v56 = vpop.f32.mrb[14].mxu1  ;;  %v16920_v50 = vpack.c.bf16 %v16918_v24, %v16919_v31 }
 0x95f   : > { %16913 = vst [vmem:[#allocation6_spill] sm:$0xff] %v16135_v56  ;;  %v8177_v9 = vadd.f32 %v8176_v13, %v15247_v18  ;;  %v8178_v32 = vpop.f32.mrb[253].mxu0  ;;  %v16138_v48 = vpop.f32.mrb[15].mxu1 }
 0x960   : > { %16914 = vst [vmem:[#allocation13_spill] sm:$0xff] %v16138_v48  ;;  %v8179_v21 = vpop.f32.mrb[254].mxu0  ;;  %v16939_v48 = vld [vmem:[#allocation28_spill] sm:$0xff] }
 0x961   : > { %v8180_v14 = vadd.f32 %v8179_v21, %v15247_v18  ;;  %v8181_v33 = vpop.f32.mrb[255].mxu0  ;;  %10167 = vrot.lane.b32.xlu0 %v8177_v9, %s12153_s28  ;;  %8924 = vmatmul.mubr.bf16.gmra.mrb[120].mxu1 %v16917_v19  ;;  %v16925_v21 = vld [vmem:[#allocation19_spill] sm:$0xff]  ;;  %v16926_v9 = vld [vmem:[#allocation18_spill] sm:$0xff]  ;;  %v16930_v19 = vpack.c.bf16 %v16928_v16, %v16929_v40 }
 0x962   : > { %8931 = vmatprep.mubr.bf16.mxu1 %v16920_v50  ;;  %v16927_v33 = vpack.c.bf16 %v16925_v21, %v16926_v9 }
 0x963   : > { %10169 = vrot.lane.b32.xlu1 %v8180_v14, %s12153_s28 }
 0x964   : > { %v16149_v13 = vpop.f32.mrb[16].mxu1 }
 0x965   : > { %16921 = vst [vmem:[#allocation12_spill] sm:$0xff] %v16149_v13  ;;  %v16151_v32 = vpop.f32.mrb[17].mxu1  ;;  %v16935_v13 = vld [vmem:[#allocation23_spill] sm:$0xff] }
 0x966   : > { %16922 = vst [vmem:[#allocation11_spill] sm:$0xff] %v16151_v32  ;;  %v16153_v56 = vpop.f32.mrb[18].mxu1 }
 0x967   : > { %16923 = vst [vmem:[#allocation10_spill] sm:$0xff] %v16153_v56  ;;  %v16155_v18 = vpop.f32.mrb[19].mxu1  ;;  %v16936_v56 = vld [vmem:[#allocation22_spill] sm:$0xff] }
 0x968   : > { %16924 = vst [vmem:[#allocation17_spill] sm:$0xff] %v16155_v18  ;;  %v16937_v32 = vpack.c.bf16 %v16935_v13, %v16936_v56  ;;  %v16938_v18 = vld [vmem:[#allocation29_spill] sm:$0xff] }
 0x969   : > { %8932 = vmatmul.mubr.bf16.gmra.mrb[124].mxu1 %v16927_v33  ;;  %v16940_v21 = vpack.c.bf16 %v16938_v18, %v16939_v48 }
 0x96a   : > { %8939 = vmatprep.mubr.bf16.mxu1 %v16930_v19  ;;  %v16943_v19 = vld [vmem:[#allocation27_spill] sm:$0xff] }
 0x96c   : > { %v16163_v31 = vpop.f32.mrb[20].mxu1 }
 0x96d   : > { %16931 = vst [vmem:[#allocation16_spill] sm:$0xff] %v16163_v31  ;;  %v16165_v50 = vpop.f32.mrb[21].mxu1 }
 0x96e   : > { %16932 = vst [vmem:[#allocation15_spill] sm:$0xff] %v16165_v50  ;;  %v16167_v14 = vpop.f32.mrb[22].mxu1  ;;  %v16947_v50 = vld [vmem:[#allocation32_spill] sm:$0xff] }
 0x96f   : > { %16933 = vst [vmem:[#allocation14_spill] sm:$0xff] %v16167_v14  ;;  %v16169_v24 = vpop.f32.mrb[23].mxu1  ;;  %v16944_v14 = vld [vmem:[#allocation26_spill] sm:$0xff] }
 0x970   : > { %16934 = vst [vmem:[#allocation21_spill] sm:$0xff] %v16169_v24  ;;  %v16945_v31 = vpack.c.bf16 %v16943_v19, %v16944_v14  ;;  %v16946_v24 = vld [vmem:[#allocation33_spill] sm:$0xff]  ;;  %v16954_v14 = vpack.c.bf16 %v15733_v39, %v15730_v5 }
 0x971   : > { %8940 = vmatmul.mubr.bf16.gmra.mrb[128].mxu1 %v16937_v32  ;;  %v16948_v56 = vpack.c.bf16 %v16946_v24, %v16947_v50 }
 0x972   : > { %8947 = vmatprep.mubr.bf16.mxu1 %v16940_v21  ;;  %v16951_v21 = vld [vmem:[#allocation31_spill] sm:$0xff] }
 0x974   : > { %v16177_v9 = vpop.f32.mrb[24].mxu1 }
 0x975   : > { %16941 = vst [vmem:[#allocation20_spill] sm:$0xff] %v16177_v9  ;;  %v16179_v33 = vpop.f32.mrb[25].mxu1 }
 0x976   : > { %v16181_v16 = vpop.f32.mrb[26].mxu1 }
 0x977   : > { %16942 = vst [vmem:[#allocation19_spill] sm:$0xff] %v16181_v16  ;;  %v16183_v40 = vpop.f32.mrb[27].mxu1  ;;  %v16952_v16 = vld [vmem:[#allocation30_spill] sm:$0xff] }
 0x978   : > { %v16953_v9 = vpack.c.bf16 %v16951_v21, %v16952_v16  ;;  %v16960_v16 = vpack.c.bf16 %v15757_v43, %v15754_v10 }
 0x979   : > { %8948 = vmatmul.mubr.bf16.gmra.mrb[132].mxu1 %v16945_v31 }
 0x97a   : > { %8955 = vmatprep.mubr.bf16.mxu1 %v16948_v56  ;;  %v16957_v56 = vld [vmem:[#allocation35_spill] sm:$0xff] }
 0x97c   : > { %v16191_v13 = vpop.f32.mrb[28].mxu1 }
 0x97d   : > { %16949 = vst [vmem:[#allocation18_spill] sm:$0xff] %v16191_v13  ;;  %v16193_v48 = vpop.f32.mrb[29].mxu1 }
 0x97e   : > { %v16195_v32 = vpop.f32.mrb[30].mxu1 }
 0x97f   : > { %16950 = vst [vmem:[#allocation25_spill] sm:$0xff] %v16195_v32  ;;  %v16197_v18 = vpop.f32.mrb[31].mxu1  ;;  %v16958_v32 = vld [vmem:[#allocation34_spill] sm:$0xff] }
 0x980   : > { %v16959_v13 = vpack.c.bf16 %v16957_v56, %v16958_v32  ;;  %v16964_v32 = vpack.c.bf16 %v15784_v63, %v15781_v29 }
 0x981   : > { %8956 = vmatmul.mubr.bf16.gmra.mrb[136].mxu1 %v16953_v9 }
 0x982   : > { %8963 = vmatprep.mubr.bf16.mxu1 %v16954_v14  ;;  %v16961_v14 = vld [vmem:[#allocation37_spill] sm:$0xff] }
 0x984   : > { %v16205_v31 = vpop.f32.mrb[32].mxu1 }
 0x985   : > { %16955 = vst [vmem:[#allocation24_spill] sm:$0xff] %v16205_v31  ;;  %v16207_v50 = vpop.f32.mrb[33].mxu1 }
 0x986   : > { %v16209_v24 = vpop.f32.mrb[34].mxu1 }
 0x987   : > { %16956 = vst [vmem:[#allocation23_spill] sm:$0xff] %v16209_v24  ;;  %v16211_v19 = vpop.f32.mrb[35].mxu1  ;;  %v16962_v24 = vld [vmem:[#allocation36_spill] sm:$0xff] }
 0x988   : > { %v16963_v31 = vpack.c.bf16 %v16961_v14, %v16962_v24  ;;  %v16966_v24 = vpack.c.bf16 %v15810_v54, %v15807_v1 }
 0x989   : > { %8964 = vmatmul.mubr.bf16.gmra.mrb[140].mxu1 %v16959_v13 }
 0x98a   : > { %8971 = vmatprep.mubr.bf16.mxu1 %v16960_v16  ;;  %v16965_v16 = vpack.c.bf16 %v15777_v53, %v15774_v55  ;;  %v16968_v55 = vpack.c.bf16 %v15836_v34, %v15833_v62 }
 0x98c   : > { %v16219_v9 = vpop.f32.mrb[36].mxu1 }
 0x98d   : > { %v16221_v5 = vpop.f32.mrb[37].mxu1 }
 0x98e   : > { %v16223_v39 = vpop.f32.mrb[38].mxu1 }
 0x98f   : > { %v16225_v21 = vpop.f32.mrb[39].mxu1 }
 0x991   : > { %8972 = vmatmul.mubr.bf16.gmra.mrb[144].mxu1 %v16963_v31 }
 0x992   : > { %8979 = vmatprep.mubr.bf16.mxu1 %v16964_v32  ;;  %v16967_v32 = vpack.c.bf16 %v15803_v49, %v15800_v15  ;;  %v16970_v15 = vpack.c.bf16 %v15862_v45, %v15859_v6 }
 0x994   : > { %v16233_v13 = vpop.f32.mrb[40].mxu1 }
 0x995   : > { %v16235_v10 = vpop.f32.mrb[41].mxu1 }
 0x996   : > { %v16237_v43 = vpop.f32.mrb[42].mxu1 }
 0x997   : > { %v16239_v56 = vpop.f32.mrb[43].mxu1 }
 0x999   : > { %8980 = vmatmul.mubr.bf16.gmra.mrb[148].mxu1 %v16965_v16 }
 0x99a   : > { %8987 = vmatprep.mubr.bf16.mxu1 %v16966_v24  ;;  %v16969_v24 = vpack.c.bf16 %v15829_v27, %v15826_v51  ;;  %v16972_v51 = vpack.c.bf16 %v15891_v25, %v15888_v8 }
 0x99c   : > { %v16247_v31 = vpop.f32.mrb[44].mxu1 }
 0x99d   : > { %v16249_v29 = vpop.f32.mrb[45].mxu1 }
 0x99e   : > { %v16251_v63 = vpop.f32.mrb[46].mxu1 }
 0x99f   : > { %v16253_v14 = vpop.f32.mrb[47].mxu1 }
 0x9a1   : > { %8988 = vmatmul.mubr.bf16.gmra.mrb[152].mxu1 %v16967_v32 }
 0x9a2   : > { %8995 = vmatprep.mubr.bf16.mxu1 %v16968_v55  ;;  %v16971_v55 = vpack.c.bf16 %v15855_v0, %v15852_v60  ;;  %v16974_v60 = vpack.c.bf16 %v15917_v26, %v15914_v2  ;;  %v16320_v2 = vld [vmem:[%s16765_s13] ss:$0 sm:$0xff] }
 0x9a4   : > { %v16261_v53 = vpop.f32.mrb[48].mxu1 }
 0x9a5   : > { %v16263_v1 = vpop.f32.mrb[49].mxu1 }
 0x9a6   : > { %v16265_v54 = vpop.f32.mrb[50].mxu1 }
 0x9a7   : > { %v16267_v16 = vpop.f32.mrb[51].mxu1 }
 0x9a9   : > { %8996 = vmatmul.mubr.bf16.gmra.mrb[156].mxu1 %v16969_v24 }
 0x9aa   : > { %9003 = vmatprep.mubr.bf16.mxu1 %v16970_v15  ;;  %v16973_v15 = vpack.c.bf16 %v15884_v52, %v15881_v46  ;;  %v16979_v46 = vpack.c.bf16 %v15943_v61, %v15940_v57  ;;  %v16980_v57 = vpack.c.bf16 %v15936_v23, %v15933_v12  ;;  %v16981_v61 = vpack.c.bf16 %v15969_v47, %v15966_v58 }
 0x9ab   : > { %v16982_v23 = vpack.c.bf16 %v15962_v41, %v15959_v37  ;;  %v16983_v58 = vpack.c.bf16 %v15998_v36, %v15995_v4  ;;  %v16984_v41 = vpack.c.bf16 %v15991_v7, %v15988_v35  ;;  %v16985_v4 = vpack.c.bf16 %v16024_v30, %v16021_v44  ;;  %v16988_v7 = vld [vmem:[#allocation39_spill] sm:$0xff] }
 0x9ac   : > { %v16275_v49 = vpop.f32.mrb[52].mxu1  ;;  %v16991_v30 = vld [vmem:[#allocation43_spill] sm:$0xff] }
 0x9ad   : > { %v16277_v62 = vpop.f32.mrb[53].mxu1 }
 0x9ae   : > { %v16279_v34 = vpop.f32.mrb[54].mxu1 }
 0x9af   : > { %v16281_v32 = vpop.f32.mrb[55].mxu1 }
 0x9b1   : > { %9004 = vmatmul.mubr.bf16.gmra.mrb[160].mxu1 %v16971_v55 }
 0x9b2   : > { %9011 = vmatprep.mubr.bf16.mxu1 %v16972_v51  ;;  %v16978_v51 = vpack.c.bf16 %v15910_v59, %v15907_v42 }
 0x9b4   : > { %v16289_v27 = vpop.f32.mrb[56].mxu1 }
 0x9b5   : > { %v16291_v6 = vpop.f32.mrb[57].mxu1 }
 0x9b6   : > { %v16293_v45 = vpop.f32.mrb[58].mxu1 }
 0x9b7   : > { %v16295_v24 = vpop.f32.mrb[59].mxu1 }
 0x9b9   : > { %9012 = vmatmul.mubr.bf16.gmra.mrb[164].mxu1 %v16973_v15 }
 0x9ba   : > { %9019 = vmatprep.mubr.bf16.mxu1 %v16974_v60 }
 0x9bc   : > { %v16303_v0 = vpop.f32.mrb[60].mxu1 }
 0x9bd   : > { %16975 = vst [vmem:[#allocation22_spill] sm:$0xff] %v16303_v0  ;;  %v16305_v8 = vpop.f32.mrb[61].mxu1 }
 0x9be   : > { %v16307_v25 = vpop.f32.mrb[62].mxu1 }
 0x9bf   : > { %16976 = vst [vmem:[#allocation29_spill] sm:$0xff] %v16307_v25  ;;  %v16309_v55 = vpop.f32.mrb[63].mxu1 }
 0x9c0   : > { %16977 = vst [vmem:[#allocation28_spill] sm:$0xff] %v16309_v55 }
 0x9c1   : > { %9020 = vmatmul.mubr.bf16.gmra.mrb[168].mxu1 %v16978_v51 }
 0x9c2   : > { %9027 = vmatprep.mubr.bf16.mxu1 %v16979_v46 }
 0x9c4   : > { %v8813_v52 = vpop.f32.mrb[64].mxu1 }
 0x9c5   : > { %v8814_v26 = vadd.f32 %v8813_v52, %v16067_v22  ;;  %v8815_v15 = vpop.f32.mrb[65].mxu1 }
 0x9c6   : > { %v8816_v60 = vpop.f32.mrb[66].mxu1 }
 0x9c7   : > { %v9075_v25 = vadd.f32 %v16320_v2, %v8814_v26  ;;  %v8817_v0 = vadd.f32 %v8816_v60, %v16075_v20  ;;  %v8818_v42 = vpop.f32.mrb[67].mxu1 }
 0x9c9   : > { %v9076_v59 = vadd.f32 %v16320_v2, %v8817_v0  ;;  %9028 = vmatmul.mubr.bf16.gmra.mrb[172].mxu1 %v16980_v57  ;;  %v9139_v51 = vmax.f32 %v9075_v25, 0.0 }
 0x9ca   : > { %9035 = vmatprep.mubr.bf16.mxu1 %v16981_v61 }
 0x9cb   : > { %v9140_v46 = vmax.f32 %v9076_v59, 0.0 }
 0x9cc   : > { %v8821_v22 = vpop.f32.mrb[68].mxu1 }
 0x9cd   : > { %v8822_v52 = vadd.f32 %v16065_v28, %v8821_v22  ;;  %v8823_v15 = vpop.f32.mrb[69].mxu1  ;;  %v9219_v26 = vpack.c.bf16 %v9140_v46, %v9139_v51  ;;  %v16986_v22 = vld [vmem:[#allocation5_spill] sm:$0xff] }
 0x9ce   : > { %v8824_v55 = vpop.f32.mrb[70].mxu1 }
 0x9cf   : > { %v9077_v20 = vadd.f32 %v16320_v2, %v8822_v52  ;;  %v8825_v0 = vadd.f32 %v16069_v11, %v8824_v55  ;;  %v8826_v60 = vpop.f32.mrb[71].mxu1  ;;  %11241 = vmatprep.mubr.bf16.mxu0 %v9219_v26 }
 0x9d1   : > { %v9078_v12 = vadd.f32 %v16320_v2, %v8825_v0  ;;  %9036 = vmatmul.mubr.bf16.gmra.mrb[176].mxu1 %v16982_v23  ;;  %v9141_v47 = vmax.f32 %v9077_v20, 0.0  ;;  %v16987_v0 = vld [vmem:[#allocation4_spill] sm:$0xff]  ;;  %v16989_v23 = vld [vmem:[#allocation38_spill] sm:$0xff] }
 0x9d2   : > { %9043 = vmatprep.mubr.bf16.mxu1 %v16983_v58  ;;  %v16990_v44 = vpack.c.bf16 %v16988_v7, %v16989_v23  ;;  %v16992_v58 = vld [vmem:[#allocation42_spill] sm:$0xff] }
 0x9d3   : > { %v9142_v28 = vmax.f32 %v9078_v12, 0.0 }
 0x9d4   : > { %v8829_v25 = vpop.f32.mrb[72].mxu1 }
 0x9d5   : > { %v9220_v42 = vpack.c.bf16 %v9142_v28, %v9141_v47  ;;  %v8830_v59 = vadd.f32 %v8829_v25, %v16091_v3  ;;  %v8831_v57 = vpop.f32.mrb[73].mxu1  ;;  %v16993_v47 = vpack.c.bf16 %v16991_v30, %v16992_v58 }
 0x9d6   : > { %v8832_v11 = vpop.f32.mrb[74].mxu1  ;;  %v16994_v57 = vld [vmem:[#allocation2_spill] sm:$0xff] }
 0x9d7   : > { %v9079_v55 = vadd.f32 %v16320_v2, %v8830_v59  ;;  %v8833_v61 = vadd.f32 %v8832_v11, %v16099_v38  ;;  %v8834_v51 = vpop.f32.mrb[75].mxu1  ;;  %11242 = vmatmul.mubr.bf16.vlgmr.msra.gmra.mrb[0].mxu0 %v9220_v42 }
 0x9d9   : > { %v9080_v37 = vadd.f32 %v16320_v2, %v8833_v61  ;;  %9044 = vmatmul.mubr.bf16.gmra.mrb[180].mxu1 %v16984_v41  ;;  %v9143_v36 = vmax.f32 %v9079_v55, 0.0 }
 0x9da   : > { %9051 = vmatprep.mubr.bf16.mxu1 %v16985_v4 }
 0x9db   : > { %v9144_v3 = vmax.f32 %v9080_v37, 0.0 }
 0x9dc   : > { %v8837_v46 = vpop.f32.mrb[76].mxu1 }
 0x9dd   : > { %v8838_v52 = vadd.f32 %v16986_v22, %v8837_v46  ;;  %v8839_v15 = vpop.f32.mrb[77].mxu1  ;;  %v9221_v26 = vpack.c.bf16 %v9144_v3, %v9143_v36  ;;  %v16995_v36 = vld [vmem:[#allocation41_spill] sm:$0xff]  ;;  %v16996_v3 = vld [vmem:[#allocation40_spill] sm:$0xff] }
 0x9de   : > { %v8840_v38 = vpop.f32.mrb[78].mxu1  ;;  %v16997_v46 = vpack.c.bf16 %v16995_v36, %v16996_v3  ;;  %v17002_v36 = vld [vmem:[#allocation8_spill] sm:$0xff] }
 0x9df   : > { %v9081_v20 = vadd.f32 %v16320_v2, %v8838_v52  ;;  %v8841_v60 = vadd.f32 %v16987_v0, %v8840_v38  ;;  %v8842_v12 = vpop.f32.mrb[79].mxu1  ;;  %11245 = vmatprep.mubr.bf16.mxu0 %v9221_v26  ;;  %v16998_v26 = vld [vmem:[#allocation3_spill] sm:$0xff] }
 0x9e1   : > { %v9082_v35 = vadd.f32 %v16320_v2, %v8841_v60  ;;  %9052 = vmatmul.mubr.bf16.gmra.mrb[184].mxu1 %v16990_v44  ;;  %v9145_v28 = vmax.f32 %v9081_v20, 0.0 }
 0x9e2   : > { %9059 = vmatprep.mubr.bf16.mxu1 %v16993_v47 }
 0x9e3   : > { %v9146_v25 = vmax.f32 %v9082_v35, 0.0  ;;  %v16999_v35 = vld [vmem:[#allocation9_spill] sm:$0xff] }
 0x9e4   : > { %v8845_v42 = vpop.f32.mrb[80].mxu1 }
 0x9e5   : > { %v9222_v59 = vpack.c.bf16 %v9146_v25, %v9145_v28  ;;  %v8846_v11 = vadd.f32 %v8845_v42, %v16994_v57  ;;  %v8847_v55 = vpop.f32.mrb[81].mxu1  ;;  %v17000_v28 = vld [vmem:[#allocation7_spill] sm:$0xff] }
 0x9e6   : > { %v8848_v61 = vpop.f32.mrb[82].mxu1 }
 0x9e7   : > { %v9083_v51 = vadd.f32 %v16320_v2, %v8846_v11  ;;  %v8849_v37 = vadd.f32 %v8848_v61, %v16120_v17  ;;  %v8850_v41 = vpop.f32.mrb[83].mxu1  ;;  %11246 = vmatmul.mubr.bf16.gmra.mrb[4].mxu0 %v9222_v59  ;;  %v17001_v11 = vld [vmem:[#allocation13_spill] sm:$0xff] }
 0x9e9   : > { %v9084_v4 = vadd.f32 %v16320_v2, %v8849_v37  ;;  %9060 = vmatmul.mubr.bf16.gmra.mrb[188].mxu1 %v16997_v46  ;;  %v9147_v22 = vmax.f32 %v9083_v51, 0.0 }
 0x9eb   : > { %v9148_v52 = vmax.f32 %v9084_v4, 0.0 }
 0x9ec   : > { %v8853_v15 = vpop.f32.mrb[84].mxu1 }
 0x9ed   : > { %v8854_v38 = vadd.f32 %v16998_v26, %v8853_v15  ;;  %v8855_v20 = vpop.f32.mrb[85].mxu1  ;;  %v9223_v0 = vpack.c.bf16 %v9148_v52, %v9147_v22  ;;  %v17003_v26 = vld [vmem:[#allocation6_spill] sm:$0xff] }
 0x9ee   : > { %v8856_v60 = vpop.f32.mrb[86].mxu1 }
 0x9ef   : > { %v9085_v12 = vadd.f32 %v16320_v2, %v8854_v38  ;;  %v8857_v17 = vadd.f32 %v16999_v35, %v8856_v60  ;;  %v8858_v7 = vpop.f32.mrb[87].mxu1  ;;  %11249 = vmatprep.mubr.bf16.mxu0 %v9223_v0 }
 0x9f0   : > { %v17004_v7 = vld [vmem:[#allocation11_spill] sm:$0xff] }
 0x9f1   : > { %v9086_v23 = vadd.f32 %v16320_v2, %v8857_v17  ;;  %v9149_v44 = vmax.f32 %v9085_v12, 0.0 }
 0x9f3   : > { %v9150_v30 = vmax.f32 %v9086_v23, 0.0 }
 0x9f4   : > { %v8861_v58 = vpop.f32.mrb[88].mxu1 }
 0x9f5   : > { %v9224_v47 = vpack.c.bf16 %v9150_v30, %v9149_v44  ;;  %v8862_v25 = vadd.f32 %v8861_v58, %v17000_v28  ;;  %v8863_v42 = vpop.f32.mrb[89].mxu1 }
 0x9f6   : > { %v8864_v59 = vpop.f32.mrb[90].mxu1 }
 0x9f7   : > { %v9087_v57 = vadd.f32 %v16320_v2, %v8862_v25  ;;  %v8865_v55 = vadd.f32 %v8864_v59, %v17001_v11  ;;  %v8866_v61 = vpop.f32.mrb[91].mxu1  ;;  %11250 = vmatmul.mubr.bf16.gmra.mrb[8].mxu0 %v9224_v47  ;;  %v17005_v47 = vld [vmem:[#allocation17_spill] sm:$0xff] }
 0x9f9   : > { %v9088_v51 = vadd.f32 %v16320_v2, %v8865_v55  ;;  %v9151_v37 = vmax.f32 %v9087_v57, 0.0  ;;  %v17006_v55 = vld [vmem:[#allocation12_spill] sm:$0xff] }
 0x9fb   : > { %v9152_v41 = vmax.f32 %v9088_v51, 0.0 }
 0x9fc   : > { %v8869_v4 = vpop.f32.mrb[92].mxu1 }
 0x9fd   : > { %v8870_v3 = vadd.f32 %v17002_v36, %v8869_v4  ;;  %v8871_v46 = vpop.f32.mrb[93].mxu1  ;;  %v9225_v22 = vpack.c.bf16 %v9152_v41, %v9151_v37  ;;  %v17007_v36 = vld [vmem:[#allocation10_spill] sm:$0xff] }
 0x9fe   : > { %v8872_v52 = vpop.f32.mrb[94].mxu1 }
 0x9ff   : > { %v9089_v15 = vadd.f32 %v16320_v2, %v8870_v3  ;;  %v8873_v38 = vadd.f32 %v17003_v26, %v8872_v52  ;;  %v8874_v20 = vpop.f32.mrb[95].mxu1  ;;  %11253 = vmatprep.mubr.bf16.mxu0 %v9225_v22 }
 0xa00   : > { %v17008_v20 = vld [vmem:[#allocation15_spill] sm:$0xff] }
 0xa01   : > { %v9090_v0 = vadd.f32 %v16320_v2, %v8873_v38  ;;  %v9153_v60 = vmax.f32 %v9089_v15, 0.0 }
 0xa03   : > { %v9154_v12 = vmax.f32 %v9090_v0, 0.0 }
 0xa04   : > { %v8877_v35 = vpop.f32.mrb[96].mxu1 }
 0xa05   : > { %v9226_v17 = vpack.c.bf16 %v9154_v12, %v9153_v60  ;;  %v8878_v23 = vadd.f32 %v8877_v35, %v17004_v7  ;;  %v8879_v44 = vpop.f32.mrb[97].mxu1 }
 0xa06   : > { %v8880_v30 = vpop.f32.mrb[98].mxu1 }
 0xa07   : > { %v9091_v58 = vadd.f32 %v16320_v2, %v8878_v23  ;;  %v8881_v28 = vadd.f32 %v8880_v30, %v17005_v47  ;;  %v8882_v25 = vpop.f32.mrb[99].mxu1  ;;  %11254 = vmatmul.mubr.bf16.gmra.mrb[12].mxu0 %v9226_v17  ;;  %v17009_v17 = vld [vmem:[#allocation21_spill] sm:$0xff] }
 0xa09   : > { %v9092_v42 = vadd.f32 %v16320_v2, %v8881_v28  ;;  %v9155_v59 = vmax.f32 %v9091_v58, 0.0  ;;  %v17010_v28 = vld [vmem:[#allocation16_spill] sm:$0xff] }
 0xa0b   : > { %v9156_v57 = vmax.f32 %v9092_v42, 0.0 }
 0xa0c   : > { %v8885_v11 = vpop.f32.mrb[100].mxu1 }
 0xa0d   : > { %v8886_v61 = vadd.f32 %v17006_v55, %v8885_v11  ;;  %v8887_v51 = vpop.f32.mrb[101].mxu1  ;;  %v9227_v37 = vpack.c.bf16 %v9156_v57, %v9155_v59  ;;  %v17011_v55 = vld [vmem:[#allocation14_spill] sm:$0xff] }
 0xa0e   : > { %v8888_v41 = vpop.f32.mrb[102].mxu1 }
 0xa0f   : > { %v9093_v4 = vadd.f32 %v16320_v2, %v8886_v61  ;;  %v8889_v3 = vadd.f32 %v17007_v36, %v8888_v41  ;;  %v8890_v46 = vpop.f32.mrb[103].mxu1  ;;  %11257 = vmatprep.mubr.bf16.mxu0 %v9227_v37 }
 0xa11   : > { %v9094_v22 = vadd.f32 %v16320_v2, %v8889_v3  ;;  %v9157_v52 = vmax.f32 %v9093_v4, 0.0 }
 0xa13   : > { %v9158_v15 = vmax.f32 %v9094_v22, 0.0 }
 0xa14   : > { %v8893_v26 = vpop.f32.mrb[104].mxu1 }
 0xa15   : > { %v9228_v38 = vpack.c.bf16 %v9158_v15, %v9157_v52  ;;  %v8894_v0 = vadd.f32 %v8893_v26, %v17008_v20  ;;  %v8895_v60 = vpop.f32.mrb[105].mxu1 }
 0xa16   : > { %v8896_v12 = vpop.f32.mrb[106].mxu1 }
 0xa17   : > { %v9095_v35 = vadd.f32 %v16320_v2, %v8894_v0  ;;  %v8897_v7 = vadd.f32 %v8896_v12, %v17009_v17  ;;  %v8898_v23 = vpop.f32.mrb[107].mxu1  ;;  %11258 = vmatmul.mubr.bf16.gmra.mrb[16].mxu0 %v9228_v38 }
 0xa19   : > { %v9096_v44 = vadd.f32 %v16320_v2, %v8897_v7  ;;  %v9159_v30 = vmax.f32 %v9095_v35, 0.0  ;;  %v17012_v35 = vld [vmem:[#allocation20_spill] sm:$0xff] }
 0xa1b   : > { %v9160_v58 = vmax.f32 %v9096_v44, 0.0 }
 0xa1c   : > { %v8901_v47 = vpop.f32.mrb[108].mxu1 }
 0xa1d   : > { %v8902_v25 = vadd.f32 %v17010_v28, %v8901_v47  ;;  %v8903_v42 = vpop.f32.mrb[109].mxu1  ;;  %v9229_v59 = vpack.c.bf16 %v9160_v58, %v9159_v30  ;;  %v17013_v30 = vld [vmem:[#allocation19_spill] sm:$0xff] }
 0xa1e   : > { %v8904_v57 = vpop.f32.mrb[110].mxu1 }
 0xa1f   : > { %v9097_v11 = vadd.f32 %v16320_v2, %v8902_v25  ;;  %v8905_v61 = vadd.f32 %v17011_v55, %v8904_v57  ;;  %v8906_v51 = vpop.f32.mrb[111].mxu1  ;;  %11261 = vmatprep.mubr.bf16.mxu0 %v9229_v59 }
 0xa21   : > { %v9098_v37 = vadd.f32 %v16320_v2, %v8905_v61  ;;  %v9161_v41 = vmax.f32 %v9097_v11, 0.0 }
 0xa23   : > { %v9162_v4 = vmax.f32 %v9098_v37, 0.0 }
 0xa24   : > { %v8909_v36 = vpop.f32.mrb[112].mxu1 }
 0xa25   : > { %v9230_v3 = vpack.c.bf16 %v9162_v4, %v9161_v41  ;;  %v8910_v46 = vadd.f32 %v8909_v36, %v16179_v33  ;;  %v8911_v22 = vpop.f32.mrb[113].mxu1 }
 0xa26   : > { %v8912_v52 = vpop.f32.mrb[114].mxu1 }
 0xa27   : > { %v9099_v15 = vadd.f32 %v16320_v2, %v8910_v46  ;;  %v8913_v26 = vadd.f32 %v8912_v52, %v16183_v40  ;;  %v8914_v38 = vpop.f32.mrb[115].mxu1  ;;  %11262 = vmatmul.mubr.bf16.gmra.mrb[20].mxu0 %v9230_v3  ;;  %v17014_v46 = vld [vmem:[#allocation18_spill] sm:$0xff] }
 0xa28   : > { %v17015_v38 = vld [vmem:[#allocation25_spill] sm:$0xff] }
 0xa29   : > { %v9100_v20 = vadd.f32 %v16320_v2, %v8913_v26  ;;  %v9163_v0 = vmax.f32 %v9099_v15, 0.0 }
 0xa2b   : > { %v9164_v60 = vmax.f32 %v9100_v20, 0.0 }
 0xa2c   : > { %v8917_v12 = vpop.f32.mrb[116].mxu1 }
 0xa2d   : > { %v8918_v17 = vadd.f32 %v17012_v35, %v8917_v12  ;;  %v8919_v7 = vpop.f32.mrb[117].mxu1  ;;  %v9231_v23 = vpack.c.bf16 %v9164_v60, %v9163_v0 }
 0xa2e   : > { %v8920_v44 = vpop.f32.mrb[118].mxu1 }
 0xa2f   : > { %v9101_v33 = vadd.f32 %v16320_v2, %v8918_v17  ;;  %v8921_v58 = vadd.f32 %v17013_v30, %v8920_v44  ;;  %v8922_v47 = vpop.f32.mrb[119].mxu1  ;;  %11265 = vmatprep.mubr.bf16.mxu0 %v9231_v23 }
 0xa31   : > { %v9102_v40 = vadd.f32 %v16320_v2, %v8921_v58  ;;  %v9165_v28 = vmax.f32 %v9101_v33, 0.0 }
 0xa33   : > { %v9166_v25 = vmax.f32 %v9102_v40, 0.0 }
 0xa34   : > { %v8925_v42 = vpop.f32.mrb[120].mxu1 }
 0xa35   : > { %v9232_v59 = vpack.c.bf16 %v9166_v25, %v9165_v28  ;;  %v8926_v57 = vadd.f32 %v8925_v42, %v16193_v48  ;;  %v8927_v11 = vpop.f32.mrb[121].mxu1  ;;  %v17016_v42 = vld [vmem:[#allocation24_spill] sm:$0xff] }
 0xa36   : > { %v8928_v55 = vpop.f32.mrb[122].mxu1 }
 0xa37   : > { %v9103_v61 = vadd.f32 %v16320_v2, %v8926_v57  ;;  %v8929_v51 = vadd.f32 %v8928_v55, %v16197_v18  ;;  %v8930_v37 = vpop.f32.mrb[123].mxu1  ;;  %11266 = vmatmul.mubr.bf16.gmra.mrb[24].mxu0 %v9232_v59 }
 0xa39   : > { %v9104_v41 = vadd.f32 %v16320_v2, %v8929_v51  ;;  %v9167_v4 = vmax.f32 %v9103_v61, 0.0  ;;  %v17017_v61 = vld [vmem:[#allocation23_spill] sm:$0xff] }
 0xa3b   : > { %v9168_v36 = vmax.f32 %v9104_v41, 0.0 }
 0xa3c   : > { %v8933_v3 = vpop.f32.mrb[124].mxu1 }
 0xa3d   : > { %v8934_v22 = vadd.f32 %v17014_v46, %v8933_v3  ;;  %v8935_v52 = vpop.f32.mrb[125].mxu1  ;;  %v9233_v15 = vpack.c.bf16 %v9168_v36, %v9167_v4 }
 0xa3e   : > { %v8936_v26 = vpop.f32.mrb[126].mxu1 }
 0xa3f   : > { %v9105_v48 = vadd.f32 %v16320_v2, %v8934_v22  ;;  %v8937_v20 = vadd.f32 %v17015_v38, %v8936_v26  ;;  %v8938_v0 = vpop.f32.mrb[127].mxu1  ;;  %11269 = vmatprep.mubr.bf16.mxu0 %v9233_v15 }
 0xa41   : > { %v9106_v18 = vadd.f32 %v16320_v2, %v8937_v20  ;;  %v9169_v60 = vmax.f32 %v9105_v48, 0.0 }
 0xa43   : > { %v9170_v12 = vmax.f32 %v9106_v18, 0.0 }
 0xa44   : > { %v8941_v35 = vpop.f32.mrb[128].mxu1 }
 0xa45   : > { %v9234_v17 = vpack.c.bf16 %v9170_v12, %v9169_v60  ;;  %v8942_v7 = vadd.f32 %v8941_v35, %v16207_v50  ;;  %v8943_v23 = vpop.f32.mrb[129].mxu1 }
 0xa46   : > { %v8944_v44 = vpop.f32.mrb[130].mxu1 }
 0xa47   : > { %v9107_v33 = vadd.f32 %v16320_v2, %v8942_v7  ;;  %v8945_v30 = vadd.f32 %v8944_v44, %v16211_v19  ;;  %v8946_v58 = vpop.f32.mrb[131].mxu1  ;;  %11270 = vmatmul.mubr.bf16.gmra.mrb[28].mxu0 %v9234_v17 }
 0xa49   : > { %v9108_v47 = vadd.f32 %v16320_v2, %v8945_v30  ;;  %v9171_v40 = vmax.f32 %v9107_v33, 0.0 }
 0xa4b   : > { %v9172_v28 = vmax.f32 %v9108_v47, 0.0 }
 0xa4c   : > { %v8949_v25 = vpop.f32.mrb[132].mxu1 }
 0xa4d   : > { %v8950_v59 = vadd.f32 %v17016_v42, %v8949_v25  ;;  %v8951_v57 = vpop.f32.mrb[133].mxu1  ;;  %v9235_v11 = vpack.c.bf16 %v9172_v28, %v9171_v40 }
 0xa4e   : > { %v8952_v55 = vpop.f32.mrb[134].mxu1 }
 0xa4f   : > { %v9109_v50 = vadd.f32 %v16320_v2, %v8950_v59  ;;  %v8953_v51 = vadd.f32 %v17017_v61, %v8952_v55  ;;  %v8954_v37 = vpop.f32.mrb[135].mxu1  ;;  %11273 = vmatprep.mubr.bf16.mxu0 %v9235_v11 }
 0xa51   : > { %v9110_v19 = vadd.f32 %v16320_v2, %v8953_v51  ;;  %v9173_v41 = vmax.f32 %v9109_v50, 0.0 }
 0xa53   : > { %v9174_v4 = vmax.f32 %v9110_v19, 0.0 }
 0xa54   : > { %v8957_v36 = vpop.f32.mrb[136].mxu1 }
 0xa55   : > { %v9236_v3 = vpack.c.bf16 %v9174_v4, %v9173_v41  ;;  %v8958_v46 = vadd.f32 %v8957_v36, %v16221_v5  ;;  %v8959_v22 = vpop.f32.mrb[137].mxu1 }
 0xa56   : > { %v8960_v52 = vpop.f32.mrb[138].mxu1 }
 0xa57   : > { %v9111_v15 = vadd.f32 %v16320_v2, %v8958_v46  ;;  %v8961_v26 = vadd.f32 %v8960_v52, %v16225_v21  ;;  %v8962_v48 = vpop.f32.mrb[139].mxu1  ;;  %11274 = vmatmul.mubr.bf16.gmra.mrb[32].mxu0 %v9236_v3 }
 0xa59   : > { %v9112_v38 = vadd.f32 %v16320_v2, %v8961_v26  ;;  %v9175_v20 = vmax.f32 %v9111_v15, 0.0 }
 0xa5b   : > { %v9176_v0 = vmax.f32 %v9112_v38, 0.0 }
 0xa5c   : > { %v8965_v18 = vpop.f32.mrb[140].mxu1 }
 0xa5d   : > { %v8966_v60 = vadd.f32 %v16219_v9, %v8965_v18  ;;  %v8967_v12 = vpop.f32.mrb[141].mxu1  ;;  %v9237_v35 = vpack.c.bf16 %v9176_v0, %v9175_v20 }
 0xa5e   : > { %v8968_v17 = vpop.f32.mrb[142].mxu1 }
 0xa5f   : > { %v9113_v5 = vadd.f32 %v16320_v2, %v8966_v60  ;;  %v8969_v7 = vadd.f32 %v16223_v39, %v8968_v17  ;;  %v8970_v23 = vpop.f32.mrb[143].mxu1  ;;  %11277 = vmatprep.mubr.bf16.mxu0 %v9237_v35 }
 0xa61   : > { %v9114_v21 = vadd.f32 %v16320_v2, %v8969_v7  ;;  %v9177_v44 = vmax.f32 %v9113_v5, 0.0 }
 0xa63   : > { %v9178_v33 = vmax.f32 %v9114_v21, 0.0 }
 0xa64   : > { %v8973_v30 = vpop.f32.mrb[144].mxu1 }
 0xa65   : > { %v9238_v58 = vpack.c.bf16 %v9178_v33, %v9177_v44  ;;  %v8974_v47 = vadd.f32 %v8973_v30, %v16235_v10  ;;  %v8975_v40 = vpop.f32.mrb[145].mxu1 }
 0xa66   : > { %v8976_v28 = vpop.f32.mrb[146].mxu1 }
 0xa67   : > { %v9115_v9 = vadd.f32 %v16320_v2, %v8974_v47  ;;  %v8977_v25 = vadd.f32 %v8976_v28, %v16239_v56  ;;  %v8978_v42 = vpop.f32.mrb[147].mxu1  ;;  %11278 = vmatmul.mubr.bf16.gmra.mrb[36].mxu0 %v9238_v58 }
 0xa69   : > { %v9116_v39 = vadd.f32 %v16320_v2, %v8977_v25  ;;  %v9179_v59 = vmax.f32 %v9115_v9, 0.0 }
 0xa6b   : > { %v9180_v57 = vmax.f32 %v9116_v39, 0.0 }
 0xa6c   : > { %v8981_v11 = vpop.f32.mrb[148].mxu1 }
 0xa6d   : > { %v8982_v55 = vadd.f32 %v16233_v13, %v8981_v11  ;;  %v8983_v50 = vpop.f32.mrb[149].mxu1  ;;  %v9239_v61 = vpack.c.bf16 %v9180_v57, %v9179_v59 }
 0xa6e   : > { %v8984_v51 = vpop.f32.mrb[150].mxu1 }
 0xa6f   : > { %v9117_v10 = vadd.f32 %v16320_v2, %v8982_v55  ;;  %v8985_v37 = vadd.f32 %v16237_v43, %v8984_v51  ;;  %v8986_v19 = vpop.f32.mrb[151].mxu1  ;;  %11281 = vmatprep.mubr.bf16.mxu0 %v9239_v61 }
 0xa71   : > { %v9118_v56 = vadd.f32 %v16320_v2, %v8985_v37  ;;  %v9181_v41 = vmax.f32 %v9117_v10, 0.0 }
 0xa73   : > { %v9182_v4 = vmax.f32 %v9118_v56, 0.0 }
 0xa74   : > { %v8989_v36 = vpop.f32.mrb[152].mxu1 }
 0xa75   : > { %v9240_v3 = vpack.c.bf16 %v9182_v4, %v9181_v41  ;;  %v8990_v46 = vadd.f32 %v8989_v36, %v16249_v29  ;;  %v8991_v22 = vpop.f32.mrb[153].mxu1 }
 0xa76   : > { %v8992_v52 = vpop.f32.mrb[154].mxu1 }
 0xa77   : > { %v9119_v13 = vadd.f32 %v16320_v2, %v8990_v46  ;;  %v8993_v15 = vadd.f32 %v8992_v52, %v16253_v14  ;;  %v8994_v26 = vpop.f32.mrb[155].mxu1  ;;  %11282 = vmatmul.mubr.bf16.gmra.mrb[40].mxu0 %v9240_v3 }
 0xa79   : > { %v9120_v43 = vadd.f32 %v16320_v2, %v8993_v15  ;;  %v9183_v48 = vmax.f32 %v9119_v13, 0.0 }
 0xa7b   : > { %v9184_v38 = vmax.f32 %v9120_v43, 0.0 }
 0xa7c   : > { %v8997_v20 = vpop.f32.mrb[156].mxu1 }
 0xa7d   : > { %v8998_v0 = vadd.f32 %v16247_v31, %v8997_v20  ;;  %v8999_v18 = vpop.f32.mrb[157].mxu1  ;;  %v9241_v60 = vpack.c.bf16 %v9184_v38, %v9183_v48 }
 0xa7e   : > { %v9000_v12 = vpop.f32.mrb[158].mxu1 }
 0xa7f   : > { %v9121_v29 = vadd.f32 %v16320_v2, %v8998_v0  ;;  %v9001_v35 = vadd.f32 %v16251_v63, %v9000_v12  ;;  %v9002_v17 = vpop.f32.mrb[159].mxu1  ;;  %11285 = vmatprep.mubr.bf16.mxu0 %v9241_v60 }
 0xa81   : > { %v9122_v14 = vadd.f32 %v16320_v2, %v9001_v35  ;;  %v9185_v5 = vmax.f32 %v9121_v29, 0.0 }
 0xa83   : > { %v9186_v7 = vmax.f32 %v9122_v14, 0.0 }
 0xa84   : > { %v9005_v23 = vpop.f32.mrb[160].mxu1 }
 0xa85   : > { %v9242_v21 = vpack.c.bf16 %v9186_v7, %v9185_v5  ;;  %v9006_v44 = vadd.f32 %v9005_v23, %v16263_v1  ;;  %v9007_v33 = vpop.f32.mrb[161].mxu1 }
 0xa86   : > { %v9008_v30 = vpop.f32.mrb[162].mxu1 }
 0xa87   : > { %v9123_v31 = vadd.f32 %v16320_v2, %v9006_v44  ;;  %v9009_v58 = vadd.f32 %v9008_v30, %v16267_v16  ;;  %v9010_v47 = vpop.f32.mrb[163].mxu1  ;;  %11286 = vmatmul.mubr.bf16.gmra.mrb[44].mxu0 %v9242_v21 }
 0xa89   : > { %v9124_v63 = vadd.f32 %v16320_v2, %v9009_v58  ;;  %v9187_v40 = vmax.f32 %v9123_v31, 0.0 }
 0xa8b   : > { %v9188_v28 = vmax.f32 %v9124_v63, 0.0 }
 0xa8c   : > { %v9013_v9 = vpop.f32.mrb[164].mxu1 }
 0xa8d   : > { %v9014_v25 = vadd.f32 %v16261_v53, %v9013_v9  ;;  %v9015_v42 = vpop.f32.mrb[165].mxu1  ;;  %v9243_v39 = vpack.c.bf16 %v9188_v28, %v9187_v40 }
 0xa8e   : > { %v9016_v59 = vpop.f32.mrb[166].mxu1 }
 0xa8f   : > { %v9125_v1 = vadd.f32 %v16320_v2, %v9014_v25  ;;  %v9017_v57 = vadd.f32 %v16265_v54, %v9016_v59  ;;  %v9018_v11 = vpop.f32.mrb[167].mxu1  ;;  %11289 = vmatprep.mubr.bf16.mxu0 %v9243_v39 }
 0xa91   : > { %v9126_v16 = vadd.f32 %v16320_v2, %v9017_v57  ;;  %v9189_v55 = vmax.f32 %v9125_v1, 0.0 }
 0xa93   : > { %v9190_v50 = vmax.f32 %v9126_v16, 0.0 }
 0xa94   : > { %v9021_v61 = vpop.f32.mrb[168].mxu1 }
 0xa95   : > { %v9244_v51 = vpack.c.bf16 %v9190_v50, %v9189_v55  ;;  %v9022_v10 = vadd.f32 %v9021_v61, %v16277_v62  ;;  %v9023_v37 = vpop.f32.mrb[169].mxu1 }
 0xa96   : > { %v9024_v19 = vpop.f32.mrb[170].mxu1 }
 0xa97   : > { %v9127_v53 = vadd.f32 %v16320_v2, %v9022_v10  ;;  %v9025_v56 = vadd.f32 %v9024_v19, %v16281_v32  ;;  %v9026_v41 = vpop.f32.mrb[171].mxu1  ;;  %11290 = vmatmul.mubr.bf16.gmra.mrb[48].mxu0 %v9244_v51  ;;  %v17018_v51 = vld [vmem:[#allocation28_spill] sm:$0xff] }
 0xa99   : > { %v9128_v54 = vadd.f32 %v16320_v2, %v9025_v56  ;;  %v9191_v4 = vmax.f32 %v9127_v53, 0.0 }
 0xa9b   : > { %v9192_v36 = vmax.f32 %v9128_v54, 0.0 }
 0xa9c   : > { %v9029_v3 = vpop.f32.mrb[172].mxu1 }
 0xa9d   : > { %v9030_v46 = vadd.f32 %v16275_v49, %v9029_v3  ;;  %v9031_v22 = vpop.f32.mrb[173].mxu1  ;;  %v9245_v52 = vpack.c.bf16 %v9192_v36, %v9191_v4 }
 0xa9e   : > { %v9032_v13 = vpop.f32.mrb[174].mxu1 }
 0xa9f   : > { %v9129_v62 = vadd.f32 %v16320_v2, %v9030_v46  ;;  %v9033_v15 = vadd.f32 %v16279_v34, %v9032_v13  ;;  %v9034_v26 = vpop.f32.mrb[175].mxu1  ;;  %11293 = vmatprep.mubr.bf16.mxu0 %v9245_v52  ;;  %v16467_v34 = vld [vmem:[%s16767_s15] ss:$0 sm:$0xff] }
 0xaa1   : > { %v9130_v32 = vadd.f32 %v16320_v2, %v9033_v15  ;;  %v9193_v43 = vmax.f32 %v9129_v62, 0.0 }
 0xaa3   : > { %v9194_v48 = vmax.f32 %v9130_v32, 0.0 }
 0xaa4   : > { %v9037_v38 = vpop.f32.mrb[176].mxu1 }
 0xaa5   : > { %v9246_v20 = vpack.c.bf16 %v9194_v48, %v9193_v43  ;;  %v9038_v0 = vadd.f32 %v9037_v38, %v16291_v6  ;;  %v9039_v18 = vpop.f32.mrb[177].mxu1  ;;  %v17019_v48 = vld [vmem:[#allocation22_spill] sm:$0xff] }
 0xaa6   : > { %v9040_v60 = vpop.f32.mrb[178].mxu1 }
 0xaa7   : > { %v9131_v49 = vadd.f32 %v16320_v2, %v9038_v0  ;;  %v9041_v12 = vadd.f32 %v9040_v60, %v16295_v24  ;;  %v9042_v29 = vpop.f32.mrb[179].mxu1  ;;  %11294 = vmatmul.mubr.bf16.gmra.mrb[52].mxu0 %v9246_v20 }
 0xaa9   : > { %v9132_v35 = vadd.f32 %v16320_v2, %v9041_v12  ;;  %v9195_v14 = vmax.f32 %v9131_v49, 0.0 }
 0xaaa   : > { %v11243_v17 = vpop.f32.mrb[0].mxu0 }
 0xaab   : > { %v9196_v5 = vmax.f32 %v9132_v35, 0.0  ;;  %v9349_v6 = vadd.f32 %v11243_v17, %v16467_v34  ;;  %v9340_v7 = vpop.f32.mrb[1].mxu0  ;;  %v17020_v35 = vld [vmem:[#allocation29_spill] sm:$0xff] }
 0xaac   : > { %v9341_v23 = vadd.f32 %v16467_v34, %v9340_v7  ;;  %v9045_v21 = vpop.f32.mrb[180].mxu1  ;;  %v11244_v44 = vpop.f32.mrb[2].mxu0 }
 0xaad   : > { %v11019_v24 = vmul.f32 -1.442695, %v9349_v6  ;;  %v9046_v33 = vadd.f32 %v16289_v27, %v9045_v21  ;;  %v9352_v30 = vadd.f32 %v11244_v44, %v16467_v34  ;;  %v9047_v31 = vpop.f32.mrb[181].mxu1  ;;  %v9343_v58 = vpop.f32.mrb[3].mxu0  ;;  %v9247_v47 = vpack.c.bf16 %v9196_v5, %v9195_v14 }
 0xaae   : > { %v11017_v63 = vmul.f32 -1.442695, %v9341_v23  ;;  %v9344_v40 = vadd.f32 %v16467_v34, %v9343_v58  ;;  %v9048_v28 = vpop.f32.mrb[182].mxu1  ;;  %v10048_v21 = vpop.permute.xlu1 %10047 }
 0xaaf   : > { %11886 = vpow2.f32 %v11019_v24  ;;  %v9133_v9 = vadd.f32 %v16320_v2, %v9046_v33  ;;  %v11020_v25 = vmul.f32 -1.442695, %v9352_v30  ;;  %v9049_v42 = vadd.f32 %v16293_v45, %v9048_v28  ;;  %v9050_v39 = vpop.f32.mrb[183].mxu1  ;;  %11297 = vmatprep.mubr.bf16.mxu0 %v9247_v47  ;;  %v10044_v44 = vpop.permute.xlu0 %10043 }
 0xab0   : > { %11888 = vpow2.f32 %v11017_v63  ;;  %v11018_v59 = vmul.f32 -1.442695, %v9344_v40 }
 0xab1   : > { %11890 = vpow2.f32 %v11020_v25  ;;  %v9134_v27 = vadd.f32 %v16320_v2, %v9049_v42  ;;  %v9197_v1 = vmax.f32 %v9133_v9, 0.0 }
 0xab2   : > { %11892 = vpow2.f32 %v11018_v59  ;;  %v10050_v63 = vpop.permute.xlu1 %10049 }
 0xab3   : > { %v9198_v57 = vmax.f32 %v9134_v27, 0.0  ;;  %v10046_v9 = vpop.permute.xlu0 %10045 }
 0xab4   : > { %v9053_v11 = vpop.f32.mrb[184].mxu1 }
 0xab5   : > { %v9248_v16 = vpack.c.bf16 %v9198_v57, %v9197_v1  ;;  %v9054_v55 = vadd.f32 %v9053_v11, %v16305_v8  ;;  %v9055_v50 = vpop.f32.mrb[185].mxu1 }
 0xab6   : > { %v9056_v61 = vpop.f32.mrb[186].mxu1 }
 0xab7   : > { %v9057_v10 = vadd.f32 %v9056_v61, %v17018_v51  ;;  %v9058_v37 = vpop.f32.mrb[187].mxu1  ;;  %11298 = vmatmul.mubr.bf16.gmra.mrb[56].mxu0 %v9248_v16  ;;  %v9135_v45 = vadd.f32 %v16320_v2, %v9054_v55 }
 0xab9   : > { %v11887_v19 = vpop.eup %11886  ;;  %v9136_v53 = vadd.f32 %v16320_v2, %v9057_v10  ;;  %v9199_v13 = vmax.f32 %v9135_v45, 0.0 }
 0xaba   : > { %v11889_v56 = vpop.eup %11888  ;;  %v9789_v41 = vadd.f32 1.0, %v11887_v19  ;;  %v11247_v54 = vpop.f32.mrb[4].mxu0 }
 0xabb   : > { %v11891_v4 = vpop.eup %11890  ;;  %v9787_v36 = vadd.f32 1.0, %v11889_v56  ;;  %v9200_v3 = vmax.f32 %v9136_v53, 0.0  ;;  %v9365_v46 = vadd.f32 %v11247_v54, %v16467_v34  ;;  %v9356_v8 = vpop.f32.mrb[5].mxu0 }
 0xabc   : > { %v11893_v22 = vpop.eup %11892  ;;  %11894 = vrcp.f32 %v9789_v41  ;;  %v9790_v52 = vadd.f32 1.0, %v11891_v4  ;;  %v9357_v62 = vadd.f32 %v16467_v34, %v9356_v8  ;;  %v9061_v15 = vpop.f32.mrb[188].mxu1 }
 0xabd   : > { %v11248_v26 = vpop.f32.mrb[6].mxu0  ;;  %11896 = vrcp.f32 %v9787_v36  ;;  %v9788_v32 = vadd.f32 1.0, %v11893_v22  ;;  %v11023_v43 = vmul.f32 -1.442695, %v9365_v46  ;;  %v9062_v38 = vadd.f32 %v17019_v48, %v9061_v15  ;;  %v9063_v20 = vpop.f32.mrb[189].mxu1 }
 0xabe   : > { %v9359_v0 = vpop.f32.mrb[7].mxu0  ;;  %11898 = vrcp.f32 %v9790_v52  ;;  %v11021_v18 = vmul.f32 -1.442695, %v9357_v62  ;;  %v9368_v60 = vadd.f32 %v11248_v26, %v16467_v34  ;;  %v9064_v12 = vpop.f32.mrb[190].mxu1  ;;  %v9249_v5 = vpack.c.bf16 %v9200_v3, %v9199_v13 }
 0xabf   : > { %v9360_v49 = vadd.f32 %v16467_v34, %v9359_v0  ;;  %11900 = vrcp.f32 %v9788_v32  ;;  %v9137_v29 = vadd.f32 %v16320_v2, %v9062_v38  ;;  %v9065_v17 = vadd.f32 %v17020_v35, %v9064_v12  ;;  %v9066_v14 = vpop.f32.mrb[191].mxu1  ;;  %v10052_v36 = vpop.permute.xlu0 %10051 }
 0xac0   : > { %11902 = vpow2.f32 %v11023_v43  ;;  %v11024_v6 = vmul.f32 -1.442695, %v9368_v60  ;;  %11301 = vmatprep.mubr.bf16.mxu0 %v9249_v5  ;;  %v10054_v3 = vpop.permute.xlu1 %10053 }
 0xac1   : > { %v11022_v7 = vmul.f32 -1.442695, %v9360_v49  ;;  %11904 = vpow2.f32 %v11021_v18  ;;  %v9138_v23 = vadd.f32 %v16320_v2, %v9065_v17  ;;  %v9201_v24 = vmax.f32 %v9137_v29, 0.0 }
 0xac2   : > { %11906 = vpow2.f32 %v11024_v6 }
 0xac3   : > { %11908 = vpow2.f32 %v11022_v7  ;;  %v9202_v33 = vmax.f32 %v9138_v23, 0.0  ;;  %v10056_v8 = vpop.permute.xlu0 %10055 }
 0xac4   : > { %v10058_v62 = vpop.permute.xlu1 %10057 }
 0xac5   : > { %v9250_v30 = vpack.c.bf16 %v9202_v33, %v9201_v24 }
 0xac6   : > { %v11895_v31 = vpop.eup %11894 }
 0xac7   : > { %v11897_v2 = vpop.eup %11896  ;;  %v10238_v58 = vsel %vm10235_vm5, %v11895_v31, %v10048_v21  ;;  %11302 = vmatmul.mubr.bf16.gmra.mrb[60].mxu0 %v9250_v30  ;;  %v10060_v30 = vpop.permute.xlu0 %10059 }
 0xac8   : > { %v11899_v47 = vpop.eup %11898  ;;  %10303 = vst.msk [vmem:[%s16494_s23 + $0x10] sm:$0xff] %vm10300_vm6, %v10238_v58  ;;  %v10236_v40 = vsel %vm10235_vm5, %v11897_v2, %v10044_v44  ;;  %v10062_v31 = vpop.permute.xlu1 %10061 }
 0xac9   : > { %v11901_v28 = vpop.eup %11900  ;;  %10301 = vst.msk [vmem:[%s16494_s23] sm:$0xff] %vm10300_vm6, %v10236_v40  ;;  %v10239_v25 = vsel %vm10235_vm5, %v11899_v47, %v10050_v63 }
 0xaca   : > { %v11903_v42 = vpop.eup %11902  ;;  %10304 = vst.msk [vmem:[%s16494_s23 + $0x18] sm:$0xff] %vm10300_vm6, %v10239_v25  ;;  %v10237_v39 = vsel %vm10235_vm5, %v11901_v28, %v10046_v9  ;;  %v11251_v59 = vpop.f32.mrb[8].mxu0 }
 0xacb   : > { %v11905_v27 = vpop.eup %11904  ;;  %10302 = vst.msk [vmem:[%s16494_s23 + $0x8] sm:$0xff] %vm10300_vm6, %v10237_v39  ;;  %v9793_v1 = vadd.f32 1.0, %v11903_v42  ;;  %v9381_v57 = vadd.f32 %v11251_v59, %v16467_v34  ;;  %v9372_v11 = vpop.f32.mrb[9].mxu0 }
 0xacc   : > { %v11907_v16 = vpop.eup %11906  ;;  %v9791_v55 = vadd.f32 1.0, %v11905_v27  ;;  %v9373_v50 = vadd.f32 %v16467_v34, %v9372_v11  ;;  %v11252_v61 = vpop.f32.mrb[10].mxu0 }
 0xacd   : > { %v11909_v51 = vpop.eup %11908  ;;  %11910 = vrcp.f32 %v9793_v1  ;;  %v9794_v10 = vadd.f32 1.0, %v11907_v16  ;;  %v11027_v37 = vmul.f32 -1.442695, %v9381_v57  ;;  %v9384_v45 = vadd.f32 %v11252_v61, %v16467_v34  ;;  %v9375_v19 = vpop.f32.mrb[11].mxu0 }
 0xace   : > { %11912 = vrcp.f32 %v9791_v55  ;;  %v9792_v53 = vadd.f32 1.0, %v11909_v51  ;;  %v11025_v56 = vmul.f32 -1.442695, %v9373_v50  ;;  %v9376_v41 = vadd.f32 %v16467_v34, %v9375_v19  ;;  %v10064_v58 = vpop.permute.xlu0 %10063  ;;  %v10066_v28 = vpop.permute.xlu1 %10065 }
 0xacf   : > { %11914 = vrcp.f32 %v9794_v10  ;;  %v11028_v54 = vmul.f32 -1.442695, %v9384_v45 }
 0xad0   : > { %11916 = vrcp.f32 %v9792_v53  ;;  %v11026_v4 = vmul.f32 -1.442695, %v9376_v41 }
 0xad1   : > { %11918 = vpow2.f32 %v11027_v37 }
 0xad2   : > { %11920 = vpow2.f32 %v11025_v56 }
 0xad3   : > { %11922 = vpow2.f32 %v11028_v54 }
 0xad4   : > { %11924 = vpow2.f32 %v11026_v4 }
 0xad7   : > { %v11911_v46 = vpop.eup %11910 }
 0xad8   : > { %v11913_v22 = vpop.eup %11912  ;;  %v10242_v52 = vsel %vm10235_vm5, %v11911_v46, %v10056_v8  ;;  %v10070_v46 = vpop.permute.xlu1 %10069 }
 0xad9   : > { %v11915_v13 = vpop.eup %11914  ;;  %10307 = vst.msk [vmem:[%s16494_s23 + $0x30] sm:$0xff] %vm10300_vm6, %v10242_v52  ;;  %v10240_v15 = vsel %vm10235_vm5, %v11913_v22, %v10052_v36 }
 0xada   : > { %v11917_v26 = vpop.eup %11916  ;;  %10305 = vst.msk [vmem:[%s16494_s23 + $0x20] sm:$0xff] %vm10300_vm6, %v10240_v15  ;;  %v10243_v32 = vsel %vm10235_vm5, %v11915_v13, %v10058_v62  ;;  %v11255_v43 = vpop.f32.mrb[12].mxu0 }
 0xadb   : > { %v11919_v48 = vpop.eup %11918  ;;  %10308 = vst.msk [vmem:[%s16494_s23 + $0x38] sm:$0xff] %vm10300_vm6, %v10243_v32  ;;  %v10241_v38 = vsel %vm10235_vm5, %v11917_v26, %v10054_v3  ;;  %v9397_v20 = vadd.f32 %v11255_v43, %v16467_v34  ;;  %v9388_v0 = vpop.f32.mrb[13].mxu0 }
 0xadc   : > { %v11921_v18 = vpop.eup %11920  ;;  %10306 = vst.msk [vmem:[%s16494_s23 + $0x28] sm:$0xff] %vm10300_vm6, %v10241_v38  ;;  %v9797_v60 = vadd.f32 1.0, %v11919_v48  ;;  %v9389_v49 = vadd.f32 %v16467_v34, %v9388_v0  ;;  %v11256_v12 = vpop.f32.mrb[14].mxu0 }
 0xadd   : > { %v11923_v29 = vpop.eup %11922  ;;  %v9795_v35 = vadd.f32 1.0, %v11921_v18  ;;  %v9400_v17 = vadd.f32 %v11256_v12, %v16467_v34  ;;  %v9391_v14 = vpop.f32.mrb[15].mxu0  ;;  %v11031_v7 = vmul.f32 -1.442695, %v9397_v20 }
 0xade   : > { %v11925_v5 = vpop.eup %11924  ;;  %11926 = vrcp.f32 %v9797_v60  ;;  %v9798_v6 = vadd.f32 1.0, %v11923_v29  ;;  %v9392_v23 = vadd.f32 %v16467_v34, %v9391_v14  ;;  %v11029_v44 = vmul.f32 -1.442695, %v9389_v49  ;;  %v10068_v3 = vpop.permute.xlu0 %10067 }
 0xadf   : > { %11928 = vrcp.f32 %v9795_v35  ;;  %v9796_v21 = vadd.f32 1.0, %v11925_v5  ;;  %v11032_v24 = vmul.f32 -1.442695, %v9400_v17  ;;  %v10074_v26 = vpop.permute.xlu1 %10073 }
 0xae0   : > { %11930 = vrcp.f32 %v9798_v6  ;;  %v11030_v33 = vmul.f32 -1.442695, %v9392_v23 }
 0xae1   : > { %11932 = vrcp.f32 %v9796_v21 }
 0xae2   : > { %11934 = vpow2.f32 %v11031_v7  ;;  %v10072_v22 = vpop.permute.xlu0 %10071 }
 0xae3   : > { %11936 = vpow2.f32 %v11029_v44 }
 0xae4   : > { %11938 = vpow2.f32 %v11032_v24 }
 0xae5   : > { %11940 = vpow2.f32 %v11030_v33 }
 0xae8   : > { %v11927_v2 = vpop.eup %11926 }
 0xae9   : > { %v11929_v47 = vpop.eup %11928  ;;  %v10246_v63 = vsel %vm10235_vm5, %v11927_v2, %v10064_v58  ;;  %v10078_v2 = vpop.permute.xlu1 %10077 }
 0xaea   : > { %v11931_v40 = vpop.eup %11930  ;;  %10311 = vst.msk [vmem:[%s16494_s23 + $0x50] sm:$0xff] %vm10300_vm6, %v10246_v63  ;;  %v10244_v9 = vsel %vm10235_vm5, %v11929_v47, %v10060_v30  ;;  %v11259_v25 = vpop.f32.mrb[16].mxu0 }
 0xaeb   : > { %v11933_v42 = vpop.eup %11932  ;;  %10309 = vst.msk [vmem:[%s16494_s23 + $0x40] sm:$0xff] %vm10300_vm6, %v10244_v9  ;;  %v10247_v39 = vsel %vm10235_vm5, %v11931_v40, %v10066_v28  ;;  %v9413_v59 = vadd.f32 %v11259_v25, %v16467_v34  ;;  %v9404_v27 = vpop.f32.mrb[17].mxu0 }
 0xaec   : > { %v11935_v1 = vpop.eup %11934  ;;  %10312 = vst.msk [vmem:[%s16494_s23 + $0x58] sm:$0xff] %vm10300_vm6, %v10247_v39  ;;  %v10245_v57 = vsel %vm10235_vm5, %v11933_v42, %v10062_v31  ;;  %v9405_v11 = vadd.f32 %v16467_v34, %v9404_v27  ;;  %v11260_v16 = vpop.f32.mrb[18].mxu0 }
 0xaed   : > { %v11937_v55 = vpop.eup %11936  ;;  %10310 = vst.msk [vmem:[%s16494_s23 + $0x48] sm:$0xff] %vm10300_vm6, %v10245_v57  ;;  %v9801_v50 = vadd.f32 1.0, %v11935_v1  ;;  %v9416_v61 = vadd.f32 %v11260_v16, %v16467_v34  ;;  %v9407_v51 = vpop.f32.mrb[19].mxu0  ;;  %v11035_v56 = vmul.f32 -1.442695, %v9413_v59 }
 0xaee   : > { %v11939_v10 = vpop.eup %11938  ;;  %v9799_v37 = vadd.f32 1.0, %v11937_v55  ;;  %v9408_v45 = vadd.f32 %v16467_v34, %v9407_v51  ;;  %v11033_v54 = vmul.f32 -1.442695, %v9405_v11  ;;  %v10076_v31 = vpop.permute.xlu0 %10075 }
 0xaef   : > { %v11941_v19 = vpop.eup %11940  ;;  %11942 = vrcp.f32 %v9801_v50  ;;  %v9802_v53 = vadd.f32 1.0, %v11939_v10  ;;  %v11036_v4 = vmul.f32 -1.442695, %v9416_v61  ;;  %v10082_v27 = vpop.permute.xlu1 %10081 }
 0xaf0   : > { %11944 = vrcp.f32 %v9799_v37  ;;  %v9800_v41 = vadd.f32 1.0, %v11941_v19  ;;  %v11034_v36 = vmul.f32 -1.442695, %v9408_v45 }
 0xaf1   : > { %11946 = vrcp.f32 %v9802_v53 }
 0xaf2   : > { %11948 = vrcp.f32 %v9800_v41  ;;  %v10080_v63 = vpop.permute.xlu0 %10079 }
 0xaf3   : > { %11950 = vpow2.f32 %v11035_v56 }
 0xaf4   : > { %11952 = vpow2.f32 %v11033_v54 }
 0xaf5   : > { %11954 = vpow2.f32 %v11036_v4 }
 0xaf6   : > { %11956 = vpow2.f32 %v11034_v36 }
 0xaf9   : > { %v11943_v8 = vpop.eup %11942 }
 0xafa   : > { %v11945_v52 = vpop.eup %11944  ;;  %v10250_v13 = vsel %vm10235_vm5, %v11943_v8, %v10072_v22  ;;  %v11263_v62 = vpop.f32.mrb[20].mxu0 }
 0xafb   : > { %v11947_v15 = vpop.eup %11946  ;;  %10315 = vst.msk [vmem:[%s16494_s23 + $0x70] sm:$0xff] %vm10300_vm6, %v10250_v13  ;;  %v10248_v32 = vsel %vm10235_vm5, %v11945_v52, %v10068_v3  ;;  %v9429_v43 = vadd.f32 %v11263_v62, %v16467_v34  ;;  %v9420_v48 = vpop.f32.mrb[21].mxu0 }
 0xafc   : > { %v11949_v38 = vpop.eup %11948  ;;  %10313 = vst.msk [vmem:[%s16494_s23 + $0x60] sm:$0xff] %vm10300_vm6, %v10248_v32  ;;  %v10251_v20 = vsel %vm10235_vm5, %v11947_v15, %v10074_v26  ;;  %v9421_v0 = vadd.f32 %v16467_v34, %v9420_v48  ;;  %v11264_v18 = vpop.f32.mrb[22].mxu0 }
 0xafd   : > { %v11951_v60 = vpop.eup %11950  ;;  %10316 = vst.msk [vmem:[%s16494_s23 + $0x78] sm:$0xff] %vm10300_vm6, %v10251_v20  ;;  %v10249_v49 = vsel %vm10235_vm5, %v11949_v38, %v10070_v46  ;;  %v11039_v12 = vmul.f32 -1.442695, %v9429_v43  ;;  %v9432_v29 = vadd.f32 %v11264_v18, %v16467_v34  ;;  %v9423_v35 = vpop.f32.mrb[23].mxu0 }
 0xafe   : > { %v11953_v17 = vpop.eup %11952  ;;  %10314 = vst.msk [vmem:[%s16494_s23 + $0x68] sm:$0xff] %vm10300_vm6, %v10249_v49  ;;  %v9805_v14 = vadd.f32 1.0, %v11951_v60  ;;  %v9424_v5 = vadd.f32 %v16467_v34, %v9423_v35  ;;  %v11037_v44 = vmul.f32 -1.442695, %v9421_v0  ;;  %v10084_v46 = vpop.permute.xlu0 %10083 }
 0xaff   : > { %v11955_v6 = vpop.eup %11954  ;;  %v9803_v7 = vadd.f32 1.0, %v11953_v17  ;;  %11958 = vpow2.f32 %v11039_v12  ;;  %v11040_v33 = vmul.f32 -1.442695, %v9432_v29  ;;  %v10086_v13 = vpop.permute.xlu1 %10085 }
 0xb00   : > { %v11957_v23 = vpop.eup %11956  ;;  %11960 = vrcp.f32 %v9805_v14  ;;  %v9806_v21 = vadd.f32 1.0, %v11955_v6  ;;  %v11038_v30 = vmul.f32 -1.442695, %v9424_v5 }
 0xb01   : > { %11962 = vrcp.f32 %v9803_v7  ;;  %v9804_v24 = vadd.f32 1.0, %v11957_v23 }
 0xb02   : > { %11964 = vrcp.f32 %v9806_v21  ;;  %v10088_v22 = vpop.permute.xlu0 %10087 }
 0xb03   : > { %11966 = vrcp.f32 %v9804_v24  ;;  %v10090_v18 = vpop.permute.xlu1 %10089 }
 0xb04   : > { %11968 = vpow2.f32 %v11037_v44 }
 0xb05   : > { %11970 = vpow2.f32 %v11040_v33 }
 0xb06   : > { %11972 = vpow2.f32 %v11038_v30 }
 0xb09   : > { %v11959_v58 = vpop.eup %11958 }
 0xb0a   : > { %v11961_v47 = vpop.eup %11960  ;;  %v9809_v40 = vadd.f32 1.0, %v11959_v58  ;;  %v11267_v28 = vpop.f32.mrb[24].mxu0 }
 0xb0b   : > { %v11963_v9 = vpop.eup %11962  ;;  %v10254_v25 = vsel %vm10235_vm5, %v11961_v47, %v10080_v63  ;;  %v9445_v42 = vadd.f32 %v11267_v28, %v16467_v34  ;;  %v9436_v39 = vpop.f32.mrb[25].mxu0 }
 0xb0c   : > { %v11965_v59 = vpop.eup %11964  ;;  %10319 = vst.msk [vmem:[%s16494_s23 + $0x90] sm:$0xff] %vm10300_vm6, %v10254_v25  ;;  %v10252_v1 = vsel %vm10235_vm5, %v11963_v9, %v10076_v31  ;;  %11974 = vrcp.f32 %v9809_v40  ;;  %v9437_v57 = vadd.f32 %v16467_v34, %v9436_v39  ;;  %v11268_v11 = vpop.f32.mrb[26].mxu0 }
 0xb0d   : > { %v11967_v16 = vpop.eup %11966  ;;  %10317 = vst.msk [vmem:[%s16494_s23 + $0x80] sm:$0xff] %vm10300_vm6, %v10252_v1  ;;  %v10255_v55 = vsel %vm10235_vm5, %v11965_v59, %v10082_v27  ;;  %v11043_v50 = vmul.f32 -1.442695, %v9445_v42  ;;  %v9448_v61 = vadd.f32 %v11268_v11, %v16467_v34  ;;  %v9439_v51 = vpop.f32.mrb[27].mxu0 }
 0xb0e   : > { %v11969_v10 = vpop.eup %11968  ;;  %10320 = vst.msk [vmem:[%s16494_s23 + $0x98] sm:$0xff] %vm10300_vm6, %v10255_v55  ;;  %v10253_v37 = vsel %vm10235_vm5, %v11967_v16, %v10078_v2  ;;  %v11041_v45 = vmul.f32 -1.442695, %v9437_v57  ;;  %v9440_v19 = vadd.f32 %v16467_v34, %v9439_v51  ;;  %v10092_v2 = vpop.permute.xlu0 %10091 }
 0xb0f   : > { %v11971_v53 = vpop.eup %11970  ;;  %10318 = vst.msk [vmem:[%s16494_s23 + $0x88] sm:$0xff] %vm10300_vm6, %v10253_v37  ;;  %v9807_v56 = vadd.f32 1.0, %v11969_v10  ;;  %11976 = vpow2.f32 %v11043_v50  ;;  %v11044_v4 = vmul.f32 -1.442695, %v9448_v61  ;;  %v10094_v40 = vpop.permute.xlu1 %10093 }
 0xb10   : > { %v11973_v41 = vpop.eup %11972  ;;  %v9810_v54 = vadd.f32 1.0, %v11971_v53  ;;  %11978 = vpow2.f32 %v11041_v45  ;;  %v11042_v3 = vmul.f32 -1.442695, %v9440_v19 }
 0xb11   : > { %11980 = vrcp.f32 %v9807_v56  ;;  %v9808_v36 = vadd.f32 1.0, %v11973_v41 }
 0xb12   : > { %11982 = vrcp.f32 %v9810_v54  ;;  %v10096_v47 = vpop.permute.xlu0 %10095 }
 0xb13   : > { %11984 = vrcp.f32 %v9808_v36  ;;  %v10098_v1 = vpop.permute.xlu1 %10097 }
 0xb14   : > { %11986 = vpow2.f32 %v11044_v4 }
 0xb15   : > { %11988 = vpow2.f32 %v11042_v3 }
 0xb16   : > { %v11975_v8 = vpop.eup %11974 }
 0xb17   : > { %v10258_v52 = vsel %vm10235_vm5, %v11975_v8, %v10088_v22  ;;  %v10100_v8 = vpop.permute.xlu0 %10099 }
 0xb18   : > { %10323 = vst.msk [vmem:[%s16494_s23 + $0xb0] sm:$0xff] %vm10300_vm6, %v10258_v52  ;;  %v10102_v52 = vpop.permute.xlu1 %10101 }
 0xb19   : > { %v11977_v62 = vpop.eup %11976 }
 0xb1a   : > { %v11979_v15 = vpop.eup %11978  ;;  %v9813_v26 = vadd.f32 1.0, %v11977_v62  ;;  %v11271_v32 = vpop.f32.mrb[28].mxu0 }
 0xb1b   : > { %v11981_v43 = vpop.eup %11980  ;;  %v9811_v48 = vadd.f32 1.0, %v11979_v15  ;;  %v9461_v38 = vadd.f32 %v11271_v32, %v16467_v34  ;;  %v9452_v20 = vpop.f32.mrb[29].mxu0 }
 0xb1c   : > { %v11983_v0 = vpop.eup %11982  ;;  %v10256_v60 = vsel %vm10235_vm5, %v11981_v43, %v10084_v46  ;;  %11990 = vrcp.f32 %v9813_v26  ;;  %v9453_v49 = vadd.f32 %v16467_v34, %v9452_v20  ;;  %v11272_v12 = vpop.f32.mrb[30].mxu0 }
 0xb1d   : > { %v11985_v29 = vpop.eup %11984  ;;  %10321 = vst.msk [vmem:[%s16494_s23 + $0xa0] sm:$0xff] %vm10300_vm6, %v10256_v60  ;;  %v10259_v35 = vsel %vm10235_vm5, %v11983_v0, %v10090_v18  ;;  %11992 = vrcp.f32 %v9811_v48  ;;  %v11047_v17 = vmul.f32 -1.442695, %v9461_v38  ;;  %v9464_v14 = vadd.f32 %v11272_v12, %v16467_v34  ;;  %v9455_v5 = vpop.f32.mrb[31].mxu0 }
 0xb1e   : > { %v11987_v6 = vpop.eup %11986  ;;  %10324 = vst.msk [vmem:[%s16494_s23 + $0xb8] sm:$0xff] %vm10300_vm6, %v10259_v35  ;;  %v10257_v7 = vsel %vm10235_vm5, %v11985_v29, %v10086_v13  ;;  %v11045_v23 = vmul.f32 -1.442695, %v9453_v49  ;;  %v9456_v21 = vadd.f32 %v16467_v34, %v9455_v5  ;;  %v10104_v13 = vpop.permute.xlu0 %10103 }
 0xb1f   : > { %v11989_v44 = vpop.eup %11988  ;;  %10322 = vst.msk [vmem:[%s16494_s23 + $0xa8] sm:$0xff] %vm10300_vm6, %v10257_v7  ;;  %v9814_v24 = vadd.f32 1.0, %v11987_v6  ;;  %11994 = vpow2.f32 %v11047_v17  ;;  %v11048_v33 = vmul.f32 -1.442695, %v9464_v14  ;;  %v10106_v48 = vpop.permute.xlu1 %10105 }
 0xb20   : > { %v9812_v30 = vadd.f32 1.0, %v11989_v44  ;;  %11996 = vpow2.f32 %v11045_v23  ;;  %v11046_v31 = vmul.f32 -1.442695, %v9456_v21 }
 0xb21   : > { %11998 = vrcp.f32 %v9814_v24 }
 0xb22   : > { %12000 = vrcp.f32 %v9812_v30 }
 0xb23   : > { %12002 = vpow2.f32 %v11048_v33 }
 0xb24   : > { %12004 = vpow2.f32 %v11046_v31 }
 0xb26   : > { %v11991_v58 = vpop.eup %11990 }
 0xb27   : > { %v11993_v63 = vpop.eup %11992  ;;  %v10262_v28 = vsel %vm10235_vm5, %v11991_v58, %v10096_v47  ;;  %v10108_v58 = vpop.permute.xlu0 %10107 }
 0xb28   : > { %10327 = vst.msk [vmem:[%s16494_s23 + $0xd0] sm:$0xff] %vm10300_vm6, %v10262_v28  ;;  %v10260_v9 = vsel %vm10235_vm5, %v11993_v63, %v10092_v2  ;;  %v10110_v63 = vpop.permute.xlu1 %10109 }
 0xb29   : > { %v11995_v25 = vpop.eup %11994  ;;  %10325 = vst.msk [vmem:[%s16494_s23 + $0xc0] sm:$0xff] %vm10300_vm6, %v10260_v9 }
 0xb2a   : > { %v11997_v42 = vpop.eup %11996  ;;  %v9817_v39 = vadd.f32 1.0, %v11995_v25  ;;  %v11275_v59 = vpop.f32.mrb[32].mxu0 }
 0xb2b   : > { %v11999_v27 = vpop.eup %11998  ;;  %v9815_v57 = vadd.f32 1.0, %v11997_v42  ;;  %v9477_v11 = vadd.f32 %v11275_v59, %v16467_v34  ;;  %v9468_v16 = vpop.f32.mrb[33].mxu0 }
 0xb2c   : > { %v12001_v55 = vpop.eup %12000  ;;  %v10263_v50 = vsel %vm10235_vm5, %v11999_v27, %v10098_v1  ;;  %12006 = vrcp.f32 %v9817_v39  ;;  %v9469_v61 = vadd.f32 %v16467_v34, %v9468_v16  ;;  %v11276_v51 = vpop.f32.mrb[34].mxu0 }
 0xb2d   : > { %v12003_v10 = vpop.eup %12002  ;;  %10328 = vst.msk [vmem:[%s16494_s23 + $0xd8] sm:$0xff] %vm10300_vm6, %v10263_v50  ;;  %v10261_v37 = vsel %vm10235_vm5, %v12001_v55, %v10094_v40  ;;  %12008 = vrcp.f32 %v9815_v57  ;;  %v11051_v45 = vmul.f32 -1.442695, %v9477_v11  ;;  %v9480_v19 = vadd.f32 %v11276_v51, %v16467_v34  ;;  %v9471_v53 = vpop.f32.mrb[35].mxu0 }
 0xb2e   : > { %v12005_v56 = vpop.eup %12004  ;;  %10326 = vst.msk [vmem:[%s16494_s23 + $0xc8] sm:$0xff] %vm10300_vm6, %v10261_v37  ;;  %v9818_v41 = vadd.f32 1.0, %v12003_v10  ;;  %v11049_v54 = vmul.f32 -1.442695, %v9469_v61  ;;  %v9472_v4 = vadd.f32 %v16467_v34, %v9471_v53  ;;  %v10112_v40 = vpop.permute.xlu0 %10111 }
 0xb2f   : > { %v9816_v36 = vadd.f32 1.0, %v12005_v56  ;;  %12010 = vpow2.f32 %v11051_v45  ;;  %v11052_v3 = vmul.f32 -1.442695, %v9480_v19  ;;  %v10114_v42 = vpop.permute.xlu1 %10113 }
 0xb30   : > { %12012 = vrcp.f32 %v9818_v41  ;;  %v11050_v46 = vmul.f32 -1.442695, %v9472_v4 }
 0xb31   : > { %12014 = vrcp.f32 %v9816_v36 }
 0xb32   : > { %12016 = vpow2.f32 %v11049_v54 }
 0xb33   : > { %12018 = vpow2.f32 %v11052_v3 }
 0xb34   : > { %12020 = vpow2.f32 %v11050_v46 }
 0xb36   : > { %v12007_v22 = vpop.eup %12006 }
 0xb37   : > { %v12009_v62 = vpop.eup %12008  ;;  %v10266_v15 = vsel %vm10235_vm5, %v12007_v22, %v10104_v13  ;;  %v10116_v22 = vpop.permute.xlu0 %10115 }
 0xb38   : > { %10331 = vst.msk [vmem:[%s16494_s23 + $0xf0] sm:$0xff] %vm10300_vm6, %v10266_v15  ;;  %v10264_v26 = vsel %vm10235_vm5, %v12009_v62, %v10100_v8 }
 0xb39   : > { %v12011_v32 = vpop.eup %12010  ;;  %10329 = vst.msk [vmem:[%s16494_s23 + $0xe0] sm:$0xff] %vm10300_vm6, %v10264_v26 }
 0xb3a   : > { %v12013_v43 = vpop.eup %12012  ;;  %v9821_v38 = vadd.f32 1.0, %v12011_v32  ;;  %v11279_v20 = vpop.f32.mrb[36].mxu0 }
 0xb3b   : > { %v12015_v0 = vpop.eup %12014  ;;  %v10267_v18 = vsel %vm10235_vm5, %v12013_v43, %v10106_v48  ;;  %v9493_v60 = vadd.f32 %v11279_v20, %v16467_v34  ;;  %v9484_v49 = vpop.f32.mrb[37].mxu0 }
 0xb3c   : > { %v12017_v12 = vpop.eup %12016  ;;  %10332 = vst.msk [vmem:[%s16494_s23 + $0xf8] sm:$0xff] %vm10300_vm6, %v10267_v18  ;;  %v10265_v29 = vsel %vm10235_vm5, %v12015_v0, %v10102_v52  ;;  %12022 = vrcp.f32 %v9821_v38  ;;  %v9485_v35 = vadd.f32 %v16467_v34, %v9484_v49  ;;  %v11280_v17 = vpop.f32.mrb[38].mxu0 }
 0xb3d   : > { %v12019_v14 = vpop.eup %12018  ;;  %10330 = vst.msk [vmem:[%s16494_s23 + $0xe8] sm:$0xff] %vm10300_vm6, %v10265_v29  ;;  %v9819_v5 = vadd.f32 1.0, %v12017_v12  ;;  %v9496_v6 = vadd.f32 %v11280_v17, %v16467_v34  ;;  %v9487_v7 = vpop.f32.mrb[39].mxu0  ;;  %v11055_v44 = vmul.f32 -1.442695, %v9493_v60 }
 0xb3e   : > { %v12021_v23 = vpop.eup %12020  ;;  %v9822_v21 = vadd.f32 1.0, %v12019_v14  ;;  %v9488_v24 = vadd.f32 %v16467_v34, %v9487_v7  ;;  %v11053_v30 = vmul.f32 -1.442695, %v9485_v35  ;;  %v10118_v52 = vpop.permute.xlu1 %10117 }
 0xb3f   : > { %12024 = vrcp.f32 %v9819_v5  ;;  %v9820_v33 = vadd.f32 1.0, %v12021_v23  ;;  %v11056_v31 = vmul.f32 -1.442695, %v9496_v6  ;;  %v10120_v62 = vpop.permute.xlu0 %10119  ;;  %v16658_v23 = vld [vmem:[%s16767_s15] ss:$0 sm:$0xff] }
 0xb40   : > { %12026 = vrcp.f32 %v9822_v21  ;;  %v11054_v2 = vmul.f32 -1.442695, %v9488_v24 }
 0xb41   : > { %12028 = vrcp.f32 %v9820_v33 }
 0xb42   : > { %12030 = vpow2.f32 %v11055_v44  ;;  %v10122_v48 = vpop.permute.xlu1 %10121 }
 0xb43   : > { %12032 = vpow2.f32 %v11053_v30 }
 0xb44   : > { %12034 = vpow2.f32 %v11056_v31 }
 0xb45   : > { %12036 = vpow2.f32 %v11054_v2 }
 0xb46   : > { %v12023_v47 = vpop.eup %12022 }
 0xb47   : > { %v10270_v28 = vsel %vm10235_vm5, %v12023_v47, %v10112_v40  ;;  %v10124_v47 = vpop.permute.xlu0 %10123 }
 0xb48   : > { %10335 = vst.msk [vmem:[%s16494_s23 + $0x110] sm:$0xff] %vm10300_vm6, %v10270_v28 }
 0xb49   : > { %v12025_v9 = vpop.eup %12024 }
 0xb4a   : > { %v12027_v25 = vpop.eup %12026  ;;  %v10268_v39 = vsel %vm10235_vm5, %v12025_v9, %v10108_v58  ;;  %v11283_v59 = vpop.f32.mrb[40].mxu0 }
 0xb4b   : > { %v12029_v27 = vpop.eup %12028  ;;  %10333 = vst.msk [vmem:[%s16494_s23 + $0x100] sm:$0xff] %vm10300_vm6, %v10268_v39  ;;  %v10271_v1 = vsel %vm10235_vm5, %v12027_v25, %v10114_v42  ;;  %v9509_v57 = vadd.f32 %v11283_v59, %v16467_v34  ;;  %v9500_v11 = vpop.f32.mrb[41].mxu0 }
 0xb4c   : > { %v12031_v16 = vpop.eup %12030  ;;  %10336 = vst.msk [vmem:[%s16494_s23 + $0x118] sm:$0xff] %vm10300_vm6, %v10271_v1  ;;  %v10269_v55 = vsel %vm10235_vm5, %v12029_v27, %v10110_v63  ;;  %v9501_v50 = vadd.f32 %v16467_v34, %v9500_v11  ;;  %v11284_v61 = vpop.f32.mrb[42].mxu0 }
 0xb4d   : > { %v12033_v51 = vpop.eup %12032  ;;  %10334 = vst.msk [vmem:[%s16494_s23 + $0x108] sm:$0xff] %vm10300_vm6, %v10269_v55  ;;  %v9825_v10 = vadd.f32 1.0, %v12031_v16  ;;  %v9512_v37 = vadd.f32 %v11284_v61, %v16467_v34  ;;  %v9503_v45 = vpop.f32.mrb[43].mxu0  ;;  %v11059_v4 = vmul.f32 -1.442695, %v9509_v57 }
 0xb4e   : > { %v12035_v19 = vpop.eup %12034  ;;  %v9823_v53 = vadd.f32 1.0, %v12033_v51  ;;  %v9504_v56 = vadd.f32 %v16467_v34, %v9503_v45  ;;  %v11057_v3 = vmul.f32 -1.442695, %v9501_v50  ;;  %v10126_v63 = vpop.permute.xlu1 %10125 }
 0xb4f   : > { %v12037_v41 = vpop.eup %12036  ;;  %12038 = vrcp.f32 %v9825_v10  ;;  %v9826_v54 = vadd.f32 1.0, %v12035_v19  ;;  %v11060_v46 = vmul.f32 -1.442695, %v9512_v37  ;;  %v10128_v9 = vpop.permute.xlu0 %10127 }
 0xb50   : > { %12040 = vrcp.f32 %v9823_v53  ;;  %v9824_v36 = vadd.f32 1.0, %v12037_v41  ;;  %v11058_v8 = vmul.f32 -1.442695, %v9504_v56 }
 0xb51   : > { %12042 = vrcp.f32 %v9826_v54 }
 0xb52   : > { %12044 = vrcp.f32 %v9824_v36  ;;  %v10130_v11 = vpop.permute.xlu1 %10129 }
 0xb53   : > { %12046 = vpow2.f32 %v11059_v4 }
 0xb54   : > { %12048 = vpow2.f32 %v11057_v3 }
 0xb55   : > { %12050 = vpow2.f32 %v11060_v46 }
 0xb56   : > { %12052 = vpow2.f32 %v11058_v8 }
 0xb59   : > { %v12039_v13 = vpop.eup %12038 }
 0xb5a   : > { %v12041_v15 = vpop.eup %12040  ;;  %v10274_v26 = vsel %vm10235_vm5, %v12039_v13, %v10120_v62  ;;  %v11287_v32 = vpop.f32.mrb[44].mxu0 }
 0xb5b   : > { %v12043_v43 = vpop.eup %12042  ;;  %10339 = vst.msk [vmem:[%s16494_s23 + $0x130] sm:$0xff] %vm10300_vm6, %v10274_v26  ;;  %v10272_v38 = vsel %vm10235_vm5, %v12041_v15, %v10116_v22  ;;  %v9525_v20 = vadd.f32 %v11287_v32, %v16467_v34  ;;  %v9516_v0 = vpop.f32.mrb[45].mxu0 }
 0xb5c   : > { %v12045_v18 = vpop.eup %12044  ;;  %10337 = vst.msk [vmem:[%s16494_s23 + $0x120] sm:$0xff] %vm10300_vm6, %v10272_v38  ;;  %v10275_v60 = vsel %vm10235_vm5, %v12043_v43, %v10122_v48  ;;  %v9517_v49 = vadd.f32 %v16467_v34, %v9516_v0  ;;  %v11288_v12 = vpop.f32.mrb[46].mxu0 }
 0xb5d   : > { %v12047_v29 = vpop.eup %12046  ;;  %10340 = vst.msk [vmem:[%s16494_s23 + $0x138] sm:$0xff] %vm10300_vm6, %v10275_v60  ;;  %v10273_v35 = vsel %vm10235_vm5, %v12045_v18, %v10118_v52  ;;  %v11063_v17 = vmul.f32 -1.442695, %v9525_v20  ;;  %v9528_v14 = vadd.f32 %v11288_v12, %v16467_v34  ;;  %v9519_v5 = vpop.f32.mrb[47].mxu0 }
 0xb5e   : > { %v12049_v6 = vpop.eup %12048  ;;  %10338 = vst.msk [vmem:[%s16494_s23 + $0x128] sm:$0xff] %vm10300_vm6, %v10273_v35  ;;  %v9829_v7 = vadd.f32 1.0, %v12047_v29  ;;  %v9520_v21 = vadd.f32 %v16658_v23, %v9519_v5  ;;  %v11061_v31 = vmul.f32 -1.442695, %v9517_v49  ;;  %v10132_v52 = vpop.permute.xlu0 %10131 }
 0xb5f   : > { %v12051_v44 = vpop.eup %12050  ;;  %v9827_v24 = vadd.f32 1.0, %v12049_v6  ;;  %12054 = vpow2.f32 %v11063_v17  ;;  %v11064_v2 = vmul.f32 -1.442695, %v9528_v14  ;;  %v10134_v26 = vpop.permute.xlu1 %10133 }
 0xb60   : > { %v12053_v33 = vpop.eup %12052  ;;  %12056 = vrcp.f32 %v9829_v7  ;;  %v9830_v30 = vadd.f32 1.0, %v12051_v44  ;;  %v11062_v58 = vmul.f32 -1.442695, %v9520_v21 }
 0xb61   : > { %12058 = vrcp.f32 %v9827_v24  ;;  %v9828_v34 = vadd.f32 1.0, %v12053_v33 }
 0xb62   : > { %12060 = vrcp.f32 %v9830_v30  ;;  %v10136_v62 = vpop.permute.xlu0 %10135 }
 0xb63   : > { %12062 = vrcp.f32 %v9828_v34  ;;  %v10138_v12 = vpop.permute.xlu1 %10137 }
 0xb64   : > { %12064 = vpow2.f32 %v11061_v31 }
 0xb65   : > { %12066 = vpow2.f32 %v11064_v2 }
 0xb66   : > { %12068 = vpow2.f32 %v11062_v58 }
 0xb69   : > { %v12055_v40 = vpop.eup %12054 }
 0xb6a   : > { %v12057_v28 = vpop.eup %12056  ;;  %v9833_v25 = vadd.f32 1.0, %v12055_v40  ;;  %v11291_v42 = vpop.f32.mrb[48].mxu0 }
 0xb6b   : > { %v12059_v39 = vpop.eup %12058  ;;  %v10278_v59 = vsel %vm10235_vm5, %v12057_v28, %v10128_v9  ;;  %v9541_v27 = vadd.f32 %v16658_v23, %v11291_v42  ;;  %v9532_v1 = vpop.f32.mrb[49].mxu0 }
 0xb6c   : > { %v12061_v57 = vpop.eup %12060  ;;  %10343 = vst.msk [vmem:[%s16494_s23 + $0x150] sm:$0xff] %vm10300_vm6, %v10278_v59  ;;  %v10276_v16 = vsel %vm10235_vm5, %v12059_v39, %v10124_v47  ;;  %12070 = vrcp.f32 %v9833_v25  ;;  %v9533_v55 = vadd.f32 %v16658_v23, %v9532_v1  ;;  %v11292_v50 = vpop.f32.mrb[50].mxu0 }
 0xb6d   : > { %v12063_v61 = vpop.eup %12062  ;;  %10341 = vst.msk [vmem:[%s16494_s23 + $0x140] sm:$0xff] %vm10300_vm6, %v10276_v16  ;;  %v10279_v51 = vsel %vm10235_vm5, %v12061_v57, %v10130_v11  ;;  %v11067_v10 = vmul.f32 -1.442695, %v9541_v27  ;;  %v9544_v37 = vadd.f32 %v16658_v23, %v11292_v50  ;;  %v9535_v45 = vpop.f32.mrb[51].mxu0 }
 0xb6e   : > { %v12065_v19 = vpop.eup %12064  ;;  %10344 = vst.msk [vmem:[%s16494_s23 + $0x158] sm:$0xff] %vm10300_vm6, %v10279_v51  ;;  %v10277_v53 = vsel %vm10235_vm5, %v12063_v61, %v10126_v63  ;;  %v11065_v56 = vmul.f32 -1.442695, %v9533_v55  ;;  %v9536_v41 = vadd.f32 %v16658_v23, %v9535_v45  ;;  %v10140_v63 = vpop.permute.xlu0 %10139 }
 0xb6f   : > { %v12067_v54 = vpop.eup %12066  ;;  %10342 = vst.msk [vmem:[%s16494_s23 + $0x148] sm:$0xff] %vm10300_vm6, %v10277_v53  ;;  %v9831_v4 = vadd.f32 1.0, %v12065_v19  ;;  %12072 = vpow2.f32 %v11067_v10  ;;  %v11068_v46 = vmul.f32 -1.442695, %v9544_v37  ;;  %v10142_v25 = vpop.permute.xlu1 %10141 }
 0xb70   : > { %v12069_v36 = vpop.eup %12068  ;;  %v9834_v3 = vadd.f32 1.0, %v12067_v54  ;;  %12074 = vpow2.f32 %v11065_v56  ;;  %v11066_v22 = vmul.f32 -1.442695, %v9536_v41 }
 0xb71   : > { %12076 = vrcp.f32 %v9831_v4  ;;  %v9832_v8 = vadd.f32 1.0, %v12069_v36 }
 0xb72   : > { %12078 = vrcp.f32 %v9834_v3  ;;  %v10144_v28 = vpop.permute.xlu0 %10143 }
 0xb73   : > { %12080 = vrcp.f32 %v9832_v8  ;;  %v10146_v16 = vpop.permute.xlu1 %10145 }
 0xb74   : > { %12082 = vpow2.f32 %v11068_v46 }
 0xb75   : > { %12084 = vpow2.f32 %v11066_v22 }
 0xb76   : > { %v12071_v13 = vpop.eup %12070 }
 0xb77   : > { %v10282_v15 = vsel %vm10235_vm5, %v12071_v13, %v10136_v62  ;;  %v10148_v13 = vpop.permute.xlu0 %10147 }
 0xb78   : > { %10347 = vst.msk [vmem:[%s16494_s23 + $0x170] sm:$0xff] %vm10300_vm6, %v10282_v15  ;;  %v10150_v15 = vpop.permute.xlu1 %10149 }
 0xb79   : > { %v12073_v32 = vpop.eup %12072 }
 0xb7a   : > { %v12075_v43 = vpop.eup %12074  ;;  %v9837_v48 = vadd.f32 1.0, %v12073_v32  ;;  %v11295_v38 = vpop.f32.mrb[52].mxu0 }
 0xb7b   : > { %v12077_v20 = vpop.eup %12076  ;;  %v9835_v0 = vadd.f32 1.0, %v12075_v43  ;;  %v9557_v18 = vadd.f32 %v16658_v23, %v11295_v38  ;;  %v9548_v60 = vpop.f32.mrb[53].mxu0 }
 0xb7c   : > { %v12079_v49 = vpop.eup %12078  ;;  %v10280_v29 = vsel %vm10235_vm5, %v12077_v20, %v10132_v52  ;;  %12086 = vrcp.f32 %v9837_v48  ;;  %v9549_v35 = vadd.f32 %v16658_v23, %v9548_v60  ;;  %v11296_v17 = vpop.f32.mrb[54].mxu0 }
 0xb7d   : > { %v12081_v14 = vpop.eup %12080  ;;  %10345 = vst.msk [vmem:[%s16494_s23 + $0x160] sm:$0xff] %vm10300_vm6, %v10280_v29  ;;  %v10283_v5 = vsel %vm10235_vm5, %v12079_v49, %v10138_v12  ;;  %12088 = vrcp.f32 %v9835_v0  ;;  %v11071_v6 = vmul.f32 -1.442695, %v9557_v18  ;;  %v9560_v7 = vadd.f32 %v16658_v23, %v11296_v17  ;;  %v9551_v21 = vpop.f32.mrb[55].mxu0 }
 0xb7e   : > { %v12083_v44 = vpop.eup %12082  ;;  %10348 = vst.msk [vmem:[%s16494_s23 + $0x178] sm:$0xff] %vm10300_vm6, %v10283_v5  ;;  %v10281_v24 = vsel %vm10235_vm5, %v12081_v14, %v10134_v26  ;;  %v11069_v33 = vmul.f32 -1.442695, %v9549_v35  ;;  %v9552_v30 = vadd.f32 %v16658_v23, %v9551_v21  ;;  %v10152_v26 = vpop.permute.xlu0 %10151 }
 0xb7f   : > { %v12085_v31 = vpop.eup %12084  ;;  %10346 = vst.msk [vmem:[%s16494_s23 + $0x168] sm:$0xff] %vm10300_vm6, %v10281_v24  ;;  %v9838_v34 = vadd.f32 1.0, %v12083_v44  ;;  %12090 = vpow2.f32 %v11071_v6  ;;  %v11072_v2 = vmul.f32 -1.442695, %v9560_v7  ;;  %v10154_v0 = vpop.permute.xlu1 %10153 }
 0xb80   : > { %v9836_v58 = vadd.f32 1.0, %v12085_v31  ;;  %12092 = vpow2.f32 %v11069_v33  ;;  %v11070_v47 = vmul.f32 -1.442695, %v9552_v30 }
 0xb81   : > { %12094 = vrcp.f32 %v9838_v34 }
 0xb82   : > { %12096 = vrcp.f32 %v9836_v58 }
 0xb83   : > { %12098 = vpow2.f32 %v11072_v2 }
 0xb84   : > { %12100 = vpow2.f32 %v11070_v47 }
 0xb86   : > { %v12087_v40 = vpop.eup %12086 }
 0xb87   : > { %v12089_v9 = vpop.eup %12088  ;;  %v10286_v42 = vsel %vm10235_vm5, %v12087_v40, %v10144_v28  ;;  %v10156_v40 = vpop.permute.xlu0 %10155 }
 0xb88   : > { %10351 = vst.msk [vmem:[%s16494_s23 + $0x190] sm:$0xff] %vm10300_vm6, %v10286_v42  ;;  %v10284_v39 = vsel %vm10235_vm5, %v12089_v9, %v10140_v63  ;;  %v10158_v9 = vpop.permute.xlu1 %10157 }
 0xb89   : > { %v12091_v59 = vpop.eup %12090  ;;  %10349 = vst.msk [vmem:[%s16494_s23 + $0x180] sm:$0xff] %vm10300_vm6, %v10284_v39 }
 0xb8a   : > { %v12093_v27 = vpop.eup %12092  ;;  %v9841_v1 = vadd.f32 1.0, %v12091_v59  ;;  %v11299_v57 = vpop.f32.mrb[56].mxu0 }
 0xb8b   : > { %v12095_v11 = vpop.eup %12094  ;;  %v9839_v55 = vadd.f32 1.0, %v12093_v27  ;;  %v9573_v50 = vadd.f32 %v16658_v23, %v11299_v57  ;;  %v9564_v61 = vpop.f32.mrb[57].mxu0 }
 0xb8c   : > { %v12097_v51 = vpop.eup %12096  ;;  %v10287_v10 = vsel %vm10235_vm5, %v12095_v11, %v10146_v16  ;;  %12102 = vrcp.f32 %v9841_v1  ;;  %v9565_v37 = vadd.f32 %v16658_v23, %v9564_v61  ;;  %v11300_v45 = vpop.f32.mrb[58].mxu0 }
 0xb8d   : > { %v12099_v19 = vpop.eup %12098  ;;  %10352 = vst.msk [vmem:[%s16494_s23 + $0x198] sm:$0xff] %vm10300_vm6, %v10287_v10  ;;  %v10285_v53 = vsel %vm10235_vm5, %v12097_v51, %v10142_v25  ;;  %12104 = vrcp.f32 %v9839_v55  ;;  %v11075_v56 = vmul.f32 -1.442695, %v9573_v50  ;;  %v9576_v41 = vadd.f32 %v16658_v23, %v11300_v45  ;;  %v9567_v54 = vpop.f32.mrb[59].mxu0 }
 0xb8e   : > { %v12101_v4 = vpop.eup %12100  ;;  %10350 = vst.msk [vmem:[%s16494_s23 + $0x188] sm:$0xff] %vm10300_vm6, %v10285_v53  ;;  %v9842_v36 = vadd.f32 1.0, %v12099_v19  ;;  %v11073_v3 = vmul.f32 -1.442695, %v9565_v37  ;;  %v9568_v46 = vadd.f32 %v16658_v23, %v9567_v54  ;;  %v10160_v25 = vpop.permute.xlu0 %10159 }
 0xb8f   : > { %v9840_v8 = vadd.f32 1.0, %v12101_v4  ;;  %12106 = vpow2.f32 %v11075_v56  ;;  %v11076_v22 = vmul.f32 -1.442695, %v9576_v41  ;;  %v10162_v59 = vpop.permute.xlu1 %10161 }
 0xb90   : > { %12108 = vrcp.f32 %v9842_v36  ;;  %v11074_v52 = vmul.f32 -1.442695, %v9568_v46 }
 0xb91   : > { %12110 = vrcp.f32 %v9840_v8 }
 0xb92   : > { %12112 = vpow2.f32 %v11073_v3  ;;  %v10164_v19 = vpop.permute.xlu0 %10163 }
 0xb93   : > { %12114 = vpow2.f32 %v11076_v22  ;;  %v10166_v53 = vpop.permute.xlu1 %10165 }
 0xb94   : > { %12116 = vpow2.f32 %v11074_v52 }
 0xb96   : > { %v12103_v62 = vpop.eup %12102  ;;  %v10168_v41 = vpop.permute.xlu0 %10167 }
 0xb97   : > { %v12105_v32 = vpop.eup %12104  ;;  %v10290_v43 = vsel %vm10235_vm5, %v12103_v62, %v10152_v26  ;;  %v10170_v3 = vpop.permute.xlu1 %10169 }
 0xb98   : > { %10355 = vst.msk [vmem:[%s16494_s23 + $0x1b0] sm:$0xff] %vm10300_vm6, %v10290_v43  ;;  %v10288_v48 = vsel %vm10235_vm5, %v12105_v32, %v10148_v13 }
 0xb99   : > { %v12107_v38 = vpop.eup %12106  ;;  %10353 = vst.msk [vmem:[%s16494_s23 + $0x1a0] sm:$0xff] %vm10300_vm6, %v10288_v48 }
 0xb9a   : > { %v12109_v20 = vpop.eup %12108  ;;  %v9845_v18 = vadd.f32 1.0, %v12107_v38  ;;  %v11303_v60 = vpop.f32.mrb[60].mxu0 }
 0xb9b   : > { %v12111_v49 = vpop.eup %12110  ;;  %v10291_v12 = vsel %vm10235_vm5, %v12109_v20, %v10154_v0  ;;  %v9589_v29 = vadd.f32 %v16658_v23, %v11303_v60  ;;  %v9580_v35 = vpop.f32.mrb[61].mxu0 }
 0xb9c   : > { %v12113_v17 = vpop.eup %12112  ;;  %10356 = vst.msk [vmem:[%s16494_s23 + $0x1b8] sm:$0xff] %vm10300_vm6, %v10291_v12  ;;  %v10289_v14 = vsel %vm10235_vm5, %v12111_v49, %v10150_v15  ;;  %12118 = vrcp.f32 %v9845_v18  ;;  %v9581_v5 = vadd.f32 %v16658_v23, %v9580_v35  ;;  %v11304_v6 = vpop.f32.mrb[62].mxu0 }
 0xb9d   : > { %v12115_v7 = vpop.eup %12114  ;;  %10354 = vst.msk [vmem:[%s16494_s23 + $0x1a8] sm:$0xff] %vm10300_vm6, %v10289_v14  ;;  %v9843_v21 = vadd.f32 1.0, %v12113_v17  ;;  %v9592_v44 = vadd.f32 %v16658_v23, %v11304_v6  ;;  %v9583_v24 = vpop.f32.mrb[63].mxu0  ;;  %v11079_v31 = vmul.f32 -1.442695, %v9589_v29 }
 0xb9e   : > { %v12117_v33 = vpop.eup %12116  ;;  %v9846_v30 = vadd.f32 1.0, %v12115_v7  ;;  %v9584_v34 = vadd.f32 %v16658_v23, %v9583_v24  ;;  %v11077_v58 = vmul.f32 -1.442695, %v9581_v5 }
 0xb9f   : > { %12120 = vrcp.f32 %v9843_v21  ;;  %v9844_v2 = vadd.f32 1.0, %v12117_v33  ;;  %v11080_v47 = vmul.f32 -1.442695, %v9592_v44 }
 0xba0   : > { %12122 = vrcp.f32 %v9846_v30  ;;  %v11078_v63 = vmul.f32 -1.442695, %v9584_v34 }
 0xba1   : > { %12124 = vrcp.f32 %v9844_v2 }
 0xba2   : > { %12126 = vpow2.f32 %v11079_v31 }
 0xba3   : > { %12128 = vpow2.f32 %v11077_v58 }
 0xba4   : > { %12130 = vpow2.f32 %v11080_v47 }
 0xba5   : > { %12132 = vpow2.f32 %v11078_v63 }
 0xba6   : > { %v12119_v28 = vpop.eup %12118 }
 0xba7   : > { %v10294_v23 = vsel %vm10235_vm5, %v12119_v28, %v10160_v25 }
 0xba8   : > { %10359 = vst.msk [vmem:[%s16494_s23 + $0x1d0] sm:$0xff] %vm10300_vm6, %v10294_v23 }
 0xba9   : > { %v12121_v42 = vpop.eup %12120 }
 0xbaa   : > { %v12123_v39 = vpop.eup %12122  ;;  %v10292_v27 = vsel %vm10235_vm5, %v12121_v42, %v10156_v40 }
 0xbab   : > { %v12125_v1 = vpop.eup %12124  ;;  %10357 = vst.msk [vmem:[%s16494_s23 + $0x1c0] sm:$0xff] %vm10300_vm6, %v10292_v27  ;;  %v10295_v57 = vsel %vm10235_vm5, %v12123_v39, %v10162_v59 }
 0xbac   : > { %v12127_v11 = vpop.eup %12126  ;;  %10360 = vst.msk [vmem:[%s16494_s23 + $0x1d8] sm:$0xff] %vm10300_vm6, %v10295_v57  ;;  %v10293_v16 = vsel %vm10235_vm5, %v12125_v1, %v10158_v9 }
 0xbad   : > { %v12129_v55 = vpop.eup %12128  ;;  %10358 = vst.msk [vmem:[%s16494_s23 + $0x1c8] sm:$0xff] %vm10300_vm6, %v10293_v16  ;;  %v9849_v50 = vadd.f32 1.0, %v12127_v11 }
 0xbae   : > { %v12131_v61 = vpop.eup %12130  ;;  %v9847_v51 = vadd.f32 1.0, %v12129_v55 }
 0xbaf   : > { %v12133_v10 = vpop.eup %12132  ;;  %12134 = vrcp.f32 %v9849_v50  ;;  %v9850_v37 = vadd.f32 1.0, %v12131_v61 }
 0xbb0   : > { %12136 = vrcp.f32 %v9847_v51  ;;  %v9848_v45 = vadd.f32 1.0, %v12133_v10 }
 0xbb1   : > { %12138 = vrcp.f32 %v9850_v37 }
 0xbb2   : > { %12140 = vrcp.f32 %v9848_v45 }
 0xbb9   : > { %v12135_v56 = vpop.eup %12134 }
 0xbba   : > { %v12137_v54 = vpop.eup %12136  ;;  %v10298_v4 = vsel %vm10235_vm5, %v12135_v56, %v10168_v41 }
 0xbbb   : > { %v12139_v36 = vpop.eup %12138  ;;  %10363 = vst.msk [vmem:[%s16494_s23 + $0x1f0] sm:$0xff] %vm10300_vm6, %v10298_v4  ;;  %v10296_v46 = vsel %vm10235_vm5, %v12137_v54, %v10164_v19 }
 0xbbc   : > { %v12141_v8 = vpop.eup %12140  ;;  %10361 = vst.msk [vmem:[%s16494_s23 + $0x1e0] sm:$0xff] %vm10300_vm6, %v10296_v46  ;;  %v10299_v22 = vsel %vm10235_vm5, %v12139_v36, %v10170_v3 }
 0xbbd   : > { %10364 = vst.msk [vmem:[%s16494_s23 + $0x1f8] sm:$0xff] %vm10300_vm6, %v10299_v22  ;;  %v10297_v52 = vsel %vm10235_vm5, %v12141_v8, %v10166_v53 }
 0xbbe   : > { %10362 = vst.msk [vmem:[%s16494_s23 + $0x1e8] sm:$0xff] %vm10300_vm6, %v10297_v52 }
 0xbbf PF: > { %s26_s21 = sadd.s32 1, %s12149_s21  }
 0xbc0   : > { %p23_p4 = scmp.ge.s32.totalorder %s26_s21, 4  }
 0xbc2   :  { %25 = sbr.rel (!%p23_p4) target bundleno = 2 (0x2), region = 127 }

</bundles_post_ra>
